<compile_context>
chip_gen: v7x
topology: tpu7x:2x2x1
jax: 0.10.0
libtpu: 0.0.40
codegen_flags: <defaults>
</compile_context>

<pallas_src>
import jax
import jax.numpy as jnp
from jax import lax
from jax.experimental import pallas as pl
from jax.experimental.pallas import tpu as pltpu

LANE = 128            # channels are zero-padded to a multiple of this (lane-dense)
CONV_ROW_TILE = 256   # max output-row tile for the fused conv kernels
ELT_ROW_TILE = 512    # max row tile for the standalone LayerNorm+ReLU kernel
_EPS = 1e-5


def _rup(x, m):
    return ((x + m - 1) // m) * m


def _pick_row_tile(rows, cap=ELT_ROW_TILE):
    assert rows % 8 == 0
    t = min(cap, rows)
    t -= t % 8
    while t > 8 and rows % t != 0:
        t -= 8
    return max(t, 8)


# ----------------------------------------------------------------------------
# Pallas kernels
# ----------------------------------------------------------------------------
def _make_conv_kernel(*, K, s, pool_s, cin_p, cout_p, c_out, tl, win_rows,
                      l_valid_conv, epilogue, has_residual):
    """Fused: SAME conv (K taps, stride s) + bias [+ LN/affine + ReLU epilogue]
    [+ SAME max-pooled, channel-padded residual add]."""

    def kernel(x_ref, w_ref, b_ref, p1_ref, p2_ref, *rest):
        if has_residual:
            id_ref, o_ref = rest
        else:
            (o_ref,) = rest
        base = pl.multiple_of(pl.program_id(1) * tl, 8)
        # one aligned dynamic load of the input window; taps are static slices
        win = x_ref[pl.ds(base, win_rows), :]                    # (win_rows, s*cin_p)
        acc = jnp.zeros((tl, cout_p), jnp.float32)
        for t in range(K):                                       # in-VMEM im2col
            q, r = divmod(t, s)
            xs = win[q:q + tl, r * cin_p:(r + 1) * cin_p]        # (tl, cin_p)
            acc = acc + jnp.dot(xs, w_ref[t * cin_p:(t + 1) * cin_p, :],
                                preferred_element_type=jnp.float32)
        acc = acc + b_ref[...]
        if epilogue == "ln_relu":        # per-position channel LayerNorm + ReLU
            lane = lax.broadcasted_iota(jnp.int32, (1, cout_p), 1)
            cm = (lane < c_out).astype(jnp.float32)
            mu = jnp.sum(acc * cm, axis=-1, keepdims=True) * (1.0 / c_out)
            xc = (acc - mu) * cm
            var = jnp.sum(xc * xc, axis=-1, keepdims=True) * (1.0 / c_out)
            acc = jnp.maximum(
                xc * lax.rsqrt(var + _EPS) * p1_ref[...] + p2_ref[...], 0.0)
        elif epilogue == "affine_relu":  # BatchNorm(eval)/identity scale + ReLU
            acc = jnp.maximum(acc * p1_ref[...] + p2_ref[...], 0.0)
        # zero rows beyond the valid conv length (== F.pad(out, ...) right-pad)
        rows = base + lax.broadcasted_iota(jnp.int32, (tl, 1), 0)
        acc = jnp.where(rows < l_valid_conv, acc, 0.0)
        if has_residual:                 # fused SAME max-pool + residual add
            idt = id_ref[...]                                    # (tl, pool_s*cout_p)
            pooled = idt[:, 0:cout_p]
            for r in range(1, pool_s):
                pooled = jnp.maximum(pooled, idt[:, r * cout_p:(r + 1) * cout_p])
            acc = acc + pooled
        o_ref[...] = acc

    return kernel


def _make_norm_relu_kernel(*, c_real, c_p, mode):
    def kernel(x_ref, g_ref, b_ref, o_ref):
        x = x_ref[...]
        if mode == "ln_relu":
            lane = lax.broadcasted_iota(jnp.int32, (1, c_p), 1)
            cm = (lane < c_real).astype(jnp.float32)
            mu = jnp.sum(x * cm, axis=-1, keepdims=True) * (1.0 / c_real)
            xc = (x - mu) * cm
            var = jnp.sum(xc * xc, axis=-1, keepdims=True) * (1.0 / c_real)
            y = xc * lax.rsqrt(var + _EPS) * g_ref[...] + b_ref[...]
        else:  # plain ReLU
            y = x
        o_ref[...] = jnp.maximum(y, 0.0)

    return kernel


# ----------------------------------------------------------------------------
# Wrappers
# ----------------------------------------------------------------------------
def conv_fused(x, L, c_in, w, b, stride, *, epilogue="none", p1=None, p2=None,
               identity=None, id_len=None, id_c_in=None, pool_stride=None):
    """x: (N, L_phys, cin_p) channel-last; rows >= L and lanes >= c_in are zero.
    w: (c_out, c_in, K) PyTorch conv weight; b: (c_out,).
    Returns (y, l_out, c_out); y is (N, l_out_phys, cout_p) with the same
    zero-padding invariants (padded rows / lanes are exactly zero)."""
    N, _, cin_p = x.shape
    c_out, wc_in, K = w.shape
    assert wc_in == c_in and cin_p == _rup(c_in, LANE)
    cout_p = _rup(c_out, LANE)
    s = stride
    l_conv = -(-L // s)
    if identity is not None:
        ps = pool_stride
        l_id = -(-id_len // ps)
        if l_id % 2 != 0:
            l_id += 1
        l_need = max(l_conv, l_id)
    else:
        ps = 1
        l_id = None
        l_need = l_conv
    tl = min(CONV_ROW_TILE, _rup(l_need, 8))
    n_tiles = -(-l_need // tl)
    l_phys = n_tiles * tl
    qmax = (K - 1) // s
    win_rows = _rup(tl + qmax, 8)

    # SAME padding + free phase-fold reshape (same bytes, just regrouped).
    p_same = max(0, (l_conv - 1) * s + K - L)
    pad_l = p_same // 2
    Lq = l_phys + (win_rows - tl)
    Lq = max(Lq, -(-(L + pad_l) // s))
    Lq = _rup(Lq, 8)
    pad_r = Lq * s - L - pad_l
    xf = jnp.pad(x[:, :L, :], ((0, 0), (pad_l, pad_r), (0, 0)))
    xf = xf.reshape(N, Lq, s * cin_p)

    # Weights / per-channel vectors, zero-padded to lane multiples (MXU 128-aligned).
    wt = jnp.transpose(w, (2, 1, 0)).astype(jnp.float32)         # (K, c_in, c_out)
    wt = jnp.pad(wt, ((0, 0), (0, cin_p - c_in), (0, cout_p - c_out)))
    wt = wt.reshape(K * cin_p, cout_p)
    bias = jnp.pad(b.astype(jnp.float32), (0, cout_p - c_out)).reshape(1, cout_p)
    if p1 is None:
        p1 = jnp.zeros((c_out,), jnp.float32)
    if p2 is None:
        p2 = jnp.zeros((c_out,), jnp.float32)
    p1v = jnp.pad(p1.astype(jnp.float32), (0, cout_p - c_out)).reshape(1, cout_p)
    p2v = jnp.pad(p2.astype(jnp.float32), (0, cout_p - c_out)).reshape(1, cout_p)

    args = [xf, wt, bias, p1v, p2v]
    in_specs = [
        pl.BlockSpec((None, Lq, s * cin_p), lambda n, j: (n, 0, 0)),  # resident / batch elem
        pl.BlockSpec((K * cin_p, cout_p), lambda n, j: (0, 0)),
        pl.BlockSpec((1, cout_p), lambda n, j: (0, 0)),
        pl.BlockSpec((1, cout_p), lambda n, j: (0, 0)),
        pl.BlockSpec((1, cout_p), lambda n, j: (0, 0)),
    ]
    if identity is not None:
        # SAME max-pool padding + channel shift of the identity, phase-folded so the
        # kernel pools with `ps` static lane-slices (lane-dense, no extra kernel).
        ch1 = (c_out - id_c_in) // 2
        p_pool = max(0, l_id * ps - id_len)
        id_pad_l = p_pool // 2
        id_pad_r = l_phys * ps - id_len - id_pad_l
        idf = jnp.pad(identity[:, :id_len, :id_c_in],
                      ((0, 0), (id_pad_l, id_pad_r),
                       (ch1, cout_p - id_c_in - ch1)))
        idf = idf.reshape(N, l_phys, ps * cout_p)
        args.append(idf)
        in_specs.append(pl.BlockSpec((None, tl, ps * cout_p), lambda n, j: (n, j, 0)))

    kernel = _make_conv_kernel(K=K, s=s, pool_s=ps, cin_p=cin_p, cout_p=cout_p,
                               c_out=c_out, tl=tl, win_rows=win_rows,
                               l_valid_conv=l_conv, epilogue=epilogue,
                               has_residual=identity is not None)
    y = pl.pallas_call(
        kernel,
        out_shape=jax.ShapeDtypeStruct((N, l_phys, cout_p), jnp.float32),
        grid=(N, n_tiles),
        in_specs=in_specs,
        out_specs=pl.BlockSpec((None, tl, cout_p), lambda n, j: (n, j, 0)),
        compiler_params=pltpu.CompilerParams(
            dimension_semantics=("parallel", "parallel")),
    )(*args)
    return y, (l_id if identity is not None else l_conv), c_out


def norm_relu(x, c_real, gamma=None, beta=None, mode="ln_relu"):
    """Standalone rms1+relu1 (pre-activation of conv1); lane-dense, big row tiles."""
    N, Lp, c_p = x.shape
    rows = N * Lp
    tm = _pick_row_tile(rows)
    if gamma is None:
        gamma = jnp.ones((c_real,), jnp.float32)
    if beta is None:
        beta = jnp.zeros((c_real,), jnp.float32)
    g = jnp.pad(gamma.astype(jnp.float32), (0, c_p - c_real)).reshape(1, c_p)
    bb = jnp.pad(beta.astype(jnp.float32), (0, c_p - c_real)).reshape(1, c_p)
    y = pl.pallas_call(
        _make_norm_relu_kernel(c_real=c_real, c_p=c_p, mode=mode),
        out_shape=jax.ShapeDtypeStruct((rows, c_p), jnp.float32),
        grid=(rows // tm,),
        in_specs=[pl.BlockSpec((tm, c_p), lambda i: (i, 0)),
                  pl.BlockSpec((1, c_p), lambda i: (0, 0)),
                  pl.BlockSpec((1, c_p), lambda i: (0, 0))],
        out_specs=pl.BlockSpec((tm, c_p), lambda i: (i, 0)),
        compiler_params=pltpu.CompilerParams(dimension_semantics=("parallel",)),
    )(x.reshape(rows, c_p), g, bb)
    return y.reshape(N, Lp, c_p)


# ----------------------------------------------------------------------------
# Model (BasicBlock / ResNet1D) forward
# ----------------------------------------------------------------------------
def basic_block_forward(h, L, c_in, p, cfg, use_bn=True):
    out_ch, K, s, is_first = cfg["out_ch"], cfg["k"], cfg["s"], cfg["is_first"]
    assert cfg["in_ch"] == c_in
    identity = h
    # rms1 + relu1 (+ do1: eval-mode dropout == identity)
    if is_first:
        a = h  # first block: rms1 skipped and relu1 is a no-op (h == relu(h) from the stem)
    elif use_bn:
        a = norm_relu(h, c_in, p["ln1_w"], p["ln1_b"], mode="ln_relu")
    else:
        a = norm_relu(h, c_in, mode="relu")
    # conv1 (stride s) with rms2+relu2 fused into its epilogue (+ do2 == identity)
    if use_bn:
        z, l1, _ = conv_fused(a, L, c_in, p["conv1_w"], p["conv1_b"], s,
                              epilogue="ln_relu", p1=p["ln2_w"], p2=p["ln2_b"])
    else:
        z, l1, _ = conv_fused(a, L, c_in, p["conv1_w"], p["conv1_b"], s,
                              epilogue="affine_relu",
                              p1=jnp.ones((out_ch,), jnp.float32),
                              p2=jnp.zeros((out_ch,), jnp.float32))
    # conv2 (stride 1) + fused [maxpool(identity) + channel-pad + right-pad(out) + add]
    y, l2, _ = conv_fused(z, l1, out_ch, p["conv2_w"], p["conv2_b"], 1,
                          epilogue="none",
                          identity=identity, id_len=L, id_c_in=c_in, pool_stride=s)
    return y, l2, out_ch


def resnet1d_forward(x_ncw, params, cfgs, use_bn=True):
    n, c_in, L = x_ncw.shape
    cin_p = _rup(c_in, LANE)
    # NCW -> channel-last, channels zero-padded to a lane multiple (done ONCE).
    x = jnp.pad(jnp.transpose(x_ncw, (0, 2, 1)).astype(jnp.float32),
                ((0, 0), (0, 0), (0, cin_p - c_in)))
    bf = params["first_conv_w"].shape[0]
    if use_bn:
        # BatchNorm1d, eval mode, running_mean=0 / running_var=1.
        scale = params["bn_w"] / jnp.sqrt(1.0 + _EPS)
        shift = params["bn_b"]
    else:
        scale = jnp.ones((bf,), jnp.float32)
        shift = jnp.zeros((bf,), jnp.float32)
    h, Lh, c = conv_fused(x, L, c_in, params["first_conv_w"], params["first_conv_b"],
                          1, epilogue="affine_relu", p1=scale, p2=shift)
    for blk, cfg in zip(params["blocks"], cfgs):
        h, Lh, c = basic_block_forward(h, Lh, c, blk, cfg, use_bn=use_bn)
    return jnp.transpose(h[:, :Lh, :c], (0, 2, 1))   # back to (N, C, L), exact shape


# ----------------------------------------------------------------------------
# Deterministic parameter init (PyTorch-style uniform bounds)
# ----------------------------------------------------------------------------
def init_resnet1d_params(key, in_channels, base_filters, kernel_size, stride,
                         n_block, increasefilter_gap, channel):
    def conv_init(k, cout, cin, ksz):
        kw, kb = jax.random.split(k)
        bound = 1.0 / float(cin * ksz) ** 0.5
        w = jax.random.uniform(kw, (cout, cin, ksz), jnp.float32, -bound, bound)
        b = jax.random.uniform(kb, (cout,), jnp.float32, -bound, bound)
        return w, b

    keys = jax.random.split(key, n_block + 1)
    params = {}
    params["first_conv_w"], params["first_conv_b"] = conv_init(
        keys[0], base_filters, in_channels, kernel_size)
    params["bn_w"] = jnp.ones((base_filters,), jnp.float32)
    params["bn_b"] = jnp.zeros((base_filters,), jnp.float32)

    blocks, cfgs = [], []
    for i in range(n_block):
        if i == 0:
            cin, cout, k, s, is_first = base_filters, base_filters, kernel_size, stride, True
        else:
            cin = int(base_filters * 2 ** ((i - 1) // increasefilter_gap))
            cout = cin * 2 if (i % increasefilter_gap == 0) else cin
            k, s = (8, 3) if channel != "Resp" else (4, 2)
            is_first = False
        k1, k2 = jax.random.split(keys[i + 1])
        c1w, c1b = conv_init(k1, cout, cin, k)
        c2w, c2b = conv_init(k2, cout, cout, k)
        blocks.append(dict(
            ln1_w=jnp.ones((cin,), jnp.float32), ln1_b=jnp.zeros((cin,), jnp.float32),
            ln2_w=jnp.ones((cout,), jnp.float32), ln2_b=jnp.zeros((cout,), jnp.float32),
            conv1_w=c1w, conv1_b=c1b, conv2_w=c2w, conv2_b=c2b))
        cfgs.append(dict(in_ch=cin, out_ch=cout, k=k, s=s, is_first=is_first))
    params["blocks"] = blocks
    return params, cfgs


# ----------------------------------------------------------------------------
if __name__ == "__main__":
    key = jax.random.PRNGKey(0)
    kx, kp = jax.random.split(key)

    # small config: in_channels=4, base_filters=8, kernel=5, stride=2,
    # n_block=4, increasefilter_gap=2 (exercises channel expansion), channel='ECG'
    in_channels, base_filters, kernel_size, stride = 4, 8, 5, 2
    n_block, increasefilter_gap, channel = 4, 2, "ECG"

    x = jax.random.normal(kx, (2, in_channels, 64), jnp.float32)
    params, cfgs = init_resnet1d_params(kp, in_channels, base_filters, kernel_size,
                                        stride, n_block, increasefilter_gap, channel)

    fwd = jax.jit(lambda xv, pv: resnet1d_forward(xv, pv, cfgs, use_bn=True))
    out = jax.block_until_ready(fwd(x, params))
    assert out.shape == (2, 16, 2), out.shape
    assert bool(jnp.all(jnp.isfinite(out)))
    print("KERNEL_OK")
</pallas_src>

<mosaic_0001>
module attributes {stable_mosaic.version = 11 : i64} {
  func.func @kernel(%arg0: i32, %arg1: i32, %arg2: memref<1x72x128xf32, #tpu.memory_space<vmem>>, %arg3: memref<640x128xf32, #tpu.memory_space<vmem>>, %arg4: memref<1x128xf32, #tpu.memory_space<vmem>>, %arg5: memref<1x128xf32, #tpu.memory_space<vmem>>, %arg6: memref<1x128xf32, #tpu.memory_space<vmem>>, %arg7: memref<1x64x128xf32, #tpu.memory_space<vmem>>) attributes {dimension_semantics = [#tpu.dimension_semantics<parallel>, #tpu.dimension_semantics<parallel>], iteration_bounds = array<i64: 2, 1>, scalar_prefetch = 0 : i64, scratch_operands = 0 : i64, tpu.core_type = #tpu.core_type<tc>, window_params = [{transform_indices = @transform_0, window_bounds = array<i64: 1, 72, 128>}, {pipeline_mode = #tpu.pipeline_mode<synchronous>, transform_indices = @transform_1, window_bounds = array<i64: 640, 128>}, {pipeline_mode = #tpu.pipeline_mode<synchronous>, transform_indices = @transform_2, window_bounds = array<i64: 1, 128>}, {pipeline_mode = #tpu.pipeline_mode<synchronous>, transform_indices = @transform_3, window_bounds = array<i64: 1, 128>}, {pipeline_mode = #tpu.pipeline_mode<synchronous>, transform_indices = @transform_4, window_bounds = array<i64: 1, 128>}, {transform_indices = @transform_5, window_bounds = array<i64: 1, 64, 128>}]} {
    %c64_i32 = arith.constant 64 : i32
    %0 = arith.muli %arg1, %c64_i32 : i32
    %1 = tpu.assume_multiple %0, 8 : i32
    %c0 = arith.constant 0 : index
    %2 = arith.index_cast %1 : i32 to index
    %c0_0 = arith.constant 0 : index
    %3 = vector.load %arg2[%c0, %2, %c0_0] : memref<1x72x128xf32, #tpu.memory_space<vmem>>, vector<1x72x128xf32>
    %4 = vector.shape_cast %3 : vector<1x72x128xf32> to vector<72x128xf32>
    %cst = arith.constant 0.000000e+00 : f32
    %5 = vector.broadcast %cst : f32 to vector<64x128xf32>
    %6 = vector.extract_strided_slice %4 {offsets = [0, 0], sizes = [64, 128], strides = [1, 1]} : vector<72x128xf32> to vector<64x128xf32>
    %c0_1 = arith.constant 0 : index
    %c0_2 = arith.constant 0 : index
    %7 = vector.load %arg3[%c0_1, %c0_2] : memref<640x128xf32, #tpu.memory_space<vmem>>, vector<128x128xf32>
    %cst_3 = arith.constant dense<0.000000e+00> : vector<64x128xf32>
    %8 = tpu.matmul %6, %7, %cst_3 {dimension_numbers = #tpu.dot_dimension_numbers<[1], [0], [0], [1], [0, 0, 1, 1], [], []>} : vector<64x128xf32>, vector<128x128xf32>, vector<64x128xf32> -> vector<64x128xf32>
    %9 = arith.addf %5, %8 : vector<64x128xf32>
    %10 = vector.extract_strided_slice %4 {offsets = [1, 0], sizes = [64, 128], strides = [1, 1]} : vector<72x128xf32> to vector<64x128xf32>
    %c128 = arith.constant 128 : index
    %c0_4 = arith.constant 0 : index
    %11 = vector.load %arg3[%c128, %c0_4] : memref<640x128xf32, #tpu.memory_space<vmem>>, vector<128x128xf32>
    %cst_5 = arith.constant dense<0.000000e+00> : vector<64x128xf32>
    %12 = tpu.matmul %10, %11, %cst_5 {dimension_numbers = #tpu.dot_dimension_numbers<[1], [0], [0], [1], [0, 0, 1, 1], [], []>} : vector<64x128xf32>, vector<128x128xf32>, vector<64x128xf32> -> vector<64x128xf32>
    %13 = arith.addf %9, %12 : vector<64x128xf32>
    %14 = vector.extract_strided_slice %4 {offsets = [2, 0], sizes = [64, 128], strides = [1, 1]} : vector<72x128xf32> to vector<64x128xf32>
    %c256 = arith.constant 256 : index
    %c0_6 = arith.constant 0 : index
    %15 = vector.load %arg3[%c256, %c0_6] : memref<640x128xf32, #tpu.memory_space<vmem>>, vector<128x128xf32>
    %cst_7 = arith.constant dense<0.000000e+00> : vector<64x128xf32>
    %16 = tpu.matmul %14, %15, %cst_7 {dimension_numbers = #tpu.dot_dimension_numbers<[1], [0], [0], [1], [0, 0, 1, 1], [], []>} : vector<64x128xf32>, vector<128x128xf32>, vector<64x128xf32> -> vector<64x128xf32>
    %17 = arith.addf %13, %16 : vector<64x128xf32>
    %18 = vector.extract_strided_slice %4 {offsets = [3, 0], sizes = [64, 128], strides = [1, 1]} : vector<72x128xf32> to vector<64x128xf32>
    %c384 = arith.constant 384 : index
    %c0_8 = arith.constant 0 : index
    %19 = vector.load %arg3[%c384, %c0_8] : memref<640x128xf32, #tpu.memory_space<vmem>>, vector<128x128xf32>
    %cst_9 = arith.constant dense<0.000000e+00> : vector<64x128xf32>
    %20 = tpu.matmul %18, %19, %cst_9 {dimension_numbers = #tpu.dot_dimension_numbers<[1], [0], [0], [1], [0, 0, 1, 1], [], []>} : vector<64x128xf32>, vector<128x128xf32>, vector<64x128xf32> -> vector<64x128xf32>
    %21 = arith.addf %17, %20 : vector<64x128xf32>
    %22 = vector.extract_strided_slice %4 {offsets = [4, 0], sizes = [64, 128], strides = [1, 1]} : vector<72x128xf32> to vector<64x128xf32>
    %c512 = arith.constant 512 : index
    %c0_10 = arith.constant 0 : index
    %23 = vector.load %arg3[%c512, %c0_10] : memref<640x128xf32, #tpu.memory_space<vmem>>, vector<128x128xf32>
    %cst_11 = arith.constant dense<0.000000e+00> : vector<64x128xf32>
    %24 = tpu.matmul %22, %23, %cst_11 {dimension_numbers = #tpu.dot_dimension_numbers<[1], [0], [0], [1], [0, 0, 1, 1], [], []>} : vector<64x128xf32>, vector<128x128xf32>, vector<64x128xf32> -> vector<64x128xf32>
    %25 = arith.addf %21, %24 : vector<64x128xf32>
    %c0_12 = arith.constant 0 : index
    %c0_13 = arith.constant 0 : index
    %26 = vector.load %arg4[%c0_12, %c0_13] : memref<1x128xf32, #tpu.memory_space<vmem>>, vector<1x128xf32>
    %27 = vector.broadcast %26 : vector<1x128xf32> to vector<64x128xf32>
    %28 = arith.addf %25, %27 : vector<64x128xf32>
    %c0_14 = arith.constant 0 : index
    %c0_15 = arith.constant 0 : index
    %29 = vector.load %arg5[%c0_14, %c0_15] : memref<1x128xf32, #tpu.memory_space<vmem>>, vector<1x128xf32>
    %30 = vector.broadcast %29 : vector<1x128xf32> to vector<64x128xf32>
    %31 = arith.mulf %28, %30 : vector<64x128xf32>
    %c0_16 = arith.constant 0 : index
    %c0_17 = arith.constant 0 : index
    %32 = vector.load %arg6[%c0_16, %c0_17] : memref<1x128xf32, #tpu.memory_space<vmem>>, vector<1x128xf32>
    %33 = vector.broadcast %32 : vector<1x128xf32> to vector<64x128xf32>
    %34 = arith.addf %31, %33 : vector<64x128xf32>
    %cst_18 = arith.constant 0.000000e+00 : f32
    %35 = vector.broadcast %cst_18 : f32 to vector<64x128xf32>
    %36 = arith.maximumf %34, %35 : vector<64x128xf32>
    %37 = tpu.iota {dimensions = array<i32: 0>} : vector<64x1xi32>
    %38 = vector.broadcast %1 : i32 to vector<64x1xi32>
    %39 = arith.addi %38, %37 : vector<64x1xi32>
    %c64_i32_19 = arith.constant 64 : i32
    %40 = vector.broadcast %c64_i32_19 : i32 to vector<64x1xi32>
    %41 = arith.cmpi slt, %39, %40 : vector<64x1xi32>
    %cst_20 = arith.constant 0.000000e+00 : f32
    %42 = vector.shape_cast %41 : vector<64x1xi1> to vector<64x1xi1>
    %43 = vector.broadcast %42 : vector<64x1xi1> to vector<64x128xi1>
    %44 = vector.broadcast %cst_20 : f32 to vector<64x128xf32>
    %45 = arith.select %43, %36, %44 : vector<64x128xi1>, vector<64x128xf32>
    %c0_21 = arith.constant 0 : index
    %c0_22 = arith.constant 0 : index
    %c0_23 = arith.constant 0 : index
    %46 = vector.load %arg7[%c0_21, %c0_22, %c0_23] : memref<1x64x128xf32, #tpu.memory_space<vmem>>, vector<1x64x128xf32>
    %47 = vector.shape_cast %46 : vector<1x64x128xf32> to vector<64x128xf32>
    %48 = vector.shape_cast %45 : vector<64x128xf32> to vector<1x64x128xf32>
    tpu.vector_store %arg7[%c0_21, %c0_22, %c0_23], %48 {strides = array<i32>} : memref<1x64x128xf32, #tpu.memory_space<vmem>>, vector<1x64x128xf32>,
    return
  }
  func.func @transform_0(%arg0: i32, %arg1: i32) -> (i32, i32, i32) {
    %c0_i32 = arith.constant 0 : i32
    %c0_i32_0 = arith.constant 0 : i32
    %c0_i32_1 = arith.constant 0 : i32
    return %arg0, %c0_i32, %c0_i32_0 : i32, i32, i32
  }
  func.func @transform_1(%arg0: i32, %arg1: i32) -> (i32, i32) {
    %c0_i32 = arith.constant 0 : i32
    %c0_i32_0 = arith.constant 0 : i32
    %c0_i32_1 = arith.constant 0 : i32
    return %c0_i32, %c0_i32_0 : i32, i32
  }
  func.func @transform_2(%arg0: i32, %arg1: i32) -> (i32, i32) {
    %c0_i32 = arith.constant 0 : i32
    %c0_i32_0 = arith.constant 0 : i32
    %c0_i32_1 = arith.constant 0 : i32
    return %c0_i32, %c0_i32_0 : i32, i32
  }
  func.func @transform_3(%arg0: i32, %arg1: i32) -> (i32, i32) {
    %c0_i32 = arith.constant 0 : i32
    %c0_i32_0 = arith.constant 0 : i32
    %c0_i32_1 = arith.constant 0 : i32
    return %c0_i32, %c0_i32_0 : i32, i32
  }
  func.func @transform_4(%arg0: i32, %arg1: i32) -> (i32, i32) {
    %c0_i32 = arith.constant 0 : i32
    %c0_i32_0 = arith.constant 0 : i32
    %c0_i32_1 = arith.constant 0 : i32
    return %c0_i32, %c0_i32_0 : i32, i32
  }
  func.func @transform_5(%arg0: i32, %arg1: i32) -> (i32, i32, i32) {
    %c0_i32 = arith.constant 0 : i32
    %c0_i32_0 = arith.constant 0 : i32
    return %arg0, %arg1, %c0_i32 : i32, i32, i32
  }
}

module attributes {stable_mosaic.version = 11 : i64} {
  func.func @kernel(%arg0: i32, %arg1: i32, %arg2: memref<1x40x256xf32, #tpu.memory_space<vmem>>, %arg3: memref<640x128xf32, #tpu.memory_space<vmem>>, %arg4: memref<1x128xf32, #tpu.memory_space<vmem>>, %arg5: memref<1x128xf32, #tpu.memory_space<vmem>>, %arg6: memref<1x128xf32, #tpu.memory_space<vmem>>, %arg7: memref<1x32x128xf32, #tpu.memory_space<vmem>>) attributes {dimension_semantics = [#tpu.dimension_semantics<parallel>, #tpu.dimension_semantics<parallel>], iteration_bounds = array<i64: 2, 1>, scalar_prefetch = 0 : i64, scratch_operands = 0 : i64, tpu.core_type = #tpu.core_type<tc>, window_params = [{transform_indices = @transform_0, window_bounds = array<i64: 1, 40, 256>}, {pipeline_mode = #tpu.pipeline_mode<synchronous>, transform_indices = @transform_1, window_bounds = array<i64: 640, 128>}, {pipeline_mode = #tpu.pipeline_mode<synchronous>, transform_indices = @transform_2, window_bounds = array<i64: 1, 128>}, {pipeline_mode = #tpu.pipeline_mode<synchronous>, transform_indices = @transform_3, window_bounds = array<i64: 1, 128>}, {pipeline_mode = #tpu.pipeline_mode<synchronous>, transform_indices = @transform_4, window_bounds = array<i64: 1, 128>}, {transform_indices = @transform_5, window_bounds = array<i64: 1, 32, 128>}]} {
    %c32_i32 = arith.constant 32 : i32
    %0 = arith.muli %arg1, %c32_i32 : i32
    %1 = tpu.assume_multiple %0, 8 : i32
    %c0 = arith.constant 0 : index
    %2 = arith.index_cast %1 : i32 to index
    %c0_0 = arith.constant 0 : index
    %3 = vector.load %arg2[%c0, %2, %c0_0] : memref<1x40x256xf32, #tpu.memory_space<vmem>>, vector<1x40x256xf32>
    %4 = vector.shape_cast %3 : vector<1x40x256xf32> to vector<40x256xf32>
    %cst = arith.constant 0.000000e+00 : f32
    %5 = vector.broadcast %cst : f32 to vector<32x128xf32>
    %6 = vector.extract_strided_slice %4 {offsets = [0, 0], sizes = [32, 128], strides = [1, 1]} : vector<40x256xf32> to vector<32x128xf32>
    %c0_1 = arith.constant 0 : index
    %c0_2 = arith.constant 0 : index
    %7 = vector.load %arg3[%c0_1, %c0_2] : memref<640x128xf32, #tpu.memory_space<vmem>>, vector<128x128xf32>
    %cst_3 = arith.constant dense<0.000000e+00> : vector<32x128xf32>
    %8 = tpu.matmul %6, %7, %cst_3 {dimension_numbers = #tpu.dot_dimension_numbers<[1], [0], [0], [1], [0, 0, 1, 1], [], []>} : vector<32x128xf32>, vector<128x128xf32>, vector<32x128xf32> -> vector<32x128xf32>
    %9 = arith.addf %5, %8 : vector<32x128xf32>
    %10 = vector.extract_strided_slice %4 {offsets = [0, 128], sizes = [32, 128], strides = [1, 1]} : vector<40x256xf32> to vector<32x128xf32>
    %c128 = arith.constant 128 : index
    %c0_4 = arith.constant 0 : index
    %11 = vector.load %arg3[%c128, %c0_4] : memref<640x128xf32, #tpu.memory_space<vmem>>, vector<128x128xf32>
    %cst_5 = arith.constant dense<0.000000e+00> : vector<32x128xf32>
    %12 = tpu.matmul %10, %11, %cst_5 {dimension_numbers = #tpu.dot_dimension_numbers<[1], [0], [0], [1], [0, 0, 1, 1], [], []>} : vector<32x128xf32>, vector<128x128xf32>, vector<32x128xf32> -> vector<32x128xf32>
    %13 = arith.addf %9, %12 : vector<32x128xf32>
    %14 = vector.extract_strided_slice %4 {offsets = [1, 0], sizes = [32, 128], strides = [1, 1]} : vector<40x256xf32> to vector<32x128xf32>
    %c256 = arith.constant 256 : index
    %c0_6 = arith.constant 0 : index
    %15 = vector.load %arg3[%c256, %c0_6] : memref<640x128xf32, #tpu.memory_space<vmem>>, vector<128x128xf32>
    %cst_7 = arith.constant dense<0.000000e+00> : vector<32x128xf32>
    %16 = tpu.matmul %14, %15, %cst_7 {dimension_numbers = #tpu.dot_dimension_numbers<[1], [0], [0], [1], [0, 0, 1, 1], [], []>} : vector<32x128xf32>, vector<128x128xf32>, vector<32x128xf32> -> vector<32x128xf32>
    %17 = arith.addf %13, %16 : vector<32x128xf32>
    %18 = vector.extract_strided_slice %4 {offsets = [1, 128], sizes = [32, 128], strides = [1, 1]} : vector<40x256xf32> to vector<32x128xf32>
    %c384 = arith.constant 384 : index
    %c0_8 = arith.constant 0 : index
    %19 = vector.load %arg3[%c384, %c0_8] : memref<640x128xf32, #tpu.memory_space<vmem>>, vector<128x128xf32>
    %cst_9 = arith.constant dense<0.000000e+00> : vector<32x128xf32>
    %20 = tpu.matmul %18, %19, %cst_9 {dimension_numbers = #tpu.dot_dimension_numbers<[1], [0], [0], [1], [0, 0, 1, 1], [], []>} : vector<32x128xf32>, vector<128x128xf32>, vector<32x128xf32> -> vector<32x128xf32>
    %21 = arith.addf %17, %20 : vector<32x128xf32>
    %22 = vector.extract_strided_slice %4 {offsets = [2, 0], sizes = [32, 128], strides = [1, 1]} : vector<40x256xf32> to vector<32x128xf32>
    %c512 = arith.constant 512 : index
    %c0_10 = arith.constant 0 : index
    %23 = vector.load %arg3[%c512, %c0_10] : memref<640x128xf32, #tpu.memory_space<vmem>>, vector<128x128xf32>
    %cst_11 = arith.constant dense<0.000000e+00> : vector<32x128xf32>
    %24 = tpu.matmul %22, %23, %cst_11 {dimension_numbers = #tpu.dot_dimension_numbers<[1], [0], [0], [1], [0, 0, 1, 1], [], []>} : vector<32x128xf32>, vector<128x128xf32>, vector<32x128xf32> -> vector<32x128xf32>
    %25 = arith.addf %21, %24 : vector<32x128xf32>
    %c0_12 = arith.constant 0 : index
    %c0_13 = arith.constant 0 : index
    %26 = vector.load %arg4[%c0_12, %c0_13] : memref<1x128xf32, #tpu.memory_space<vmem>>, vector<1x128xf32>
    %27 = vector.broadcast %26 : vector<1x128xf32> to vector<32x128xf32>
    %28 = arith.addf %25, %27 : vector<32x128xf32>
    %29 = tpu.iota {dimensions = array<i32: 1>} : vector<1x128xi32>
    %c8_i32 = arith.constant 8 : i32
    %30 = vector.broadcast %c8_i32 : i32 to vector<1x128xi32>
    %31 = arith.cmpi slt, %29, %30 : vector<1x128xi32>
    %32 = arith.extui %31 : vector<1x128xi1> to vector<1x128xi32>
    %33 = arith.sitofp %32 : vector<1x128xi32> to vector<1x128xf32>
    %34 = vector.broadcast %33 : vector<1x128xf32> to vector<32x128xf32>
    %35 = arith.mulf %28, %34 : vector<32x128xf32>
    %cst_14 = arith.constant dense<0.000000e+00> : vector<32xf32>
    %36 = vector.multi_reduction <add>, %35, %cst_14 [1] : vector<32x128xf32> to vector<32xf32>
    %37 = vector.shape_cast %36 : vector<32xf32> to vector<32x1xf32>
    %cst_15 = arith.constant 1.250000e-01 : f32
    %38 = vector.broadcast %cst_15 : f32 to vector<32x1xf32>
    %39 = arith.mulf %37, %38 : vector<32x1xf32>
    %40 = vector.broadcast %39 : vector<32x1xf32> to vector<32x128xf32>
    %41 = arith.subf %28, %40 : vector<32x128xf32>
    %42 = vector.broadcast %33 : vector<1x128xf32> to vector<32x128xf32>
    %43 = arith.mulf %41, %42 : vector<32x128xf32>
    %44 = arith.mulf %43, %43 : vector<32x128xf32>
    %cst_16 = arith.constant dense<0.000000e+00> : vector<32xf32>
    %45 = vector.multi_reduction <add>, %44, %cst_16 [1] : vector<32x128xf32> to vector<32xf32>
    %46 = vector.shape_cast %45 : vector<32xf32> to vector<32x1xf32>
    %cst_17 = arith.constant 1.250000e-01 : f32
    %47 = vector.broadcast %cst_17 : f32 to vector<32x1xf32>
    %48 = arith.mulf %46, %47 : vector<32x1xf32>
    %cst_18 = arith.constant 9.99999974E-6 : f32
    %49 = vector.broadcast %cst_18 : f32 to vector<32x1xf32>
    %50 = arith.addf %48, %49 : vector<32x1xf32>
    %51 = math.rsqrt %50 : vector<32x1xf32>
    %52 = vector.broadcast %51 : vector<32x1xf32> to vector<32x128xf32>
    %53 = arith.mulf %43, %52 : vector<32x128xf32>
    %c0_19 = arith.constant 0 : index
    %c0_20 = arith.constant 0 : index
    %54 = vector.load %arg5[%c0_19, %c0_20] : memref<1x128xf32, #tpu.memory_space<vmem>>, vector<1x128xf32>
    %55 = vector.broadcast %54 : vector<1x128xf32> to vector<32x128xf32>
    %56 = arith.mulf %53, %55 : vector<32x128xf32>
    %c0_21 = arith.constant 0 : index
    %c0_22 = arith.constant 0 : index
    %57 = vector.load %arg6[%c0_21, %c0_22] : memref<1x128xf32, #tpu.memory_space<vmem>>, vector<1x128xf32>
    %58 = vector.broadcast %57 : vector<1x128xf32> to vector<32x128xf32>
    %59 = arith.addf %56, %58 : vector<32x128xf32>
    %cst_23 = arith.constant 0.000000e+00 : f32
    %60 = vector.broadcast %cst_23 : f32 to vector<32x128xf32>
    %61 = arith.maximumf %59, %60 : vector<32x128xf32>
    %62 = tpu.iota {dimensions = array<i32: 0>} : vector<32x1xi32>
    %63 = vector.broadcast %1 : i32 to vector<32x1xi32>
    %64 = arith.addi %63, %62 : vector<32x1xi32>
    %c32_i32_24 = arith.constant 32 : i32
    %65 = vector.broadcast %c32_i32_24 : i32 to vector<32x1xi32>
    %66 = arith.cmpi slt, %64, %65 : vector<32x1xi32>
    %cst_25 = arith.constant 0.000000e+00 : f32
    %67 = vector.shape_cast %66 : vector<32x1xi1> to vector<32x1xi1>
    %68 = vector.broadcast %67 : vector<32x1xi1> to vector<32x128xi1>
    %69 = vector.broadcast %cst_25 : f32 to vector<32x128xf32>
    %70 = arith.select %68, %61, %69 : vector<32x128xi1>, vector<32x128xf32>
    %c0_26 = arith.constant 0 : index
    %c0_27 = arith.constant 0 : index
    %c0_28 = arith.constant 0 : index
    %71 = vector.load %arg7[%c0_26, %c0_27, %c0_28] : memref<1x32x128xf32, #tpu.memory_space<vmem>>, vector<1x32x128xf32>
    %72 = vector.shape_cast %71 : vector<1x32x128xf32> to vector<32x128xf32>
    %73 = vector.shape_cast %70 : vector<32x128xf32> to vector<1x32x128xf32>
    tpu.vector_store %arg7[%c0_26, %c0_27, %c0_28], %73 {strides = array<i32>} : memref<1x32x128xf32, #tpu.memory_space<vmem>>, vector<1x32x128xf32>,
    return
  }
  func.func @transform_0(%arg0: i32, %arg1: i32) -> (i32, i32, i32) {
    %c0_i32 = arith.constant 0 : i32
    %c0_i32_0 = arith.constant 0 : i32
    %c0_i32_1 = arith.constant 0 : i32
    return %arg0, %c0_i32, %c0_i32_0 : i32, i32, i32
  }
  func.func @transform_1(%arg0: i32, %arg1: i32) -> (i32, i32) {
    %c0_i32 = arith.constant 0 : i32
    %c0_i32_0 = arith.constant 0 : i32
    %c0_i32_1 = arith.constant 0 : i32
    return %c0_i32, %c0_i32_0 : i32, i32
  }
  func.func @transform_2(%arg0: i32, %arg1: i32) -> (i32, i32) {
    %c0_i32 = arith.constant 0 : i32
    %c0_i32_0 = arith.constant 0 : i32
    %c0_i32_1 = arith.constant 0 : i32
    return %c0_i32, %c0_i32_0 : i32, i32
  }
  func.func @transform_3(%arg0: i32, %arg1: i32) -> (i32, i32) {
    %c0_i32 = arith.constant 0 : i32
    %c0_i32_0 = arith.constant 0 : i32
    %c0_i32_1 = arith.constant 0 : i32
    return %c0_i32, %c0_i32_0 : i32, i32
  }
  func.func @transform_4(%arg0: i32, %arg1: i32) -> (i32, i32) {
    %c0_i32 = arith.constant 0 : i32
    %c0_i32_0 = arith.constant 0 : i32
    %c0_i32_1 = arith.constant 0 : i32
    return %c0_i32, %c0_i32_0 : i32, i32
  }
  func.func @transform_5(%arg0: i32, %arg1: i32) -> (i32, i32, i32) {
    %c0_i32 = arith.constant 0 : i32
    %c0_i32_0 = arith.constant 0 : i32
    return %arg0, %arg1, %c0_i32 : i32, i32, i32
  }
}

module attributes {stable_mosaic.version = 11 : i64} {
  func.func @kernel(%arg0: i32, %arg1: i32, %arg2: memref<1x40x128xf32, #tpu.memory_space<vmem>>, %arg3: memref<640x128xf32, #tpu.memory_space<vmem>>, %arg4: memref<1x128xf32, #tpu.memory_space<vmem>>, %arg5: memref<1x128xf32, #tpu.memory_space<vmem>>, %arg6: memref<1x128xf32, #tpu.memory_space<vmem>>, %arg7: memref<1x32x256xf32, #tpu.memory_space<vmem>>, %arg8: memref<1x32x128xf32, #tpu.memory_space<vmem>>) attributes {dimension_semantics = [#tpu.dimension_semantics<parallel>, #tpu.dimension_semantics<parallel>], iteration_bounds = array<i64: 2, 1>, scalar_prefetch = 0 : i64, scratch_operands = 0 : i64, tpu.core_type = #tpu.core_type<tc>, window_params = [{transform_indices = @transform_0, window_bounds = array<i64: 1, 40, 128>}, {pipeline_mode = #tpu.pipeline_mode<synchronous>, transform_indices = @transform_1, window_bounds = array<i64: 640, 128>}, {pipeline_mode = #tpu.pipeline_mode<synchronous>, transform_indices = @transform_2, window_bounds = array<i64: 1, 128>}, {pipeline_mode = #tpu.pipeline_mode<synchronous>, transform_indices = @transform_3, window_bounds = array<i64: 1, 128>}, {pipeline_mode = #tpu.pipeline_mode<synchronous>, transform_indices = @transform_4, window_bounds = array<i64: 1, 128>}, {transform_indices = @transform_5, window_bounds = array<i64: 1, 32, 256>}, {transform_indices = @transform_6, window_bounds = array<i64: 1, 32, 128>}]} {
    %c32_i32 = arith.constant 32 : i32
    %0 = arith.muli %arg1, %c32_i32 : i32
    %1 = tpu.assume_multiple %0, 8 : i32
    %c0 = arith.constant 0 : index
    %2 = arith.index_cast %1 : i32 to index
    %c0_0 = arith.constant 0 : index
    %3 = vector.load %arg2[%c0, %2, %c0_0] : memref<1x40x128xf32, #tpu.memory_space<vmem>>, vector<1x40x128xf32>
    %4 = vector.shape_cast %3 : vector<1x40x128xf32> to vector<40x128xf32>
    %cst = arith.constant 0.000000e+00 : f32
    %5 = vector.broadcast %cst : f32 to vector<32x128xf32>
    %6 = vector.extract_strided_slice %4 {offsets = [0, 0], sizes = [32, 128], strides = [1, 1]} : vector<40x128xf32> to vector<32x128xf32>
    %c0_1 = arith.constant 0 : index
    %c0_2 = arith.constant 0 : index
    %7 = vector.load %arg3[%c0_1, %c0_2] : memref<640x128xf32, #tpu.memory_space<vmem>>, vector<128x128xf32>
    %cst_3 = arith.constant dense<0.000000e+00> : vector<32x128xf32>
    %8 = tpu.matmul %6, %7, %cst_3 {dimension_numbers = #tpu.dot_dimension_numbers<[1], [0], [0], [1], [0, 0, 1, 1], [], []>} : vector<32x128xf32>, vector<128x128xf32>, vector<32x128xf32> -> vector<32x128xf32>
    %9 = arith.addf %5, %8 : vector<32x128xf32>
    %10 = vector.extract_strided_slice %4 {offsets = [1, 0], sizes = [32, 128], strides = [1, 1]} : vector<40x128xf32> to vector<32x128xf32>
    %c128 = arith.constant 128 : index
    %c0_4 = arith.constant 0 : index
    %11 = vector.load %arg3[%c128, %c0_4] : memref<640x128xf32, #tpu.memory_space<vmem>>, vector<128x128xf32>
    %cst_5 = arith.constant dense<0.000000e+00> : vector<32x128xf32>
    %12 = tpu.matmul %10, %11, %cst_5 {dimension_numbers = #tpu.dot_dimension_numbers<[1], [0], [0], [1], [0, 0, 1, 1], [], []>} : vector<32x128xf32>, vector<128x128xf32>, vector<32x128xf32> -> vector<32x128xf32>
    %13 = arith.addf %9, %12 : vector<32x128xf32>
    %14 = vector.extract_strided_slice %4 {offsets = [2, 0], sizes = [32, 128], strides = [1, 1]} : vector<40x128xf32> to vector<32x128xf32>
    %c256 = arith.constant 256 : index
    %c0_6 = arith.constant 0 : index
    %15 = vector.load %arg3[%c256, %c0_6] : memref<640x128xf32, #tpu.memory_space<vmem>>, vector<128x128xf32>
    %cst_7 = arith.constant dense<0.000000e+00> : vector<32x128xf32>
    %16 = tpu.matmul %14, %15, %cst_7 {dimension_numbers = #tpu.dot_dimension_numbers<[1], [0], [0], [1], [0, 0, 1, 1], [], []>} : vector<32x128xf32>, vector<128x128xf32>, vector<32x128xf32> -> vector<32x128xf32>
    %17 = arith.addf %13, %16 : vector<32x128xf32>
    %18 = vector.extract_strided_slice %4 {offsets = [3, 0], sizes = [32, 128], strides = [1, 1]} : vector<40x128xf32> to vector<32x128xf32>
    %c384 = arith.constant 384 : index
    %c0_8 = arith.constant 0 : index
    %19 = vector.load %arg3[%c384, %c0_8] : memref<640x128xf32, #tpu.memory_space<vmem>>, vector<128x128xf32>
    %cst_9 = arith.constant dense<0.000000e+00> : vector<32x128xf32>
    %20 = tpu.matmul %18, %19, %cst_9 {dimension_numbers = #tpu.dot_dimension_numbers<[1], [0], [0], [1], [0, 0, 1, 1], [], []>} : vector<32x128xf32>, vector<128x128xf32>, vector<32x128xf32> -> vector<32x128xf32>
    %21 = arith.addf %17, %20 : vector<32x128xf32>
    %22 = vector.extract_strided_slice %4 {offsets = [4, 0], sizes = [32, 128], strides = [1, 1]} : vector<40x128xf32> to vector<32x128xf32>
    %c512 = arith.constant 512 : index
    %c0_10 = arith.constant 0 : index
    %23 = vector.load %arg3[%c512, %c0_10] : memref<640x128xf32, #tpu.memory_space<vmem>>, vector<128x128xf32>
    %cst_11 = arith.constant dense<0.000000e+00> : vector<32x128xf32>
    %24 = tpu.matmul %22, %23, %cst_11 {dimension_numbers = #tpu.dot_dimension_numbers<[1], [0], [0], [1], [0, 0, 1, 1], [], []>} : vector<32x128xf32>, vector<128x128xf32>, vector<32x128xf32> -> vector<32x128xf32>
    %25 = arith.addf %21, %24 : vector<32x128xf32>
    %c0_12 = arith.constant 0 : index
    %c0_13 = arith.constant 0 : index
    %26 = vector.load %arg4[%c0_12, %c0_13] : memref<1x128xf32, #tpu.memory_space<vmem>>, vector<1x128xf32>
    %27 = vector.broadcast %26 : vector<1x128xf32> to vector<32x128xf32>
    %28 = arith.addf %25, %27 : vector<32x128xf32>
    %29 = tpu.iota {dimensions = array<i32: 0>} : vector<32x1xi32>
    %30 = vector.broadcast %1 : i32 to vector<32x1xi32>
    %31 = arith.addi %30, %29 : vector<32x1xi32>
    %c32_i32_14 = arith.constant 32 : i32
    %32 = vector.broadcast %c32_i32_14 : i32 to vector<32x1xi32>
    %33 = arith.cmpi slt, %31, %32 : vector<32x1xi32>
    %cst_15 = arith.constant 0.000000e+00 : f32
    %34 = vector.shape_cast %33 : vector<32x1xi1> to vector<32x1xi1>
    %35 = vector.broadcast %34 : vector<32x1xi1> to vector<32x128xi1>
    %36 = vector.broadcast %cst_15 : f32 to vector<32x128xf32>
    %37 = arith.select %35, %28, %36 : vector<32x128xi1>, vector<32x128xf32>
    %c0_16 = arith.constant 0 : index
    %c0_17 = arith.constant 0 : index
    %c0_18 = arith.constant 0 : index
    %38 = vector.load %arg7[%c0_16, %c0_17, %c0_18] : memref<1x32x256xf32, #tpu.memory_space<vmem>>, vector<1x32x256xf32>
    %39 = vector.shape_cast %38 : vector<1x32x256xf32> to vector<32x256xf32>
    %40 = vector.extract_strided_slice %39 {offsets = [0, 0], sizes = [32, 128], strides = [1, 1]} : vector<32x256xf32> to vector<32x128xf32>
    %41 = vector.extract_strided_slice %39 {offsets = [0, 128], sizes = [32, 128], strides = [1, 1]} : vector<32x256xf32> to vector<32x128xf32>
    %42 = arith.maximumf %40, %41 : vector<32x128xf32>
    %43 = arith.addf %37, %42 : vector<32x128xf32>
    %c0_19 = arith.constant 0 : index
    %c0_20 = arith.constant 0 : index
    %c0_21 = arith.constant 0 : index
    %44 = vector.load %arg8[%c0_19, %c0_20, %c0_21] : memref<1x32x128xf32, #tpu.memory_space<vmem>>, vector<1x32x128xf32>
    %45 = vector.shape_cast %44 : vector<1x32x128xf32> to vector<32x128xf32>
    %46 = vector.shape_cast %43 : vector<32x128xf32> to vector<1x32x128xf32>
    tpu.vector_store %arg8[%c0_19, %c0_20, %c0_21], %46 {strides = array<i32>} : memref<1x32x128xf32, #tpu.memory_space<vmem>>, vector<1x32x128xf32>,
    return
  }
  func.func @transform_0(%arg0: i32, %arg1: i32) -> (i32, i32, i32) {
    %c0_i32 = arith.constant 0 : i32
    %c0_i32_0 = arith.constant 0 : i32
    %c0_i32_1 = arith.constant 0 : i32
    return %arg0, %c0_i32, %c0_i32_0 : i32, i32, i32
  }
  func.func @transform_1(%arg0: i32, %arg1: i32) -> (i32, i32) {
    %c0_i32 = arith.constant 0 : i32
    %c0_i32_0 = arith.constant 0 : i32
    %c0_i32_1 = arith.constant 0 : i32
    return %c0_i32, %c0_i32_0 : i32, i32
  }
  func.func @transform_2(%arg0: i32, %arg1: i32) -> (i32, i32) {
    %c0_i32 = arith.constant 0 : i32
    %c0_i32_0 = arith.constant 0 : i32
    %c0_i32_1 = arith.constant 0 : i32
    return %c0_i32, %c0_i32_0 : i32, i32
  }
  func.func @transform_3(%arg0: i32, %arg1: i32) -> (i32, i32) {
    %c0_i32 = arith.constant 0 : i32
    %c0_i32_0 = arith.constant 0 : i32
    %c0_i32_1 = arith.constant 0 : i32
    return %c0_i32, %c0_i32_0 : i32, i32
  }
  func.func @transform_4(%arg0: i32, %arg1: i32) -> (i32, i32) {
    %c0_i32 = arith.constant 0 : i32
    %c0_i32_0 = arith.constant 0 : i32
    %c0_i32_1 = arith.constant 0 : i32
    return %c0_i32, %c0_i32_0 : i32, i32
  }
  func.func @transform_5(%arg0: i32, %arg1: i32) -> (i32, i32, i32) {
    %c0_i32 = arith.constant 0 : i32
    %c0_i32_0 = arith.constant 0 : i32
    return %arg0, %arg1, %c0_i32 : i32, i32, i32
  }
  func.func @transform_6(%arg0: i32, %arg1: i32) -> (i32, i32, i32) {
    %c0_i32 = arith.constant 0 : i32
    %c0_i32_0 = arith.constant 0 : i32
    return %arg0, %arg1, %c0_i32 : i32, i32, i32
  }
}

module attributes {stable_mosaic.version = 11 : i64} {
  func.func @kernel(%arg0: i32, %arg1: memref<64x128xf32, #tpu.memory_space<vmem>>, %arg2: memref<1x128xf32, #tpu.memory_space<vmem>>, %arg3: memref<1x128xf32, #tpu.memory_space<vmem>>, %arg4: memref<64x128xf32, #tpu.memory_space<vmem>>) attributes {dimension_semantics = [#tpu.dimension_semantics<parallel>], iteration_bounds = array<i64: 1>, scalar_prefetch = 0 : i64, scratch_operands = 0 : i64, tpu.core_type = #tpu.core_type<tc>, window_params = [{transform_indices = @transform_0, window_bounds = array<i64: 64, 128>}, {pipeline_mode = #tpu.pipeline_mode<synchronous>, transform_indices = @transform_1, window_bounds = array<i64: 1, 128>}, {pipeline_mode = #tpu.pipeline_mode<synchronous>, transform_indices = @transform_2, window_bounds = array<i64: 1, 128>}, {transform_indices = @transform_3, window_bounds = array<i64: 64, 128>}]} {
    %c0 = arith.constant 0 : index
    %c0_0 = arith.constant 0 : index
    %0 = vector.load %arg1[%c0, %c0_0] : memref<64x128xf32, #tpu.memory_space<vmem>>, vector<64x128xf32>
    %1 = tpu.iota {dimensions = array<i32: 1>} : vector<1x128xi32>
    %c8_i32 = arith.constant 8 : i32
    %2 = vector.broadcast %c8_i32 : i32 to vector<1x128xi32>
    %3 = arith.cmpi slt, %1, %2 : vector<1x128xi32>
    %4 = arith.extui %3 : vector<1x128xi1> to vector<1x128xi32>
    %5 = arith.sitofp %4 : vector<1x128xi32> to vector<1x128xf32>
    %6 = vector.broadcast %5 : vector<1x128xf32> to vector<64x128xf32>
    %7 = arith.mulf %0, %6 : vector<64x128xf32>
    %cst = arith.constant dense<0.000000e+00> : vector<64xf32>
    %8 = vector.multi_reduction <add>, %7, %cst [1] : vector<64x128xf32> to vector<64xf32>
    %9 = vector.shape_cast %8 : vector<64xf32> to vector<64x1xf32>
    %cst_1 = arith.constant 1.250000e-01 : f32
    %10 = vector.broadcast %cst_1 : f32 to vector<64x1xf32>
    %11 = arith.mulf %9, %10 : vector<64x1xf32>
    %12 = vector.broadcast %11 : vector<64x1xf32> to vector<64x128xf32>
    %13 = arith.subf %0, %12 : vector<64x128xf32>
    %14 = vector.broadcast %5 : vector<1x128xf32> to vector<64x128xf32>
    %15 = arith.mulf %13, %14 : vector<64x128xf32>
    %16 = arith.mulf %15, %15 : vector<64x128xf32>
    %cst_2 = arith.constant dense<0.000000e+00> : vector<64xf32>
    %17 = vector.multi_reduction <add>, %16, %cst_2 [1] : vector<64x128xf32> to vector<64xf32>
    %18 = vector.shape_cast %17 : vector<64xf32> to vector<64x1xf32>
    %cst_3 = arith.constant 1.250000e-01 : f32
    %19 = vector.broadcast %cst_3 : f32 to vector<64x1xf32>
    %20 = arith.mulf %18, %19 : vector<64x1xf32>
    %cst_4 = arith.constant 9.99999974E-6 : f32
    %21 = vector.broadcast %cst_4 : f32 to vector<64x1xf32>
    %22 = arith.addf %20, %21 : vector<64x1xf32>
    %23 = math.rsqrt %22 : vector<64x1xf32>
    %24 = vector.broadcast %23 : vector<64x1xf32> to vector<64x128xf32>
    %25 = arith.mulf %15, %24 : vector<64x128xf32>
    %c0_5 = arith.constant 0 : index
    %c0_6 = arith.constant 0 : index
    %26 = vector.load %arg2[%c0_5, %c0_6] : memref<1x128xf32, #tpu.memory_space<vmem>>, vector<1x128xf32>
    %27 = vector.broadcast %26 : vector<1x128xf32> to vector<64x128xf32>
    %28 = arith.mulf %25, %27 : vector<64x128xf32>
    %c0_7 = arith.constant 0 : index
    %c0_8 = arith.constant 0 : index
    %29 = vector.load %arg3[%c0_7, %c0_8] : memref<1x128xf32, #tpu.memory_space<vmem>>, vector<1x128xf32>
    %30 = vector.broadcast %29 : vector<1x128xf32> to vector<64x128xf32>
    %31 = arith.addf %28, %30 : vector<64x128xf32>
    %cst_9 = arith.constant 0.000000e+00 : f32
    %32 = vector.broadcast %cst_9 : f32 to vector<64x128xf32>
    %33 = arith.maximumf %31, %32 : vector<64x128xf32>
    %c0_10 = arith.constant 0 : index
    %c0_11 = arith.constant 0 : index
    %34 = vector.load %arg4[%c0_10, %c0_11] : memref<64x128xf32, #tpu.memory_space<vmem>>, vector<64x128xf32>
    tpu.vector_store %arg4[%c0_10, %c0_11], %33 {strides = array<i32>} : memref<64x128xf32, #tpu.memory_space<vmem>>, vector<64x128xf32>,
    return
  }
  func.func @transform_0(%arg0: i32) -> (i32, i32) {
    %c0_i32 = arith.constant 0 : i32
    %c0_i32_0 = arith.constant 0 : i32
    return %arg0, %c0_i32 : i32, i32
  }
  func.func @transform_1(%arg0: i32) -> (i32, i32) {
    %c0_i32 = arith.constant 0 : i32
    %c0_i32_0 = arith.constant 0 : i32
    %c0_i32_1 = arith.constant 0 : i32
    return %c0_i32, %c0_i32_0 : i32, i32
  }
  func.func @transform_2(%arg0: i32) -> (i32, i32) {
    %c0_i32 = arith.constant 0 : i32
    %c0_i32_0 = arith.constant 0 : i32
    %c0_i32_1 = arith.constant 0 : i32
    return %c0_i32, %c0_i32_0 : i32, i32
  }
  func.func @transform_3(%arg0: i32) -> (i32, i32) {
    %c0_i32 = arith.constant 0 : i32
    %c0_i32_0 = arith.constant 0 : i32
    return %arg0, %c0_i32 : i32, i32
  }
}

module attributes {stable_mosaic.version = 11 : i64} {
  func.func @kernel(%arg0: i32, %arg1: i32, %arg2: memref<1x24x384xf32, #tpu.memory_space<vmem>>, %arg3: memref<1024x128xf32, #tpu.memory_space<vmem>>, %arg4: memref<1x128xf32, #tpu.memory_space<vmem>>, %arg5: memref<1x128xf32, #tpu.memory_space<vmem>>, %arg6: memref<1x128xf32, #tpu.memory_space<vmem>>, %arg7: memref<1x16x128xf32, #tpu.memory_space<vmem>>) attributes {dimension_semantics = [#tpu.dimension_semantics<parallel>, #tpu.dimension_semantics<parallel>], iteration_bounds = array<i64: 2, 1>, scalar_prefetch = 0 : i64, scratch_operands = 0 : i64, tpu.core_type = #tpu.core_type<tc>, window_params = [{transform_indices = @transform_0, window_bounds = array<i64: 1, 24, 384>}, {pipeline_mode = #tpu.pipeline_mode<synchronous>, transform_indices = @transform_1, window_bounds = array<i64: 1024, 128>}, {pipeline_mode = #tpu.pipeline_mode<synchronous>, transform_indices = @transform_2, window_bounds = array<i64: 1, 128>}, {pipeline_mode = #tpu.pipeline_mode<synchronous>, transform_indices = @transform_3, window_bounds = array<i64: 1, 128>}, {pipeline_mode = #tpu.pipeline_mode<synchronous>, transform_indices = @transform_4, window_bounds = array<i64: 1, 128>}, {transform_indices = @transform_5, window_bounds = array<i64: 1, 16, 128>}]} {
    %c16_i32 = arith.constant 16 : i32
    %0 = arith.muli %arg1, %c16_i32 : i32
    %1 = tpu.assume_multiple %0, 8 : i32
    %c0 = arith.constant 0 : index
    %2 = arith.index_cast %1 : i32 to index
    %c0_0 = arith.constant 0 : index
    %3 = vector.load %arg2[%c0, %2, %c0_0] : memref<1x24x384xf32, #tpu.memory_space<vmem>>, vector<1x24x384xf32>
    %4 = vector.shape_cast %3 : vector<1x24x384xf32> to vector<24x384xf32>
    %cst = arith.constant 0.000000e+00 : f32
    %5 = vector.broadcast %cst : f32 to vector<16x128xf32>
    %6 = vector.extract_strided_slice %4 {offsets = [0, 0], sizes = [16, 128], strides = [1, 1]} : vector<24x384xf32> to vector<16x128xf32>
    %c0_1 = arith.constant 0 : index
    %c0_2 = arith.constant 0 : index
    %7 = vector.load %arg3[%c0_1, %c0_2] : memref<1024x128xf32, #tpu.memory_space<vmem>>, vector<128x128xf32>
    %cst_3 = arith.constant dense<0.000000e+00> : vector<16x128xf32>
    %8 = tpu.matmul %6, %7, %cst_3 {dimension_numbers = #tpu.dot_dimension_numbers<[1], [0], [0], [1], [0, 0, 1, 1], [], []>} : vector<16x128xf32>, vector<128x128xf32>, vector<16x128xf32> -> vector<16x128xf32>
    %9 = arith.addf %5, %8 : vector<16x128xf32>
    %10 = vector.extract_strided_slice %4 {offsets = [0, 128], sizes = [16, 128], strides = [1, 1]} : vector<24x384xf32> to vector<16x128xf32>
    %c128 = arith.constant 128 : index
    %c0_4 = arith.constant 0 : index
    %11 = vector.load %arg3[%c128, %c0_4] : memref<1024x128xf32, #tpu.memory_space<vmem>>, vector<128x128xf32>
    %cst_5 = arith.constant dense<0.000000e+00> : vector<16x128xf32>
    %12 = tpu.matmul %10, %11, %cst_5 {dimension_numbers = #tpu.dot_dimension_numbers<[1], [0], [0], [1], [0, 0, 1, 1], [], []>} : vector<16x128xf32>, vector<128x128xf32>, vector<16x128xf32> -> vector<16x128xf32>
    %13 = arith.addf %9, %12 : vector<16x128xf32>
    %14 = vector.extract_strided_slice %4 {offsets = [0, 256], sizes = [16, 128], strides = [1, 1]} : vector<24x384xf32> to vector<16x128xf32>
    %c256 = arith.constant 256 : index
    %c0_6 = arith.constant 0 : index
    %15 = vector.load %arg3[%c256, %c0_6] : memref<1024x128xf32, #tpu.memory_space<vmem>>, vector<128x128xf32>
    %cst_7 = arith.constant dense<0.000000e+00> : vector<16x128xf32>
    %16 = tpu.matmul %14, %15, %cst_7 {dimension_numbers = #tpu.dot_dimension_numbers<[1], [0], [0], [1], [0, 0, 1, 1], [], []>} : vector<16x128xf32>, vector<128x128xf32>, vector<16x128xf32> -> vector<16x128xf32>
    %17 = arith.addf %13, %16 : vector<16x128xf32>
    %18 = vector.extract_strided_slice %4 {offsets = [1, 0], sizes = [16, 128], strides = [1, 1]} : vector<24x384xf32> to vector<16x128xf32>
    %c384 = arith.constant 384 : index
    %c0_8 = arith.constant 0 : index
    %19 = vector.load %arg3[%c384, %c0_8] : memref<1024x128xf32, #tpu.memory_space<vmem>>, vector<128x128xf32>
    %cst_9 = arith.constant dense<0.000000e+00> : vector<16x128xf32>
    %20 = tpu.matmul %18, %19, %cst_9 {dimension_numbers = #tpu.dot_dimension_numbers<[1], [0], [0], [1], [0, 0, 1, 1], [], []>} : vector<16x128xf32>, vector<128x128xf32>, vector<16x128xf32> -> vector<16x128xf32>
    %21 = arith.addf %17, %20 : vector<16x128xf32>
    %22 = vector.extract_strided_slice %4 {offsets = [1, 128], sizes = [16, 128], strides = [1, 1]} : vector<24x384xf32> to vector<16x128xf32>
    %c512 = arith.constant 512 : index
    %c0_10 = arith.constant 0 : index
    %23 = vector.load %arg3[%c512, %c0_10] : memref<1024x128xf32, #tpu.memory_space<vmem>>, vector<128x128xf32>
    %cst_11 = arith.constant dense<0.000000e+00> : vector<16x128xf32>
    %24 = tpu.matmul %22, %23, %cst_11 {dimension_numbers = #tpu.dot_dimension_numbers<[1], [0], [0], [1], [0, 0, 1, 1], [], []>} : vector<16x128xf32>, vector<128x128xf32>, vector<16x128xf32> -> vector<16x128xf32>
    %25 = arith.addf %21, %24 : vector<16x128xf32>
    %26 = vector.extract_strided_slice %4 {offsets = [1, 256], sizes = [16, 128], strides = [1, 1]} : vector<24x384xf32> to vector<16x128xf32>
    %c640 = arith.constant 640 : index
    %c0_12 = arith.constant 0 : index
    %27 = vector.load %arg3[%c640, %c0_12] : memref<1024x128xf32, #tpu.memory_space<vmem>>, vector<128x128xf32>
    %cst_13 = arith.constant dense<0.000000e+00> : vector<16x128xf32>
    %28 = tpu.matmul %26, %27, %cst_13 {dimension_numbers = #tpu.dot_dimension_numbers<[1], [0], [0], [1], [0, 0, 1, 1], [], []>} : vector<16x128xf32>, vector<128x128xf32>, vector<16x128xf32> -> vector<16x128xf32>
    %29 = arith.addf %25, %28 : vector<16x128xf32>
    %30 = vector.extract_strided_slice %4 {offsets = [2, 0], sizes = [16, 128], strides = [1, 1]} : vector<24x384xf32> to vector<16x128xf32>
    %c768 = arith.constant 768 : index
    %c0_14 = arith.constant 0 : index
    %31 = vector.load %arg3[%c768, %c0_14] : memref<1024x128xf32, #tpu.memory_space<vmem>>, vector<128x128xf32>
    %cst_15 = arith.constant dense<0.000000e+00> : vector<16x128xf32>
    %32 = tpu.matmul %30, %31, %cst_15 {dimension_numbers = #tpu.dot_dimension_numbers<[1], [0], [0], [1], [0, 0, 1, 1], [], []>} : vector<16x128xf32>, vector<128x128xf32>, vector<16x128xf32> -> vector<16x128xf32>
    %33 = arith.addf %29, %32 : vector<16x128xf32>
    %34 = vector.extract_strided_slice %4 {offsets = [2, 128], sizes = [16, 128], strides = [1, 1]} : vector<24x384xf32> to vector<16x128xf32>
    %c896 = arith.constant 896 : index
    %c0_16 = arith.constant 0 : index
    %35 = vector.load %arg3[%c896, %c0_16] : memref<1024x128xf32, #tpu.memory_space<vmem>>, vector<128x128xf32>
    %cst_17 = arith.constant dense<0.000000e+00> : vector<16x128xf32>
    %36 = tpu.matmul %34, %35, %cst_17 {dimension_numbers = #tpu.dot_dimension_numbers<[1], [0], [0], [1], [0, 0, 1, 1], [], []>} : vector<16x128xf32>, vector<128x128xf32>, vector<16x128xf32> -> vector<16x128xf32>
    %37 = arith.addf %33, %36 : vector<16x128xf32>
    %c0_18 = arith.constant 0 : index
    %c0_19 = arith.constant 0 : index
    %38 = vector.load %arg4[%c0_18, %c0_19] : memref<1x128xf32, #tpu.memory_space<vmem>>, vector<1x128xf32>
    %39 = vector.broadcast %38 : vector<1x128xf32> to vector<16x128xf32>
    %40 = arith.addf %37, %39 : vector<16x128xf32>
    %41 = tpu.iota {dimensions = array<i32: 1>} : vector<1x128xi32>
    %c8_i32 = arith.constant 8 : i32
    %42 = vector.broadcast %c8_i32 : i32 to vector<1x128xi32>
    %43 = arith.cmpi slt, %41, %42 : vector<1x128xi32>
    %44 = arith.extui %43 : vector<1x128xi1> to vector<1x128xi32>
    %45 = arith.sitofp %44 : vector<1x128xi32> to vector<1x128xf32>
    %46 = vector.broadcast %45 : vector<1x128xf32> to vector<16x128xf32>
    %47 = arith.mulf %40, %46 : vector<16x128xf32>
    %cst_20 = arith.constant dense<0.000000e+00> : vector<16xf32>
    %48 = vector.multi_reduction <add>, %47, %cst_20 [1] : vector<16x128xf32> to vector<16xf32>
    %49 = vector.shape_cast %48 : vector<16xf32> to vector<16x1xf32>
    %cst_21 = arith.constant 1.250000e-01 : f32
    %50 = vector.broadcast %cst_21 : f32 to vector<16x1xf32>
    %51 = arith.mulf %49, %50 : vector<16x1xf32>
    %52 = vector.broadcast %51 : vector<16x1xf32> to vector<16x128xf32>
    %53 = arith.subf %40, %52 : vector<16x128xf32>
    %54 = vector.broadcast %45 : vector<1x128xf32> to vector<16x128xf32>
    %55 = arith.mulf %53, %54 : vector<16x128xf32>
    %56 = arith.mulf %55, %55 : vector<16x128xf32>
    %cst_22 = arith.constant dense<0.000000e+00> : vector<16xf32>
    %57 = vector.multi_reduction <add>, %56, %cst_22 [1] : vector<16x128xf32> to vector<16xf32>
    %58 = vector.shape_cast %57 : vector<16xf32> to vector<16x1xf32>
    %cst_23 = arith.constant 1.250000e-01 : f32
    %59 = vector.broadcast %cst_23 : f32 to vector<16x1xf32>
    %60 = arith.mulf %58, %59 : vector<16x1xf32>
    %cst_24 = arith.constant 9.99999974E-6 : f32
    %61 = vector.broadcast %cst_24 : f32 to vector<16x1xf32>
    %62 = arith.addf %60, %61 : vector<16x1xf32>
    %63 = math.rsqrt %62 : vector<16x1xf32>
    %64 = vector.broadcast %63 : vector<16x1xf32> to vector<16x128xf32>
    %65 = arith.mulf %55, %64 : vector<16x128xf32>
    %c0_25 = arith.constant 0 : index
    %c0_26 = arith.constant 0 : index
    %66 = vector.load %arg5[%c0_25, %c0_26] : memref<1x128xf32, #tpu.memory_space<vmem>>, vector<1x128xf32>
    %67 = vector.broadcast %66 : vector<1x128xf32> to vector<16x128xf32>
    %68 = arith.mulf %65, %67 : vector<16x128xf32>
    %c0_27 = arith.constant 0 : index
    %c0_28 = arith.constant 0 : index
    %69 = vector.load %arg6[%c0_27, %c0_28] : memref<1x128xf32, #tpu.memory_space<vmem>>, vector<1x128xf32>
    %70 = vector.broadcast %69 : vector<1x128xf32> to vector<16x128xf32>
    %71 = arith.addf %68, %70 : vector<16x128xf32>
    %cst_29 = arith.constant 0.000000e+00 : f32
    %72 = vector.broadcast %cst_29 : f32 to vector<16x128xf32>
    %73 = arith.maximumf %71, %72 : vector<16x128xf32>
    %74 = tpu.iota {dimensions = array<i32: 0>} : vector<16x1xi32>
    %75 = vector.broadcast %1 : i32 to vector<16x1xi32>
    %76 = arith.addi %75, %74 : vector<16x1xi32>
    %c11_i32 = arith.constant 11 : i32
    %77 = vector.broadcast %c11_i32 : i32 to vector<16x1xi32>
    %78 = arith.cmpi slt, %76, %77 : vector<16x1xi32>
    %cst_30 = arith.constant 0.000000e+00 : f32
    %79 = vector.shape_cast %78 : vector<16x1xi1> to vector<16x1xi1>
    %80 = vector.broadcast %79 : vector<16x1xi1> to vector<16x128xi1>
    %81 = vector.broadcast %cst_30 : f32 to vector<16x128xf32>
    %82 = arith.select %80, %73, %81 : vector<16x128xi1>, vector<16x128xf32>
    %c0_31 = arith.constant 0 : index
    %c0_32 = arith.constant 0 : index
    %c0_33 = arith.constant 0 : index
    %83 = vector.load %arg7[%c0_31, %c0_32, %c0_33] : memref<1x16x128xf32, #tpu.memory_space<vmem>>, vector<1x16x128xf32>
    %84 = vector.shape_cast %83 : vector<1x16x128xf32> to vector<16x128xf32>
    %85 = vector.shape_cast %82 : vector<16x128xf32> to vector<1x16x128xf32>
    tpu.vector_store %arg7[%c0_31, %c0_32, %c0_33], %85 {strides = array<i32>} : memref<1x16x128xf32, #tpu.memory_space<vmem>>, vector<1x16x128xf32>,
    return
  }
  func.func @transform_0(%arg0: i32, %arg1: i32) -> (i32, i32, i32) {
    %c0_i32 = arith.constant 0 : i32
    %c0_i32_0 = arith.constant 0 : i32
    %c0_i32_1 = arith.constant 0 : i32
    return %arg0, %c0_i32, %c0_i32_0 : i32, i32, i32
  }
  func.func @transform_1(%arg0: i32, %arg1: i32) -> (i32, i32) {
    %c0_i32 = arith.constant 0 : i32
    %c0_i32_0 = arith.constant 0 : i32
    %c0_i32_1 = arith.constant 0 : i32
    return %c0_i32, %c0_i32_0 : i32, i32
  }
  func.func @transform_2(%arg0: i32, %arg1: i32) -> (i32, i32) {
    %c0_i32 = arith.constant 0 : i32
    %c0_i32_0 = arith.constant 0 : i32
    %c0_i32_1 = arith.constant 0 : i32
    return %c0_i32, %c0_i32_0 : i32, i32
  }
  func.func @transform_3(%arg0: i32, %arg1: i32) -> (i32, i32) {
    %c0_i32 = arith.constant 0 : i32
    %c0_i32_0 = arith.constant 0 : i32
    %c0_i32_1 = arith.constant 0 : i32
    return %c0_i32, %c0_i32_0 : i32, i32
  }
  func.func @transform_4(%arg0: i32, %arg1: i32) -> (i32, i32) {
    %c0_i32 = arith.constant 0 : i32
    %c0_i32_0 = arith.constant 0 : i32
    %c0_i32_1 = arith.constant 0 : i32
    return %c0_i32, %c0_i32_0 : i32, i32
  }
  func.func @transform_5(%arg0: i32, %arg1: i32) -> (i32, i32, i32) {
    %c0_i32 = arith.constant 0 : i32
    %c0_i32_0 = arith.constant 0 : i32
    return %arg0, %arg1, %c0_i32 : i32, i32, i32
  }
}

module attributes {stable_mosaic.version = 11 : i64} {
  func.func @kernel(%arg0: i32, %arg1: i32, %arg2: memref<1x24x128xf32, #tpu.memory_space<vmem>>, %arg3: memref<1024x128xf32, #tpu.memory_space<vmem>>, %arg4: memref<1x128xf32, #tpu.memory_space<vmem>>, %arg5: memref<1x128xf32, #tpu.memory_space<vmem>>, %arg6: memref<1x128xf32, #tpu.memory_space<vmem>>, %arg7: memref<1x16x384xf32, #tpu.memory_space<vmem>>, %arg8: memref<1x16x128xf32, #tpu.memory_space<vmem>>) attributes {dimension_semantics = [#tpu.dimension_semantics<parallel>, #tpu.dimension_semantics<parallel>], iteration_bounds = array<i64: 2, 1>, scalar_prefetch = 0 : i64, scratch_operands = 0 : i64, tpu.core_type = #tpu.core_type<tc>, window_params = [{transform_indices = @transform_0, window_bounds = array<i64: 1, 24, 128>}, {pipeline_mode = #tpu.pipeline_mode<synchronous>, transform_indices = @transform_1, window_bounds = array<i64: 1024, 128>}, {pipeline_mode = #tpu.pipeline_mode<synchronous>, transform_indices = @transform_2, window_bounds = array<i64: 1, 128>}, {pipeline_mode = #tpu.pipeline_mode<synchronous>, transform_indices = @transform_3, window_bounds = array<i64: 1, 128>}, {pipeline_mode = #tpu.pipeline_mode<synchronous>, transform_indices = @transform_4, window_bounds = array<i64: 1, 128>}, {transform_indices = @transform_5, window_bounds = array<i64: 1, 16, 384>}, {transform_indices = @transform_6, window_bounds = array<i64: 1, 16, 128>}]} {
    %c16_i32 = arith.constant 16 : i32
    %0 = arith.muli %arg1, %c16_i32 : i32
    %1 = tpu.assume_multiple %0, 8 : i32
    %c0 = arith.constant 0 : index
    %2 = arith.index_cast %1 : i32 to index
    %c0_0 = arith.constant 0 : index
    %3 = vector.load %arg2[%c0, %2, %c0_0] : memref<1x24x128xf32, #tpu.memory_space<vmem>>, vector<1x24x128xf32>
    %4 = vector.shape_cast %3 : vector<1x24x128xf32> to vector<24x128xf32>
    %cst = arith.constant 0.000000e+00 : f32
    %5 = vector.broadcast %cst : f32 to vector<16x128xf32>
    %6 = vector.extract_strided_slice %4 {offsets = [0, 0], sizes = [16, 128], strides = [1, 1]} : vector<24x128xf32> to vector<16x128xf32>
    %c0_1 = arith.constant 0 : index
    %c0_2 = arith.constant 0 : index
    %7 = vector.load %arg3[%c0_1, %c0_2] : memref<1024x128xf32, #tpu.memory_space<vmem>>, vector<128x128xf32>
    %cst_3 = arith.constant dense<0.000000e+00> : vector<16x128xf32>
    %8 = tpu.matmul %6, %7, %cst_3 {dimension_numbers = #tpu.dot_dimension_numbers<[1], [0], [0], [1], [0, 0, 1, 1], [], []>} : vector<16x128xf32>, vector<128x128xf32>, vector<16x128xf32> -> vector<16x128xf32>
    %9 = arith.addf %5, %8 : vector<16x128xf32>
    %10 = vector.extract_strided_slice %4 {offsets = [1, 0], sizes = [16, 128], strides = [1, 1]} : vector<24x128xf32> to vector<16x128xf32>
    %c128 = arith.constant 128 : index
    %c0_4 = arith.constant 0 : index
    %11 = vector.load %arg3[%c128, %c0_4] : memref<1024x128xf32, #tpu.memory_space<vmem>>, vector<128x128xf32>
    %cst_5 = arith.constant dense<0.000000e+00> : vector<16x128xf32>
    %12 = tpu.matmul %10, %11, %cst_5 {dimension_numbers = #tpu.dot_dimension_numbers<[1], [0], [0], [1], [0, 0, 1, 1], [], []>} : vector<16x128xf32>, vector<128x128xf32>, vector<16x128xf32> -> vector<16x128xf32>
    %13 = arith.addf %9, %12 : vector<16x128xf32>
    %14 = vector.extract_strided_slice %4 {offsets = [2, 0], sizes = [16, 128], strides = [1, 1]} : vector<24x128xf32> to vector<16x128xf32>
    %c256 = arith.constant 256 : index
    %c0_6 = arith.constant 0 : index
    %15 = vector.load %arg3[%c256, %c0_6] : memref<1024x128xf32, #tpu.memory_space<vmem>>, vector<128x128xf32>
    %cst_7 = arith.constant dense<0.000000e+00> : vector<16x128xf32>
    %16 = tpu.matmul %14, %15, %cst_7 {dimension_numbers = #tpu.dot_dimension_numbers<[1], [0], [0], [1], [0, 0, 1, 1], [], []>} : vector<16x128xf32>, vector<128x128xf32>, vector<16x128xf32> -> vector<16x128xf32>
    %17 = arith.addf %13, %16 : vector<16x128xf32>
    %18 = vector.extract_strided_slice %4 {offsets = [3, 0], sizes = [16, 128], strides = [1, 1]} : vector<24x128xf32> to vector<16x128xf32>
    %c384 = arith.constant 384 : index
    %c0_8 = arith.constant 0 : index
    %19 = vector.load %arg3[%c384, %c0_8] : memref<1024x128xf32, #tpu.memory_space<vmem>>, vector<128x128xf32>
    %cst_9 = arith.constant dense<0.000000e+00> : vector<16x128xf32>
    %20 = tpu.matmul %18, %19, %cst_9 {dimension_numbers = #tpu.dot_dimension_numbers<[1], [0], [0], [1], [0, 0, 1, 1], [], []>} : vector<16x128xf32>, vector<128x128xf32>, vector<16x128xf32> -> vector<16x128xf32>
    %21 = arith.addf %17, %20 : vector<16x128xf32>
    %22 = vector.extract_strided_slice %4 {offsets = [4, 0], sizes = [16, 128], strides = [1, 1]} : vector<24x128xf32> to vector<16x128xf32>
    %c512 = arith.constant 512 : index
    %c0_10 = arith.constant 0 : index
    %23 = vector.load %arg3[%c512, %c0_10] : memref<1024x128xf32, #tpu.memory_space<vmem>>, vector<128x128xf32>
    %cst_11 = arith.constant dense<0.000000e+00> : vector<16x128xf32>
    %24 = tpu.matmul %22, %23, %cst_11 {dimension_numbers = #tpu.dot_dimension_numbers<[1], [0], [0], [1], [0, 0, 1, 1], [], []>} : vector<16x128xf32>, vector<128x128xf32>, vector<16x128xf32> -> vector<16x128xf32>
    %25 = arith.addf %21, %24 : vector<16x128xf32>
    %26 = vector.extract_strided_slice %4 {offsets = [5, 0], sizes = [16, 128], strides = [1, 1]} : vector<24x128xf32> to vector<16x128xf32>
    %c640 = arith.constant 640 : index
    %c0_12 = arith.constant 0 : index
    %27 = vector.load %arg3[%c640, %c0_12] : memref<1024x128xf32, #tpu.memory_space<vmem>>, vector<128x128xf32>
    %cst_13 = arith.constant dense<0.000000e+00> : vector<16x128xf32>
    %28 = tpu.matmul %26, %27, %cst_13 {dimension_numbers = #tpu.dot_dimension_numbers<[1], [0], [0], [1], [0, 0, 1, 1], [], []>} : vector<16x128xf32>, vector<128x128xf32>, vector<16x128xf32> -> vector<16x128xf32>
    %29 = arith.addf %25, %28 : vector<16x128xf32>
    %30 = vector.extract_strided_slice %4 {offsets = [6, 0], sizes = [16, 128], strides = [1, 1]} : vector<24x128xf32> to vector<16x128xf32>
    %c768 = arith.constant 768 : index
    %c0_14 = arith.constant 0 : index
    %31 = vector.load %arg3[%c768, %c0_14] : memref<1024x128xf32, #tpu.memory_space<vmem>>, vector<128x128xf32>
    %cst_15 = arith.constant dense<0.000000e+00> : vector<16x128xf32>
    %32 = tpu.matmul %30, %31, %cst_15 {dimension_numbers = #tpu.dot_dimension_numbers<[1], [0], [0], [1], [0, 0, 1, 1], [], []>} : vector<16x128xf32>, vector<128x128xf32>, vector<16x128xf32> -> vector<16x128xf32>
    %33 = arith.addf %29, %32 : vector<16x128xf32>
    %34 = vector.extract_strided_slice %4 {offsets = [7, 0], sizes = [16, 128], strides = [1, 1]} : vector<24x128xf32> to vector<16x128xf32>
    %c896 = arith.constant 896 : index
    %c0_16 = arith.constant 0 : index
    %35 = vector.load %arg3[%c896, %c0_16] : memref<1024x128xf32, #tpu.memory_space<vmem>>, vector<128x128xf32>
    %cst_17 = arith.constant dense<0.000000e+00> : vector<16x128xf32>
    %36 = tpu.matmul %34, %35, %cst_17 {dimension_numbers = #tpu.dot_dimension_numbers<[1], [0], [0], [1], [0, 0, 1, 1], [], []>} : vector<16x128xf32>, vector<128x128xf32>, vector<16x128xf32> -> vector<16x128xf32>
    %37 = arith.addf %33, %36 : vector<16x128xf32>
    %c0_18 = arith.constant 0 : index
    %c0_19 = arith.constant 0 : index
    %38 = vector.load %arg4[%c0_18, %c0_19] : memref<1x128xf32, #tpu.memory_space<vmem>>, vector<1x128xf32>
    %39 = vector.broadcast %38 : vector<1x128xf32> to vector<16x128xf32>
    %40 = arith.addf %37, %39 : vector<16x128xf32>
    %41 = tpu.iota {dimensions = array<i32: 0>} : vector<16x1xi32>
    %42 = vector.broadcast %1 : i32 to vector<16x1xi32>
    %43 = arith.addi %42, %41 : vector<16x1xi32>
    %c11_i32 = arith.constant 11 : i32
    %44 = vector.broadcast %c11_i32 : i32 to vector<16x1xi32>
    %45 = arith.cmpi slt, %43, %44 : vector<16x1xi32>
    %cst_20 = arith.constant 0.000000e+00 : f32
    %46 = vector.shape_cast %45 : vector<16x1xi1> to vector<16x1xi1>
    %47 = vector.broadcast %46 : vector<16x1xi1> to vector<16x128xi1>
    %48 = vector.broadcast %cst_20 : f32 to vector<16x128xf32>
    %49 = arith.select %47, %40, %48 : vector<16x128xi1>, vector<16x128xf32>
    %c0_21 = arith.constant 0 : index
    %c0_22 = arith.constant 0 : index
    %c0_23 = arith.constant 0 : index
    %50 = vector.load %arg7[%c0_21, %c0_22, %c0_23] : memref<1x16x384xf32, #tpu.memory_space<vmem>>, vector<1x16x384xf32>
    %51 = vector.shape_cast %50 : vector<1x16x384xf32> to vector<16x384xf32>
    %52 = vector.extract_strided_slice %51 {offsets = [0, 0], sizes = [16, 128], strides = [1, 1]} : vector<16x384xf32> to vector<16x128xf32>
    %53 = vector.extract_strided_slice %51 {offsets = [0, 128], sizes = [16, 128], strides = [1, 1]} : vector<16x384xf32> to vector<16x128xf32>
    %54 = arith.maximumf %52, %53 : vector<16x128xf32>
    %55 = vector.extract_strided_slice %51 {offsets = [0, 256], sizes = [16, 128], strides = [1, 1]} : vector<16x384xf32> to vector<16x128xf32>
    %56 = arith.maximumf %54, %55 : vector<16x128xf32>
    %57 = arith.addf %49, %56 : vector<16x128xf32>
    %c0_24 = arith.constant 0 : index
    %c0_25 = arith.constant 0 : index
    %c0_26 = arith.constant 0 : index
    %58 = vector.load %arg8[%c0_24, %c0_25, %c0_26] : memref<1x16x128xf32, #tpu.memory_space<vmem>>, vector<1x16x128xf32>
    %59 = vector.shape_cast %58 : vector<1x16x128xf32> to vector<16x128xf32>
    %60 = vector.shape_cast %57 : vector<16x128xf32> to vector<1x16x128xf32>
    tpu.vector_store %arg8[%c0_24, %c0_25, %c0_26], %60 {strides = array<i32>} : memref<1x16x128xf32, #tpu.memory_space<vmem>>, vector<1x16x128xf32>,
    return
  }
  func.func @transform_0(%arg0: i32, %arg1: i32) -> (i32, i32, i32) {
    %c0_i32 = arith.constant 0 : i32
    %c0_i32_0 = arith.constant 0 : i32
    %c0_i32_1 = arith.constant 0 : i32
    return %arg0, %c0_i32, %c0_i32_0 : i32, i32, i32
  }
  func.func @transform_1(%arg0: i32, %arg1: i32) -> (i32, i32) {
    %c0_i32 = arith.constant 0 : i32
    %c0_i32_0 = arith.constant 0 : i32
    %c0_i32_1 = arith.constant 0 : i32
    return %c0_i32, %c0_i32_0 : i32, i32
  }
  func.func @transform_2(%arg0: i32, %arg1: i32) -> (i32, i32) {
    %c0_i32 = arith.constant 0 : i32
    %c0_i32_0 = arith.constant 0 : i32
    %c0_i32_1 = arith.constant 0 : i32
    return %c0_i32, %c0_i32_0 : i32, i32
  }
  func.func @transform_3(%arg0: i32, %arg1: i32) -> (i32, i32) {
    %c0_i32 = arith.constant 0 : i32
    %c0_i32_0 = arith.constant 0 : i32
    %c0_i32_1 = arith.constant 0 : i32
    return %c0_i32, %c0_i32_0 : i32, i32
  }
  func.func @transform_4(%arg0: i32, %arg1: i32) -> (i32, i32) {
    %c0_i32 = arith.constant 0 : i32
    %c0_i32_0 = arith.constant 0 : i32
    %c0_i32_1 = arith.constant 0 : i32
    return %c0_i32, %c0_i32_0 : i32, i32
  }
  func.func @transform_5(%arg0: i32, %arg1: i32) -> (i32, i32, i32) {
    %c0_i32 = arith.constant 0 : i32
    %c0_i32_0 = arith.constant 0 : i32
    return %arg0, %arg1, %c0_i32 : i32, i32, i32
  }
  func.func @transform_6(%arg0: i32, %arg1: i32) -> (i32, i32, i32) {
    %c0_i32 = arith.constant 0 : i32
    %c0_i32_0 = arith.constant 0 : i32
    return %arg0, %arg1, %c0_i32 : i32, i32, i32
  }
}

module attributes {stable_mosaic.version = 11 : i64} {
  func.func @kernel(%arg0: i32, %arg1: memref<32x128xf32, #tpu.memory_space<vmem>>, %arg2: memref<1x128xf32, #tpu.memory_space<vmem>>, %arg3: memref<1x128xf32, #tpu.memory_space<vmem>>, %arg4: memref<32x128xf32, #tpu.memory_space<vmem>>) attributes {dimension_semantics = [#tpu.dimension_semantics<parallel>], iteration_bounds = array<i64: 1>, scalar_prefetch = 0 : i64, scratch_operands = 0 : i64, tpu.core_type = #tpu.core_type<tc>, window_params = [{transform_indices = @transform_0, window_bounds = array<i64: 32, 128>}, {pipeline_mode = #tpu.pipeline_mode<synchronous>, transform_indices = @transform_1, window_bounds = array<i64: 1, 128>}, {pipeline_mode = #tpu.pipeline_mode<synchronous>, transform_indices = @transform_2, window_bounds = array<i64: 1, 128>}, {transform_indices = @transform_3, window_bounds = array<i64: 32, 128>}]} {
    %c0 = arith.constant 0 : index
    %c0_0 = arith.constant 0 : index
    %0 = vector.load %arg1[%c0, %c0_0] : memref<32x128xf32, #tpu.memory_space<vmem>>, vector<32x128xf32>
    %1 = tpu.iota {dimensions = array<i32: 1>} : vector<1x128xi32>
    %c8_i32 = arith.constant 8 : i32
    %2 = vector.broadcast %c8_i32 : i32 to vector<1x128xi32>
    %3 = arith.cmpi slt, %1, %2 : vector<1x128xi32>
    %4 = arith.extui %3 : vector<1x128xi1> to vector<1x128xi32>
    %5 = arith.sitofp %4 : vector<1x128xi32> to vector<1x128xf32>
    %6 = vector.broadcast %5 : vector<1x128xf32> to vector<32x128xf32>
    %7 = arith.mulf %0, %6 : vector<32x128xf32>
    %cst = arith.constant dense<0.000000e+00> : vector<32xf32>
    %8 = vector.multi_reduction <add>, %7, %cst [1] : vector<32x128xf32> to vector<32xf32>
    %9 = vector.shape_cast %8 : vector<32xf32> to vector<32x1xf32>
    %cst_1 = arith.constant 1.250000e-01 : f32
    %10 = vector.broadcast %cst_1 : f32 to vector<32x1xf32>
    %11 = arith.mulf %9, %10 : vector<32x1xf32>
    %12 = vector.broadcast %11 : vector<32x1xf32> to vector<32x128xf32>
    %13 = arith.subf %0, %12 : vector<32x128xf32>
    %14 = vector.broadcast %5 : vector<1x128xf32> to vector<32x128xf32>
    %15 = arith.mulf %13, %14 : vector<32x128xf32>
    %16 = arith.mulf %15, %15 : vector<32x128xf32>
    %cst_2 = arith.constant dense<0.000000e+00> : vector<32xf32>
    %17 = vector.multi_reduction <add>, %16, %cst_2 [1] : vector<32x128xf32> to vector<32xf32>
    %18 = vector.shape_cast %17 : vector<32xf32> to vector<32x1xf32>
    %cst_3 = arith.constant 1.250000e-01 : f32
    %19 = vector.broadcast %cst_3 : f32 to vector<32x1xf32>
    %20 = arith.mulf %18, %19 : vector<32x1xf32>
    %cst_4 = arith.constant 9.99999974E-6 : f32
    %21 = vector.broadcast %cst_4 : f32 to vector<32x1xf32>
    %22 = arith.addf %20, %21 : vector<32x1xf32>
    %23 = math.rsqrt %22 : vector<32x1xf32>
    %24 = vector.broadcast %23 : vector<32x1xf32> to vector<32x128xf32>
    %25 = arith.mulf %15, %24 : vector<32x128xf32>
    %c0_5 = arith.constant 0 : index
    %c0_6 = arith.constant 0 : index
    %26 = vector.load %arg2[%c0_5, %c0_6] : memref<1x128xf32, #tpu.memory_space<vmem>>, vector<1x128xf32>
    %27 = vector.broadcast %26 : vector<1x128xf32> to vector<32x128xf32>
    %28 = arith.mulf %25, %27 : vector<32x128xf32>
    %c0_7 = arith.constant 0 : index
    %c0_8 = arith.constant 0 : index
    %29 = vector.load %arg3[%c0_7, %c0_8] : memref<1x128xf32, #tpu.memory_space<vmem>>, vector<1x128xf32>
    %30 = vector.broadcast %29 : vector<1x128xf32> to vector<32x128xf32>
    %31 = arith.addf %28, %30 : vector<32x128xf32>
    %cst_9 = arith.constant 0.000000e+00 : f32
    %32 = vector.broadcast %cst_9 : f32 to vector<32x128xf32>
    %33 = arith.maximumf %31, %32 : vector<32x128xf32>
    %c0_10 = arith.constant 0 : index
    %c0_11 = arith.constant 0 : index
    %34 = vector.load %arg4[%c0_10, %c0_11] : memref<32x128xf32, #tpu.memory_space<vmem>>, vector<32x128xf32>
    tpu.vector_store %arg4[%c0_10, %c0_11], %33 {strides = array<i32>} : memref<32x128xf32, #tpu.memory_space<vmem>>, vector<32x128xf32>,
    return
  }
  func.func @transform_0(%arg0: i32) -> (i32, i32) {
    %c0_i32 = arith.constant 0 : i32
    %c0_i32_0 = arith.constant 0 : i32
    return %arg0, %c0_i32 : i32, i32
  }
  func.func @transform_1(%arg0: i32) -> (i32, i32) {
    %c0_i32 = arith.constant 0 : i32
    %c0_i32_0 = arith.constant 0 : i32
    %c0_i32_1 = arith.constant 0 : i32
    return %c0_i32, %c0_i32_0 : i32, i32
  }
  func.func @transform_2(%arg0: i32) -> (i32, i32) {
    %c0_i32 = arith.constant 0 : i32
    %c0_i32_0 = arith.constant 0 : i32
    %c0_i32_1 = arith.constant 0 : i32
    return %c0_i32, %c0_i32_0 : i32, i32
  }
  func.func @transform_3(%arg0: i32) -> (i32, i32) {
    %c0_i32 = arith.constant 0 : i32
    %c0_i32_0 = arith.constant 0 : i32
    return %arg0, %c0_i32 : i32, i32
  }
}

module attributes {stable_mosaic.version = 11 : i64} {
  func.func @kernel(%arg0: i32, %arg1: i32, %arg2: memref<1x16x384xf32, #tpu.memory_space<vmem>>, %arg3: memref<1024x128xf32, #tpu.memory_space<vmem>>, %arg4: memref<1x128xf32, #tpu.memory_space<vmem>>, %arg5: memref<1x128xf32, #tpu.memory_space<vmem>>, %arg6: memref<1x128xf32, #tpu.memory_space<vmem>>, %arg7: memref<1x8x128xf32, #tpu.memory_space<vmem>>) attributes {dimension_semantics = [#tpu.dimension_semantics<parallel>, #tpu.dimension_semantics<parallel>], iteration_bounds = array<i64: 2, 1>, scalar_prefetch = 0 : i64, scratch_operands = 0 : i64, tpu.core_type = #tpu.core_type<tc>, window_params = [{transform_indices = @transform_0, window_bounds = array<i64: 1, 16, 384>}, {pipeline_mode = #tpu.pipeline_mode<synchronous>, transform_indices = @transform_1, window_bounds = array<i64: 1024, 128>}, {pipeline_mode = #tpu.pipeline_mode<synchronous>, transform_indices = @transform_2, window_bounds = array<i64: 1, 128>}, {pipeline_mode = #tpu.pipeline_mode<synchronous>, transform_indices = @transform_3, window_bounds = array<i64: 1, 128>}, {pipeline_mode = #tpu.pipeline_mode<synchronous>, transform_indices = @transform_4, window_bounds = array<i64: 1, 128>}, {transform_indices = @transform_5, window_bounds = array<i64: 1, 8, 128>}]} {
    %c8_i32 = arith.constant 8 : i32
    %0 = arith.muli %arg1, %c8_i32 : i32
    %1 = tpu.assume_multiple %0, 8 : i32
    %c0 = arith.constant 0 : index
    %2 = arith.index_cast %1 : i32 to index
    %c0_0 = arith.constant 0 : index
    %3 = vector.load %arg2[%c0, %2, %c0_0] : memref<1x16x384xf32, #tpu.memory_space<vmem>>, vector<1x16x384xf32>
    %4 = vector.shape_cast %3 : vector<1x16x384xf32> to vector<16x384xf32>
    %cst = arith.constant 0.000000e+00 : f32
    %5 = vector.broadcast %cst : f32 to vector<8x128xf32>
    %6 = vector.extract_strided_slice %4 {offsets = [0, 0], sizes = [8, 128], strides = [1, 1]} : vector<16x384xf32> to vector<8x128xf32>
    %c0_1 = arith.constant 0 : index
    %c0_2 = arith.constant 0 : index
    %7 = vector.load %arg3[%c0_1, %c0_2] : memref<1024x128xf32, #tpu.memory_space<vmem>>, vector<128x128xf32>
    %cst_3 = arith.constant dense<0.000000e+00> : vector<8x128xf32>
    %8 = tpu.matmul %6, %7, %cst_3 {dimension_numbers = #tpu.dot_dimension_numbers<[1], [0], [0], [1], [0, 0, 1, 1], [], []>} : vector<8x128xf32>, vector<128x128xf32>, vector<8x128xf32> -> vector<8x128xf32>
    %9 = arith.addf %5, %8 : vector<8x128xf32>
    %10 = vector.extract_strided_slice %4 {offsets = [0, 128], sizes = [8, 128], strides = [1, 1]} : vector<16x384xf32> to vector<8x128xf32>
    %c128 = arith.constant 128 : index
    %c0_4 = arith.constant 0 : index
    %11 = vector.load %arg3[%c128, %c0_4] : memref<1024x128xf32, #tpu.memory_space<vmem>>, vector<128x128xf32>
    %cst_5 = arith.constant dense<0.000000e+00> : vector<8x128xf32>
    %12 = tpu.matmul %10, %11, %cst_5 {dimension_numbers = #tpu.dot_dimension_numbers<[1], [0], [0], [1], [0, 0, 1, 1], [], []>} : vector<8x128xf32>, vector<128x128xf32>, vector<8x128xf32> -> vector<8x128xf32>
    %13 = arith.addf %9, %12 : vector<8x128xf32>
    %14 = vector.extract_strided_slice %4 {offsets = [0, 256], sizes = [8, 128], strides = [1, 1]} : vector<16x384xf32> to vector<8x128xf32>
    %c256 = arith.constant 256 : index
    %c0_6 = arith.constant 0 : index
    %15 = vector.load %arg3[%c256, %c0_6] : memref<1024x128xf32, #tpu.memory_space<vmem>>, vector<128x128xf32>
    %cst_7 = arith.constant dense<0.000000e+00> : vector<8x128xf32>
    %16 = tpu.matmul %14, %15, %cst_7 {dimension_numbers = #tpu.dot_dimension_numbers<[1], [0], [0], [1], [0, 0, 1, 1], [], []>} : vector<8x128xf32>, vector<128x128xf32>, vector<8x128xf32> -> vector<8x128xf32>
    %17 = arith.addf %13, %16 : vector<8x128xf32>
    %18 = vector.extract_strided_slice %4 {offsets = [1, 0], sizes = [8, 128], strides = [1, 1]} : vector<16x384xf32> to vector<8x128xf32>
    %c384 = arith.constant 384 : index
    %c0_8 = arith.constant 0 : index
    %19 = vector.load %arg3[%c384, %c0_8] : memref<1024x128xf32, #tpu.memory_space<vmem>>, vector<128x128xf32>
    %cst_9 = arith.constant dense<0.000000e+00> : vector<8x128xf32>
    %20 = tpu.matmul %18, %19, %cst_9 {dimension_numbers = #tpu.dot_dimension_numbers<[1], [0], [0], [1], [0, 0, 1, 1], [], []>} : vector<8x128xf32>, vector<128x128xf32>, vector<8x128xf32> -> vector<8x128xf32>
    %21 = arith.addf %17, %20 : vector<8x128xf32>
    %22 = vector.extract_strided_slice %4 {offsets = [1, 128], sizes = [8, 128], strides = [1, 1]} : vector<16x384xf32> to vector<8x128xf32>
    %c512 = arith.constant 512 : index
    %c0_10 = arith.constant 0 : index
    %23 = vector.load %arg3[%c512, %c0_10] : memref<1024x128xf32, #tpu.memory_space<vmem>>, vector<128x128xf32>
    %cst_11 = arith.constant dense<0.000000e+00> : vector<8x128xf32>
    %24 = tpu.matmul %22, %23, %cst_11 {dimension_numbers = #tpu.dot_dimension_numbers<[1], [0], [0], [1], [0, 0, 1, 1], [], []>} : vector<8x128xf32>, vector<128x128xf32>, vector<8x128xf32> -> vector<8x128xf32>
    %25 = arith.addf %21, %24 : vector<8x128xf32>
    %26 = vector.extract_strided_slice %4 {offsets = [1, 256], sizes = [8, 128], strides = [1, 1]} : vector<16x384xf32> to vector<8x128xf32>
    %c640 = arith.constant 640 : index
    %c0_12 = arith.constant 0 : index
    %27 = vector.load %arg3[%c640, %c0_12] : memref<1024x128xf32, #tpu.memory_space<vmem>>, vector<128x128xf32>
    %cst_13 = arith.constant dense<0.000000e+00> : vector<8x128xf32>
    %28 = tpu.matmul %26, %27, %cst_13 {dimension_numbers = #tpu.dot_dimension_numbers<[1], [0], [0], [1], [0, 0, 1, 1], [], []>} : vector<8x128xf32>, vector<128x128xf32>, vector<8x128xf32> -> vector<8x128xf32>
    %29 = arith.addf %25, %28 : vector<8x128xf32>
    %30 = vector.extract_strided_slice %4 {offsets = [2, 0], sizes = [8, 128], strides = [1, 1]} : vector<16x384xf32> to vector<8x128xf32>
    %c768 = arith.constant 768 : index
    %c0_14 = arith.constant 0 : index
    %31 = vector.load %arg3[%c768, %c0_14] : memref<1024x128xf32, #tpu.memory_space<vmem>>, vector<128x128xf32>
    %cst_15 = arith.constant dense<0.000000e+00> : vector<8x128xf32>
    %32 = tpu.matmul %30, %31, %cst_15 {dimension_numbers = #tpu.dot_dimension_numbers<[1], [0], [0], [1], [0, 0, 1, 1], [], []>} : vector<8x128xf32>, vector<128x128xf32>, vector<8x128xf32> -> vector<8x128xf32>
    %33 = arith.addf %29, %32 : vector<8x128xf32>
    %34 = vector.extract_strided_slice %4 {offsets = [2, 128], sizes = [8, 128], strides = [1, 1]} : vector<16x384xf32> to vector<8x128xf32>
    %c896 = arith.constant 896 : index
    %c0_16 = arith.constant 0 : index
    %35 = vector.load %arg3[%c896, %c0_16] : memref<1024x128xf32, #tpu.memory_space<vmem>>, vector<128x128xf32>
    %cst_17 = arith.constant dense<0.000000e+00> : vector<8x128xf32>
    %36 = tpu.matmul %34, %35, %cst_17 {dimension_numbers = #tpu.dot_dimension_numbers<[1], [0], [0], [1], [0, 0, 1, 1], [], []>} : vector<8x128xf32>, vector<128x128xf32>, vector<8x128xf32> -> vector<8x128xf32>
    %37 = arith.addf %33, %36 : vector<8x128xf32>
    %c0_18 = arith.constant 0 : index
    %c0_19 = arith.constant 0 : index
    %38 = vector.load %arg4[%c0_18, %c0_19] : memref<1x128xf32, #tpu.memory_space<vmem>>, vector<1x128xf32>
    %39 = vector.broadcast %38 : vector<1x128xf32> to vector<8x128xf32>
    %40 = arith.addf %37, %39 : vector<8x128xf32>
    %41 = tpu.iota {dimensions = array<i32: 1>} : vector<1x128xi32>
    %c16_i32 = arith.constant 16 : i32
    %42 = vector.broadcast %c16_i32 : i32 to vector<1x128xi32>
    %43 = arith.cmpi slt, %41, %42 : vector<1x128xi32>
    %44 = arith.extui %43 : vector<1x128xi1> to vector<1x128xi32>
    %45 = arith.sitofp %44 : vector<1x128xi32> to vector<1x128xf32>
    %46 = vector.broadcast %45 : vector<1x128xf32> to vector<8x128xf32>
    %47 = arith.mulf %40, %46 : vector<8x128xf32>
    %cst_20 = arith.constant dense<0.000000e+00> : vector<8xf32>
    %48 = vector.multi_reduction <add>, %47, %cst_20 [1] : vector<8x128xf32> to vector<8xf32>
    %49 = vector.shape_cast %48 : vector<8xf32> to vector<8x1xf32>
    %cst_21 = arith.constant 6.250000e-02 : f32
    %50 = vector.broadcast %cst_21 : f32 to vector<8x1xf32>
    %51 = arith.mulf %49, %50 : vector<8x1xf32>
    %52 = vector.broadcast %51 : vector<8x1xf32> to vector<8x128xf32>
    %53 = arith.subf %40, %52 : vector<8x128xf32>
    %54 = vector.broadcast %45 : vector<1x128xf32> to vector<8x128xf32>
    %55 = arith.mulf %53, %54 : vector<8x128xf32>
    %56 = arith.mulf %55, %55 : vector<8x128xf32>
    %cst_22 = arith.constant dense<0.000000e+00> : vector<8xf32>
    %57 = vector.multi_reduction <add>, %56, %cst_22 [1] : vector<8x128xf32> to vector<8xf32>
    %58 = vector.shape_cast %57 : vector<8xf32> to vector<8x1xf32>
    %cst_23 = arith.constant 6.250000e-02 : f32
    %59 = vector.broadcast %cst_23 : f32 to vector<8x1xf32>
    %60 = arith.mulf %58, %59 : vector<8x1xf32>
    %cst_24 = arith.constant 9.99999974E-6 : f32
    %61 = vector.broadcast %cst_24 : f32 to vector<8x1xf32>
    %62 = arith.addf %60, %61 : vector<8x1xf32>
    %63 = math.rsqrt %62 : vector<8x1xf32>
    %64 = vector.broadcast %63 : vector<8x1xf32> to vector<8x128xf32>
    %65 = arith.mulf %55, %64 : vector<8x128xf32>
    %c0_25 = arith.constant 0 : index
    %c0_26 = arith.constant 0 : index
    %66 = vector.load %arg5[%c0_25, %c0_26] : memref<1x128xf32, #tpu.memory_space<vmem>>, vector<1x128xf32>
    %67 = vector.broadcast %66 : vector<1x128xf32> to vector<8x128xf32>
    %68 = arith.mulf %65, %67 : vector<8x128xf32>
    %c0_27 = arith.constant 0 : index
    %c0_28 = arith.constant 0 : index
    %69 = vector.load %arg6[%c0_27, %c0_28] : memref<1x128xf32, #tpu.memory_space<vmem>>, vector<1x128xf32>
    %70 = vector.broadcast %69 : vector<1x128xf32> to vector<8x128xf32>
    %71 = arith.addf %68, %70 : vector<8x128xf32>
    %cst_29 = arith.constant 0.000000e+00 : f32
    %72 = vector.broadcast %cst_29 : f32 to vector<8x128xf32>
    %73 = arith.maximumf %71, %72 : vector<8x128xf32>
    %74 = tpu.iota {dimensions = array<i32: 0>} : vector<8x1xi32>
    %75 = vector.broadcast %1 : i32 to vector<8x1xi32>
    %76 = arith.addi %75, %74 : vector<8x1xi32>
    %c4_i32 = arith.constant 4 : i32
    %77 = vector.broadcast %c4_i32 : i32 to vector<8x1xi32>
    %78 = arith.cmpi slt, %76, %77 : vector<8x1xi32>
    %cst_30 = arith.constant 0.000000e+00 : f32
    %79 = vector.shape_cast %78 : vector<8x1xi1> to vector<8x1xi1>
    %80 = vector.broadcast %79 : vector<8x1xi1> to vector<8x128xi1>
    %81 = vector.broadcast %cst_30 : f32 to vector<8x128xf32>
    %82 = arith.select %80, %73, %81 : vector<8x128xi1>, vector<8x128xf32>
    %c0_31 = arith.constant 0 : index
    %c0_32 = arith.constant 0 : index
    %c0_33 = arith.constant 0 : index
    %83 = vector.load %arg7[%c0_31, %c0_32, %c0_33] : memref<1x8x128xf32, #tpu.memory_space<vmem>>, vector<1x8x128xf32>
    %84 = vector.shape_cast %83 : vector<1x8x128xf32> to vector<8x128xf32>
    %85 = vector.shape_cast %82 : vector<8x128xf32> to vector<1x8x128xf32>
    tpu.vector_store %arg7[%c0_31, %c0_32, %c0_33], %85 {strides = array<i32>} : memref<1x8x128xf32, #tpu.memory_space<vmem>>, vector<1x8x128xf32>,
    return
  }
  func.func @transform_0(%arg0: i32, %arg1: i32) -> (i32, i32, i32) {
    %c0_i32 = arith.constant 0 : i32
    %c0_i32_0 = arith.constant 0 : i32
    %c0_i32_1 = arith.constant 0 : i32
    return %arg0, %c0_i32, %c0_i32_0 : i32, i32, i32
  }
  func.func @transform_1(%arg0: i32, %arg1: i32) -> (i32, i32) {
    %c0_i32 = arith.constant 0 : i32
    %c0_i32_0 = arith.constant 0 : i32
    %c0_i32_1 = arith.constant 0 : i32
    return %c0_i32, %c0_i32_0 : i32, i32
  }
  func.func @transform_2(%arg0: i32, %arg1: i32) -> (i32, i32) {
    %c0_i32 = arith.constant 0 : i32
    %c0_i32_0 = arith.constant 0 : i32
    %c0_i32_1 = arith.constant 0 : i32
    return %c0_i32, %c0_i32_0 : i32, i32
  }
  func.func @transform_3(%arg0: i32, %arg1: i32) -> (i32, i32) {
    %c0_i32 = arith.constant 0 : i32
    %c0_i32_0 = arith.constant 0 : i32
    %c0_i32_1 = arith.constant 0 : i32
    return %c0_i32, %c0_i32_0 : i32, i32
  }
  func.func @transform_4(%arg0: i32, %arg1: i32) -> (i32, i32) {
    %c0_i32 = arith.constant 0 : i32
    %c0_i32_0 = arith.constant 0 : i32
    %c0_i32_1 = arith.constant 0 : i32
    return %c0_i32, %c0_i32_0 : i32, i32
  }
  func.func @transform_5(%arg0: i32, %arg1: i32) -> (i32, i32, i32) {
    %c0_i32 = arith.constant 0 : i32
    %c0_i32_0 = arith.constant 0 : i32
    return %arg0, %arg1, %c0_i32 : i32, i32, i32
  }
}

module attributes {stable_mosaic.version = 11 : i64} {
  func.func @kernel(%arg0: i32, %arg1: i32, %arg2: memref<1x16x128xf32, #tpu.memory_space<vmem>>, %arg3: memref<1024x128xf32, #tpu.memory_space<vmem>>, %arg4: memref<1x128xf32, #tpu.memory_space<vmem>>, %arg5: memref<1x128xf32, #tpu.memory_space<vmem>>, %arg6: memref<1x128xf32, #tpu.memory_space<vmem>>, %arg7: memref<1x8x384xf32, #tpu.memory_space<vmem>>, %arg8: memref<1x8x128xf32, #tpu.memory_space<vmem>>) attributes {dimension_semantics = [#tpu.dimension_semantics<parallel>, #tpu.dimension_semantics<parallel>], iteration_bounds = array<i64: 2, 1>, scalar_prefetch = 0 : i64, scratch_operands = 0 : i64, tpu.core_type = #tpu.core_type<tc>, window_params = [{transform_indices = @transform_0, window_bounds = array<i64: 1, 16, 128>}, {pipeline_mode = #tpu.pipeline_mode<synchronous>, transform_indices = @transform_1, window_bounds = array<i64: 1024, 128>}, {pipeline_mode = #tpu.pipeline_mode<synchronous>, transform_indices = @transform_2, window_bounds = array<i64: 1, 128>}, {pipeline_mode = #tpu.pipeline_mode<synchronous>, transform_indices = @transform_3, window_bounds = array<i64: 1, 128>}, {pipeline_mode = #tpu.pipeline_mode<synchronous>, transform_indices = @transform_4, window_bounds = array<i64: 1, 128>}, {transform_indices = @transform_5, window_bounds = array<i64: 1, 8, 384>}, {transform_indices = @transform_6, window_bounds = array<i64: 1, 8, 128>}]} {
    %c8_i32 = arith.constant 8 : i32
    %0 = arith.muli %arg1, %c8_i32 : i32
    %1 = tpu.assume_multiple %0, 8 : i32
    %c0 = arith.constant 0 : index
    %2 = arith.index_cast %1 : i32 to index
    %c0_0 = arith.constant 0 : index
    %3 = vector.load %arg2[%c0, %2, %c0_0] : memref<1x16x128xf32, #tpu.memory_space<vmem>>, vector<1x16x128xf32>
    %4 = vector.shape_cast %3 : vector<1x16x128xf32> to vector<16x128xf32>
    %cst = arith.constant 0.000000e+00 : f32
    %5 = vector.broadcast %cst : f32 to vector<8x128xf32>
    %6 = vector.extract_strided_slice %4 {offsets = [0, 0], sizes = [8, 128], strides = [1, 1]} : vector<16x128xf32> to vector<8x128xf32>
    %c0_1 = arith.constant 0 : index
    %c0_2 = arith.constant 0 : index
    %7 = vector.load %arg3[%c0_1, %c0_2] : memref<1024x128xf32, #tpu.memory_space<vmem>>, vector<128x128xf32>
    %cst_3 = arith.constant dense<0.000000e+00> : vector<8x128xf32>
    %8 = tpu.matmul %6, %7, %cst_3 {dimension_numbers = #tpu.dot_dimension_numbers<[1], [0], [0], [1], [0, 0, 1, 1], [], []>} : vector<8x128xf32>, vector<128x128xf32>, vector<8x128xf32> -> vector<8x128xf32>
    %9 = arith.addf %5, %8 : vector<8x128xf32>
    %10 = vector.extract_strided_slice %4 {offsets = [1, 0], sizes = [8, 128], strides = [1, 1]} : vector<16x128xf32> to vector<8x128xf32>
    %c128 = arith.constant 128 : index
    %c0_4 = arith.constant 0 : index
    %11 = vector.load %arg3[%c128, %c0_4] : memref<1024x128xf32, #tpu.memory_space<vmem>>, vector<128x128xf32>
    %cst_5 = arith.constant dense<0.000000e+00> : vector<8x128xf32>
    %12 = tpu.matmul %10, %11, %cst_5 {dimension_numbers = #tpu.dot_dimension_numbers<[1], [0], [0], [1], [0, 0, 1, 1], [], []>} : vector<8x128xf32>, vector<128x128xf32>, vector<8x128xf32> -> vector<8x128xf32>
    %13 = arith.addf %9, %12 : vector<8x128xf32>
    %14 = vector.extract_strided_slice %4 {offsets = [2, 0], sizes = [8, 128], strides = [1, 1]} : vector<16x128xf32> to vector<8x128xf32>
    %c256 = arith.constant 256 : index
    %c0_6 = arith.constant 0 : index
    %15 = vector.load %arg3[%c256, %c0_6] : memref<1024x128xf32, #tpu.memory_space<vmem>>, vector<128x128xf32>
    %cst_7 = arith.constant dense<0.000000e+00> : vector<8x128xf32>
    %16 = tpu.matmul %14, %15, %cst_7 {dimension_numbers = #tpu.dot_dimension_numbers<[1], [0], [0], [1], [0, 0, 1, 1], [], []>} : vector<8x128xf32>, vector<128x128xf32>, vector<8x128xf32> -> vector<8x128xf32>
    %17 = arith.addf %13, %16 : vector<8x128xf32>
    %18 = vector.extract_strided_slice %4 {offsets = [3, 0], sizes = [8, 128], strides = [1, 1]} : vector<16x128xf32> to vector<8x128xf32>
    %c384 = arith.constant 384 : index
    %c0_8 = arith.constant 0 : index
    %19 = vector.load %arg3[%c384, %c0_8] : memref<1024x128xf32, #tpu.memory_space<vmem>>, vector<128x128xf32>
    %cst_9 = arith.constant dense<0.000000e+00> : vector<8x128xf32>
    %20 = tpu.matmul %18, %19, %cst_9 {dimension_numbers = #tpu.dot_dimension_numbers<[1], [0], [0], [1], [0, 0, 1, 1], [], []>} : vector<8x128xf32>, vector<128x128xf32>, vector<8x128xf32> -> vector<8x128xf32>
    %21 = arith.addf %17, %20 : vector<8x128xf32>
    %22 = vector.extract_strided_slice %4 {offsets = [4, 0], sizes = [8, 128], strides = [1, 1]} : vector<16x128xf32> to vector<8x128xf32>
    %c512 = arith.constant 512 : index
    %c0_10 = arith.constant 0 : index
    %23 = vector.load %arg3[%c512, %c0_10] : memref<1024x128xf32, #tpu.memory_space<vmem>>, vector<128x128xf32>
    %cst_11 = arith.constant dense<0.000000e+00> : vector<8x128xf32>
    %24 = tpu.matmul %22, %23, %cst_11 {dimension_numbers = #tpu.dot_dimension_numbers<[1], [0], [0], [1], [0, 0, 1, 1], [], []>} : vector<8x128xf32>, vector<128x128xf32>, vector<8x128xf32> -> vector<8x128xf32>
    %25 = arith.addf %21, %24 : vector<8x128xf32>
    %26 = vector.extract_strided_slice %4 {offsets = [5, 0], sizes = [8, 128], strides = [1, 1]} : vector<16x128xf32> to vector<8x128xf32>
    %c640 = arith.constant 640 : index
    %c0_12 = arith.constant 0 : index
    %27 = vector.load %arg3[%c640, %c0_12] : memref<1024x128xf32, #tpu.memory_space<vmem>>, vector<128x128xf32>
    %cst_13 = arith.constant dense<0.000000e+00> : vector<8x128xf32>
    %28 = tpu.matmul %26, %27, %cst_13 {dimension_numbers = #tpu.dot_dimension_numbers<[1], [0], [0], [1], [0, 0, 1, 1], [], []>} : vector<8x128xf32>, vector<128x128xf32>, vector<8x128xf32> -> vector<8x128xf32>
    %29 = arith.addf %25, %28 : vector<8x128xf32>
    %30 = vector.extract_strided_slice %4 {offsets = [6, 0], sizes = [8, 128], strides = [1, 1]} : vector<16x128xf32> to vector<8x128xf32>
    %c768 = arith.constant 768 : index
    %c0_14 = arith.constant 0 : index
    %31 = vector.load %arg3[%c768, %c0_14] : memref<1024x128xf32, #tpu.memory_space<vmem>>, vector<128x128xf32>
    %cst_15 = arith.constant dense<0.000000e+00> : vector<8x128xf32>
    %32 = tpu.matmul %30, %31, %cst_15 {dimension_numbers = #tpu.dot_dimension_numbers<[1], [0], [0], [1], [0, 0, 1, 1], [], []>} : vector<8x128xf32>, vector<128x128xf32>, vector<8x128xf32> -> vector<8x128xf32>
    %33 = arith.addf %29, %32 : vector<8x128xf32>
    %34 = vector.extract_strided_slice %4 {offsets = [7, 0], sizes = [8, 128], strides = [1, 1]} : vector<16x128xf32> to vector<8x128xf32>
    %c896 = arith.constant 896 : index
    %c0_16 = arith.constant 0 : index
    %35 = vector.load %arg3[%c896, %c0_16] : memref<1024x128xf32, #tpu.memory_space<vmem>>, vector<128x128xf32>
    %cst_17 = arith.constant dense<0.000000e+00> : vector<8x128xf32>
    %36 = tpu.matmul %34, %35, %cst_17 {dimension_numbers = #tpu.dot_dimension_numbers<[1], [0], [0], [1], [0, 0, 1, 1], [], []>} : vector<8x128xf32>, vector<128x128xf32>, vector<8x128xf32> -> vector<8x128xf32>
    %37 = arith.addf %33, %36 : vector<8x128xf32>
    %c0_18 = arith.constant 0 : index
    %c0_19 = arith.constant 0 : index
    %38 = vector.load %arg4[%c0_18, %c0_19] : memref<1x128xf32, #tpu.memory_space<vmem>>, vector<1x128xf32>
    %39 = vector.broadcast %38 : vector<1x128xf32> to vector<8x128xf32>
    %40 = arith.addf %37, %39 : vector<8x128xf32>
    %41 = tpu.iota {dimensions = array<i32: 0>} : vector<8x1xi32>
    %42 = vector.broadcast %1 : i32 to vector<8x1xi32>
    %43 = arith.addi %42, %41 : vector<8x1xi32>
    %c4_i32 = arith.constant 4 : i32
    %44 = vector.broadcast %c4_i32 : i32 to vector<8x1xi32>
    %45 = arith.cmpi slt, %43, %44 : vector<8x1xi32>
    %cst_20 = arith.constant 0.000000e+00 : f32
    %46 = vector.shape_cast %45 : vector<8x1xi1> to vector<8x1xi1>
    %47 = vector.broadcast %46 : vector<8x1xi1> to vector<8x128xi1>
    %48 = vector.broadcast %cst_20 : f32 to vector<8x128xf32>
    %49 = arith.select %47, %40, %48 : vector<8x128xi1>, vector<8x128xf32>
    %c0_21 = arith.constant 0 : index
    %c0_22 = arith.constant 0 : index
    %c0_23 = arith.constant 0 : index
    %50 = vector.load %arg7[%c0_21, %c0_22, %c0_23] : memref<1x8x384xf32, #tpu.memory_space<vmem>>, vector<1x8x384xf32>
    %51 = vector.shape_cast %50 : vector<1x8x384xf32> to vector<8x384xf32>
    %52 = vector.extract_strided_slice %51 {offsets = [0, 0], sizes = [8, 128], strides = [1, 1]} : vector<8x384xf32> to vector<8x128xf32>
    %53 = vector.extract_strided_slice %51 {offsets = [0, 128], sizes = [8, 128], strides = [1, 1]} : vector<8x384xf32> to vector<8x128xf32>
    %54 = arith.maximumf %52, %53 : vector<8x128xf32>
    %55 = vector.extract_strided_slice %51 {offsets = [0, 256], sizes = [8, 128], strides = [1, 1]} : vector<8x384xf32> to vector<8x128xf32>
    %56 = arith.maximumf %54, %55 : vector<8x128xf32>
    %57 = arith.addf %49, %56 : vector<8x128xf32>
    %c0_24 = arith.constant 0 : index
    %c0_25 = arith.constant 0 : index
    %c0_26 = arith.constant 0 : index
    %58 = vector.load %arg8[%c0_24, %c0_25, %c0_26] : memref<1x8x128xf32, #tpu.memory_space<vmem>>, vector<1x8x128xf32>
    %59 = vector.shape_cast %58 : vector<1x8x128xf32> to vector<8x128xf32>
    %60 = vector.shape_cast %57 : vector<8x128xf32> to vector<1x8x128xf32>
    tpu.vector_store %arg8[%c0_24, %c0_25, %c0_26], %60 {strides = array<i32>} : memref<1x8x128xf32, #tpu.memory_space<vmem>>, vector<1x8x128xf32>,
    return
  }
  func.func @transform_0(%arg0: i32, %arg1: i32) -> (i32, i32, i32) {
    %c0_i32 = arith.constant 0 : i32
    %c0_i32_0 = arith.constant 0 : i32
    %c0_i32_1 = arith.constant 0 : i32
    return %arg0, %c0_i32, %c0_i32_0 : i32, i32, i32
  }
  func.func @transform_1(%arg0: i32, %arg1: i32) -> (i32, i32) {
    %c0_i32 = arith.constant 0 : i32
    %c0_i32_0 = arith.constant 0 : i32
    %c0_i32_1 = arith.constant 0 : i32
    return %c0_i32, %c0_i32_0 : i32, i32
  }
  func.func @transform_2(%arg0: i32, %arg1: i32) -> (i32, i32) {
    %c0_i32 = arith.constant 0 : i32
    %c0_i32_0 = arith.constant 0 : i32
    %c0_i32_1 = arith.constant 0 : i32
    return %c0_i32, %c0_i32_0 : i32, i32
  }
  func.func @transform_3(%arg0: i32, %arg1: i32) -> (i32, i32) {
    %c0_i32 = arith.constant 0 : i32
    %c0_i32_0 = arith.constant 0 : i32
    %c0_i32_1 = arith.constant 0 : i32
    return %c0_i32, %c0_i32_0 : i32, i32
  }
  func.func @transform_4(%arg0: i32, %arg1: i32) -> (i32, i32) {
    %c0_i32 = arith.constant 0 : i32
    %c0_i32_0 = arith.constant 0 : i32
    %c0_i32_1 = arith.constant 0 : i32
    return %c0_i32, %c0_i32_0 : i32, i32
  }
  func.func @transform_5(%arg0: i32, %arg1: i32) -> (i32, i32, i32) {
    %c0_i32 = arith.constant 0 : i32
    %c0_i32_0 = arith.constant 0 : i32
    return %arg0, %arg1, %c0_i32 : i32, i32, i32
  }
  func.func @transform_6(%arg0: i32, %arg1: i32) -> (i32, i32, i32) {
    %c0_i32 = arith.constant 0 : i32
    %c0_i32_0 = arith.constant 0 : i32
    return %arg0, %arg1, %c0_i32 : i32, i32, i32
  }
}

module attributes {stable_mosaic.version = 11 : i64} {
  func.func @kernel(%arg0: i32, %arg1: memref<16x128xf32, #tpu.memory_space<vmem>>, %arg2: memref<1x128xf32, #tpu.memory_space<vmem>>, %arg3: memref<1x128xf32, #tpu.memory_space<vmem>>, %arg4: memref<16x128xf32, #tpu.memory_space<vmem>>) attributes {dimension_semantics = [#tpu.dimension_semantics<parallel>], iteration_bounds = array<i64: 1>, scalar_prefetch = 0 : i64, scratch_operands = 0 : i64, tpu.core_type = #tpu.core_type<tc>, window_params = [{transform_indices = @transform_0, window_bounds = array<i64: 16, 128>}, {pipeline_mode = #tpu.pipeline_mode<synchronous>, transform_indices = @transform_1, window_bounds = array<i64: 1, 128>}, {pipeline_mode = #tpu.pipeline_mode<synchronous>, transform_indices = @transform_2, window_bounds = array<i64: 1, 128>}, {transform_indices = @transform_3, window_bounds = array<i64: 16, 128>}]} {
    %c0 = arith.constant 0 : index
    %c0_0 = arith.constant 0 : index
    %0 = vector.load %arg1[%c0, %c0_0] : memref<16x128xf32, #tpu.memory_space<vmem>>, vector<16x128xf32>
    %1 = tpu.iota {dimensions = array<i32: 1>} : vector<1x128xi32>
    %c16_i32 = arith.constant 16 : i32
    %2 = vector.broadcast %c16_i32 : i32 to vector<1x128xi32>
    %3 = arith.cmpi slt, %1, %2 : vector<1x128xi32>
    %4 = arith.extui %3 : vector<1x128xi1> to vector<1x128xi32>
    %5 = arith.sitofp %4 : vector<1x128xi32> to vector<1x128xf32>
    %6 = vector.broadcast %5 : vector<1x128xf32> to vector<16x128xf32>
    %7 = arith.mulf %0, %6 : vector<16x128xf32>
    %cst = arith.constant dense<0.000000e+00> : vector<16xf32>
    %8 = vector.multi_reduction <add>, %7, %cst [1] : vector<16x128xf32> to vector<16xf32>
    %9 = vector.shape_cast %8 : vector<16xf32> to vector<16x1xf32>
    %cst_1 = arith.constant 6.250000e-02 : f32
    %10 = vector.broadcast %cst_1 : f32 to vector<16x1xf32>
    %11 = arith.mulf %9, %10 : vector<16x1xf32>
    %12 = vector.broadcast %11 : vector<16x1xf32> to vector<16x128xf32>
    %13 = arith.subf %0, %12 : vector<16x128xf32>
    %14 = vector.broadcast %5 : vector<1x128xf32> to vector<16x128xf32>
    %15 = arith.mulf %13, %14 : vector<16x128xf32>
    %16 = arith.mulf %15, %15 : vector<16x128xf32>
    %cst_2 = arith.constant dense<0.000000e+00> : vector<16xf32>
    %17 = vector.multi_reduction <add>, %16, %cst_2 [1] : vector<16x128xf32> to vector<16xf32>
    %18 = vector.shape_cast %17 : vector<16xf32> to vector<16x1xf32>
    %cst_3 = arith.constant 6.250000e-02 : f32
    %19 = vector.broadcast %cst_3 : f32 to vector<16x1xf32>
    %20 = arith.mulf %18, %19 : vector<16x1xf32>
    %cst_4 = arith.constant 9.99999974E-6 : f32
    %21 = vector.broadcast %cst_4 : f32 to vector<16x1xf32>
    %22 = arith.addf %20, %21 : vector<16x1xf32>
    %23 = math.rsqrt %22 : vector<16x1xf32>
    %24 = vector.broadcast %23 : vector<16x1xf32> to vector<16x128xf32>
    %25 = arith.mulf %15, %24 : vector<16x128xf32>
    %c0_5 = arith.constant 0 : index
    %c0_6 = arith.constant 0 : index
    %26 = vector.load %arg2[%c0_5, %c0_6] : memref<1x128xf32, #tpu.memory_space<vmem>>, vector<1x128xf32>
    %27 = vector.broadcast %26 : vector<1x128xf32> to vector<16x128xf32>
    %28 = arith.mulf %25, %27 : vector<16x128xf32>
    %c0_7 = arith.constant 0 : index
    %c0_8 = arith.constant 0 : index
    %29 = vector.load %arg3[%c0_7, %c0_8] : memref<1x128xf32, #tpu.memory_space<vmem>>, vector<1x128xf32>
    %30 = vector.broadcast %29 : vector<1x128xf32> to vector<16x128xf32>
    %31 = arith.addf %28, %30 : vector<16x128xf32>
    %cst_9 = arith.constant 0.000000e+00 : f32
    %32 = vector.broadcast %cst_9 : f32 to vector<16x128xf32>
    %33 = arith.maximumf %31, %32 : vector<16x128xf32>
    %c0_10 = arith.constant 0 : index
    %c0_11 = arith.constant 0 : index
    %34 = vector.load %arg4[%c0_10, %c0_11] : memref<16x128xf32, #tpu.memory_space<vmem>>, vector<16x128xf32>
    tpu.vector_store %arg4[%c0_10, %c0_11], %33 {strides = array<i32>} : memref<16x128xf32, #tpu.memory_space<vmem>>, vector<16x128xf32>,
    return
  }
  func.func @transform_0(%arg0: i32) -> (i32, i32) {
    %c0_i32 = arith.constant 0 : i32
    %c0_i32_0 = arith.constant 0 : i32
    return %arg0, %c0_i32 : i32, i32
  }
  func.func @transform_1(%arg0: i32) -> (i32, i32) {
    %c0_i32 = arith.constant 0 : i32
    %c0_i32_0 = arith.constant 0 : i32
    %c0_i32_1 = arith.constant 0 : i32
    return %c0_i32, %c0_i32_0 : i32, i32
  }
  func.func @transform_2(%arg0: i32) -> (i32, i32) {
    %c0_i32 = arith.constant 0 : i32
    %c0_i32_0 = arith.constant 0 : i32
    %c0_i32_1 = arith.constant 0 : i32
    return %c0_i32, %c0_i32_0 : i32, i32
  }
  func.func @transform_3(%arg0: i32) -> (i32, i32) {
    %c0_i32 = arith.constant 0 : i32
    %c0_i32_0 = arith.constant 0 : i32
    return %arg0, %c0_i32 : i32, i32
  }
}

module attributes {stable_mosaic.version = 11 : i64} {
  func.func @kernel(%arg0: i32, %arg1: i32, %arg2: memref<1x16x384xf32, #tpu.memory_space<vmem>>, %arg3: memref<1024x128xf32, #tpu.memory_space<vmem>>, %arg4: memref<1x128xf32, #tpu.memory_space<vmem>>, %arg5: memref<1x128xf32, #tpu.memory_space<vmem>>, %arg6: memref<1x128xf32, #tpu.memory_space<vmem>>, %arg7: memref<1x8x128xf32, #tpu.memory_space<vmem>>) attributes {dimension_semantics = [#tpu.dimension_semantics<parallel>, #tpu.dimension_semantics<parallel>], iteration_bounds = array<i64: 2, 1>, scalar_prefetch = 0 : i64, scratch_operands = 0 : i64, tpu.core_type = #tpu.core_type<tc>, window_params = [{transform_indices = @transform_0, window_bounds = array<i64: 1, 16, 384>}, {pipeline_mode = #tpu.pipeline_mode<synchronous>, transform_indices = @transform_1, window_bounds = array<i64: 1024, 128>}, {pipeline_mode = #tpu.pipeline_mode<synchronous>, transform_indices = @transform_2, window_bounds = array<i64: 1, 128>}, {pipeline_mode = #tpu.pipeline_mode<synchronous>, transform_indices = @transform_3, window_bounds = array<i64: 1, 128>}, {pipeline_mode = #tpu.pipeline_mode<synchronous>, transform_indices = @transform_4, window_bounds = array<i64: 1, 128>}, {transform_indices = @transform_5, window_bounds = array<i64: 1, 8, 128>}]} {
    %c8_i32 = arith.constant 8 : i32
    %0 = arith.muli %arg1, %c8_i32 : i32
    %1 = tpu.assume_multiple %0, 8 : i32
    %c0 = arith.constant 0 : index
    %2 = arith.index_cast %1 : i32 to index
    %c0_0 = arith.constant 0 : index
    %3 = vector.load %arg2[%c0, %2, %c0_0] : memref<1x16x384xf32, #tpu.memory_space<vmem>>, vector<1x16x384xf32>
    %4 = vector.shape_cast %3 : vector<1x16x384xf32> to vector<16x384xf32>
    %cst = arith.constant 0.000000e+00 : f32
    %5 = vector.broadcast %cst : f32 to vector<8x128xf32>
    %6 = vector.extract_strided_slice %4 {offsets = [0, 0], sizes = [8, 128], strides = [1, 1]} : vector<16x384xf32> to vector<8x128xf32>
    %c0_1 = arith.constant 0 : index
    %c0_2 = arith.constant 0 : index
    %7 = vector.load %arg3[%c0_1, %c0_2] : memref<1024x128xf32, #tpu.memory_space<vmem>>, vector<128x128xf32>
    %cst_3 = arith.constant dense<0.000000e+00> : vector<8x128xf32>
    %8 = tpu.matmul %6, %7, %cst_3 {dimension_numbers = #tpu.dot_dimension_numbers<[1], [0], [0], [1], [0, 0, 1, 1], [], []>} : vector<8x128xf32>, vector<128x128xf32>, vector<8x128xf32> -> vector<8x128xf32>
    %9 = arith.addf %5, %8 : vector<8x128xf32>
    %10 = vector.extract_strided_slice %4 {offsets = [0, 128], sizes = [8, 128], strides = [1, 1]} : vector<16x384xf32> to vector<8x128xf32>
    %c128 = arith.constant 128 : index
    %c0_4 = arith.constant 0 : index
    %11 = vector.load %arg3[%c128, %c0_4] : memref<1024x128xf32, #tpu.memory_space<vmem>>, vector<128x128xf32>
    %cst_5 = arith.constant dense<0.000000e+00> : vector<8x128xf32>
    %12 = tpu.matmul %10, %11, %cst_5 {dimension_numbers = #tpu.dot_dimension_numbers<[1], [0], [0], [1], [0, 0, 1, 1], [], []>} : vector<8x128xf32>, vector<128x128xf32>, vector<8x128xf32> -> vector<8x128xf32>
    %13 = arith.addf %9, %12 : vector<8x128xf32>
    %14 = vector.extract_strided_slice %4 {offsets = [0, 256], sizes = [8, 128], strides = [1, 1]} : vector<16x384xf32> to vector<8x128xf32>
    %c256 = arith.constant 256 : index
    %c0_6 = arith.constant 0 : index
    %15 = vector.load %arg3[%c256, %c0_6] : memref<1024x128xf32, #tpu.memory_space<vmem>>, vector<128x128xf32>
    %cst_7 = arith.constant dense<0.000000e+00> : vector<8x128xf32>
    %16 = tpu.matmul %14, %15, %cst_7 {dimension_numbers = #tpu.dot_dimension_numbers<[1], [0], [0], [1], [0, 0, 1, 1], [], []>} : vector<8x128xf32>, vector<128x128xf32>, vector<8x128xf32> -> vector<8x128xf32>
    %17 = arith.addf %13, %16 : vector<8x128xf32>
    %18 = vector.extract_strided_slice %4 {offsets = [1, 0], sizes = [8, 128], strides = [1, 1]} : vector<16x384xf32> to vector<8x128xf32>
    %c384 = arith.constant 384 : index
    %c0_8 = arith.constant 0 : index
    %19 = vector.load %arg3[%c384, %c0_8] : memref<1024x128xf32, #tpu.memory_space<vmem>>, vector<128x128xf32>
    %cst_9 = arith.constant dense<0.000000e+00> : vector<8x128xf32>
    %20 = tpu.matmul %18, %19, %cst_9 {dimension_numbers = #tpu.dot_dimension_numbers<[1], [0], [0], [1], [0, 0, 1, 1], [], []>} : vector<8x128xf32>, vector<128x128xf32>, vector<8x128xf32> -> vector<8x128xf32>
    %21 = arith.addf %17, %20 : vector<8x128xf32>
    %22 = vector.extract_strided_slice %4 {offsets = [1, 128], sizes = [8, 128], strides = [1, 1]} : vector<16x384xf32> to vector<8x128xf32>
    %c512 = arith.constant 512 : index
    %c0_10 = arith.constant 0 : index
    %23 = vector.load %arg3[%c512, %c0_10] : memref<1024x128xf32, #tpu.memory_space<vmem>>, vector<128x128xf32>
    %cst_11 = arith.constant dense<0.000000e+00> : vector<8x128xf32>
    %24 = tpu.matmul %22, %23, %cst_11 {dimension_numbers = #tpu.dot_dimension_numbers<[1], [0], [0], [1], [0, 0, 1, 1], [], []>} : vector<8x128xf32>, vector<128x128xf32>, vector<8x128xf32> -> vector<8x128xf32>
    %25 = arith.addf %21, %24 : vector<8x128xf32>
    %26 = vector.extract_strided_slice %4 {offsets = [1, 256], sizes = [8, 128], strides = [1, 1]} : vector<16x384xf32> to vector<8x128xf32>
    %c640 = arith.constant 640 : index
    %c0_12 = arith.constant 0 : index
    %27 = vector.load %arg3[%c640, %c0_12] : memref<1024x128xf32, #tpu.memory_space<vmem>>, vector<128x128xf32>
    %cst_13 = arith.constant dense<0.000000e+00> : vector<8x128xf32>
    %28 = tpu.matmul %26, %27, %cst_13 {dimension_numbers = #tpu.dot_dimension_numbers<[1], [0], [0], [1], [0, 0, 1, 1], [], []>} : vector<8x128xf32>, vector<128x128xf32>, vector<8x128xf32> -> vector<8x128xf32>
    %29 = arith.addf %25, %28 : vector<8x128xf32>
    %30 = vector.extract_strided_slice %4 {offsets = [2, 0], sizes = [8, 128], strides = [1, 1]} : vector<16x384xf32> to vector<8x128xf32>
    %c768 = arith.constant 768 : index
    %c0_14 = arith.constant 0 : index
    %31 = vector.load %arg3[%c768, %c0_14] : memref<1024x128xf32, #tpu.memory_space<vmem>>, vector<128x128xf32>
    %cst_15 = arith.constant dense<0.000000e+00> : vector<8x128xf32>
    %32 = tpu.matmul %30, %31, %cst_15 {dimension_numbers = #tpu.dot_dimension_numbers<[1], [0], [0], [1], [0, 0, 1, 1], [], []>} : vector<8x128xf32>, vector<128x128xf32>, vector<8x128xf32> -> vector<8x128xf32>
    %33 = arith.addf %29, %32 : vector<8x128xf32>
    %34 = vector.extract_strided_slice %4 {offsets = [2, 128], sizes = [8, 128], strides = [1, 1]} : vector<16x384xf32> to vector<8x128xf32>
    %c896 = arith.constant 896 : index
    %c0_16 = arith.constant 0 : index
    %35 = vector.load %arg3[%c896, %c0_16] : memref<1024x128xf32, #tpu.memory_space<vmem>>, vector<128x128xf32>
    %cst_17 = arith.constant dense<0.000000e+00> : vector<8x128xf32>
    %36 = tpu.matmul %34, %35, %cst_17 {dimension_numbers = #tpu.dot_dimension_numbers<[1], [0], [0], [1], [0, 0, 1, 1], [], []>} : vector<8x128xf32>, vector<128x128xf32>, vector<8x128xf32> -> vector<8x128xf32>
    %37 = arith.addf %33, %36 : vector<8x128xf32>
    %c0_18 = arith.constant 0 : index
    %c0_19 = arith.constant 0 : index
    %38 = vector.load %arg4[%c0_18, %c0_19] : memref<1x128xf32, #tpu.memory_space<vmem>>, vector<1x128xf32>
    %39 = vector.broadcast %38 : vector<1x128xf32> to vector<8x128xf32>
    %40 = arith.addf %37, %39 : vector<8x128xf32>
    %41 = tpu.iota {dimensions = array<i32: 1>} : vector<1x128xi32>
    %c16_i32 = arith.constant 16 : i32
    %42 = vector.broadcast %c16_i32 : i32 to vector<1x128xi32>
    %43 = arith.cmpi slt, %41, %42 : vector<1x128xi32>
    %44 = arith.extui %43 : vector<1x128xi1> to vector<1x128xi32>
    %45 = arith.sitofp %44 : vector<1x128xi32> to vector<1x128xf32>
    %46 = vector.broadcast %45 : vector<1x128xf32> to vector<8x128xf32>
    %47 = arith.mulf %40, %46 : vector<8x128xf32>
    %cst_20 = arith.constant dense<0.000000e+00> : vector<8xf32>
    %48 = vector.multi_reduction <add>, %47, %cst_20 [1] : vector<8x128xf32> to vector<8xf32>
    %49 = vector.shape_cast %48 : vector<8xf32> to vector<8x1xf32>
    %cst_21 = arith.constant 6.250000e-02 : f32
    %50 = vector.broadcast %cst_21 : f32 to vector<8x1xf32>
    %51 = arith.mulf %49, %50 : vector<8x1xf32>
    %52 = vector.broadcast %51 : vector<8x1xf32> to vector<8x128xf32>
    %53 = arith.subf %40, %52 : vector<8x128xf32>
    %54 = vector.broadcast %45 : vector<1x128xf32> to vector<8x128xf32>
    %55 = arith.mulf %53, %54 : vector<8x128xf32>
    %56 = arith.mulf %55, %55 : vector<8x128xf32>
    %cst_22 = arith.constant dense<0.000000e+00> : vector<8xf32>
    %57 = vector.multi_reduction <add>, %56, %cst_22 [1] : vector<8x128xf32> to vector<8xf32>
    %58 = vector.shape_cast %57 : vector<8xf32> to vector<8x1xf32>
    %cst_23 = arith.constant 6.250000e-02 : f32
    %59 = vector.broadcast %cst_23 : f32 to vector<8x1xf32>
    %60 = arith.mulf %58, %59 : vector<8x1xf32>
    %cst_24 = arith.constant 9.99999974E-6 : f32
    %61 = vector.broadcast %cst_24 : f32 to vector<8x1xf32>
    %62 = arith.addf %60, %61 : vector<8x1xf32>
    %63 = math.rsqrt %62 : vector<8x1xf32>
    %64 = vector.broadcast %63 : vector<8x1xf32> to vector<8x128xf32>
    %65 = arith.mulf %55, %64 : vector<8x128xf32>
    %c0_25 = arith.constant 0 : index
    %c0_26 = arith.constant 0 : index
    %66 = vector.load %arg5[%c0_25, %c0_26] : memref<1x128xf32, #tpu.memory_space<vmem>>, vector<1x128xf32>
    %67 = vector.broadcast %66 : vector<1x128xf32> to vector<8x128xf32>
    %68 = arith.mulf %65, %67 : vector<8x128xf32>
    %c0_27 = arith.constant 0 : index
    %c0_28 = arith.constant 0 : index
    %69 = vector.load %arg6[%c0_27, %c0_28] : memref<1x128xf32, #tpu.memory_space<vmem>>, vector<1x128xf32>
    %70 = vector.broadcast %69 : vector<1x128xf32> to vector<8x128xf32>
    %71 = arith.addf %68, %70 : vector<8x128xf32>
    %cst_29 = arith.constant 0.000000e+00 : f32
    %72 = vector.broadcast %cst_29 : f32 to vector<8x128xf32>
    %73 = arith.maximumf %71, %72 : vector<8x128xf32>
    %74 = tpu.iota {dimensions = array<i32: 0>} : vector<8x1xi32>
    %75 = vector.broadcast %1 : i32 to vector<8x1xi32>
    %76 = arith.addi %75, %74 : vector<8x1xi32>
    %c2_i32 = arith.constant 2 : i32
    %77 = vector.broadcast %c2_i32 : i32 to vector<8x1xi32>
    %78 = arith.cmpi slt, %76, %77 : vector<8x1xi32>
    %cst_30 = arith.constant 0.000000e+00 : f32
    %79 = vector.shape_cast %78 : vector<8x1xi1> to vector<8x1xi1>
    %80 = vector.broadcast %79 : vector<8x1xi1> to vector<8x128xi1>
    %81 = vector.broadcast %cst_30 : f32 to vector<8x128xf32>
    %82 = arith.select %80, %73, %81 : vector<8x128xi1>, vector<8x128xf32>
    %c0_31 = arith.constant 0 : index
    %c0_32 = arith.constant 0 : index
    %c0_33 = arith.constant 0 : index
    %83 = vector.load %arg7[%c0_31, %c0_32, %c0_33] : memref<1x8x128xf32, #tpu.memory_space<vmem>>, vector<1x8x128xf32>
    %84 = vector.shape_cast %83 : vector<1x8x128xf32> to vector<8x128xf32>
    %85 = vector.shape_cast %82 : vector<8x128xf32> to vector<1x8x128xf32>
    tpu.vector_store %arg7[%c0_31, %c0_32, %c0_33], %85 {strides = array<i32>} : memref<1x8x128xf32, #tpu.memory_space<vmem>>, vector<1x8x128xf32>,
    return
  }
  func.func @transform_0(%arg0: i32, %arg1: i32) -> (i32, i32, i32) {
    %c0_i32 = arith.constant 0 : i32
    %c0_i32_0 = arith.constant 0 : i32
    %c0_i32_1 = arith.constant 0 : i32
    return %arg0, %c0_i32, %c0_i32_0 : i32, i32, i32
  }
  func.func @transform_1(%arg0: i32, %arg1: i32) -> (i32, i32) {
    %c0_i32 = arith.constant 0 : i32
    %c0_i32_0 = arith.constant 0 : i32
    %c0_i32_1 = arith.constant 0 : i32
    return %c0_i32, %c0_i32_0 : i32, i32
  }
  func.func @transform_2(%arg0: i32, %arg1: i32) -> (i32, i32) {
    %c0_i32 = arith.constant 0 : i32
    %c0_i32_0 = arith.constant 0 : i32
    %c0_i32_1 = arith.constant 0 : i32
    return %c0_i32, %c0_i32_0 : i32, i32
  }
  func.func @transform_3(%arg0: i32, %arg1: i32) -> (i32, i32) {
    %c0_i32 = arith.constant 0 : i32
    %c0_i32_0 = arith.constant 0 : i32
    %c0_i32_1 = arith.constant 0 : i32
    return %c0_i32, %c0_i32_0 : i32, i32
  }
  func.func @transform_4(%arg0: i32, %arg1: i32) -> (i32, i32) {
    %c0_i32 = arith.constant 0 : i32
    %c0_i32_0 = arith.constant 0 : i32
    %c0_i32_1 = arith.constant 0 : i32
    return %c0_i32, %c0_i32_0 : i32, i32
  }
  func.func @transform_5(%arg0: i32, %arg1: i32) -> (i32, i32, i32) {
    %c0_i32 = arith.constant 0 : i32
    %c0_i32_0 = arith.constant 0 : i32
    return %arg0, %arg1, %c0_i32 : i32, i32, i32
  }
}

module attributes {stable_mosaic.version = 11 : i64} {
  func.func @kernel(%arg0: i32, %arg1: i32, %arg2: memref<1x16x128xf32, #tpu.memory_space<vmem>>, %arg3: memref<1024x128xf32, #tpu.memory_space<vmem>>, %arg4: memref<1x128xf32, #tpu.memory_space<vmem>>, %arg5: memref<1x128xf32, #tpu.memory_space<vmem>>, %arg6: memref<1x128xf32, #tpu.memory_space<vmem>>, %arg7: memref<1x8x384xf32, #tpu.memory_space<vmem>>, %arg8: memref<1x8x128xf32, #tpu.memory_space<vmem>>) attributes {dimension_semantics = [#tpu.dimension_semantics<parallel>, #tpu.dimension_semantics<parallel>], iteration_bounds = array<i64: 2, 1>, scalar_prefetch = 0 : i64, scratch_operands = 0 : i64, tpu.core_type = #tpu.core_type<tc>, window_params = [{transform_indices = @transform_0, window_bounds = array<i64: 1, 16, 128>}, {pipeline_mode = #tpu.pipeline_mode<synchronous>, transform_indices = @transform_1, window_bounds = array<i64: 1024, 128>}, {pipeline_mode = #tpu.pipeline_mode<synchronous>, transform_indices = @transform_2, window_bounds = array<i64: 1, 128>}, {pipeline_mode = #tpu.pipeline_mode<synchronous>, transform_indices = @transform_3, window_bounds = array<i64: 1, 128>}, {pipeline_mode = #tpu.pipeline_mode<synchronous>, transform_indices = @transform_4, window_bounds = array<i64: 1, 128>}, {transform_indices = @transform_5, window_bounds = array<i64: 1, 8, 384>}, {transform_indices = @transform_6, window_bounds = array<i64: 1, 8, 128>}]} {
    %c8_i32 = arith.constant 8 : i32
    %0 = arith.muli %arg1, %c8_i32 : i32
    %1 = tpu.assume_multiple %0, 8 : i32
    %c0 = arith.constant 0 : index
    %2 = arith.index_cast %1 : i32 to index
    %c0_0 = arith.constant 0 : index
    %3 = vector.load %arg2[%c0, %2, %c0_0] : memref<1x16x128xf32, #tpu.memory_space<vmem>>, vector<1x16x128xf32>
    %4 = vector.shape_cast %3 : vector<1x16x128xf32> to vector<16x128xf32>
    %cst = arith.constant 0.000000e+00 : f32
    %5 = vector.broadcast %cst : f32 to vector<8x128xf32>
    %6 = vector.extract_strided_slice %4 {offsets = [0, 0], sizes = [8, 128], strides = [1, 1]} : vector<16x128xf32> to vector<8x128xf32>
    %c0_1 = arith.constant 0 : index
    %c0_2 = arith.constant 0 : index
    %7 = vector.load %arg3[%c0_1, %c0_2] : memref<1024x128xf32, #tpu.memory_space<vmem>>, vector<128x128xf32>
    %cst_3 = arith.constant dense<0.000000e+00> : vector<8x128xf32>
    %8 = tpu.matmul %6, %7, %cst_3 {dimension_numbers = #tpu.dot_dimension_numbers<[1], [0], [0], [1], [0, 0, 1, 1], [], []>} : vector<8x128xf32>, vector<128x128xf32>, vector<8x128xf32> -> vector<8x128xf32>
    %9 = arith.addf %5, %8 : vector<8x128xf32>
    %10 = vector.extract_strided_slice %4 {offsets = [1, 0], sizes = [8, 128], strides = [1, 1]} : vector<16x128xf32> to vector<8x128xf32>
    %c128 = arith.constant 128 : index
    %c0_4 = arith.constant 0 : index
    %11 = vector.load %arg3[%c128, %c0_4] : memref<1024x128xf32, #tpu.memory_space<vmem>>, vector<128x128xf32>
    %cst_5 = arith.constant dense<0.000000e+00> : vector<8x128xf32>
    %12 = tpu.matmul %10, %11, %cst_5 {dimension_numbers = #tpu.dot_dimension_numbers<[1], [0], [0], [1], [0, 0, 1, 1], [], []>} : vector<8x128xf32>, vector<128x128xf32>, vector<8x128xf32> -> vector<8x128xf32>
    %13 = arith.addf %9, %12 : vector<8x128xf32>
    %14 = vector.extract_strided_slice %4 {offsets = [2, 0], sizes = [8, 128], strides = [1, 1]} : vector<16x128xf32> to vector<8x128xf32>
    %c256 = arith.constant 256 : index
    %c0_6 = arith.constant 0 : index
    %15 = vector.load %arg3[%c256, %c0_6] : memref<1024x128xf32, #tpu.memory_space<vmem>>, vector<128x128xf32>
    %cst_7 = arith.constant dense<0.000000e+00> : vector<8x128xf32>
    %16 = tpu.matmul %14, %15, %cst_7 {dimension_numbers = #tpu.dot_dimension_numbers<[1], [0], [0], [1], [0, 0, 1, 1], [], []>} : vector<8x128xf32>, vector<128x128xf32>, vector<8x128xf32> -> vector<8x128xf32>
    %17 = arith.addf %13, %16 : vector<8x128xf32>
    %18 = vector.extract_strided_slice %4 {offsets = [3, 0], sizes = [8, 128], strides = [1, 1]} : vector<16x128xf32> to vector<8x128xf32>
    %c384 = arith.constant 384 : index
    %c0_8 = arith.constant 0 : index
    %19 = vector.load %arg3[%c384, %c0_8] : memref<1024x128xf32, #tpu.memory_space<vmem>>, vector<128x128xf32>
    %cst_9 = arith.constant dense<0.000000e+00> : vector<8x128xf32>
    %20 = tpu.matmul %18, %19, %cst_9 {dimension_numbers = #tpu.dot_dimension_numbers<[1], [0], [0], [1], [0, 0, 1, 1], [], []>} : vector<8x128xf32>, vector<128x128xf32>, vector<8x128xf32> -> vector<8x128xf32>
    %21 = arith.addf %17, %20 : vector<8x128xf32>
    %22 = vector.extract_strided_slice %4 {offsets = [4, 0], sizes = [8, 128], strides = [1, 1]} : vector<16x128xf32> to vector<8x128xf32>
    %c512 = arith.constant 512 : index
    %c0_10 = arith.constant 0 : index
    %23 = vector.load %arg3[%c512, %c0_10] : memref<1024x128xf32, #tpu.memory_space<vmem>>, vector<128x128xf32>
    %cst_11 = arith.constant dense<0.000000e+00> : vector<8x128xf32>
    %24 = tpu.matmul %22, %23, %cst_11 {dimension_numbers = #tpu.dot_dimension_numbers<[1], [0], [0], [1], [0, 0, 1, 1], [], []>} : vector<8x128xf32>, vector<128x128xf32>, vector<8x128xf32> -> vector<8x128xf32>
    %25 = arith.addf %21, %24 : vector<8x128xf32>
    %26 = vector.extract_strided_slice %4 {offsets = [5, 0], sizes = [8, 128], strides = [1, 1]} : vector<16x128xf32> to vector<8x128xf32>
    %c640 = arith.constant 640 : index
    %c0_12 = arith.constant 0 : index
    %27 = vector.load %arg3[%c640, %c0_12] : memref<1024x128xf32, #tpu.memory_space<vmem>>, vector<128x128xf32>
    %cst_13 = arith.constant dense<0.000000e+00> : vector<8x128xf32>
    %28 = tpu.matmul %26, %27, %cst_13 {dimension_numbers = #tpu.dot_dimension_numbers<[1], [0], [0], [1], [0, 0, 1, 1], [], []>} : vector<8x128xf32>, vector<128x128xf32>, vector<8x128xf32> -> vector<8x128xf32>
    %29 = arith.addf %25, %28 : vector<8x128xf32>
    %30 = vector.extract_strided_slice %4 {offsets = [6, 0], sizes = [8, 128], strides = [1, 1]} : vector<16x128xf32> to vector<8x128xf32>
    %c768 = arith.constant 768 : index
    %c0_14 = arith.constant 0 : index
    %31 = vector.load %arg3[%c768, %c0_14] : memref<1024x128xf32, #tpu.memory_space<vmem>>, vector<128x128xf32>
    %cst_15 = arith.constant dense<0.000000e+00> : vector<8x128xf32>
    %32 = tpu.matmul %30, %31, %cst_15 {dimension_numbers = #tpu.dot_dimension_numbers<[1], [0], [0], [1], [0, 0, 1, 1], [], []>} : vector<8x128xf32>, vector<128x128xf32>, vector<8x128xf32> -> vector<8x128xf32>
    %33 = arith.addf %29, %32 : vector<8x128xf32>
    %34 = vector.extract_strided_slice %4 {offsets = [7, 0], sizes = [8, 128], strides = [1, 1]} : vector<16x128xf32> to vector<8x128xf32>
    %c896 = arith.constant 896 : index
    %c0_16 = arith.constant 0 : index
    %35 = vector.load %arg3[%c896, %c0_16] : memref<1024x128xf32, #tpu.memory_space<vmem>>, vector<128x128xf32>
    %cst_17 = arith.constant dense<0.000000e+00> : vector<8x128xf32>
    %36 = tpu.matmul %34, %35, %cst_17 {dimension_numbers = #tpu.dot_dimension_numbers<[1], [0], [0], [1], [0, 0, 1, 1], [], []>} : vector<8x128xf32>, vector<128x128xf32>, vector<8x128xf32> -> vector<8x128xf32>
    %37 = arith.addf %33, %36 : vector<8x128xf32>
    %c0_18 = arith.constant 0 : index
    %c0_19 = arith.constant 0 : index
    %38 = vector.load %arg4[%c0_18, %c0_19] : memref<1x128xf32, #tpu.memory_space<vmem>>, vector<1x128xf32>
    %39 = vector.broadcast %38 : vector<1x128xf32> to vector<8x128xf32>
    %40 = arith.addf %37, %39 : vector<8x128xf32>
    %41 = tpu.iota {dimensions = array<i32: 0>} : vector<8x1xi32>
    %42 = vector.broadcast %1 : i32 to vector<8x1xi32>
    %43 = arith.addi %42, %41 : vector<8x1xi32>
    %c2_i32 = arith.constant 2 : i32
    %44 = vector.broadcast %c2_i32 : i32 to vector<8x1xi32>
    %45 = arith.cmpi slt, %43, %44 : vector<8x1xi32>
    %cst_20 = arith.constant 0.000000e+00 : f32
    %46 = vector.shape_cast %45 : vector<8x1xi1> to vector<8x1xi1>
    %47 = vector.broadcast %46 : vector<8x1xi1> to vector<8x128xi1>
    %48 = vector.broadcast %cst_20 : f32 to vector<8x128xf32>
    %49 = arith.select %47, %40, %48 : vector<8x128xi1>, vector<8x128xf32>
    %c0_21 = arith.constant 0 : index
    %c0_22 = arith.constant 0 : index
    %c0_23 = arith.constant 0 : index
    %50 = vector.load %arg7[%c0_21, %c0_22, %c0_23] : memref<1x8x384xf32, #tpu.memory_space<vmem>>, vector<1x8x384xf32>
    %51 = vector.shape_cast %50 : vector<1x8x384xf32> to vector<8x384xf32>
    %52 = vector.extract_strided_slice %51 {offsets = [0, 0], sizes = [8, 128], strides = [1, 1]} : vector<8x384xf32> to vector<8x128xf32>
    %53 = vector.extract_strided_slice %51 {offsets = [0, 128], sizes = [8, 128], strides = [1, 1]} : vector<8x384xf32> to vector<8x128xf32>
    %54 = arith.maximumf %52, %53 : vector<8x128xf32>
    %55 = vector.extract_strided_slice %51 {offsets = [0, 256], sizes = [8, 128], strides = [1, 1]} : vector<8x384xf32> to vector<8x128xf32>
    %56 = arith.maximumf %54, %55 : vector<8x128xf32>
    %57 = arith.addf %49, %56 : vector<8x128xf32>
    %c0_24 = arith.constant 0 : index
    %c0_25 = arith.constant 0 : index
    %c0_26 = arith.constant 0 : index
    %58 = vector.load %arg8[%c0_24, %c0_25, %c0_26] : memref<1x8x128xf32, #tpu.memory_space<vmem>>, vector<1x8x128xf32>
    %59 = vector.shape_cast %58 : vector<1x8x128xf32> to vector<8x128xf32>
    %60 = vector.shape_cast %57 : vector<8x128xf32> to vector<1x8x128xf32>
    tpu.vector_store %arg8[%c0_24, %c0_25, %c0_26], %60 {strides = array<i32>} : memref<1x8x128xf32, #tpu.memory_space<vmem>>, vector<1x8x128xf32>,
    return
  }
  func.func @transform_0(%arg0: i32, %arg1: i32) -> (i32, i32, i32) {
    %c0_i32 = arith.constant 0 : i32
    %c0_i32_0 = arith.constant 0 : i32
    %c0_i32_1 = arith.constant 0 : i32
    return %arg0, %c0_i32, %c0_i32_0 : i32, i32, i32
  }
  func.func @transform_1(%arg0: i32, %arg1: i32) -> (i32, i32) {
    %c0_i32 = arith.constant 0 : i32
    %c0_i32_0 = arith.constant 0 : i32
    %c0_i32_1 = arith.constant 0 : i32
    return %c0_i32, %c0_i32_0 : i32, i32
  }
  func.func @transform_2(%arg0: i32, %arg1: i32) -> (i32, i32) {
    %c0_i32 = arith.constant 0 : i32
    %c0_i32_0 = arith.constant 0 : i32
    %c0_i32_1 = arith.constant 0 : i32
    return %c0_i32, %c0_i32_0 : i32, i32
  }
  func.func @transform_3(%arg0: i32, %arg1: i32) -> (i32, i32) {
    %c0_i32 = arith.constant 0 : i32
    %c0_i32_0 = arith.constant 0 : i32
    %c0_i32_1 = arith.constant 0 : i32
    return %c0_i32, %c0_i32_0 : i32, i32
  }
  func.func @transform_4(%arg0: i32, %arg1: i32) -> (i32, i32) {
    %c0_i32 = arith.constant 0 : i32
    %c0_i32_0 = arith.constant 0 : i32
    %c0_i32_1 = arith.constant 0 : i32
    return %c0_i32, %c0_i32_0 : i32, i32
  }
  func.func @transform_5(%arg0: i32, %arg1: i32) -> (i32, i32, i32) {
    %c0_i32 = arith.constant 0 : i32
    %c0_i32_0 = arith.constant 0 : i32
    return %arg0, %arg1, %c0_i32 : i32, i32, i32
  }
  func.func @transform_6(%arg0: i32, %arg1: i32) -> (i32, i32, i32) {
    %c0_i32 = arith.constant 0 : i32
    %c0_i32_0 = arith.constant 0 : i32
    return %arg0, %arg1, %c0_i32 : i32, i32, i32
  }
}

</mosaic_0001>

<bundles_post_ra>
// kernel: _lambda_.15
= control target key start
LH: loop header
LB: loop body
LE: loop exit
PB: predicated region body
PF: predicated region fallthrough
CT: control target
= control target key end

     0   :  { %v22_v0 = vlaneseq  ;;  %v201_v4 = vmov 0.0   ;;  %s334_s0 = inlined_call_operand.vmem [shape: f32[64,128], index: 0, kind: input, shape index: {}]   ;;  %s335_s1 = inlined_call_operand.vmem [shape: f32[1,128], index: 1, kind: input, shape index: {}]   ;;  %s336_s2 = inlined_call_operand.vmem [shape: f32[1,128], index: 2, kind: input, shape index: {}]   ;;  %s337_s3 = inlined_call_operand.vmem [shape: f32[64,128], index: 3, kind: output, shape index: {}]  }
   0x1   :  { %v14_v2 = vld [vmem:[%s334_s0] sm:$0xff]  ;;  %v16_v3 = vld [vmem:[%s334_s0 + $0x10] sm:$0xff]  ;;  %v15_v6 = vld [vmem:[%s334_s0 + $0x8] sm:$0xff] }
   0x2   :  { %v23_v1 = vand.u32 127, %v22_v0  ;;  %v17_v7 = vld [vmem:[%s334_s0 + $0x18] sm:$0xff]  ;;  %v18_v12 = vld [vmem:[%s334_s0 + $0x20] sm:$0xff]  ;;  %v19_v13 = vld [vmem:[%s334_s0 + $0x28] sm:$0xff] }
   0x3   :  { %v20_v16 = vld [vmem:[%s334_s0 + $0x30] sm:$0xff]  ;;  %v21_v17 = vld [vmem:[%s334_s0 + $0x38] sm:$0xff] }
   0x4   :  { %vm24_vm0 = vcmp.lt.s32.totalorder %v23_v1, 8 }
   0x5   :  { %v228_v5 = vsel %vm24_vm0, 1.0, %v201_v4 }
   0x6   :  { %v27_v8 = vmul.f32 %v228_v5, %v14_v2  ;;  %v29_v9 = vmul.f32 %v228_v5, %v16_v3  ;;  %v28_v10 = vmul.f32 %v228_v5, %v15_v6  ;;  %v30_v11 = vmul.f32 %v228_v5, %v17_v7 }
   0x7   :  { %v31_v14 = vmul.f32 %v228_v5, %v18_v12  ;;  %v32_v15 = vmul.f32 %v228_v5, %v19_v13  ;;  %v33_v18 = vmul.f32 %v228_v5, %v20_v16  ;;  %v34_v19 = vmul.f32 %v228_v5, %v21_v17 }
   0x8   :  { %35 = vadd.xlane.f32.xlu0 %v27_v8  ;;  %39 = vadd.xlane.f32.xlu1 %v29_v9 }
   0xc   :  { %37 = vadd.xlane.f32.xlu0 %v28_v10  ;;  %41 = vadd.xlane.f32.xlu1 %v30_v11 }
  0x10   :  { %43 = vadd.xlane.f32.xlu0 %v31_v14  ;;  %45 = vadd.xlane.f32.xlu1 %v32_v15 }
  0x14   :  { %47 = vadd.xlane.f32.xlu0 %v33_v18  ;;  %49 = vadd.xlane.f32.xlu1 %v34_v19 }
  0x95   :  { %v36_v20 = vpop.xlane.xlu0 %35  ;;  %v40_v21 = vpop.xlane.xlu1 %39 }
  0x96   :  { %v51_v22 = vmul.f32 0.125, %v36_v20  ;;  %v53_v23 = vmul.f32 0.125, %v40_v21  ;;  %v183_v21 = vld [vmem:[%s336_s2] ss:$0 sm:$0xff] }
  0x98   :  { %v59_v24 = vsub.f32 %v14_v2, %v51_v22  ;;  %v61_v25 = vsub.f32 %v16_v3, %v53_v23 }
  0x99   :  { %v38_v26 = vpop.xlane.xlu0 %37  ;;  %v42_v27 = vpop.xlane.xlu1 %41 }
  0x9a   :  { %v52_v28 = vmul.f32 0.125, %v38_v26  ;;  %v54_v29 = vmul.f32 0.125, %v42_v27  ;;  %v257_v30 = vmul.f32 %v228_v5, %v59_v24  ;;  %v260_v31 = vmul.f32 %v228_v5, %v61_v25 }
  0x9c   :  { %v60_v32 = vsub.f32 %v15_v6, %v52_v28  ;;  %v62_v33 = vsub.f32 %v17_v7, %v54_v29  ;;  %v75_v34 = vmul.f32 %v257_v30, %v257_v30  ;;  %v77_v37 = vmul.f32 %v260_v31, %v260_v31 }
  0x9d   :  { %v44_v35 = vpop.xlane.xlu0 %43  ;;  %v46_v36 = vpop.xlane.xlu1 %45 }
  0x9e   :  { %v55_v38 = vmul.f32 0.125, %v44_v35  ;;  %83 = vadd.xlane.f32.xlu0 %v75_v34  ;;  %v56_v39 = vmul.f32 0.125, %v46_v36  ;;  %v267_v40 = vmul.f32 %v228_v5, %v60_v32  ;;  %v270_v41 = vmul.f32 %v228_v5, %v62_v33 }
  0xa0   :  { %v63_v42 = vsub.f32 %v18_v12, %v55_v38  ;;  %v64_v43 = vsub.f32 %v19_v13, %v56_v39  ;;  %v76_v44 = vmul.f32 %v267_v40, %v267_v40  ;;  %v78_v47 = vmul.f32 %v270_v41, %v270_v41 }
  0xa1   :  { %v48_v45 = vpop.xlane.xlu0 %47  ;;  %v50_v46 = vpop.xlane.xlu1 %49 }
  0xa2   :  { %v57_v48 = vmul.f32 0.125, %v48_v45  ;;  %87 = vadd.xlane.f32.xlu0 %v77_v37  ;;  %85 = vadd.xlane.f32.xlu1 %v76_v44  ;;  %v58_v49 = vmul.f32 0.125, %v50_v46  ;;  %v277_v50 = vmul.f32 %v228_v5, %v63_v42  ;;  %v280_v51 = vmul.f32 %v228_v5, %v64_v43 }
  0xa4   :  { %v65_v52 = vsub.f32 %v20_v16, %v57_v48  ;;  %v66_v53 = vsub.f32 %v21_v17, %v58_v49  ;;  %v79_v54 = vmul.f32 %v277_v50, %v277_v50  ;;  %v80_v55 = vmul.f32 %v280_v51, %v280_v51  ;;  %v182_v16 = vld [vmem:[%s335_s1] ss:$0 sm:$0xff] }
  0xa6   :  { %89 = vadd.xlane.f32.xlu1 %v78_v47  ;;  %91 = vadd.xlane.f32.xlu0 %v79_v54  ;;  %v287_v56 = vmul.f32 %v228_v5, %v65_v52  ;;  %v290_v57 = vmul.f32 %v228_v5, %v66_v53 }
  0xa8   :  { %v81_v58 = vmul.f32 %v287_v56, %v287_v56  ;;  %v82_v59 = vmul.f32 %v290_v57, %v290_v57 }
  0xaa   :  { %93 = vadd.xlane.f32.xlu1 %v80_v55  ;;  %95 = vadd.xlane.f32.xlu0 %v81_v58 }
  0xae   :  { %97 = vadd.xlane.f32.xlu1 %v82_v59 }
 0x12b   :  { %v84_v60 = vpop.xlane.xlu0 %83 }
 0x12c   :  { %v99_v61 = vmul.f32 0.125, %v84_v60 }
 0x12e   :  { %v107_v62 = vadd.f32 1e-05, %v99_v61 }
 0x12f   :  { %v86_v63 = vpop.xlane.xlu1 %85  ;;  %v88_v0 = vpop.xlane.xlu0 %87 }
 0x130   :  { %185 = vrsqrt.f32 %v107_v62  ;;  %v100_v1 = vmul.f32 0.125, %v86_v63  ;;  %v101_v2 = vmul.f32 0.125, %v88_v0 }
 0x132   :  { %v108_v3 = vadd.f32 1e-05, %v100_v1  ;;  %v109_v4 = vadd.f32 1e-05, %v101_v2 }
 0x133   :  { %v90_v5 = vpop.xlane.xlu1 %89  ;;  %v92_v6 = vpop.xlane.xlu0 %91 }
 0x134   :  { %187 = vrsqrt.f32 %v108_v3  ;;  %v102_v7 = vmul.f32 0.125, %v90_v5  ;;  %v103_v8 = vmul.f32 0.125, %v92_v6 }
 0x135   :  { %189 = vrsqrt.f32 %v109_v4 }
 0x136   :  { %v110_v9 = vadd.f32 1e-05, %v102_v7  ;;  %v111_v10 = vadd.f32 1e-05, %v103_v8 }
 0x137   :  { %v94_v11 = vpop.xlane.xlu1 %93  ;;  %v96_v12 = vpop.xlane.xlu0 %95 }
 0x138   :  { %191 = vrsqrt.f32 %v110_v9  ;;  %v104_v13 = vmul.f32 0.125, %v94_v11  ;;  %v105_v14 = vmul.f32 0.125, %v96_v12 }
 0x139   :  { %193 = vrsqrt.f32 %v111_v10 }
 0x13a   :  { %v186_v15 = vpop.eup %185  ;;  %v112_v17 = vadd.f32 1e-05, %v104_v13  ;;  %v113_v18 = vadd.f32 1e-05, %v105_v14 }
 0x13b   :  { %v123_v19 = vmul.f32 %v186_v15, %v257_v30  ;;  %v98_v20 = vpop.xlane.xlu1 %97 }
 0x13c   :  { %195 = vrsqrt.f32 %v112_v17  ;;  %v106_v22 = vmul.f32 0.125, %v98_v20 }
 0x13d   :  { %v138_v23 = vmul.f32 %v182_v16, %v123_v19  ;;  %197 = vrsqrt.f32 %v113_v18 }
 0x13e   :  { %v188_v24 = vpop.eup %187  ;;  %v114_v25 = vadd.f32 1e-05, %v106_v22 }
 0x13f   :  { %v190_v26 = vpop.eup %189  ;;  %v153_v27 = vadd.f32 %v183_v21, %v138_v23  ;;  %v124_v28 = vmul.f32 %v188_v24, %v267_v40 }
 0x140   :  { %v125_v29 = vmul.f32 %v190_v26, %v260_v31  ;;  %199 = vrsqrt.f32 %v114_v25 }
 0x141   :  { %v161_v32 = vmax.f32 %v153_v27, 0.0  ;;  %v139_v30 = vmul.f32 %v182_v16, %v124_v28 }
 0x142   :  { %v192_v33 = vpop.eup %191  ;;  %v140_v34 = vmul.f32 %v182_v16, %v125_v29 }
 0x143   :  { %v194_v35 = vpop.eup %193  ;;  %169 = vst [vmem:[%s337_s3] sm:$0xff] %v161_v32  ;;  %v154_v36 = vadd.f32 %v183_v21, %v139_v30  ;;  %v126_v37 = vmul.f32 %v192_v33, %v270_v41 }
 0x144   :  { %v155_v38 = vadd.f32 %v183_v21, %v140_v34  ;;  %v127_v39 = vmul.f32 %v194_v35, %v277_v50 }
 0x145   :  { %v162_v42 = vmax.f32 %v154_v36, 0.0  ;;  %v141_v40 = vmul.f32 %v182_v16, %v126_v37 }
 0x146   :  { %v196_v43 = vpop.eup %195  ;;  %v163_v31 = vmax.f32 %v155_v38, 0.0  ;;  %v142_v44 = vmul.f32 %v182_v16, %v127_v39 }
 0x147   :  { %v198_v45 = vpop.eup %197  ;;  %170 = vst [vmem:[%s337_s3 + $0x8] sm:$0xff] %v162_v42  ;;  %v156_v46 = vadd.f32 %v183_v21, %v141_v40  ;;  %v128_v47 = vmul.f32 %v196_v43, %v280_v51 }
 0x148   :  { %171 = vst [vmem:[%s337_s3 + $0x10] sm:$0xff] %v163_v31  ;;  %v157_v41 = vadd.f32 %v183_v21, %v142_v44  ;;  %v129_v48 = vmul.f32 %v198_v45, %v287_v56 }
 0x149   :  { %v164_v49 = vmax.f32 %v156_v46, 0.0  ;;  %v143_v50 = vmul.f32 %v182_v16, %v128_v47 }
 0x14a   :  { %v200_v52 = vpop.eup %199  ;;  %v165_v53 = vmax.f32 %v157_v41, 0.0  ;;  %v144_v54 = vmul.f32 %v182_v16, %v129_v48 }
 0x14b   :  { %172 = vst [vmem:[%s337_s3 + $0x18] sm:$0xff] %v164_v49  ;;  %v158_v55 = vadd.f32 %v183_v21, %v143_v50  ;;  %v130_v58 = vmul.f32 %v200_v52, %v290_v57 }
 0x14c   :  { %173 = vst [vmem:[%s337_s3 + $0x20] sm:$0xff] %v165_v53  ;;  %v159_v51 = vadd.f32 %v183_v21, %v144_v54 }
 0x14d   :  { %v166_v59 = vmax.f32 %v158_v55, 0.0  ;;  %v145_v60 = vmul.f32 %v182_v16, %v130_v58 }
 0x14e   :  { %v167_v56 = vmax.f32 %v159_v51, 0.0 }
 0x14f   :  { %174 = vst [vmem:[%s337_s3 + $0x28] sm:$0xff] %v166_v59  ;;  %v160_v61 = vadd.f32 %v183_v21, %v145_v60 }
 0x150   :  { %175 = vst [vmem:[%s337_s3 + $0x30] sm:$0xff] %v167_v56 }
 0x151   :  { %v168_v62 = vmax.f32 %v160_v61, 0.0 }
 0x153   :  { %176 = vst [vmem:[%s337_s3 + $0x38] sm:$0xff] %v168_v62 }

// kernel: _lambda_.13
= control target key start
LH: loop header
LB: loop body
LE: loop exit
PB: predicated region body
PF: predicated region fallthrough
CT: control target
= control target key end

     0   :  { %s1625_s18 = smov 0   ;;  %s1627_s19 = smov 0   ;;  %s1983_s0 = inlined_call_operand.vmem [shape: f32[2,40,256], index: 0, kind: input, shape index: {}]   ;;  %s1984_s1 = inlined_call_operand.vmem [shape: f32[640,128], index: 1, kind: input, shape index: {}]   ;;  %s1985_s2 = inlined_call_operand.vmem [shape: f32[1,128], index: 2, kind: input, shape index: {}]   ;;  %s1986_s3 = inlined_call_operand.vmem [shape: f32[1,128], index: 3, kind: input, shape index: {}]   ;;  %s1987_s4 = inlined_call_operand.vmem [shape: f32[1,128], index: 4, kind: input, shape index: {}]   ;;  %s1988_s5 = inlined_call_operand.vmem [shape: f32[2,32,128], index: 5, kind: output, shape index: {}]  }
   0x1   :  { %s1629_s20 = smov 0  }
   0x2 LB: > { %s27_s21 = sadd.s32 1, %s1588_s19  ;;  %p1043_p0 = scmp.ge.s32.totalorder %s1592_s20, 1  ;;  %s1592_s20 = sphi %s1629_s20, %s15_s20   ;;  %s1588_s19 = sphi %s1627_s19, %s1990_s19   ;;  %s1584_s18 = sphi %s1625_s18, %s1989_s18  }
   0x3   : > { %p29_p1 = scmp.ge.s32.totalorder %s27_s21, 2  ;;  %p201_p2 = scmp.lt.s32.totalorder %s1592_s20, 3 }
   0x5   : > { %s1992_s21 = smov (%p29_p1, %s27_s21), 0  ;;  %p202_p3 = pnand %p1043_p0, %p201_p2 }
   0x6   : > { %v280_v0 = vld [vmem:[%s1984_s1 + $0x80] sm:$0xff] (!%p202_p3)  ;;  %v281_v1 = vld [vmem:[%s1984_s1 + $0x88] sm:$0xff] (!%p202_p3)  ;;  %p233_p4 = scmp.lt.s32.totalorder (!%p202_p3), %s1584_s18, 1  ;;  %v282_v5 = vld [vmem:[%s1984_s1 + $0x90] sm:$0xff] (!%p202_p3)  ;;  %vm487_vm0 = vcmask (!%p202_p3), 1046528   ;;  %vm729_vm1 = vcmask (!%p202_p3), 1045504  }
   0x7   : > { %205 = sbr.rel (%p202_p3) target bundleno = 649 (0x289), region = 40  ;;  %v466_v2 = vld [vmem:[%s1984_s1 + $0x100] sm:$0xff] (!%p202_p3)  ;;  %v1344_v3 = vpack.c.bf16 (!%p202_p3), %v281_v1, %v280_v0  ;;  %v467_v4 = vld [vmem:[%s1984_s1 + $0x108] sm:$0xff] (!%p202_p3)  ;;  %v283_v6 = vld [vmem:[%s1984_s1 + $0x98] sm:$0xff] (!%p202_p3) }
   0x8   : > { %v1408_v7 = vpack.c.bf16 (!%p202_p3), %v467_v4, %v466_v2  ;;  %v1348_v8 = vpack.c.bf16 (!%p202_p3), %v283_v6, %v282_v5  ;;  %v468_v9 = vld [vmem:[%s1984_s1 + $0x110] sm:$0xff] (!%p202_p3)  ;;  %v469_v10 = vld [vmem:[%s1984_s1 + $0x118] sm:$0xff] (!%p202_p3)  ;;  %v284_v11 = vld [vmem:[%s1984_s1 + $0xa0] sm:$0xff] (!%p202_p3) }
   0x9   : > { %1345 = vmatprep.subr.bf16.mxu1 (!%p202_p3), %v1344_v3  ;;  %v1412_v12 = vpack.c.bf16 (!%p202_p3), %v469_v10, %v468_v9  ;;  %v285_v13 = vld [vmem:[%s1984_s1 + $0xa8] sm:$0xff] (!%p202_p3)  ;;  %v470_v14 = vld [vmem:[%s1984_s1 + $0x120] sm:$0xff] (!%p202_p3)  ;;  %v286_v18 = vld [vmem:[%s1984_s1 + $0xb0] sm:$0xff] (!%p202_p3) }
   0xa   : > { %v471_v15 = vld [vmem:[%s1984_s1 + $0x128] sm:$0xff] (!%p202_p3)  ;;  %1409 = vmatprep.subr.bf16.mxu0 (!%p202_p3), %v1408_v7  ;;  %1347 = vmatpush3.bf16.msra.mxu1 (!%p202_p3), %v1344_v3  ;;  %v1352_v16 = vpack.c.bf16 (!%p202_p3), %v285_v13, %v284_v11  ;;  %v287_v19 = vld [vmem:[%s1984_s1 + $0xb8] sm:$0xff] (!%p202_p3)  ;;  %v472_v20 = vld [vmem:[%s1984_s1 + $0x130] sm:$0xff] (!%p202_p3) }
   0xb   : > { %1411 = vmatpush3.bf16.msra.mxu0 (!%p202_p3), %v1408_v7  ;;  %1349 = vmatprep.subr.bf16.mxu1 (!%p202_p3), %v1348_v8  ;;  %v1416_v17 = vpack.c.bf16 (!%p202_p3), %v471_v15, %v470_v14  ;;  %v473_v21 = vld [vmem:[%s1984_s1 + $0x138] sm:$0xff] (!%p202_p3)  ;;  %v1356_v22 = vpack.c.bf16 (!%p202_p3), %v287_v19, %v286_v18  ;;  %v288_v24 = vld [vmem:[%s1984_s1 + $0xc0] sm:$0xff] (!%p202_p3)  ;;  %v289_v25 = vld [vmem:[%s1984_s1 + $0xc8] sm:$0xff] (!%p202_p3) }
   0xc   : > { %1413 = vmatprep.subr.bf16.mxu0 (!%p202_p3), %v1412_v12  ;;  %v1420_v23 = vpack.c.bf16 (!%p202_p3), %v473_v21, %v472_v20  ;;  %v474_v27 = vld [vmem:[%s1984_s1 + $0x140] sm:$0xff] (!%p202_p3)  ;;  %v475_v28 = vld [vmem:[%s1984_s1 + $0x148] sm:$0xff] (!%p202_p3)  ;;  %v1360_v32 = vpack.c.bf16 (!%p202_p3), %v289_v25, %v288_v24  ;;  %v290_v35 = vld [vmem:[%s1984_s1 + $0xd0] sm:$0xff] (!%p202_p3) }
   0xd   : > { %v1424_v34 = vpack.c.bf16 (!%p202_p3), %v475_v28, %v474_v27  ;;  %v291_v36 = vld [vmem:[%s1984_s1 + $0xd8] sm:$0xff] (!%p202_p3)  ;;  %v476_v37 = vld [vmem:[%s1984_s1 + $0x150] sm:$0xff] (!%p202_p3)  ;;  %v292_v42 = vld [vmem:[%s1984_s1 + $0xe0] sm:$0xff] (!%p202_p3) }
   0xe   : > { %s1994_s18 = smov (!%p233_p4, %s1584_s18), 1  ;;  %1351 = vmatpush3.bf16.msra.mxu1 %v1348_v8  ;;  %v477_v38 = vld [vmem:[%s1984_s1 + $0x158] sm:$0xff]  ;;  %v1364_v40 = vpack.c.bf16 %v291_v36, %v290_v35  ;;  %v293_v43 = vld [vmem:[%s1984_s1 + $0xe8] sm:$0xff]  ;;  %v478_v44 = vld [vmem:[%s1984_s1 + $0x160] sm:$0xff] }
   0xf   : > { %s1536_s25 = smul.u32 80, %s1994_s18  ;;  %1415 = vmatpush3.bf16.msra.mxu0 %v1412_v12  ;;  %1353 = vmatprep.subr.bf16.mxu1 %v1352_v16  ;;  %v1428_v41 = vpack.c.bf16 %v477_v38, %v476_v37  ;;  %v479_v45 = vld [vmem:[%s1984_s1 + $0x168] sm:$0xff]  ;;  %v1368_v46 = vpack.c.bf16 %v293_v43, %v292_v42  ;;  %v294_v48 = vld [vmem:[%s1984_s1 + $0xf0] sm:$0xff]  ;;  %v295_v49 = vld [vmem:[%s1984_s1 + $0xf8] sm:$0xff]  ;;  %s1053_s28 = sshll.u32 %s1994_s18, 5 }
  0x10   : > { %1417 = vmatprep.subr.bf16.mxu0 %v1416_v17  ;;  %v1432_v47 = vpack.c.bf16 %v479_v45, %v478_v44  ;;  %v480_v50 = vld [vmem:[%s1984_s1 + $0x170] sm:$0xff]  ;;  %v481_v51 = vld [vmem:[%s1984_s1 + $0x178] sm:$0xff]  ;;  %v1372_v52 = vpack.c.bf16 %v295_v49, %v294_v48  ;;  %v264_v54 = vld [vmem:[%s1984_s1] sm:$0xff]  ;;  %s246_s6 = scalar_lea.vmem %s1988_s5, %s1053_s28 }
  0x11   : > { %s1697_s11 = scalar_lea.vmem %s1983_s0, %s1536_s25  ;;  %v1436_v53 = vpack.c.bf16 %v481_v51, %v480_v50  ;;  %v265_v55 = vld [vmem:[%s1984_s1 + $0x8] sm:$0xff]  ;;  %v590_v57 = vld [vmem:[%s1984_s1 + $0x180] sm:$0xff]  ;;  %v266_v63 = vld [vmem:[%s1984_s1 + $0x10] sm:$0xff] }
  0x12   : > { %v1706_v26 = vld [vmem:[%s1697_s11 + $0x8] sm:$0xff]  ;;  %v1716_v29 = vld [vmem:[%s1697_s11] sm:$0xff]  ;;  %1355 = vmatpush3.bf16.msra.mxu1 %v1352_v16  ;;  %v1719_v30 = vld [vmem:[%s1697_s11 + $0x10] sm:$0xff]  ;;  %v1376_v59 = vpack.c.bf16 %v265_v55, %v264_v54 }
  0x13   : > { %1186 = vmatprep.mubr.f32.mxu1 %v1706_v26  ;;  %v488_v31 = vrot.slane %v1716_v29, 1  ;;  %1419 = vmatpush3.bf16.msra.mxu0 %v1416_v17  ;;  %v489_v33 = vrot.slane %v1719_v30, 1  ;;  %v1767_v56 = vld [vmem:[%s1697_s11 + $0x20] sm:$0xff]  ;;  %v591_v58 = vld [vmem:[%s1984_s1 + $0x188] sm:$0xff]  ;;  %v1777_v61 = vld [vmem:[%s1697_s11 + $0x30] sm:$0xff]  ;;  %v611_v15 = vrot.slane %v1706_v26, 1 }
  0x14   : > { %1357 = vmatprep.subr.bf16.mxu1 %v1356_v22  ;;  %1421 = vmatprep.subr.bf16.mxu0 %v1420_v23  ;;  %v491_v60 = vrot.slane %v1767_v56, 1  ;;  %v1440_v62 = vpack.c.bf16 %v591_v58, %v590_v57  ;;  %v267_v0 = vld [vmem:[%s1984_s1 + $0x18] sm:$0xff]  ;;  %v1786_v1 = vld [vmem:[%s1697_s11 + $0x40] sm:$0xff]  ;;  %v592_v2 = vld [vmem:[%s1984_s1 + $0x190] sm:$0xff]  ;;  %v493_v5 = vrot.slane %v1777_v61, 1 }
  0x15   : > { %v490_v39 = vsel %vm487_vm0, %v488_v31, %v489_v33  ;;  %v593_v3 = vld [vmem:[%s1984_s1 + $0x198] sm:$0xff]  ;;  %v1380_v7 = vpack.c.bf16 %v267_v0, %v266_v63  ;;  %v495_v8 = vrot.slane %v1786_v1, 1  ;;  %v268_v10 = vld [vmem:[%s1984_s1 + $0x20] sm:$0xff]  ;;  %v269_v11 = vld [vmem:[%s1984_s1 + $0x28] sm:$0xff] }
  0x16   : > { %1359 = vmatpush3.bf16.msra.mxu1 %v1356_v22  ;;  %1262 = vmatprep.mubr.f32.mxu0 %v490_v39  ;;  %v1795_v4 = vld [vmem:[%s1697_s11 + $0x18] sm:$0xff]  ;;  %v492_v6 = vsel %vm487_vm0, %v489_v33, %v491_v60  ;;  %v1444_v9 = vpack.c.bf16 %v593_v3, %v592_v2  ;;  %v594_v12 = vld [vmem:[%s1984_s1 + $0x1a0] sm:$0xff]  ;;  %v595_v13 = vld [vmem:[%s1984_s1 + $0x1a8] sm:$0xff]  ;;  %v494_v17 = vsel %vm487_vm0, %v491_v60, %v493_v5 }
  0x17   : > { %1423 = vmatpush3.bf16.msra.mxu0 %v1420_v23  ;;  %1361 = vmatprep.subr.bf16.mxu1 %v1360_v32  ;;  %v1814_v14 = vld [vmem:[%s1697_s11 + $0x28] sm:$0xff]  ;;  %v612_v16 = vrot.slane %v1795_v4, 1  ;;  %v1820_v18 = vld [vmem:[%s1697_s11 + $0x38] sm:$0xff]  ;;  %v1384_v19 = vpack.c.bf16 %v269_v11, %v268_v10  ;;  %v496_v20 = vsel %vm487_vm0, %v493_v5, %v495_v8  ;;  %v1448_v21 = vpack.c.bf16 %v595_v13, %v594_v12  ;;  %v270_v22 = vld [vmem:[%s1984_s1 + $0x30] sm:$0xff] }
  0x18   : > { %1425 = vmatprep.subr.bf16.mxu0 %v1424_v34  ;;  %v271_v23 = vld [vmem:[%s1984_s1 + $0x38] sm:$0xff]  ;;  %v596_v24 = vld [vmem:[%s1984_s1 + $0x1b0] sm:$0xff]  ;;  %v272_v31 = vld [vmem:[%s1984_s1 + $0x40] sm:$0xff]  ;;  %v614_v58 = vrot.slane %v1814_v14, 1  ;;  %v733_v10 = vrot.slane %v1767_v56, 2  ;;  %v735_v11 = vrot.slane %v1777_v61, 2 }
  0x19   : > { %v597_v25 = vld [vmem:[%s1984_s1 + $0x1b8] sm:$0xff]  ;;  %v613_v26 = vsel %vm487_vm0, %v611_v15, %v612_v16  ;;  %v1388_v27 = vpack.c.bf16 %v271_v23, %v270_v22  ;;  %v598_v33 = vld [vmem:[%s1984_s1 + $0x1c0] sm:$0xff]  ;;  %v274_v37 = vld [vmem:[%s1984_s1 + $0x50] sm:$0xff] }
  0x1a   : > { %1363 = vmatpush3.bf16.msra.mxu1 %v1360_v32  ;;  %v1452_v28 = vpack.c.bf16 %v597_v25, %v596_v24  ;;  %v273_v32 = vld [vmem:[%s1984_s1 + $0x48] sm:$0xff]  ;;  %v275_v38 = vld [vmem:[%s1984_s1 + $0x58] sm:$0xff]  ;;  %v600_v39 = vld [vmem:[%s1984_s1 + $0x1d0] sm:$0xff]  ;;  %v615_v2 = vsel %vm487_vm0, %v612_v16, %v614_v58  ;;  %v736_v15 = vsel %vm729_vm1, %v733_v10, %v735_v11 }
  0x1b   : > { %1427 = vmatpush3.bf16.msra.mxu0 %v1424_v34  ;;  %1365 = vmatprep.subr.bf16.mxu1 %v1364_v40  ;;  %v599_v34 = vld [vmem:[%s1984_s1 + $0x1c8] sm:$0xff]  ;;  %v1392_v35 = vpack.c.bf16 %v273_v32, %v272_v31  ;;  %v276_v43 = vld [vmem:[%s1984_s1 + $0x60] sm:$0xff]  ;;  %v278_v49 = vld [vmem:[%s1984_s1 + $0x70] sm:$0xff] }
  0x1c   : > { %1429 = vmatprep.subr.bf16.mxu0 %v1428_v41  ;;  %v1456_v36 = vpack.c.bf16 %v599_v34, %v598_v33  ;;  %v277_v44 = vld [vmem:[%s1984_s1 + $0x68] sm:$0xff]  ;;  %v602_v45 = vld [vmem:[%s1984_s1 + $0x1e0] sm:$0xff]  ;;  %v279_v50 = vld [vmem:[%s1984_s1 + $0x78] sm:$0xff] }
  0x1d   : > { %v604_v51 = vld [vmem:[%s1984_s1 + $0x1f0] sm:$0xff]  ;;  %v713_v55 = vld [vmem:[%s1984_s1 + $0x200] sm:$0xff]  ;;  %v714_v57 = vld [vmem:[%s1984_s1 + $0x208] sm:$0xff] }
  0x1e   : > { %1367 = vmatpush3.bf16.msra.mxu1 %v1364_v40  ;;  %v601_v40 = vld [vmem:[%s1984_s1 + $0x1d8] sm:$0xff]  ;;  %v263_v60 = vld [vmem:[%s1697_s11 + $0x48] sm:$0xff]  ;;  %v715_v63 = vld [vmem:[%s1984_s1 + $0x210] sm:$0xff] }
  0x1f   : > { %1431 = vmatpush3.bf16.msra.mxu0 %v1428_v41  ;;  %1369 = vmatprep.subr.bf16.mxu1 %v1368_v46  ;;  %v1396_v41 = vpack.c.bf16 %v275_v38, %v274_v37  ;;  %v1460_v42 = vpack.c.bf16 %v601_v40, %v600_v39  ;;  %v716_v0 = vld [vmem:[%s1984_s1 + $0x218] sm:$0xff]  ;;  %v618_v3 = vrot.slane %v263_v60, 1  ;;  %v725_v22 = vld [vmem:[%s1984_s1 + $0x260] sm:$0xff]  ;;  %v726_v23 = vld [vmem:[%s1984_s1 + $0x268] sm:$0xff]  ;;  %v843_v40 = vlaneseq }
  0x20   : > { %1433 = vmatprep.subr.bf16.mxu0 %v1432_v47  ;;  %v1476_v5 = vpack.c.bf16 %v716_v0, %v715_v63  ;;  %v1496_v24 = vpack.c.bf16 %v726_v23, %v725_v22  ;;  %v727_v25 = vld [vmem:[%s1984_s1 + $0x270] sm:$0xff] }
  0x22   : > { %1371 = vmatpush3.bf16.msra.mxu1 %v1368_v46  ;;  %v603_v46 = vld [vmem:[%s1984_s1 + $0x1e8] sm:$0xff] }
  0x23   : > { %1435 = vmatpush3.bf16.msra.mxu0 %v1432_v47  ;;  %1373 = vmatprep.subr.bf16.mxu1 %v1372_v52  ;;  %v1400_v47 = vpack.c.bf16 %v277_v44, %v276_v43  ;;  %v1464_v48 = vpack.c.bf16 %v603_v46, %v602_v45 }
  0x24   : > { %1437 = vmatprep.subr.bf16.mxu0 %v1436_v53 }
  0x26   : > { %1375 = vmatpush3.bf16.msra.mxu1 %v1372_v52  ;;  %v605_v52 = vld [vmem:[%s1984_s1 + $0x1f8] sm:$0xff] }
  0x27   : > { %1439 = vmatpush3.bf16.msra.mxu0 %v1436_v53  ;;  %1377 = vmatprep.subr.bf16.mxu1 %v1376_v59  ;;  %v1404_v53 = vpack.c.bf16 %v279_v50, %v278_v49  ;;  %v1468_v54 = vpack.c.bf16 %v605_v52, %v604_v51  ;;  %v1594_v50 = vmov 0.0  }
  0x28   : > { %1441 = vmatprep.subr.bf16.mxu0 %v1440_v62 }
  0x29   : > { %1187 = vmatmul.mubr.f32.vlgmr.msra.gmra.mrb[0].mxu1 %v1795_v4  ;;  %v730_v4 = vrot.slane %v1716_v29, 2 }
  0x2a   : > { %1379 = vmatpush3.bf16.msra.mxu1 %v1376_v59  ;;  %1263 = vmatmul.mubr.f32.vlgmr.msra.gmra.mrb[0].mxu0 %v492_v6  ;;  %v1472_v59 = vpack.c.bf16 %v714_v57, %v713_v55  ;;  %v717_v6 = vld [vmem:[%s1984_s1 + $0x220] sm:$0xff] }
  0x2b   : > { %1443 = vmatpush3.bf16.msra.mxu0 %v1440_v62  ;;  %1381 = vmatprep.subr.bf16.mxu1 %v1380_v7  ;;  %v616_v62 = vrot.slane %v1820_v18, 1 }
  0x2c   : > { %1445 = vmatprep.subr.bf16.mxu0 %v1444_v9  ;;  %1189 = vmatprep.mubr.f32.mxu1 %v1814_v14  ;;  %v720_v14 = vld [vmem:[%s1984_s1 + $0x238] sm:$0xff] }
  0x2d   : > { %1265 = vmatprep.mubr.f32.mxu0 %v494_v17  ;;  %1190 = vmatmul.mubr.f32.gmra.mrb[2].mxu1 %v1820_v18  ;;  %v617_v8 = vsel %vm487_vm0, %v614_v58, %v616_v62  ;;  %v619_v12 = vsel %vm487_vm0, %v616_v62, %v618_v3  ;;  %v721_v17 = vld [vmem:[%s1984_s1 + $0x240] sm:$0xff] }
  0x2e   : > { %1383 = vmatpush3.bf16.msra.mxu1 %v1380_v7  ;;  %1266 = vmatmul.mubr.f32.gmra.mrb[2].mxu0 %v496_v20  ;;  %v718_v7 = vld [vmem:[%s1984_s1 + $0x228] sm:$0xff]  ;;  %v724_v20 = vld [vmem:[%s1984_s1 + $0x258] sm:$0xff] }
  0x2f   : > { %1447 = vmatpush3.bf16.msra.mxu0 %v1444_v9  ;;  %1385 = vmatprep.subr.bf16.mxu1 %v1384_v19  ;;  %v731_v9 = vrot.slane %v1719_v30, 2  ;;  %v1480_v13 = vpack.c.bf16 %v718_v7, %v717_v6 }
  0x30   : > { %1449 = vmatprep.subr.bf16.mxu0 %v1448_v21  ;;  %1224 = vmatprep.mubr.f32.mxu1 %v1716_v29  ;;  %v719_v29 = vld [vmem:[%s1984_s1 + $0x230] sm:$0xff] }
  0x31   : > { %1300 = vmatprep.mubr.f32.mxu0 %v613_v26  ;;  %v1484_v16 = vpack.c.bf16 %v720_v14, %v719_v29  ;;  %v728_v26 = vld [vmem:[%s1984_s1 + $0x278] sm:$0xff]  ;;  %v734_v32 = vsel %vm729_vm1, %v731_v9, %v733_v10 }
  0x32   : > { %1387 = vmatpush3.bf16.msra.mxu1 %v1384_v19  ;;  %v723_v19 = vld [vmem:[%s1984_s1 + $0x250] sm:$0xff] }
  0x33   : > { %1451 = vmatpush3.bf16.msra.mxu0 %v1448_v21  ;;  %1389 = vmatprep.subr.bf16.mxu1 %v1388_v27  ;;  %v1492_v21 = vpack.c.bf16 %v724_v20, %v723_v19 }
  0x34   : > { %1453 = vmatprep.subr.bf16.mxu0 %v1452_v28 }
  0x36   : > { %1391 = vmatpush3.bf16.msra.mxu1 %v1388_v27  ;;  %v1500_v27 = vpack.c.bf16 %v728_v26, %v727_v25 }
  0x37   : > { %1455 = vmatpush3.bf16.msra.mxu0 %v1452_v28  ;;  %1393 = vmatprep.subr.bf16.mxu1 %v1392_v35  ;;  %v737_v28 = vrot.slane %v1786_v1, 2 }
  0x38   : > { %1457 = vmatprep.subr.bf16.mxu0 %v1456_v36 }
  0x39   : > { %v738_v31 = vsel %vm729_vm1, %v735_v11, %v737_v28 }
  0x3a   : > { %1395 = vmatpush3.bf16.msra.mxu1 %v1392_v35 }
  0x3b   : > { %1459 = vmatpush3.bf16.msra.mxu0 %v1456_v36  ;;  %1397 = vmatprep.subr.bf16.mxu1 %v1396_v41 }
  0x3c   : > { %1461 = vmatprep.subr.bf16.mxu0 %v1460_v42 }
  0x3e   : > { %1399 = vmatpush3.bf16.msra.mxu1 %v1396_v41  ;;  %v844_v41 = vand.u32 127, %v843_v40 }
  0x3f   : > { %1463 = vmatpush3.bf16.msra.mxu0 %v1460_v42  ;;  %1401 = vmatprep.subr.bf16.mxu1 %v1400_v47 }
  0x40   : > { %1465 = vmatprep.subr.bf16.mxu0 %v1464_v48  ;;  %vm845_vm2 = vcmp.lt.s32.totalorder %v844_v41, 8 }
  0x41   : > { %v1048_v51 = vsel %vm845_vm2, 1.0, %v1594_v50 }
  0x42   : > { %1403 = vmatpush3.bf16.msra.mxu1 %v1400_v47 }
  0x43   : > { %1467 = vmatpush3.bf16.msra.mxu0 %v1464_v48  ;;  %1405 = vmatprep.subr.bf16.mxu1 %v1404_v53 }
  0x44   : > { %1469 = vmatprep.subr.bf16.mxu0 %v1468_v54 }
  0x46   : > { %1407 = vmatpush3.bf16.msra.mxu1 %v1404_v53 }
  0x47   : > { %1471 = vmatpush3.bf16.msra.mxu0 %v1468_v54  ;;  %1504 = vmatprep.subr.bf16.mxu1 %v1472_v59 }
  0x48   : > { %1473 = vmatprep.subr.bf16.mxu0 %v1472_v59 }
  0x49   : > { %1225 = vmatmul.mubr.f32.vlgmr.msra.gmra.mrb[0].mxu1 %v1719_v30  ;;  %v1047_v30 = vld [vmem:[%s1985_s2] ss:$0 sm:$0xff] }
  0x4a   : > { %1301 = vmatmul.mubr.f32.vlgmr.msra.gmra.mrb[0].mxu0 %v615_v2  ;;  %1512 = vmatpush3.bf16.msra.mxu1 %v1472_v59 }
  0x4b   : > { %1475 = vmatpush3.bf16.msra.mxu0 %v1472_v59  ;;  %1227 = vmatprep.mubr.f32.mxu1 %v1767_v56  ;;  %v732_v56 = vsel %vm729_vm1, %v730_v4, %v731_v9 }
  0x4c   : > { %1303 = vmatprep.mubr.f32.mxu0 %v617_v8  ;;  %1477 = vmatprep.subr.bf16.mxu0 %v1476_v5 }
  0x4d   : > { %1228 = vmatmul.mubr.f32.gmra.mrb[2].mxu1 %v1777_v61  ;;  %1505 = vmatprep.subr.bf16.mxu1 %v1476_v5  ;;  %v722_v61 = vld [vmem:[%s1984_s1 + $0x248] sm:$0xff] }
  0x4e   : > { %1304 = vmatmul.mubr.f32.gmra.mrb[2].mxu0 %v619_v12  ;;  %1513 = vmatpush3.bf16.msra.mxu1 %v1476_v5  ;;  %v1488_v18 = vpack.c.bf16 %v722_v61, %v721_v17 }
  0x4f   : > { %1479 = vmatpush3.bf16.msra.mxu0 %v1476_v5  ;;  %1506 = vmatprep.subr.bf16.mxu1 %v1480_v13 }
  0x50   : > { %1481 = vmatprep.subr.bf16.mxu0 %v1480_v13  ;;  %1338 = vmatprep.mubr.f32.mxu0 %v732_v56 }
  0x51   : > { %1341 = vmatprep.mubr.f32.mxu1 %v736_v15 }
  0x52   : > { %1514 = vmatpush3.bf16.msra.mxu1 %v1480_v13 }
  0x53   : > { %1483 = vmatpush3.bf16.msra.mxu0 %v1480_v13  ;;  %1507 = vmatprep.subr.bf16.mxu1 %v1484_v16 }
  0x54   : > { %1485 = vmatprep.subr.bf16.mxu0 %v1484_v16 }
  0x56   : > { %1515 = vmatpush3.bf16.msra.mxu1 %v1484_v16 }
  0x57   : > { %1487 = vmatpush3.bf16.msra.mxu0 %v1484_v16  ;;  %1508 = vmatprep.subr.bf16.mxu1 %v1488_v18 }
  0x58   : > { %1489 = vmatprep.subr.bf16.mxu0 %v1488_v18 }
  0x5a   : > { %1516 = vmatpush3.bf16.msra.mxu1 %v1488_v18 }
  0x5b   : > { %1491 = vmatpush3.bf16.msra.mxu0 %v1488_v18  ;;  %1509 = vmatprep.subr.bf16.mxu1 %v1492_v21 }
  0x5c   : > { %1493 = vmatprep.subr.bf16.mxu0 %v1492_v21 }
  0x5e   : > { %1517 = vmatpush3.bf16.msra.mxu1 %v1492_v21 }
  0x5f   : > { %1495 = vmatpush3.bf16.msra.mxu0 %v1492_v21  ;;  %1510 = vmatprep.subr.bf16.mxu1 %v1496_v24 }
  0x60   : > { %1497 = vmatprep.subr.bf16.mxu0 %v1496_v24 }
  0x62   : > { %1518 = vmatpush3.bf16.msra.mxu1 %v1496_v24 }
  0x63   : > { %1499 = vmatpush3.bf16.msra.mxu0 %v1496_v24  ;;  %1511 = vmatprep.subr.bf16.mxu1 %v1500_v27 }
  0x64   : > { %1501 = vmatprep.subr.bf16.mxu0 %v1500_v27 }
  0x66   : > { %1519 = vmatpush3.bf16.msra.mxu1 %v1500_v27 }
  0x67   : > { %1503 = vmatpush3.bf16.msra.mxu0 %v1500_v27 }
  0x69   : > { %1342 = vmatmul.mubr.f32.vlgmr.msra.gmra.mrb[4].mxu1 %v738_v31  ;;  %v1049_v31 = vld [vmem:[%s1986_s3] ss:$0 sm:$0xff] }
  0x6a   : > { %1339 = vmatmul.mubr.f32.vlgmr.msra.gmra.mrb[0].mxu0 %v734_v32 }
 0x11c   : > { %v1226_v33 = vpop.f32.mrb[0].mxu1 }
 0x11d   : > { %v447_v34 = vpop.f32.mrb[1].mxu1 }
 0x120   : > { %v1229_v35 = vpop.f32.mrb[2].mxu1 }
 0x121   : > { %v1305_v36 = vpop.f32.mrb[2].mxu0  ;;  %v457_v37 = vpop.f32.mrb[3].mxu1 }
 0x122   : > { %v1522_v1 = vadd.f32 %v1305_v36, %v1229_v35  ;;  %v700_v38 = vpop.f32.mrb[3].mxu0 }
 0x123   : > { %v1524_v39 = vadd.f32 %v700_v38, %v457_v37 }
 0x13c   : > { %v1343_v42 = vpop.f32.mrb[4].mxu1 }
 0x13d   : > { %v1340_v43 = vpop.f32.mrb[0].mxu0  ;;  %v1523_v44 = vadd.f32 %v1522_v1, %v1343_v42  ;;  %v819_v45 = vpop.f32.mrb[5].mxu1 }
 0x13e   : > { %v1520_v46 = vadd.f32 %v1340_v43, %v1226_v33  ;;  %v809_v47 = vpop.f32.mrb[1].mxu0  ;;  %v1525_v48 = vadd.f32 %v1524_v39, %v819_v45  ;;  %v1050_v33 = vld [vmem:[%s1987_s4] ss:$0 sm:$0xff] }
 0x13f   : > { %v1521_v49 = vadd.f32 %v809_v47, %v447_v34  ;;  %v842_v54 = vadd.f32 %v1523_v44, %v1047_v30 }
 0x140   : > { %v841_v52 = vadd.f32 %v1525_v48, %v1047_v30  ;;  %v840_v57 = vadd.f32 %v1520_v46, %v1047_v30 }
 0x141   : > { %v839_v53 = vadd.f32 %v1521_v49, %v1047_v30  ;;  %v851_v59 = vmul.f32 %v1048_v51, %v842_v54 }
 0x142   : > { %v850_v55 = vmul.f32 %v1048_v51, %v841_v52  ;;  %v849_v60 = vmul.f32 %v1048_v51, %v840_v57 }
 0x143   : > { %v848_v58 = vmul.f32 %v1048_v51, %v839_v53 }
 0x144   : > { %856 = vadd.xlane.f32.xlu1 %v850_v55 }
 0x145   : > { %852 = vadd.xlane.f32.xlu0 %v848_v58 }
 0x148   : > { %858 = vadd.xlane.f32.xlu1 %v851_v59 }
 0x149   : > { %854 = vadd.xlane.f32.xlu0 %v849_v60 }
 0x1d1   : > { %v857_v62 = vpop.xlane.xlu1 %856 }
 0x1d2   : > { %v853_v63 = vpop.xlane.xlu0 %852  ;;  %v862_v0 = vmul.f32 0.125, %v857_v62 }
 0x1d3   : > { %v860_v2 = vmul.f32 0.125, %v853_v63 }
 0x1d4   : > { %v866_v5 = vsub.f32 %v841_v52, %v862_v0 }
 0x1d5   : > { %v864_v3 = vsub.f32 %v839_v53, %v860_v2  ;;  %v859_v6 = vpop.xlane.xlu1 %858 }
 0x1d6   : > { %v855_v7 = vpop.xlane.xlu0 %854  ;;  %v863_v8 = vmul.f32 0.125, %v859_v6  ;;  %v870_v13 = vmul.f32 %v1048_v51, %v866_v5 }
 0x1d7   : > { %v861_v4 = vmul.f32 0.125, %v855_v7  ;;  %v868_v9 = vmul.f32 %v1048_v51, %v864_v3 }
 0x1d8   : > { %v867_v11 = vsub.f32 %v842_v54, %v863_v8  ;;  %v874_v56 = vmul.f32 %v870_v13, %v870_v13 }
 0x1d9   : > { %v865_v10 = vsub.f32 %v840_v57, %v861_v4  ;;  %v872_v12 = vmul.f32 %v868_v9, %v868_v9 }
 0x1da   : > { %v871_v15 = vmul.f32 %v1048_v51, %v867_v11 }
 0x1db   : > { %876 = vadd.xlane.f32.xlu0 %v872_v12  ;;  %v869_v29 = vmul.f32 %v1048_v51, %v865_v10 }
 0x1dc   : > { %v875_v16 = vmul.f32 %v871_v15, %v871_v15 }
 0x1dd   : > { %v873_v14 = vmul.f32 %v869_v29, %v869_v29 }
 0x1df   : > { %878 = vadd.xlane.f32.xlu1 %v873_v14  ;;  %880 = vadd.xlane.f32.xlu0 %v874_v56 }
 0x1e3   : > { %882 = vadd.xlane.f32.xlu1 %v875_v16 }
 0x268   : > { %v877_v17 = vpop.xlane.xlu0 %876 }
 0x269   : > { %v884_v61 = vmul.f32 0.125, %v877_v17 }
 0x26b   : > { %v888_v18 = vadd.f32 1e-05, %v884_v61 }
 0x26c   : > { %v881_v19 = vpop.xlane.xlu0 %880  ;;  %v879_v20 = vpop.xlane.xlu1 %878 }
 0x26d   : > { %1562 = vrsqrt.f32 %v888_v18  ;;  %v886_v21 = vmul.f32 0.125, %v881_v19  ;;  %v885_v22 = vmul.f32 0.125, %v879_v20 }
 0x26f   : > { %v890_v23 = vadd.f32 1e-05, %v886_v21  ;;  %v889_v24 = vadd.f32 1e-05, %v885_v22 }
 0x270   : > { %v883_v25 = vpop.xlane.xlu1 %882 }
 0x271   : > { %1564 = vrsqrt.f32 %v890_v23  ;;  %v887_v26 = vmul.f32 0.125, %v883_v25 }
 0x272   : > { %1566 = vrsqrt.f32 %v889_v24 }
 0x273   : > { %v891_v27 = vadd.f32 1e-05, %v887_v26 }
 0x275   : > { %1568 = vrsqrt.f32 %v891_v27 }
 0x277   : > { %v1563_v28 = vpop.eup %1562 }
 0x278   : > { %v896_v32 = vmul.f32 %v1563_v28, %v868_v9 }
 0x27a   : > { %v907_v34 = vmul.f32 %v1049_v31, %v896_v32 }
 0x27b   : > { %v1565_v35 = vpop.eup %1564 }
 0x27c   : > { %v1567_v36 = vpop.eup %1566  ;;  %v918_v37 = vadd.f32 %v1050_v33, %v907_v34  ;;  %v898_v1 = vmul.f32 %v1565_v35, %v870_v13 }
 0x27d   : > { %v897_v38 = vmul.f32 %v1567_v36, %v869_v29 }
 0x27e   : > { %v922_v39 = vmax.f32 %v918_v37, 0.0  ;;  %v909_v40 = vmul.f32 %v1049_v31, %v898_v1 }
 0x27f   : > { %v1569_v41 = vpop.eup %1568  ;;  %v908_v42 = vmul.f32 %v1049_v31, %v897_v38 }
 0x280   : > { %952 = vst [vmem:[%s246_s6] sm:$0xff] %v922_v39  ;;  %v920_v43 = vadd.f32 %v1050_v33, %v909_v40  ;;  %v899_v30 = vmul.f32 %v1569_v41, %v871_v15 }
 0x281   : > { %v919_v44 = vadd.f32 %v1050_v33, %v908_v42 }
 0x282   : > { %v924_v45 = vmax.f32 %v920_v43, 0.0  ;;  %v910_v46 = vmul.f32 %v1049_v31, %v899_v30 }
 0x283   : > { %v923_v47 = vmax.f32 %v919_v44, 0.0 }
 0x284   : > { %954 = vst [vmem:[%s246_s6 + $0x10] sm:$0xff] %v924_v45  ;;  %v921_v48 = vadd.f32 %v1050_v33, %v910_v46 }
 0x285   : > { %953 = vst [vmem:[%s246_s6 + $0x8] sm:$0xff] %v923_v47 }
 0x286   : > { %v925_v49 = vmax.f32 %v921_v48, 0.0 }
 0x288   : > { %955 = vst [vmem:[%s246_s6 + $0x18] sm:$0xff] %v925_v49 }
 0x289 PF: > { %s15_s20 = sadd.s32 1, %s1592_s20   ;;  %s1989_s18 = smov %s1588_s19 }
 0x28a   : > { %p12_p5 = scmp.ge.s32.totalorder %s15_s20, 4   ;;  %s1990_s19 = smov %s1992_s21 }
 0x28c   :  { %14 = sbr.rel (!%p12_p5) target bundleno = 2 (0x2), region = 71 }

// kernel: _lambda_.12
= control target key start
LH: loop header
LB: loop body
LE: loop exit
PB: predicated region body
PF: predicated region fallthrough
CT: control target
= control target key end

     0   :  { %s1836_s18 = smov 0   ;;  %s1838_s19 = smov 0   ;;  %s2245_s0 = inlined_call_operand.vmem [shape: f32[2,72,128], index: 0, kind: input, shape index: {}]   ;;  %s2246_s1 = inlined_call_operand.vmem [shape: f32[640,128], index: 1, kind: input, shape index: {}]   ;;  %s2247_s2 = inlined_call_operand.vmem [shape: f32[1,128], index: 2, kind: input, shape index: {}]   ;;  %s2248_s3 = inlined_call_operand.vmem [shape: f32[1,128], index: 3, kind: input, shape index: {}]   ;;  %s2249_s4 = inlined_call_operand.vmem [shape: f32[1,128], index: 4, kind: input, shape index: {}]   ;;  %s2250_s5 = inlined_call_operand.vmem [shape: f32[2,64,128], index: 5, kind: output, shape index: {}]  }
   0x1   :  { %s1840_s20 = smov 0  }
   0x2 LB: > { %s27_s21 = sadd.s32 1, %s1800_s19  ;;  %p1199_p0 = scmp.ge.s32.totalorder %s1804_s20, 1  ;;  %s1804_s20 = sphi %s1840_s20, %s15_s20   ;;  %s1800_s19 = sphi %s1838_s19, %s2252_s19   ;;  %s1796_s18 = sphi %s1836_s18, %s2251_s18  }
   0x3   : > { %p29_p1 = scmp.ge.s32.totalorder %s27_s21, 2  ;;  %p201_p2 = scmp.lt.s32.totalorder %s1804_s20, 3 }
   0x5   : > { %s2254_s21 = smov (%p29_p1, %s27_s21), 0  ;;  %p202_p3 = pnand %p1199_p0, %p201_p2 }
   0x6   : > { %v275_v0 = vld [vmem:[%s2246_s1 + $0x80] sm:$0xff] (!%p202_p3)  ;;  %v276_v1 = vld [vmem:[%s2246_s1 + $0x88] sm:$0xff] (!%p202_p3)  ;;  %p233_p4 = scmp.lt.s32.totalorder (!%p202_p3), %s1796_s18, 1  ;;  %v277_v5 = vld [vmem:[%s2246_s1 + $0x90] sm:$0xff] (!%p202_p3)  ;;  %vm300_vm0 = vcmask (!%p202_p3), 1046528   ;;  %vm552_vm1 = vcmask (!%p202_p3), 1045504  }
   0x7   : > { %205 = sbr.rel (%p202_p3) target bundleno = 334 (0x14e), region = 40  ;;  %v536_v2 = vld [vmem:[%s2246_s1 + $0x100] sm:$0xff] (!%p202_p3)  ;;  %v1549_v3 = vpack.c.bf16 (!%p202_p3), %v276_v1, %v275_v0  ;;  %v537_v4 = vld [vmem:[%s2246_s1 + $0x108] sm:$0xff] (!%p202_p3)  ;;  %v278_v6 = vld [vmem:[%s2246_s1 + $0x98] sm:$0xff] (!%p202_p3)  ;;  %vm862_vm2 = vcmask (!%p202_p3), 1043456   ;;  %vm707_vm3 = vcmask (!%p202_p3), 1044480  }
   0x8   : > { %v1613_v7 = vpack.c.bf16 (!%p202_p3), %v537_v4, %v536_v2  ;;  %v1553_v8 = vpack.c.bf16 (!%p202_p3), %v278_v6, %v277_v5  ;;  %v538_v9 = vld [vmem:[%s2246_s1 + $0x110] sm:$0xff] (!%p202_p3)  ;;  %v539_v10 = vld [vmem:[%s2246_s1 + $0x118] sm:$0xff] (!%p202_p3)  ;;  %v279_v11 = vld [vmem:[%s2246_s1 + $0xa0] sm:$0xff] (!%p202_p3) }
   0x9   : > { %1550 = vmatprep.subr.bf16.mxu1 (!%p202_p3), %v1549_v3  ;;  %v1617_v12 = vpack.c.bf16 (!%p202_p3), %v539_v10, %v538_v9  ;;  %v280_v13 = vld [vmem:[%s2246_s1 + $0xa8] sm:$0xff] (!%p202_p3)  ;;  %v540_v14 = vld [vmem:[%s2246_s1 + $0x120] sm:$0xff] (!%p202_p3)  ;;  %v281_v18 = vld [vmem:[%s2246_s1 + $0xb0] sm:$0xff] (!%p202_p3) }
   0xa   : > { %v541_v15 = vld [vmem:[%s2246_s1 + $0x128] sm:$0xff] (!%p202_p3)  ;;  %1614 = vmatprep.subr.bf16.mxu0 (!%p202_p3), %v1613_v7  ;;  %1552 = vmatpush3.bf16.msra.mxu1 (!%p202_p3), %v1549_v3  ;;  %v1557_v16 = vpack.c.bf16 (!%p202_p3), %v280_v13, %v279_v11  ;;  %v282_v19 = vld [vmem:[%s2246_s1 + $0xb8] sm:$0xff] (!%p202_p3)  ;;  %v542_v20 = vld [vmem:[%s2246_s1 + $0x130] sm:$0xff] (!%p202_p3) }
   0xb   : > { %1616 = vmatpush3.bf16.msra.mxu0 (!%p202_p3), %v1613_v7  ;;  %1554 = vmatprep.subr.bf16.mxu1 (!%p202_p3), %v1553_v8  ;;  %v1621_v17 = vpack.c.bf16 (!%p202_p3), %v541_v15, %v540_v14  ;;  %v543_v21 = vld [vmem:[%s2246_s1 + $0x138] sm:$0xff] (!%p202_p3)  ;;  %v1561_v22 = vpack.c.bf16 (!%p202_p3), %v282_v19, %v281_v18  ;;  %v283_v24 = vld [vmem:[%s2246_s1 + $0xc0] sm:$0xff] (!%p202_p3)  ;;  %v284_v25 = vld [vmem:[%s2246_s1 + $0xc8] sm:$0xff] (!%p202_p3) }
   0xc   : > { %1618 = vmatprep.subr.bf16.mxu0 (!%p202_p3), %v1617_v12  ;;  %v1625_v23 = vpack.c.bf16 (!%p202_p3), %v543_v21, %v542_v20  ;;  %v544_v27 = vld [vmem:[%s2246_s1 + $0x140] sm:$0xff] (!%p202_p3)  ;;  %v545_v28 = vld [vmem:[%s2246_s1 + $0x148] sm:$0xff] (!%p202_p3)  ;;  %v1565_v34 = vpack.c.bf16 (!%p202_p3), %v284_v25, %v283_v24  ;;  %v285_v36 = vld [vmem:[%s2246_s1 + $0xd0] sm:$0xff] (!%p202_p3) }
   0xd   : > { %v1629_v35 = vpack.c.bf16 (!%p202_p3), %v545_v28, %v544_v27  ;;  %v286_v37 = vld [vmem:[%s2246_s1 + $0xd8] sm:$0xff] (!%p202_p3)  ;;  %v546_v40 = vld [vmem:[%s2246_s1 + $0x150] sm:$0xff] (!%p202_p3)  ;;  %v287_v46 = vld [vmem:[%s2246_s1 + $0xe0] sm:$0xff] (!%p202_p3) }
   0xe   : > { %s2256_s18 = smov (!%p233_p4, %s1796_s18), 1  ;;  %1556 = vmatpush3.bf16.msra.mxu1 %v1553_v8  ;;  %v547_v41 = vld [vmem:[%s2246_s1 + $0x158] sm:$0xff]  ;;  %v1569_v44 = vpack.c.bf16 %v286_v37, %v285_v36  ;;  %v288_v47 = vld [vmem:[%s2246_s1 + $0xe8] sm:$0xff]  ;;  %v548_v49 = vld [vmem:[%s2246_s1 + $0x160] sm:$0xff] }
   0xf   : > { %s1757_s25 = smul.u32 72, %s2256_s18  ;;  %1620 = vmatpush3.bf16.msra.mxu0 %v1617_v12  ;;  %1558 = vmatprep.subr.bf16.mxu1 %v1557_v16  ;;  %v1633_v45 = vpack.c.bf16 %v547_v41, %v546_v40  ;;  %v549_v50 = vld [vmem:[%s2246_s1 + $0x168] sm:$0xff]  ;;  %v1573_v51 = vpack.c.bf16 %v288_v47, %v287_v46  ;;  %v289_v53 = vld [vmem:[%s2246_s1 + $0xf0] sm:$0xff]  ;;  %v290_v54 = vld [vmem:[%s2246_s1 + $0xf8] sm:$0xff]  ;;  %s1208_s26 = sshll.u32 %s2256_s18, 6 }
  0x10   : > { %1622 = vmatprep.subr.bf16.mxu0 %v1621_v17  ;;  %v1637_v52 = vpack.c.bf16 %v549_v50, %v548_v49  ;;  %v550_v55 = vld [vmem:[%s2246_s1 + $0x170] sm:$0xff]  ;;  %v551_v56 = vld [vmem:[%s2246_s1 + $0x178] sm:$0xff]  ;;  %v1577_v57 = vpack.c.bf16 %v290_v54, %v289_v53  ;;  %v259_v60 = vld [vmem:[%s2246_s1] sm:$0xff]  ;;  %s246_s29 = scalar_lea.vmem %s2250_s5, %s1208_s26 }
  0x11   : > { %s1908_s11 = scalar_lea.vmem %s2245_s0, %s1757_s25  ;;  %v1641_v59 = vpack.c.bf16 %v551_v56, %v550_v55  ;;  %v260_v61 = vld [vmem:[%s2246_s1 + $0x8] sm:$0xff]  ;;  %v691_v62 = vld [vmem:[%s2246_s1 + $0x180] sm:$0xff]  ;;  %v261_v7 = vld [vmem:[%s2246_s1 + $0x10] sm:$0xff] }
  0x12   : > { %v1917_v26 = vld [vmem:[%s1908_s11] sm:$0xff]  ;;  %v1926_v29 = vld [vmem:[%s1908_s11 + $0x8] sm:$0xff]  ;;  %1560 = vmatpush3.bf16.msra.mxu1 %v1557_v16  ;;  %v1980_v58 = vld [vmem:[%s1908_s11 + $0x10] sm:$0xff]  ;;  %v1581_v3 = vpack.c.bf16 %v260_v61, %v259_v60 }
  0x13   : > { %v301_v30 = vrot.slane %v1917_v26, 1  ;;  %v553_v31 = vrot.slane %v1917_v26, 2  ;;  %v302_v32 = vrot.slane %v1926_v29, 1  ;;  %v554_v33 = vrot.slane %v1926_v29, 2  ;;  %1624 = vmatpush3.bf16.msra.mxu0 %v1621_v17  ;;  %1562 = vmatprep.subr.bf16.mxu1 %v1561_v22  ;;  %v692_v63 = vld [vmem:[%s2246_s1 + $0x188] sm:$0xff]  ;;  %v1996_v1 = vld [vmem:[%s1908_s11 + $0x18] sm:$0xff] }
  0x14   : > { %1626 = vmatprep.subr.bf16.mxu0 %v1625_v23  ;;  %v863_v42 = vrot.slane %v1917_v26, 4  ;;  %v864_v43 = vrot.slane %v1926_v29, 4  ;;  %v304_v0 = vrot.slane %v1980_v58, 1  ;;  %v866_v2 = vrot.slane %v1980_v58, 4  ;;  %v2001_v5 = vld [vmem:[%s1908_s11 + $0x20] sm:$0xff]  ;;  %v262_v8 = vld [vmem:[%s2246_s1 + $0x18] sm:$0xff] }
  0x15   : > { %v303_v38 = vsel %vm300_vm0, %v301_v30, %v302_v32  ;;  %v555_v39 = vsel %vm552_vm1, %v553_v31, %v554_v33  ;;  %v556_v4 = vrot.slane %v1980_v58, 2  ;;  %v1645_v6 = vpack.c.bf16 %v692_v63, %v691_v62  ;;  %v693_v9 = vld [vmem:[%s2246_s1 + $0x190] sm:$0xff]  ;;  %v694_v10 = vld [vmem:[%s2246_s1 + $0x198] sm:$0xff]  ;;  %v2022_v15 = vld [vmem:[%s1908_s11 + $0x28] sm:$0xff] }
  0x16   : > { %1361 = vmatprep.mubr.f32.mxu1 %v303_v38  ;;  %1449 = vmatprep.mubr.f32.mxu0 %v555_v39  ;;  %v1959_v48 = vsel %vm862_vm2, %v863_v42, %v864_v43  ;;  %v306_v11 = vrot.slane %v1996_v1, 1  ;;  %v305_v12 = vsel %vm300_vm0, %v302_v32, %v304_v0  ;;  %v558_v13 = vrot.slane %v1996_v1, 2  ;;  %v2034_v20 = vld [vmem:[%s1908_s11 + $0x30] sm:$0xff]  ;;  %v695_v24 = vld [vmem:[%s2246_s1 + $0x1a0] sm:$0xff]  ;;  %v696_v25 = vld [vmem:[%s2246_s1 + $0x1a8] sm:$0xff] }
  0x17   : > { %1564 = vmatpush3.bf16.msra.mxu1 %v1561_v22  ;;  %1628 = vmatpush3.bf16.msra.mxu0 %v1625_v23  ;;  %v308_v14 = vrot.slane %v2001_v5, 1  ;;  %v2027_v16 = vsel %vm862_vm2, %v864_v43, %v866_v2  ;;  %v557_v17 = vsel %vm552_vm1, %v554_v33, %v556_v4  ;;  %v1585_v18 = vpack.c.bf16 %v262_v8, %v261_v7  ;;  %v263_v22 = vld [vmem:[%s2246_s1 + $0x20] sm:$0xff]  ;;  %v264_v23 = vld [vmem:[%s2246_s1 + $0x28] sm:$0xff]  ;;  %v265_v40 = vld [vmem:[%s2246_s1 + $0x30] sm:$0xff] }
  0x18   : > { %1566 = vmatprep.subr.bf16.mxu1 %v1565_v34  ;;  %1630 = vmatprep.subr.bf16.mxu0 %v1629_v35  ;;  %v560_v19 = vrot.slane %v2001_v5, 2  ;;  %v1649_v21 = vpack.c.bf16 %v694_v10, %v693_v9  ;;  %v307_v27 = vsel %vm300_vm0, %v304_v0, %v306_v11  ;;  %v310_v28 = vrot.slane %v2022_v15, 1  ;;  %v2060_v38 = vld [vmem:[%s1908_s11 + $0x40] sm:$0xff]  ;;  %v266_v41 = vld [vmem:[%s2246_s1 + $0x38] sm:$0xff]  ;;  %v697_v42 = vld [vmem:[%s2246_s1 + $0x1b0] sm:$0xff] }
  0x19   : > { %v559_v30 = vsel %vm552_vm1, %v556_v4, %v558_v13  ;;  %v309_v31 = vsel %vm300_vm0, %v306_v11, %v308_v14  ;;  %v562_v32 = vrot.slane %v2022_v15, 2  ;;  %v312_v33 = vrot.slane %v2034_v20, 1  ;;  %v698_v43 = vld [vmem:[%s2246_s1 + $0x1b8] sm:$0xff]  ;;  %v267_v55 = vld [vmem:[%s2246_s1 + $0x40] sm:$0xff]  ;;  %v268_v56 = vld [vmem:[%s2246_s1 + $0x48] sm:$0xff] }
  0x1a   : > { %v561_v36 = vsel %vm552_vm1, %v558_v13, %v560_v19  ;;  %v564_v37 = vrot.slane %v2034_v20, 2  ;;  %v1653_v39 = vpack.c.bf16 %v696_v25, %v695_v24  ;;  %v316_v50 = vrot.slane %v2060_v38, 1  ;;  %v269_v7 = vld [vmem:[%s2246_s1 + $0x50] sm:$0xff]  ;;  %v270_v8 = vld [vmem:[%s2246_s1 + $0x58] sm:$0xff] }
  0x1b   : > { %1568 = vmatpush3.bf16.msra.mxu1 %v1565_v34  ;;  %1632 = vmatpush3.bf16.msra.mxu0 %v1629_v35  ;;  %v2055_v34 = vld [vmem:[%s1908_s11 + $0x38] sm:$0xff]  ;;  %v1589_v35 = vpack.c.bf16 %v264_v23, %v263_v22  ;;  %v563_v46 = vsel %vm552_vm1, %v560_v19, %v562_v32  ;;  %v313_v47 = vsel %vm300_vm0, %v310_v28, %v312_v33  ;;  %v568_v53 = vrot.slane %v2060_v38, 2  ;;  %v701_v9 = vld [vmem:[%s2246_s1 + $0x1d0] sm:$0xff]  ;;  %v704_v19 = vld [vmem:[%s2246_s1 + $0x1e8] sm:$0xff] }
  0x1c   : > { %1570 = vmatprep.subr.bf16.mxu1 %v1569_v44  ;;  %1634 = vmatprep.subr.bf16.mxu0 %v1633_v45  ;;  %v566_v49 = vrot.slane %v2055_v34, 2  ;;  %v1657_v54 = vpack.c.bf16 %v698_v43, %v697_v42  ;;  %v708_v63 = vrot.slane %v1917_v26, 3  ;;  %v709_v0 = vrot.slane %v1926_v29, 3  ;;  %v702_v10 = vld [vmem:[%s2246_s1 + $0x1d8] sm:$0xff]  ;;  %v273_v23 = vld [vmem:[%s2246_s1 + $0x70] sm:$0xff] }
  0x1d   : > { %v1665_v13 = vpack.c.bf16 %v702_v10, %v701_v9  ;;  %v705_v24 = vld [vmem:[%s2246_s1 + $0x1f0] sm:$0xff]  ;;  %v706_v25 = vld [vmem:[%s2246_s1 + $0x1f8] sm:$0xff]  ;;  %v717_v43 = vrot.slane %v2022_v15, 3 }
  0x1e   : > { %v567_v61 = vsel %vm552_vm1, %v564_v37, %v566_v49  ;;  %v569_v4 = vsel %vm552_vm1, %v566_v49, %v568_v53  ;;  %v710_v11 = vsel %vm707_vm3, %v708_v63, %v709_v0  ;;  %v861_v9 = vld [vmem:[%s2246_s1 + $0x278] sm:$0xff] }
  0x1f   : > { %1572 = vmatpush3.bf16.msra.mxu1 %v1569_v44  ;;  %1636 = vmatpush3.bf16.msra.mxu0 %v1633_v45  ;;  %v311_v44 = vsel %vm300_vm0, %v308_v14, %v310_v28  ;;  %v314_v45 = vrot.slane %v2055_v34, 1  ;;  %v271_v14 = vld [vmem:[%s2246_s1 + $0x60] sm:$0xff]  ;;  %v1673_v28 = vpack.c.bf16 %v706_v25, %v705_v24 }
  0x20   : > { %1574 = vmatprep.subr.bf16.mxu1 %v1573_v51  ;;  %1638 = vmatprep.subr.bf16.mxu0 %v1637_v52 }
  0x21   : > { %v315_v60 = vsel %vm300_vm0, %v312_v33, %v314_v45  ;;  %v317_v62 = vsel %vm300_vm0, %v314_v45, %v316_v50  ;;  %v851_v45 = vld [vmem:[%s2246_s1 + $0x228] sm:$0xff]  ;;  %v721_v50 = vrot.slane %v2055_v34, 3 }
  0x23   : > { %1576 = vmatpush3.bf16.msra.mxu1 %v1573_v51  ;;  %1640 = vmatpush3.bf16.msra.mxu0 %v1637_v52  ;;  %v1593_v51 = vpack.c.bf16 %v266_v41, %v265_v40  ;;  %v565_v52 = vsel %vm552_vm1, %v562_v32, %v564_v37  ;;  %v711_v32 = vrot.slane %v1980_v58, 3  ;;  %v849_v37 = vld [vmem:[%s2246_s1 + $0x218] sm:$0xff]  ;;  %v715_v40 = vrot.slane %v2001_v5, 3 }
  0x24   : > { %1578 = vmatprep.subr.bf16.mxu1 %v1577_v57  ;;  %1642 = vmatprep.subr.bf16.mxu0 %v1641_v59 }
  0x25   : > { %v718_v49 = vsel %vm707_vm3, %v715_v40, %v717_v43 }
  0x27   : > { %1580 = vmatpush3.bf16.msra.mxu1 %v1577_v57  ;;  %1644 = vmatpush3.bf16.msra.mxu0 %v1641_v59  ;;  %v699_v57 = vld [vmem:[%s2246_s1 + $0x1c0] sm:$0xff]  ;;  %v700_v59 = vld [vmem:[%s2246_s1 + $0x1c8] sm:$0xff] }
  0x28   : > { %1582 = vmatprep.subr.bf16.mxu1 %v1581_v3  ;;  %1646 = vmatprep.subr.bf16.mxu0 %v1645_v6 }
  0x2a   : > { %1362 = vmatmul.mubr.f32.vlgmr.msra.gmra.mrb[0].mxu1 %v305_v12  ;;  %1450 = vmatmul.mubr.f32.vlgmr.msra.gmra.mrb[0].mxu0 %v557_v17  ;;  %v1601_v12 = vpack.c.bf16 %v270_v8, %v269_v7  ;;  %v272_v17 = vld [vmem:[%s2246_s1 + $0x68] sm:$0xff]  ;;  %v860_v8 = vld [vmem:[%s2246_s1 + $0x270] sm:$0xff] }
  0x2b   : > { %1584 = vmatpush3.bf16.msra.mxu1 %v1581_v3  ;;  %1648 = vmatpush3.bf16.msra.mxu0 %v1645_v6  ;;  %v1597_v3 = vpack.c.bf16 %v268_v56, %v267_v55  ;;  %v1661_v6 = vpack.c.bf16 %v700_v59, %v699_v57  ;;  %v854_v56 = vld [vmem:[%s2246_s1 + $0x240] sm:$0xff]  ;;  %v855_v57 = vld [vmem:[%s2246_s1 + $0x248] sm:$0xff]  ;;  %v1705_v10 = vpack.c.bf16 %v861_v9, %v860_v8 }
  0x2c   : > { %1586 = vmatprep.subr.bf16.mxu1 %v1585_v18  ;;  %1650 = vmatprep.subr.bf16.mxu0 %v1649_v21  ;;  %v1693_v63 = vpack.c.bf16 %v855_v57, %v854_v56 }
  0x2d   : > { %1364 = vmatprep.mubr.f32.mxu1 %v307_v27  ;;  %1452 = vmatprep.mubr.f32.mxu0 %v559_v30  ;;  %v846_v30 = vld [vmem:[%s2246_s1 + $0x200] sm:$0xff] }
  0x2e   : > { %1365 = vmatmul.mubr.f32.gmra.mrb[2].mxu1 %v309_v31  ;;  %1453 = vmatmul.mubr.f32.gmra.mrb[2].mxu0 %v561_v36  ;;  %v847_v31 = vld [vmem:[%s2246_s1 + $0x208] sm:$0xff]  ;;  %v848_v36 = vld [vmem:[%s2246_s1 + $0x210] sm:$0xff] }
  0x2f   : > { %1588 = vmatpush3.bf16.msra.mxu1 %v1585_v18  ;;  %1652 = vmatpush3.bf16.msra.mxu0 %v1649_v21  ;;  %v703_v18 = vld [vmem:[%s2246_s1 + $0x1e0] sm:$0xff]  ;;  %v1605_v21 = vpack.c.bf16 %v272_v17, %v271_v14  ;;  %v1677_v33 = vpack.c.bf16 %v847_v31, %v846_v30  ;;  %v1681_v41 = vpack.c.bf16 %v849_v37, %v848_v36  ;;  %v878_v14 = vrot.slane %v2060_v38, 4 }
  0x30   : > { %1590 = vmatprep.subr.bf16.mxu1 %v1589_v35  ;;  %1654 = vmatprep.subr.bf16.mxu0 %v1653_v39  ;;  %v1669_v22 = vpack.c.bf16 %v704_v19, %v703_v18 }
  0x31   : > { %1367 = vmatprep.mubr.f32.mxu1 %v311_v44  ;;  %1455 = vmatprep.mubr.f32.mxu0 %v563_v46  ;;  %v850_v44 = vld [vmem:[%s2246_s1 + $0x220] sm:$0xff] }
  0x32   : > { %1368 = vmatmul.mubr.f32.gmra.mrb[4].mxu1 %v313_v47  ;;  %1456 = vmatmul.mubr.f32.gmra.mrb[4].mxu0 %v565_v52  ;;  %v1685_v47 = vpack.c.bf16 %v851_v45, %v850_v44  ;;  %v853_v52 = vld [vmem:[%s2246_s1 + $0x238] sm:$0xff] }
  0x33   : > { %1592 = vmatpush3.bf16.msra.mxu1 %v1589_v35  ;;  %1656 = vmatpush3.bf16.msra.mxu0 %v1653_v39  ;;  %v713_v35 = vrot.slane %v1996_v1, 3  ;;  %v712_v39 = vsel %vm707_vm3, %v709_v0, %v711_v32  ;;  %v856_v0 = vld [vmem:[%s2246_s1 + $0x250] sm:$0xff] }
  0x34   : > { %1594 = vmatprep.subr.bf16.mxu1 %v1593_v51  ;;  %1658 = vmatprep.subr.bf16.mxu0 %v1657_v54 }
  0x35   : > { %1370 = vmatprep.mubr.f32.mxu1 %v315_v60  ;;  %1458 = vmatprep.mubr.f32.mxu0 %v567_v61  ;;  %v714_v42 = vsel %vm707_vm3, %v711_v32, %v713_v35  ;;  %v716_v46 = vsel %vm707_vm3, %v713_v35, %v715_v40  ;;  %v870_v60 = vrot.slane %v2001_v5, 4  ;;  %v872_v61 = vrot.slane %v2022_v15, 4  ;;  %v1203_v32 = vld [vmem:[%s2247_s2] ss:$0 sm:$0xff] }
  0x36   : > { %1371 = vmatmul.mubr.f32.gmra.mrb[6].mxu1 %v317_v62  ;;  %1459 = vmatmul.mubr.f32.gmra.mrb[6].mxu0 %v569_v4  ;;  %v858_v4 = vld [vmem:[%s2246_s1 + $0x260] sm:$0xff] }
  0x37   : > { %1596 = vmatpush3.bf16.msra.mxu1 %v1593_v51  ;;  %1660 = vmatpush3.bf16.msra.mxu0 %v1657_v54  ;;  %v852_v51 = vld [vmem:[%s2246_s1 + $0x230] sm:$0xff]  ;;  %v723_v54 = vrot.slane %v2060_v38, 3  ;;  %v1204_v40 = vld [vmem:[%s2248_s3] ss:$0 sm:$0xff] }
  0x38   : > { %1598 = vmatprep.subr.bf16.mxu1 %v1597_v3  ;;  %1662 = vmatprep.subr.bf16.mxu0 %v1661_v6  ;;  %v1689_v55 = vpack.c.bf16 %v853_v52, %v852_v51 }
  0x39   : > { %1405 = vmatprep.mubr.f32.mxu1 %v1917_v26  ;;  %1493 = vmatprep.mubr.f32.mxu0 %v710_v11  ;;  %v274_v26 = vld [vmem:[%s2246_s1 + $0x78] sm:$0xff]  ;;  %v724_v62 = vsel %vm707_vm3, %v721_v50, %v723_v54  ;;  %v876_v11 = vrot.slane %v2055_v34, 4 }
  0x3a   : > { %v1609_v27 = vpack.c.bf16 %v274_v26, %v273_v23 }
  0x3b   : > { %1600 = vmatpush3.bf16.msra.mxu1 %v1597_v3  ;;  %1664 = vmatpush3.bf16.msra.mxu0 %v1661_v6  ;;  %v857_v3 = vld [vmem:[%s2246_s1 + $0x258] sm:$0xff]  ;;  %v859_v6 = vld [vmem:[%s2246_s1 + $0x268] sm:$0xff] }
  0x3c   : > { %1602 = vmatprep.subr.bf16.mxu1 %v1601_v12  ;;  %1666 = vmatprep.subr.bf16.mxu0 %v1665_v13  ;;  %v1701_v7 = vpack.c.bf16 %v859_v6, %v858_v4 }
  0x3f   : > { %1604 = vmatpush3.bf16.msra.mxu1 %v1601_v12  ;;  %1668 = vmatpush3.bf16.msra.mxu0 %v1665_v13  ;;  %v868_v12 = vrot.slane %v1996_v1, 4 }
  0x40   : > { %1606 = vmatprep.subr.bf16.mxu1 %v1605_v21  ;;  %1670 = vmatprep.subr.bf16.mxu0 %v1669_v22 }
  0x41   : > { %v869_v18 = vsel %vm862_vm2, %v866_v2, %v868_v12 }
  0x43   : > { %1608 = vmatpush3.bf16.msra.mxu1 %v1605_v21  ;;  %1672 = vmatpush3.bf16.msra.mxu0 %v1669_v22 }
  0x44   : > { %1610 = vmatprep.subr.bf16.mxu1 %v1609_v27  ;;  %1674 = vmatprep.subr.bf16.mxu0 %v1673_v28 }
  0x47   : > { %1612 = vmatpush3.bf16.msra.mxu1 %v1609_v27  ;;  %1676 = vmatpush3.bf16.msra.mxu0 %v1673_v28 }
  0x48   : > { %1709 = vmatprep.subr.bf16.mxu1 %v1677_v33  ;;  %1678 = vmatprep.subr.bf16.mxu0 %v1677_v33 }
  0x4a   : > { %1406 = vmatmul.mubr.f32.vlgmr.msra.gmra.mrb[0].mxu1 %v1926_v29  ;;  %1494 = vmatmul.mubr.f32.vlgmr.msra.gmra.mrb[0].mxu0 %v712_v39  ;;  %v719_v29 = vrot.slane %v2034_v20, 3 }
  0x4b   : > { %1717 = vmatpush3.bf16.msra.mxu1 %v1677_v33  ;;  %1680 = vmatpush3.bf16.msra.mxu0 %v1677_v33 }
  0x4c   : > { %1408 = vmatprep.mubr.f32.mxu1 %v1980_v58  ;;  %1496 = vmatprep.mubr.f32.mxu0 %v714_v42  ;;  %v720_v53 = vsel %vm707_vm3, %v717_v43, %v719_v29  ;;  %v722_v59 = vsel %vm707_vm3, %v719_v29, %v721_v50 }
  0x4d   : > { %1682 = vmatprep.subr.bf16.mxu0 %v1681_v41  ;;  %1710 = vmatprep.subr.bf16.mxu1 %v1681_v41 }
  0x4e   : > { %1409 = vmatmul.mubr.f32.gmra.mrb[2].mxu1 %v1996_v1  ;;  %1497 = vmatmul.mubr.f32.gmra.mrb[2].mxu0 %v716_v46  ;;  %v871_v1 = vsel %vm862_vm2, %v868_v12, %v870_v60  ;;  %v1205_v46 = vld [vmem:[%s2249_s4] ss:$0 sm:$0xff] }
  0x4f   : > { %1718 = vmatpush3.bf16.msra.mxu1 %v1681_v41  ;;  %1684 = vmatpush3.bf16.msra.mxu0 %v1681_v41 }
  0x50   : > { %1411 = vmatprep.mubr.f32.mxu1 %v2001_v5  ;;  %1499 = vmatprep.mubr.f32.mxu0 %v718_v49  ;;  %v873_v5 = vsel %vm862_vm2, %v870_v60, %v872_v61 }
  0x51   : > { %1686 = vmatprep.subr.bf16.mxu0 %v1685_v47  ;;  %1711 = vmatprep.subr.bf16.mxu1 %v1685_v47 }
  0x52   : > { %1412 = vmatmul.mubr.f32.gmra.mrb[4].mxu1 %v2022_v15  ;;  %1500 = vmatmul.mubr.f32.gmra.mrb[4].mxu0 %v720_v53  ;;  %v1697_v15 = vpack.c.bf16 %v857_v3, %v856_v0 }
  0x53   : > { %1719 = vmatpush3.bf16.msra.mxu1 %v1685_v47  ;;  %1688 = vmatpush3.bf16.msra.mxu0 %v1685_v47 }
  0x54   : > { %1414 = vmatprep.mubr.f32.mxu1 %v2034_v20  ;;  %1502 = vmatprep.mubr.f32.mxu0 %v722_v59 }
  0x55   : > { %1690 = vmatprep.subr.bf16.mxu0 %v1689_v55  ;;  %1712 = vmatprep.subr.bf16.mxu1 %v1689_v55 }
  0x56   : > { %1415 = vmatmul.mubr.f32.gmra.mrb[6].mxu1 %v2055_v34  ;;  %1503 = vmatmul.mubr.f32.gmra.mrb[6].mxu0 %v724_v62 }
  0x57   : > { %1720 = vmatpush3.bf16.msra.mxu1 %v1689_v55  ;;  %1692 = vmatpush3.bf16.msra.mxu0 %v1689_v55 }
  0x58   : > { %1713 = vmatprep.subr.bf16.mxu1 %v1693_v63  ;;  %1694 = vmatprep.subr.bf16.mxu0 %v1693_v63 }
  0x59   : > { %1537 = vmatprep.mubr.f32.mxu0 %v1959_v48  ;;  %1543 = vmatprep.mubr.f32.mxu1 %v873_v5  ;;  %v874_v48 = vrot.slane %v2034_v20, 4  ;;  %v879_v20 = vsel %vm862_vm2, %v876_v11, %v878_v14 }
  0x5b   : > { %1721 = vmatpush3.bf16.msra.mxu1 %v1693_v63  ;;  %1696 = vmatpush3.bf16.msra.mxu0 %v1693_v63  ;;  %v875_v13 = vsel %vm862_vm2, %v872_v61, %v874_v48  ;;  %v877_v17 = vsel %vm862_vm2, %v874_v48, %v876_v11 }
  0x5c   : > { %1714 = vmatprep.subr.bf16.mxu1 %v1697_v15  ;;  %1698 = vmatprep.subr.bf16.mxu0 %v1697_v15 }
  0x5f   : > { %1722 = vmatpush3.bf16.msra.mxu1 %v1697_v15  ;;  %1700 = vmatpush3.bf16.msra.mxu0 %v1697_v15 }
  0x60   : > { %1715 = vmatprep.subr.bf16.mxu1 %v1701_v7  ;;  %1702 = vmatprep.subr.bf16.mxu0 %v1701_v7 }
  0x63   : > { %1723 = vmatpush3.bf16.msra.mxu1 %v1701_v7  ;;  %1704 = vmatpush3.bf16.msra.mxu0 %v1701_v7 }
  0x64   : > { %1716 = vmatprep.subr.bf16.mxu1 %v1705_v10  ;;  %1706 = vmatprep.subr.bf16.mxu0 %v1705_v10 }
  0x67   : > { %1724 = vmatpush3.bf16.msra.mxu1 %v1705_v10  ;;  %1708 = vmatpush3.bf16.msra.mxu0 %v1705_v10 }
  0x6a   : > { %1544 = vmatmul.mubr.f32.vlgmr.msra.gmra.mrb[8].mxu1 %v875_v13  ;;  %1538 = vmatmul.mubr.f32.vlgmr.msra.gmra.mrb[0].mxu0 %v2027_v16 }
  0x6b   : > { %1546 = vmatprep.mubr.f32.mxu1 %v877_v17  ;;  %1540 = vmatprep.mubr.f32.mxu0 %v869_v18 }
  0x6e   : > { %1547 = vmatmul.mubr.f32.gmra.mrb[10].mxu1 %v879_v20  ;;  %1541 = vmatmul.mubr.f32.gmra.mrb[2].mxu0 %v871_v1 }
 0x11d   : > { %v1407_v34 = vpop.f32.mrb[0].mxu1 }
 0x11e   : > { %v497_v38 = vpop.f32.mrb[1].mxu1 }
 0x121   : > { %v1410_v19 = vpop.f32.mrb[2].mxu1 }
 0x122   : > { %v507_v21 = vpop.f32.mrb[3].mxu1 }
 0x125   : > { %v1413_v22 = vpop.f32.mrb[4].mxu1  ;;  %v1501_v23 = vpop.f32.mrb[4].mxu0 }
 0x126   : > { %v517_v58 = vpop.f32.mrb[5].mxu1  ;;  %v1729_v26 = vadd.f32 %v1501_v23, %v1413_v22  ;;  %v819_v2 = vpop.f32.mrb[5].mxu0 }
 0x127   : > { %v1731_v24 = vadd.f32 %v819_v2, %v517_v58 }
 0x129   : > { %v1416_v25 = vpop.f32.mrb[6].mxu1  ;;  %v1504_v16 = vpop.f32.mrb[6].mxu0 }
 0x12a   : > { %v527_v27 = vpop.f32.mrb[7].mxu1  ;;  %v1733_v28 = vadd.f32 %v1504_v16, %v1416_v25  ;;  %v829_v30 = vpop.f32.mrb[7].mxu0 }
 0x12b   : > { %v1735_v31 = vadd.f32 %v829_v30, %v527_v27 }
 0x13d   : > { %v1545_v33 = vpop.f32.mrb[8].mxu1  ;;  %v1539_v35 = vpop.f32.mrb[0].mxu0 }
 0x13e   : > { %v1730_v36 = vadd.f32 %v1729_v26, %v1545_v33  ;;  %v974_v37 = vpop.f32.mrb[9].mxu1  ;;  %v1725_v39 = vadd.f32 %v1539_v35, %v1407_v34  ;;  %v954_v41 = vpop.f32.mrb[1].mxu0 }
 0x13f   : > { %v1732_v42 = vadd.f32 %v1731_v24, %v974_v37  ;;  %v1726_v44 = vadd.f32 %v954_v41, %v497_v38 }
 0x140   : > { %v1013_v43 = vadd.f32 %v1730_v36, %v1203_v32  ;;  %v1009_v45 = vadd.f32 %v1725_v39, %v1203_v32 }
 0x141   : > { %v1012_v29 = vadd.f32 %v1732_v42, %v1203_v32  ;;  %v1548_v47 = vpop.f32.mrb[10].mxu1  ;;  %v1008_v50 = vadd.f32 %v1726_v44, %v1203_v32  ;;  %v1542_v51 = vpop.f32.mrb[2].mxu0 }
 0x142   : > { %v1028_v49 = vmul.f32 %v1204_v40, %v1013_v43  ;;  %v1734_v52 = vadd.f32 %v1733_v28, %v1548_v47  ;;  %v984_v53 = vpop.f32.mrb[11].mxu1  ;;  %v1024_v54 = vmul.f32 %v1204_v40, %v1009_v45  ;;  %v1727_v56 = vadd.f32 %v1542_v51, %v1410_v19  ;;  %v964_v57 = vpop.f32.mrb[3].mxu0 }
 0x143   : > { %v1027_v55 = vmul.f32 %v1204_v40, %v1012_v29  ;;  %v1736_v59 = vadd.f32 %v1735_v31, %v984_v53  ;;  %v1023_v61 = vmul.f32 %v1204_v40, %v1008_v50  ;;  %v1728_v63 = vadd.f32 %v964_v57, %v507_v21 }
 0x144   : > { %v1043_v60 = vadd.f32 %v1205_v46, %v1028_v49  ;;  %v1015_v62 = vadd.f32 %v1734_v52, %v1203_v32  ;;  %v1039_v0 = vadd.f32 %v1205_v46, %v1024_v54  ;;  %v1011_v5 = vadd.f32 %v1727_v56, %v1203_v32 }
 0x145   : > { %v1042_v3 = vadd.f32 %v1205_v46, %v1027_v55  ;;  %v1014_v15 = vadd.f32 %v1736_v59, %v1203_v32  ;;  %v1038_v6 = vadd.f32 %v1205_v46, %v1023_v61  ;;  %v1010_v8 = vadd.f32 %v1728_v63, %v1203_v32 }
 0x146   : > { %v1051_v4 = vmax.f32 %v1043_v60, 0.0  ;;  %v1030_v7 = vmul.f32 %v1204_v40, %v1015_v62  ;;  %v1047_v9 = vmax.f32 %v1039_v0, 0.0  ;;  %v1026_v48 = vmul.f32 %v1204_v40, %v1011_v5 }
 0x147   : > { %v1050_v10 = vmax.f32 %v1042_v3, 0.0  ;;  %v1029_v11 = vmul.f32 %v1204_v40, %v1014_v15  ;;  %v1046_v12 = vmax.f32 %v1038_v6, 0.0  ;;  %v1025_v14 = vmul.f32 %v1204_v40, %v1010_v8 }
 0x148   : > { %1109 = vst [vmem:[%s246_s29 + $0x28] sm:$0xff] %v1051_v4  ;;  %v1045_v13 = vadd.f32 %v1205_v46, %v1030_v7  ;;  %1105 = vst [vmem:[%s246_s29 + $0x8] sm:$0xff] %v1047_v9  ;;  %v1041_v17 = vadd.f32 %v1205_v46, %v1026_v48 }
 0x149   : > { %1108 = vst [vmem:[%s246_s29 + $0x20] sm:$0xff] %v1050_v10  ;;  %v1044_v18 = vadd.f32 %v1205_v46, %v1029_v11  ;;  %1104 = vst [vmem:[%s246_s29] sm:$0xff] %v1046_v12  ;;  %v1040_v1 = vadd.f32 %v1205_v46, %v1025_v14 }
 0x14a   : > { %v1053_v20 = vmax.f32 %v1045_v13, 0.0  ;;  %v1049_v34 = vmax.f32 %v1041_v17, 0.0 }
 0x14b   : > { %v1052_v38 = vmax.f32 %v1044_v18, 0.0  ;;  %v1048_v19 = vmax.f32 %v1040_v1, 0.0 }
 0x14c   : > { %1111 = vst [vmem:[%s246_s29 + $0x38] sm:$0xff] %v1053_v20  ;;  %1107 = vst [vmem:[%s246_s29 + $0x18] sm:$0xff] %v1049_v34 }
 0x14d   : > { %1110 = vst [vmem:[%s246_s29 + $0x30] sm:$0xff] %v1052_v38  ;;  %1106 = vst [vmem:[%s246_s29 + $0x10] sm:$0xff] %v1048_v19 }
 0x14e PF: > { %s15_s20 = sadd.s32 1, %s1804_s20   ;;  %s2251_s18 = smov %s1800_s19 }
 0x14f   : > { %p12_p5 = scmp.ge.s32.totalorder %s15_s20, 4   ;;  %s2252_s19 = smov %s2254_s21 }
 0x151   :  { %14 = sbr.rel (!%p12_p5) target bundleno = 2 (0x2), region = 71 }

// kernel: _lambda_.14
= control target key start
LH: loop header
LB: loop body
LE: loop exit
PB: predicated region body
PF: predicated region fallthrough
CT: control target
= control target key end

     0   :  { %s1641_s21 = smov 0   ;;  %s1643_s22 = smov 0   ;;  %s1998_s0 = inlined_call_operand.vmem [shape: f32[2,40,128], index: 0, kind: input, shape index: {}]   ;;  %s1999_s1 = inlined_call_operand.vmem [shape: f32[640,128], index: 1, kind: input, shape index: {}]   ;;  %s2000_s2 = inlined_call_operand.vmem [shape: f32[1,128], index: 2, kind: input, shape index: {}]   ;;  %s2001_s3 = inlined_call_operand.vmem [shape: f32[1,128], index: 3, kind: input, shape index: {}, may-alias: {3,4}]   ;;  %s2002_s4 = inlined_call_operand.vmem [shape: f32[1,128], index: 4, kind: input, shape index: {}, may-alias: {3,4}]   ;;  %s2003_s5 = inlined_call_operand.vmem [shape: f32[2,32,256], index: 5, kind: input, shape index: {}]   ;;  %s2004_s6 = inlined_call_operand.vmem [shape: f32[2,32,128], index: 6, kind: output, shape index: {}]  }
   0x1   :  { %s1645_s23 = smov 0  }
   0x2 LB: > { %s28_s3 = sadd.s32 1, %s1600_s22  ;;  %p1064_p0 = scmp.ge.s32.totalorder %s1604_s23, 1  ;;  %s1604_s23 = sphi %s1645_s23, %s16_s23   ;;  %s1600_s22 = sphi %s1643_s22, %s2006_s22   ;;  %s1596_s21 = sphi %s1641_s21, %s2005_s21  }
   0x3   : > { %p30_p1 = scmp.ge.s32.totalorder %s28_s3, 2  ;;  %p244_p2 = scmp.lt.s32.totalorder %s1604_s23, 3 }
   0x5   : > { %s2008_s3 = smov (%p30_p1, %s28_s3), 0  ;;  %p245_p3 = pnand %p1064_p0, %p244_p2 }
   0x6   : > { %v337_v0 = vld [vmem:[%s1999_s1 + $0x80] sm:$0xff] (!%p245_p3)  ;;  %v338_v1 = vld [vmem:[%s1999_s1 + $0x88] sm:$0xff] (!%p245_p3)  ;;  %p288_p4 = scmp.lt.s32.totalorder (!%p245_p3), %s1596_s21, 1  ;;  %v339_v5 = vld [vmem:[%s1999_s1 + $0x90] sm:$0xff] (!%p245_p3)  ;;  %vm358_vm0 = vcmask (!%p245_p3), 1046528   ;;  %vm558_vm1 = vcmask (!%p245_p3), 1045504  }
   0x7   : > { %248 = sbr.rel (%p245_p3) target bundleno = 326 (0x146), region = 44  ;;  %v542_v2 = vld [vmem:[%s1999_s1 + $0x100] sm:$0xff] (!%p245_p3)  ;;  %v1365_v3 = vpack.c.bf16 (!%p245_p3), %v338_v1, %v337_v0  ;;  %v543_v4 = vld [vmem:[%s1999_s1 + $0x108] sm:$0xff] (!%p245_p3)  ;;  %v340_v6 = vld [vmem:[%s1999_s1 + $0x98] sm:$0xff] (!%p245_p3)  ;;  %vm677_vm2 = vcmask (!%p245_p3), 1044480   ;;  %vm796_vm3 = vcmask (!%p245_p3), 1043456  }
   0x8   : > { %v1429_v7 = vpack.c.bf16 (!%p245_p3), %v543_v4, %v542_v2  ;;  %v1369_v8 = vpack.c.bf16 (!%p245_p3), %v340_v6, %v339_v5  ;;  %v544_v9 = vld [vmem:[%s1999_s1 + $0x110] sm:$0xff] (!%p245_p3)  ;;  %v545_v10 = vld [vmem:[%s1999_s1 + $0x118] sm:$0xff] (!%p245_p3)  ;;  %v341_v11 = vld [vmem:[%s1999_s1 + $0xa0] sm:$0xff] (!%p245_p3) }
   0x9   : > { %1366 = vmatprep.subr.bf16.mxu1 (!%p245_p3), %v1365_v3  ;;  %v1433_v12 = vpack.c.bf16 (!%p245_p3), %v545_v10, %v544_v9  ;;  %v342_v13 = vld [vmem:[%s1999_s1 + $0xa8] sm:$0xff] (!%p245_p3)  ;;  %v546_v14 = vld [vmem:[%s1999_s1 + $0x120] sm:$0xff] (!%p245_p3)  ;;  %v343_v18 = vld [vmem:[%s1999_s1 + $0xb0] sm:$0xff] (!%p245_p3) }
   0xa   : > { %v547_v15 = vld [vmem:[%s1999_s1 + $0x128] sm:$0xff] (!%p245_p3)  ;;  %1430 = vmatprep.subr.bf16.mxu0 (!%p245_p3), %v1429_v7  ;;  %1368 = vmatpush3.bf16.msra.mxu1 (!%p245_p3), %v1365_v3  ;;  %v1373_v16 = vpack.c.bf16 (!%p245_p3), %v342_v13, %v341_v11  ;;  %v344_v19 = vld [vmem:[%s1999_s1 + $0xb8] sm:$0xff] (!%p245_p3)  ;;  %v548_v20 = vld [vmem:[%s1999_s1 + $0x130] sm:$0xff] (!%p245_p3) }
   0xb   : > { %1432 = vmatpush3.bf16.msra.mxu0 (!%p245_p3), %v1429_v7  ;;  %1370 = vmatprep.subr.bf16.mxu1 (!%p245_p3), %v1369_v8  ;;  %v1437_v17 = vpack.c.bf16 (!%p245_p3), %v547_v15, %v546_v14  ;;  %v549_v21 = vld [vmem:[%s1999_s1 + $0x138] sm:$0xff] (!%p245_p3)  ;;  %v1377_v22 = vpack.c.bf16 (!%p245_p3), %v344_v19, %v343_v18  ;;  %v345_v24 = vld [vmem:[%s1999_s1 + $0xc0] sm:$0xff] (!%p245_p3)  ;;  %v346_v25 = vld [vmem:[%s1999_s1 + $0xc8] sm:$0xff] (!%p245_p3) }
   0xc   : > { %1434 = vmatprep.subr.bf16.mxu0 (!%p245_p3), %v1433_v12  ;;  %v1441_v23 = vpack.c.bf16 (!%p245_p3), %v549_v21, %v548_v20  ;;  %v550_v27 = vld [vmem:[%s1999_s1 + $0x140] sm:$0xff] (!%p245_p3)  ;;  %v551_v28 = vld [vmem:[%s1999_s1 + $0x148] sm:$0xff] (!%p245_p3)  ;;  %v1381_v34 = vpack.c.bf16 (!%p245_p3), %v346_v25, %v345_v24  ;;  %v347_v36 = vld [vmem:[%s1999_s1 + $0xd0] sm:$0xff] (!%p245_p3) }
   0xd   : > { %v1445_v35 = vpack.c.bf16 (!%p245_p3), %v551_v28, %v550_v27  ;;  %v348_v37 = vld [vmem:[%s1999_s1 + $0xd8] sm:$0xff] (!%p245_p3)  ;;  %v552_v40 = vld [vmem:[%s1999_s1 + $0x150] sm:$0xff] (!%p245_p3)  ;;  %v349_v44 = vld [vmem:[%s1999_s1 + $0xe0] sm:$0xff] (!%p245_p3) }
   0xe   : > { %s2010_s21 = smov (!%p288_p4, %s1596_s21), 1  ;;  %1372 = vmatpush3.bf16.msra.mxu1 %v1369_v8  ;;  %v553_v41 = vld [vmem:[%s1999_s1 + $0x158] sm:$0xff]  ;;  %v1385_v42 = vpack.c.bf16 %v348_v37, %v347_v36  ;;  %v350_v45 = vld [vmem:[%s1999_s1 + $0xe8] sm:$0xff]  ;;  %v554_v46 = vld [vmem:[%s1999_s1 + $0x160] sm:$0xff] }
   0xf   : > { %s1557_s25 = smul.u32 40, %s2010_s21  ;;  %1436 = vmatpush3.bf16.msra.mxu0 %v1433_v12  ;;  %1374 = vmatprep.subr.bf16.mxu1 %v1373_v16  ;;  %v1449_v43 = vpack.c.bf16 %v553_v41, %v552_v40  ;;  %v555_v47 = vld [vmem:[%s1999_s1 + $0x168] sm:$0xff]  ;;  %v1389_v48 = vpack.c.bf16 %v350_v45, %v349_v44  ;;  %v351_v50 = vld [vmem:[%s1999_s1 + $0xf0] sm:$0xff]  ;;  %v352_v51 = vld [vmem:[%s1999_s1 + $0xf8] sm:$0xff]  ;;  %s1073_s10 = sshll.u32 %s2010_s21, 6 }
  0x10   : > { %1438 = vmatprep.subr.bf16.mxu0 %v1437_v17  ;;  %v1453_v49 = vpack.c.bf16 %v555_v47, %v554_v46  ;;  %v556_v52 = vld [vmem:[%s1999_s1 + $0x170] sm:$0xff]  ;;  %v557_v53 = vld [vmem:[%s1999_s1 + $0x178] sm:$0xff]  ;;  %v1393_v54 = vpack.c.bf16 %v352_v51, %v351_v50  ;;  %v321_v57 = vld [vmem:[%s1999_s1] sm:$0xff]  ;;  %s302_s14 = scalar_lea.vmem %s2003_s5, %s1073_s10  ;;  %s1074_s17 = sshll.u32 %s2010_s21, 5 }
  0x11   : > { %s1713_s12 = scalar_lea.vmem %s1998_s0, %s1557_s25  ;;  %v1457_v56 = vpack.c.bf16 %v557_v53, %v556_v52  ;;  %v322_v58 = vld [vmem:[%s1999_s1 + $0x8] sm:$0xff]  ;;  %v661_v59 = vld [vmem:[%s1999_s1 + $0x180] sm:$0xff]  ;;  %v323_v3 = vld [vmem:[%s1999_s1 + $0x10] sm:$0xff]  ;;  %s312_s19 = scalar_lea.vmem %s2004_s6, %s1074_s17 }
  0x12   : > { %v1722_v26 = vld [vmem:[%s1713_s12] sm:$0xff]  ;;  %v1731_v29 = vld [vmem:[%s1713_s12 + $0x8] sm:$0xff]  ;;  %1376 = vmatpush3.bf16.msra.mxu1 %v1373_v16  ;;  %v1780_v55 = vld [vmem:[%s1713_s12 + $0x10] sm:$0xff]  ;;  %v1397_v63 = vpack.c.bf16 %v322_v58, %v321_v57 }
  0x13   : > { %v359_v30 = vrot.slane %v1722_v26, 1  ;;  %v559_v31 = vrot.slane %v1722_v26, 2  ;;  %v360_v32 = vrot.slane %v1731_v29, 1  ;;  %v560_v33 = vrot.slane %v1731_v29, 2  ;;  %1440 = vmatpush3.bf16.msra.mxu0 %v1437_v17  ;;  %1378 = vmatprep.subr.bf16.mxu1 %v1377_v22  ;;  %v662_v60 = vld [vmem:[%s1999_s1 + $0x188] sm:$0xff]  ;;  %v1796_v62 = vld [vmem:[%s1713_s12 + $0x18] sm:$0xff] }
  0x14   : > { %1442 = vmatprep.subr.bf16.mxu0 %v1441_v23  ;;  %v362_v61 = vrot.slane %v1780_v55, 1  ;;  %v562_v0 = vrot.slane %v1780_v55, 2  ;;  %v1800_v1 = vld [vmem:[%s1713_s12 + $0x20] sm:$0xff]  ;;  %v1461_v2 = vpack.c.bf16 %v662_v60, %v661_v59  ;;  %v324_v4 = vld [vmem:[%s1999_s1 + $0x18] sm:$0xff]  ;;  %v663_v5 = vld [vmem:[%s1999_s1 + $0x190] sm:$0xff]  ;;  %v364_v7 = vrot.slane %v1796_v62, 1 }
  0x15   : > { %v361_v38 = vsel %vm358_vm0, %v359_v30, %v360_v32  ;;  %v561_v39 = vsel %vm558_vm1, %v559_v31, %v560_v33  ;;  %v664_v6 = vld [vmem:[%s1999_s1 + $0x198] sm:$0xff]  ;;  %v564_v9 = vrot.slane %v1796_v62, 2  ;;  %v366_v10 = vrot.slane %v1800_v1, 1  ;;  %v325_v15 = vld [vmem:[%s1999_s1 + $0x20] sm:$0xff]  ;;  %v326_v16 = vld [vmem:[%s1999_s1 + $0x28] sm:$0xff] }
  0x16   : > { %1207 = vmatprep.mubr.f32.mxu1 %v361_v38  ;;  %1283 = vmatprep.mubr.f32.mxu0 %v561_v39  ;;  %v363_v8 = vsel %vm358_vm0, %v360_v32, %v362_v61  ;;  %v563_v11 = vsel %vm558_vm1, %v560_v33, %v562_v0  ;;  %v1401_v12 = vpack.c.bf16 %v324_v4, %v323_v3  ;;  %v566_v13 = vrot.slane %v1800_v1, 2  ;;  %v665_v17 = vld [vmem:[%s1999_s1 + $0x1a0] sm:$0xff]  ;;  %v666_v18 = vld [vmem:[%s1999_s1 + $0x1a8] sm:$0xff]  ;;  %v327_v28 = vld [vmem:[%s1999_s1 + $0x30] sm:$0xff] }
  0x17   : > { %1380 = vmatpush3.bf16.msra.mxu1 %v1377_v22  ;;  %1444 = vmatpush3.bf16.msra.mxu0 %v1441_v23  ;;  %v1465_v14 = vpack.c.bf16 %v664_v6, %v663_v5  ;;  %v365_v19 = vsel %vm358_vm0, %v362_v61, %v364_v7  ;;  %v565_v20 = vsel %vm558_vm1, %v562_v0, %v564_v9  ;;  %v678_v22 = vrot.slane %v1722_v26, 3  ;;  %v328_v30 = vld [vmem:[%s1999_s1 + $0x38] sm:$0xff]  ;;  %v667_v31 = vld [vmem:[%s1999_s1 + $0x1b0] sm:$0xff]  ;;  %v329_v36 = vld [vmem:[%s1999_s1 + $0x40] sm:$0xff] }
  0x18   : > { %1382 = vmatprep.subr.bf16.mxu1 %v1381_v34  ;;  %1446 = vmatprep.subr.bf16.mxu0 %v1445_v35  ;;  %v367_v21 = vsel %vm358_vm0, %v364_v7, %v366_v10  ;;  %v679_v23 = vrot.slane %v1731_v29, 3  ;;  %v1405_v24 = vpack.c.bf16 %v326_v16, %v325_v15  ;;  %v567_v25 = vsel %vm558_vm1, %v564_v9, %v566_v13  ;;  %v668_v32 = vld [vmem:[%s1999_s1 + $0x1b8] sm:$0xff]  ;;  %v330_v37 = vld [vmem:[%s1999_s1 + $0x48] sm:$0xff]  ;;  %v669_v38 = vld [vmem:[%s1999_s1 + $0x1c0] sm:$0xff] }
  0x19   : > { %v1469_v27 = vpack.c.bf16 %v666_v18, %v665_v17  ;;  %v670_v39 = vld [vmem:[%s1999_s1 + $0x1c8] sm:$0xff]  ;;  %v1413_v40 = vpack.c.bf16 %v330_v37, %v329_v36  ;;  %v671_v44 = vld [vmem:[%s1999_s1 + $0x1d0] sm:$0xff]  ;;  %v672_v45 = vld [vmem:[%s1999_s1 + $0x1d8] sm:$0xff]  ;;  %v681_v0 = vrot.slane %v1780_v55, 3  ;;  %v683_v3 = vrot.slane %v1796_v62, 3 }
  0x1a   : > { %v680_v33 = vsel %vm677_vm2, %v678_v22, %v679_v23  ;;  %v1477_v41 = vpack.c.bf16 %v670_v39, %v669_v38  ;;  %v1481_v47 = vpack.c.bf16 %v672_v45, %v671_v44  ;;  %v673_v50 = vld [vmem:[%s1999_s1 + $0x1e0] sm:$0xff]  ;;  %v674_v51 = vld [vmem:[%s1999_s1 + $0x1e8] sm:$0xff]  ;;  %v675_v57 = vld [vmem:[%s1999_s1 + $0x1f0] sm:$0xff]  ;;  %v685_v7 = vrot.slane %v1800_v1, 3 }
  0x1b   : > { %1384 = vmatpush3.bf16.msra.mxu1 %v1381_v34  ;;  %1448 = vmatpush3.bf16.msra.mxu0 %v1445_v35  ;;  %v1409_v34 = vpack.c.bf16 %v328_v30, %v327_v28  ;;  %v1473_v35 = vpack.c.bf16 %v668_v32, %v667_v31  ;;  %v1485_v53 = vpack.c.bf16 %v674_v51, %v673_v50  ;;  %v676_v58 = vld [vmem:[%s1999_s1 + $0x1f8] sm:$0xff]  ;;  %v780_v61 = vld [vmem:[%s1999_s1 + $0x200] sm:$0xff]  ;;  %v782_v4 = vld [vmem:[%s1999_s1 + $0x210] sm:$0xff]  ;;  %v798_v13 = vrot.slane %v1731_v29, 4 }
  0x1c   : > { %1386 = vmatprep.subr.bf16.mxu1 %v1385_v42  ;;  %1450 = vmatprep.subr.bf16.mxu0 %v1449_v43  ;;  %v1489_v60 = vpack.c.bf16 %v676_v58, %v675_v57  ;;  %v783_v5 = vld [vmem:[%s1999_s1 + $0x218] sm:$0xff]  ;;  %v682_v6 = vsel %vm677_vm2, %v679_v23, %v681_v0  ;;  %v784_v9 = vld [vmem:[%s1999_s1 + $0x220] sm:$0xff]  ;;  %v785_v10 = vld [vmem:[%s1999_s1 + $0x228] sm:$0xff]  ;;  %v802_v15 = vrot.slane %v1796_v62, 4  ;;  %v686_v16 = vsel %vm677_vm2, %v683_v3, %v685_v7 }
  0x1d   : > { %v1501_v17 = vpack.c.bf16 %v785_v10, %v784_v9  ;;  %v787_v18 = vld [vmem:[%s1999_s1 + $0x238] sm:$0xff]  ;;  %v790_v23 = vld [vmem:[%s1999_s1 + $0x250] sm:$0xff]  ;;  %v793_v28 = vld [vmem:[%s1999_s1 + $0x268] sm:$0xff] }
  0x1e   : > { %v794_v31 = vld [vmem:[%s1999_s1 + $0x270] sm:$0xff]  ;;  %v795_v32 = vld [vmem:[%s1999_s1 + $0x278] sm:$0xff]  ;;  %v936_v51 = vld [vmem:[%s302_s14] sm:$0xff] }
  0x1f   : > { %1388 = vmatpush3.bf16.msra.mxu1 %v1385_v42  ;;  %1452 = vmatpush3.bf16.msra.mxu0 %v1449_v43  ;;  %v331_v42 = vld [vmem:[%s1999_s1 + $0x50] sm:$0xff]  ;;  %v332_v43 = vld [vmem:[%s1999_s1 + $0x58] sm:$0xff] }
  0x20   : > { %1390 = vmatprep.subr.bf16.mxu1 %v1389_v48  ;;  %1454 = vmatprep.subr.bf16.mxu0 %v1453_v49  ;;  %v1417_v46 = vpack.c.bf16 %v332_v43, %v331_v42  ;;  %v938_v44 = vld [vmem:[%s302_s14 + $0x10] sm:$0xff]  ;;  %v943_v45 = vld [vmem:[%s302_s14 + $0x38] sm:$0xff] }
  0x23   : > { %1392 = vmatpush3.bf16.msra.mxu1 %v1389_v48  ;;  %1456 = vmatpush3.bf16.msra.mxu0 %v1453_v49  ;;  %v333_v48 = vld [vmem:[%s1999_s1 + $0x60] sm:$0xff]  ;;  %v334_v49 = vld [vmem:[%s1999_s1 + $0x68] sm:$0xff] }
  0x24   : > { %1394 = vmatprep.subr.bf16.mxu1 %v1393_v54  ;;  %1458 = vmatprep.subr.bf16.mxu0 %v1457_v56  ;;  %v1421_v52 = vpack.c.bf16 %v334_v49, %v333_v48  ;;  %v941_v48 = vld [vmem:[%s302_s14 + $0x28] sm:$0xff]  ;;  %v1070_v49 = vld [vmem:[%s2000_s2] ss:$0 sm:$0xff] }
  0x27   : > { %1396 = vmatpush3.bf16.msra.mxu1 %v1393_v54  ;;  %1460 = vmatpush3.bf16.msra.mxu0 %v1457_v56  ;;  %v335_v54 = vld [vmem:[%s1999_s1 + $0x70] sm:$0xff]  ;;  %v336_v56 = vld [vmem:[%s1999_s1 + $0x78] sm:$0xff] }
  0x28   : > { %1398 = vmatprep.subr.bf16.mxu1 %v1397_v63  ;;  %1462 = vmatprep.subr.bf16.mxu0 %v1461_v2  ;;  %v1425_v59 = vpack.c.bf16 %v336_v56, %v335_v54 }
  0x2a   : > { %1208 = vmatmul.mubr.f32.vlgmr.msra.gmra.mrb[0].mxu1 %v363_v8  ;;  %1284 = vmatmul.mubr.f32.vlgmr.msra.gmra.mrb[0].mxu0 %v563_v11  ;;  %v1497_v8 = vpack.c.bf16 %v783_v5, %v782_v4  ;;  %v684_v11 = vsel %vm677_vm2, %v681_v0, %v683_v3 }
  0x2b   : > { %1400 = vmatpush3.bf16.msra.mxu1 %v1397_v63  ;;  %1464 = vmatpush3.bf16.msra.mxu0 %v1461_v2  ;;  %v781_v63 = vld [vmem:[%s1999_s1 + $0x208] sm:$0xff] }
  0x2c   : > { %1402 = vmatprep.subr.bf16.mxu1 %v1401_v12  ;;  %1466 = vmatprep.subr.bf16.mxu0 %v1465_v14  ;;  %v1493_v2 = vpack.c.bf16 %v781_v63, %v780_v61 }
  0x2d   : > { %1210 = vmatprep.mubr.f32.mxu1 %v365_v19  ;;  %1286 = vmatprep.mubr.f32.mxu0 %v565_v20 }
  0x2e   : > { %1211 = vmatmul.mubr.f32.gmra.mrb[2].mxu1 %v367_v21  ;;  %1287 = vmatmul.mubr.f32.gmra.mrb[2].mxu0 %v567_v25  ;;  %v788_v21 = vld [vmem:[%s1999_s1 + $0x240] sm:$0xff] }
  0x2f   : > { %1404 = vmatpush3.bf16.msra.mxu1 %v1401_v12  ;;  %1468 = vmatpush3.bf16.msra.mxu0 %v1465_v14  ;;  %v797_v12 = vrot.slane %v1722_v26, 4  ;;  %v800_v14 = vrot.slane %v1780_v55, 4 }
  0x30   : > { %1406 = vmatprep.subr.bf16.mxu1 %v1405_v24  ;;  %1470 = vmatprep.subr.bf16.mxu0 %v1469_v27 }
  0x31   : > { %1245 = vmatprep.mubr.f32.mxu1 %v1722_v26  ;;  %1321 = vmatprep.mubr.f32.mxu0 %v680_v33  ;;  %v786_v26 = vld [vmem:[%s1999_s1 + $0x230] sm:$0xff]  ;;  %v803_v19 = vsel %vm796_vm3, %v800_v14, %v802_v15  ;;  %v1521_v33 = vpack.c.bf16 %v795_v32, %v794_v31  ;;  %v801_v36 = vsel %vm796_vm3, %v798_v13, %v800_v14 }
  0x32   : > { %v1505_v20 = vpack.c.bf16 %v787_v18, %v786_v26 }
  0x33   : > { %1408 = vmatpush3.bf16.msra.mxu1 %v1405_v24  ;;  %1472 = vmatpush3.bf16.msra.mxu0 %v1469_v27  ;;  %v791_v24 = vld [vmem:[%s1999_s1 + $0x258] sm:$0xff]  ;;  %v792_v27 = vld [vmem:[%s1999_s1 + $0x260] sm:$0xff] }
  0x34   : > { %1410 = vmatprep.subr.bf16.mxu1 %v1409_v34  ;;  %1474 = vmatprep.subr.bf16.mxu0 %v1473_v35  ;;  %v1513_v25 = vpack.c.bf16 %v791_v24, %v790_v23  ;;  %v1517_v30 = vpack.c.bf16 %v793_v28, %v792_v27 }
  0x37   : > { %1412 = vmatpush3.bf16.msra.mxu1 %v1409_v34  ;;  %1476 = vmatpush3.bf16.msra.mxu0 %v1473_v35  ;;  %v804_v34 = vrot.slane %v1800_v1, 4 }
  0x38   : > { %1414 = vmatprep.subr.bf16.mxu1 %v1413_v40  ;;  %1478 = vmatprep.subr.bf16.mxu0 %v1477_v41 }
  0x39   : > { %v805_v35 = vsel %vm796_vm3, %v802_v15, %v804_v34 }
  0x3b   : > { %1416 = vmatpush3.bf16.msra.mxu1 %v1413_v40  ;;  %1480 = vmatpush3.bf16.msra.mxu0 %v1477_v41 }
  0x3c   : > { %1418 = vmatprep.subr.bf16.mxu1 %v1417_v46  ;;  %1482 = vmatprep.subr.bf16.mxu0 %v1481_v47 }
  0x3f   : > { %1420 = vmatpush3.bf16.msra.mxu1 %v1417_v46  ;;  %1484 = vmatpush3.bf16.msra.mxu0 %v1481_v47  ;;  %v939_v46 = vld [vmem:[%s302_s14 + $0x18] sm:$0xff]  ;;  %v940_v47 = vld [vmem:[%s302_s14 + $0x20] sm:$0xff] }
  0x40   : > { %1422 = vmatprep.subr.bf16.mxu1 %v1421_v52  ;;  %1486 = vmatprep.subr.bf16.mxu0 %v1485_v53  ;;  %v946_v63 = vmax.f32 %v940_v47, %v941_v48 }
  0x43   : > { %1424 = vmatpush3.bf16.msra.mxu1 %v1421_v52  ;;  %1488 = vmatpush3.bf16.msra.mxu0 %v1485_v53  ;;  %v937_v52 = vld [vmem:[%s302_s14 + $0x8] sm:$0xff] }
  0x44   : > { %1426 = vmatprep.subr.bf16.mxu1 %v1425_v59  ;;  %1490 = vmatprep.subr.bf16.mxu0 %v1489_v60  ;;  %v944_v3 = vmax.f32 %v936_v51, %v937_v52 }
  0x47   : > { %1428 = vmatpush3.bf16.msra.mxu1 %v1425_v59  ;;  %1492 = vmatpush3.bf16.msra.mxu0 %v1489_v60  ;;  %v945_v59 = vmax.f32 %v938_v44, %v939_v46 }
  0x48   : > { %1525 = vmatprep.subr.bf16.mxu1 %v1493_v2  ;;  %1494 = vmatprep.subr.bf16.mxu0 %v1493_v2 }
  0x4a   : > { %1246 = vmatmul.mubr.f32.vlgmr.msra.gmra.mrb[0].mxu1 %v1731_v29  ;;  %1322 = vmatmul.mubr.f32.vlgmr.msra.gmra.mrb[0].mxu0 %v682_v6  ;;  %v942_v29 = vld [vmem:[%s302_s14 + $0x30] sm:$0xff] }
  0x4b   : > { %1533 = vmatpush3.bf16.msra.mxu1 %v1493_v2  ;;  %1496 = vmatpush3.bf16.msra.mxu0 %v1493_v2  ;;  %v947_v56 = vmax.f32 %v942_v29, %v943_v45 }
  0x4c   : > { %1248 = vmatprep.mubr.f32.mxu1 %v1780_v55  ;;  %1324 = vmatprep.mubr.f32.mxu0 %v684_v11  ;;  %v799_v55 = vsel %vm796_vm3, %v797_v12, %v798_v13 }
  0x4d   : > { %1498 = vmatprep.subr.bf16.mxu0 %v1497_v8  ;;  %1526 = vmatprep.subr.bf16.mxu1 %v1497_v8 }
  0x4e   : > { %1249 = vmatmul.mubr.f32.gmra.mrb[2].mxu1 %v1796_v62  ;;  %1325 = vmatmul.mubr.f32.gmra.mrb[2].mxu0 %v686_v16  ;;  %v789_v62 = vld [vmem:[%s1999_s1 + $0x248] sm:$0xff] }
  0x4f   : > { %1534 = vmatpush3.bf16.msra.mxu1 %v1497_v8  ;;  %1500 = vmatpush3.bf16.msra.mxu0 %v1497_v8  ;;  %v1509_v22 = vpack.c.bf16 %v789_v62, %v788_v21 }
  0x50   : > { %1527 = vmatprep.subr.bf16.mxu1 %v1501_v17  ;;  %1502 = vmatprep.subr.bf16.mxu0 %v1501_v17 }
  0x51   : > { %1359 = vmatprep.mubr.f32.mxu0 %v799_v55  ;;  %1362 = vmatprep.mubr.f32.mxu1 %v803_v19 }
  0x53   : > { %1535 = vmatpush3.bf16.msra.mxu1 %v1501_v17  ;;  %1504 = vmatpush3.bf16.msra.mxu0 %v1501_v17 }
  0x54   : > { %1528 = vmatprep.subr.bf16.mxu1 %v1505_v20  ;;  %1506 = vmatprep.subr.bf16.mxu0 %v1505_v20 }
  0x57   : > { %1536 = vmatpush3.bf16.msra.mxu1 %v1505_v20  ;;  %1508 = vmatpush3.bf16.msra.mxu0 %v1505_v20 }
  0x58   : > { %1529 = vmatprep.subr.bf16.mxu1 %v1509_v22  ;;  %1510 = vmatprep.subr.bf16.mxu0 %v1509_v22 }
  0x5b   : > { %1537 = vmatpush3.bf16.msra.mxu1 %v1509_v22  ;;  %1512 = vmatpush3.bf16.msra.mxu0 %v1509_v22 }
  0x5c   : > { %1530 = vmatprep.subr.bf16.mxu1 %v1513_v25  ;;  %1514 = vmatprep.subr.bf16.mxu0 %v1513_v25 }
  0x5f   : > { %1538 = vmatpush3.bf16.msra.mxu1 %v1513_v25  ;;  %1516 = vmatpush3.bf16.msra.mxu0 %v1513_v25 }
  0x60   : > { %1531 = vmatprep.subr.bf16.mxu1 %v1517_v30  ;;  %1518 = vmatprep.subr.bf16.mxu0 %v1517_v30 }
  0x63   : > { %1539 = vmatpush3.bf16.msra.mxu1 %v1517_v30  ;;  %1520 = vmatpush3.bf16.msra.mxu0 %v1517_v30 }
  0x64   : > { %1532 = vmatprep.subr.bf16.mxu1 %v1521_v33  ;;  %1522 = vmatprep.subr.bf16.mxu0 %v1521_v33 }
  0x67   : > { %1540 = vmatpush3.bf16.msra.mxu1 %v1521_v33  ;;  %1524 = vmatpush3.bf16.msra.mxu0 %v1521_v33 }
  0x6a   : > { %1363 = vmatmul.mubr.f32.vlgmr.msra.gmra.mrb[4].mxu1 %v805_v35  ;;  %1360 = vmatmul.mubr.f32.vlgmr.msra.gmra.mrb[0].mxu0 %v801_v36 }
 0x11d   : > { %v1247_v37 = vpop.f32.mrb[0].mxu1 }
 0x11e   : > { %v523_v38 = vpop.f32.mrb[1].mxu1 }
 0x121   : > { %v1250_v39 = vpop.f32.mrb[2].mxu1  ;;  %v1326_v40 = vpop.f32.mrb[2].mxu0 }
 0x122   : > { %v533_v41 = vpop.f32.mrb[3].mxu1  ;;  %v1543_v1 = vadd.f32 %v1326_v40, %v1250_v39  ;;  %v767_v42 = vpop.f32.mrb[3].mxu0 }
 0x123   : > { %v1545_v43 = vadd.f32 %v767_v42, %v533_v41 }
 0x13d   : > { %v1364_v50 = vpop.f32.mrb[4].mxu1  ;;  %v1361_v53 = vpop.f32.mrb[0].mxu0 }
 0x13e   : > { %v1544_v54 = vadd.f32 %v1543_v1, %v1364_v50  ;;  %v886_v57 = vpop.f32.mrb[5].mxu1  ;;  %v1541_v58 = vadd.f32 %v1361_v53, %v1247_v37  ;;  %v876_v60 = vpop.f32.mrb[1].mxu0 }
 0x13f   : > { %v1546_v61 = vadd.f32 %v1545_v43, %v886_v57  ;;  %v1542_v2 = vadd.f32 %v876_v60, %v523_v38 }
 0x140   : > { %v909_v0 = vadd.f32 %v1544_v54, %v1070_v49  ;;  %v907_v4 = vadd.f32 %v1541_v58, %v1070_v49 }
 0x141   : > { %v908_v5 = vadd.f32 %v1546_v61, %v1070_v49  ;;  %v906_v7 = vadd.f32 %v1542_v2, %v1070_v49 }
 0x142   : > { %v951_v6 = vadd.f32 %v947_v56, %v909_v0  ;;  %v949_v8 = vadd.f32 %v945_v59, %v907_v4 }
 0x143   : > { %v950_v9 = vadd.f32 %v946_v63, %v908_v5  ;;  %v948_v10 = vadd.f32 %v944_v3, %v906_v7 }
 0x144   : > { %955 = vst [vmem:[%s312_s19 + $0x18] sm:$0xff] %v951_v6  ;;  %953 = vst [vmem:[%s312_s19 + $0x8] sm:$0xff] %v949_v8 }
 0x145   : > { %954 = vst [vmem:[%s312_s19 + $0x10] sm:$0xff] %v950_v9  ;;  %952 = vst [vmem:[%s312_s19] sm:$0xff] %v948_v10 }
 0x146 PF: > { %s16_s23 = sadd.s32 1, %s1604_s23   ;;  %s2005_s21 = smov %s1600_s22 }
 0x147   : > { %p13_p5 = scmp.ge.s32.totalorder %s16_s23, 4   ;;  %s2006_s22 = smov %s2008_s3 }
 0x149   :  { %15 = sbr.rel (!%p13_p5) target bundleno = 2 (0x2), region = 78 }

// kernel: _lambda_.18
= control target key start
LH: loop header
LB: loop body
LE: loop exit
PB: predicated region body
PF: predicated region fallthrough
CT: control target
= control target key end

     0   :  { %v18_v0 = vlaneseq  ;;  %v121_v4 = vmov 0.0   ;;  %s172_s0 = inlined_call_operand.vmem [shape: f32[32,128], index: 0, kind: input, shape index: {}]   ;;  %s173_s1 = inlined_call_operand.vmem [shape: f32[1,128], index: 1, kind: input, shape index: {}]   ;;  %s174_s2 = inlined_call_operand.vmem [shape: f32[1,128], index: 2, kind: input, shape index: {}]   ;;  %s175_s3 = inlined_call_operand.vmem [shape: f32[32,128], index: 3, kind: output, shape index: {}]  }
   0x1   :  { %v14_v2 = vld [vmem:[%s172_s0] sm:$0xff]  ;;  %v16_v3 = vld [vmem:[%s172_s0 + $0x10] sm:$0xff]  ;;  %v15_v6 = vld [vmem:[%s172_s0 + $0x8] sm:$0xff] }
   0x2   :  { %v19_v1 = vand.u32 127, %v18_v0  ;;  %v17_v7 = vld [vmem:[%s172_s0 + $0x18] sm:$0xff]  ;;  %v110_v45 = vld [vmem:[%s173_s1] ss:$0 sm:$0xff] }
   0x3   :  { %v111_v47 = vld [vmem:[%s174_s2] ss:$0 sm:$0xff] }
   0x4   :  { %vm20_vm0 = vcmp.lt.s32.totalorder %v19_v1, 8 }
   0x5   :  { %v109_v5 = vsel %vm20_vm0, 1.0, %v121_v4 }
   0x6   :  { %v23_v8 = vmul.f32 %v109_v5, %v14_v2  ;;  %v25_v9 = vmul.f32 %v109_v5, %v16_v3  ;;  %v24_v10 = vmul.f32 %v109_v5, %v15_v6  ;;  %v26_v11 = vmul.f32 %v109_v5, %v17_v7 }
   0x8   :  { %27 = vadd.xlane.f32.xlu0 %v23_v8  ;;  %31 = vadd.xlane.f32.xlu1 %v25_v9 }
   0xc   :  { %29 = vadd.xlane.f32.xlu0 %v24_v10  ;;  %33 = vadd.xlane.f32.xlu1 %v26_v11 }
  0x95   :  { %v28_v12 = vpop.xlane.xlu0 %27  ;;  %v32_v13 = vpop.xlane.xlu1 %31 }
  0x96   :  { %v35_v14 = vmul.f32 0.125, %v28_v12  ;;  %v37_v15 = vmul.f32 0.125, %v32_v13 }
  0x98   :  { %v39_v16 = vsub.f32 %v14_v2, %v35_v14  ;;  %v41_v17 = vsub.f32 %v16_v3, %v37_v15 }
  0x99   :  { %v30_v18 = vpop.xlane.xlu0 %29  ;;  %v34_v19 = vpop.xlane.xlu1 %33 }
  0x9a   :  { %v36_v20 = vmul.f32 0.125, %v30_v18  ;;  %v38_v21 = vmul.f32 0.125, %v34_v19  ;;  %v43_v22 = vmul.f32 %v109_v5, %v39_v16  ;;  %v45_v23 = vmul.f32 %v109_v5, %v41_v17 }
  0x9c   :  { %v40_v24 = vsub.f32 %v15_v6, %v36_v20  ;;  %v42_v25 = vsub.f32 %v17_v7, %v38_v21  ;;  %v47_v26 = vmul.f32 %v43_v22, %v43_v22  ;;  %v49_v27 = vmul.f32 %v45_v23, %v45_v23 }
  0x9e   :  { %51 = vadd.xlane.f32.xlu0 %v47_v26  ;;  %v44_v28 = vmul.f32 %v109_v5, %v40_v24  ;;  %v46_v29 = vmul.f32 %v109_v5, %v42_v25 }
  0xa0   :  { %v48_v30 = vmul.f32 %v44_v28, %v44_v28  ;;  %v50_v31 = vmul.f32 %v46_v29, %v46_v29 }
  0xa2   :  { %55 = vadd.xlane.f32.xlu0 %v49_v27  ;;  %53 = vadd.xlane.f32.xlu1 %v48_v30 }
  0xa6   :  { %57 = vadd.xlane.f32.xlu1 %v50_v31 }
 0x12b   :  { %v52_v32 = vpop.xlane.xlu0 %51 }
 0x12c   :  { %v59_v33 = vmul.f32 0.125, %v52_v32 }
 0x12e   :  { %v63_v34 = vadd.f32 1e-05, %v59_v33 }
 0x12f   :  { %v54_v35 = vpop.xlane.xlu1 %53  ;;  %v56_v36 = vpop.xlane.xlu0 %55 }
 0x130   :  { %113 = vrsqrt.f32 %v63_v34  ;;  %v60_v37 = vmul.f32 0.125, %v54_v35  ;;  %v61_v38 = vmul.f32 0.125, %v56_v36 }
 0x132   :  { %v64_v39 = vadd.f32 1e-05, %v60_v37  ;;  %v65_v40 = vadd.f32 1e-05, %v61_v38 }
 0x133   :  { %v58_v41 = vpop.xlane.xlu1 %57 }
 0x134   :  { %115 = vrsqrt.f32 %v64_v39  ;;  %v62_v42 = vmul.f32 0.125, %v58_v41 }
 0x135   :  { %117 = vrsqrt.f32 %v65_v40 }
 0x136   :  { %v66_v43 = vadd.f32 1e-05, %v62_v42 }
 0x138   :  { %119 = vrsqrt.f32 %v66_v43 }
 0x13a   :  { %v114_v44 = vpop.eup %113 }
 0x13b   :  { %v71_v46 = vmul.f32 %v114_v44, %v43_v22 }
 0x13d   :  { %v82_v48 = vmul.f32 %v110_v45, %v71_v46 }
 0x13e   :  { %v116_v49 = vpop.eup %115 }
 0x13f   :  { %v118_v50 = vpop.eup %117  ;;  %v93_v51 = vadd.f32 %v111_v47, %v82_v48  ;;  %v72_v52 = vmul.f32 %v116_v49, %v44_v28 }
 0x140   :  { %v73_v53 = vmul.f32 %v118_v50, %v45_v23 }
 0x141   :  { %v97_v54 = vmax.f32 %v93_v51, 0.0  ;;  %v83_v55 = vmul.f32 %v110_v45, %v72_v52 }
 0x142   :  { %v120_v56 = vpop.eup %119  ;;  %v84_v57 = vmul.f32 %v110_v45, %v73_v53 }
 0x143   :  { %101 = vst [vmem:[%s175_s3] sm:$0xff] %v97_v54  ;;  %v94_v58 = vadd.f32 %v111_v47, %v83_v55  ;;  %v74_v59 = vmul.f32 %v120_v56, %v46_v29 }
 0x144   :  { %v95_v60 = vadd.f32 %v111_v47, %v84_v57 }
 0x145   :  { %v98_v61 = vmax.f32 %v94_v58, 0.0  ;;  %v85_v62 = vmul.f32 %v110_v45, %v74_v59 }
 0x146   :  { %v99_v63 = vmax.f32 %v95_v60, 0.0 }
 0x147   :  { %102 = vst [vmem:[%s175_s3 + $0x8] sm:$0xff] %v98_v61  ;;  %v96_v0 = vadd.f32 %v111_v47, %v85_v62 }
 0x148   :  { %103 = vst [vmem:[%s175_s3 + $0x10] sm:$0xff] %v99_v63 }
 0x149   :  { %v100_v1 = vmax.f32 %v96_v0, 0.0 }
 0x14b   :  { %104 = vst [vmem:[%s175_s3 + $0x18] sm:$0xff] %v100_v1 }

// kernel: _lambda_.16
= control target key start
LH: loop header
LB: loop body
LE: loop exit
PB: predicated region body
PF: predicated region fallthrough
CT: control target
= control target key end

     0   :  { %s2002_s18 = smov 0   ;;  %s2004_s19 = smov 0   ;;  %s2509_s0 = inlined_call_operand.vmem [shape: f32[2,24,384], index: 0, kind: input, shape index: {}]   ;;  %s2510_s1 = inlined_call_operand.vmem [shape: f32[1024,128], index: 1, kind: input, shape index: {}]   ;;  %s2511_s2 = inlined_call_operand.vmem [shape: f32[1,128], index: 2, kind: input, shape index: {}]   ;;  %s2512_s3 = inlined_call_operand.vmem [shape: f32[1,128], index: 3, kind: input, shape index: {}]   ;;  %s2513_s4 = inlined_call_operand.vmem [shape: f32[1,128], index: 4, kind: input, shape index: {}]   ;;  %s2514_s5 = inlined_call_operand.vmem [shape: f32[2,16,128], index: 5, kind: output, shape index: {}]  }
   0x1   :  { %s2006_s20 = smov 0  }
   0x2 LB: > { %s27_s21 = sadd.s32 1, %s1965_s19  ;;  %p1212_p0 = scmp.ge.s32.totalorder %s1969_s20, 1  ;;  %s1969_s20 = sphi %s2006_s20, %s15_s20   ;;  %s1965_s19 = sphi %s2004_s19, %s2516_s19   ;;  %s1961_s18 = sphi %s2002_s18, %s2515_s18  }
   0x3   : > { %p29_p1 = scmp.ge.s32.totalorder %s27_s21, 2  ;;  %p201_p2 = scmp.lt.s32.totalorder %s1969_s20, 3 }
   0x5   : > { %s2518_s21 = smov (%p29_p1, %s27_s21), 0  ;;  %p202_p3 = pnand %p1212_p0, %p201_p2 }
   0x6   : > { %v279_v0 = vld [vmem:[%s2510_s1 + $0x80] sm:$0xff] (!%p202_p3)  ;;  %v280_v1 = vld [vmem:[%s2510_s1 + $0x88] sm:$0xff] (!%p202_p3)  ;;  %p233_p4 = scmp.lt.s32.totalorder (!%p202_p3), %s1961_s18, 1  ;;  %v281_v5 = vld [vmem:[%s2510_s1 + $0x90] sm:$0xff] (!%p202_p3)  ;;  %vm557_vm0 = vcmask (!%p202_p3), 1046528   ;;  %vm864_vm1 = vcmask (!%p202_p3), 1045504  }
   0x7   : > { %205 = sbr.rel (%p202_p3) target bundleno = 676 (0x2a4), region = 40  ;;  %v642_v2 = vld [vmem:[%s2510_s1 + $0x200] sm:$0xff] (!%p202_p3)  ;;  %v1647_v3 = vpack.c.bf16 (!%p202_p3), %v280_v1, %v279_v0  ;;  %v643_v4 = vld [vmem:[%s2510_s1 + $0x208] sm:$0xff] (!%p202_p3)  ;;  %v282_v6 = vld [vmem:[%s2510_s1 + $0x98] sm:$0xff] (!%p202_p3) }
   0x8   : > { %v1775_v7 = vpack.c.bf16 (!%p202_p3), %v643_v4, %v642_v2  ;;  %v1651_v8 = vpack.c.bf16 (!%p202_p3), %v282_v6, %v281_v5  ;;  %v644_v9 = vld [vmem:[%s2510_s1 + $0x210] sm:$0xff] (!%p202_p3)  ;;  %v645_v10 = vld [vmem:[%s2510_s1 + $0x218] sm:$0xff] (!%p202_p3)  ;;  %v283_v11 = vld [vmem:[%s2510_s1 + $0xa0] sm:$0xff] (!%p202_p3) }
   0x9   : > { %1648 = vmatprep.subr.bf16.mxu1 (!%p202_p3), %v1647_v3  ;;  %v1779_v12 = vpack.c.bf16 (!%p202_p3), %v645_v10, %v644_v9  ;;  %v284_v13 = vld [vmem:[%s2510_s1 + $0xa8] sm:$0xff] (!%p202_p3)  ;;  %v646_v14 = vld [vmem:[%s2510_s1 + $0x220] sm:$0xff] (!%p202_p3)  ;;  %v285_v18 = vld [vmem:[%s2510_s1 + $0xb0] sm:$0xff] (!%p202_p3) }
   0xa   : > { %v647_v15 = vld [vmem:[%s2510_s1 + $0x228] sm:$0xff] (!%p202_p3)  ;;  %1776 = vmatprep.subr.bf16.mxu0 (!%p202_p3), %v1775_v7  ;;  %1650 = vmatpush3.bf16.msra.mxu1 (!%p202_p3), %v1647_v3  ;;  %v1655_v16 = vpack.c.bf16 (!%p202_p3), %v284_v13, %v283_v11  ;;  %v286_v19 = vld [vmem:[%s2510_s1 + $0xb8] sm:$0xff] (!%p202_p3)  ;;  %v648_v20 = vld [vmem:[%s2510_s1 + $0x230] sm:$0xff] (!%p202_p3) }
   0xb   : > { %1778 = vmatpush3.bf16.msra.mxu0 (!%p202_p3), %v1775_v7  ;;  %1652 = vmatprep.subr.bf16.mxu1 (!%p202_p3), %v1651_v8  ;;  %v1783_v17 = vpack.c.bf16 (!%p202_p3), %v647_v15, %v646_v14  ;;  %v649_v21 = vld [vmem:[%s2510_s1 + $0x238] sm:$0xff] (!%p202_p3)  ;;  %v1659_v22 = vpack.c.bf16 (!%p202_p3), %v286_v19, %v285_v18  ;;  %v287_v24 = vld [vmem:[%s2510_s1 + $0xc0] sm:$0xff] (!%p202_p3)  ;;  %v288_v25 = vld [vmem:[%s2510_s1 + $0xc8] sm:$0xff] (!%p202_p3) }
   0xc   : > { %1780 = vmatprep.subr.bf16.mxu0 (!%p202_p3), %v1779_v12  ;;  %v1787_v23 = vpack.c.bf16 (!%p202_p3), %v649_v21, %v648_v20  ;;  %v650_v27 = vld [vmem:[%s2510_s1 + $0x240] sm:$0xff] (!%p202_p3)  ;;  %v651_v28 = vld [vmem:[%s2510_s1 + $0x248] sm:$0xff] (!%p202_p3)  ;;  %v1663_v35 = vpack.c.bf16 (!%p202_p3), %v288_v25, %v287_v24  ;;  %v289_v38 = vld [vmem:[%s2510_s1 + $0xd0] sm:$0xff] (!%p202_p3) }
   0xd   : > { %v1791_v37 = vpack.c.bf16 (!%p202_p3), %v651_v28, %v650_v27  ;;  %v290_v39 = vld [vmem:[%s2510_s1 + $0xd8] sm:$0xff] (!%p202_p3)  ;;  %v652_v42 = vld [vmem:[%s2510_s1 + $0x250] sm:$0xff] (!%p202_p3)  ;;  %v291_v47 = vld [vmem:[%s2510_s1 + $0xe0] sm:$0xff] (!%p202_p3) }
   0xe   : > { %s2520_s18 = smov (!%p233_p4, %s1961_s18), 1  ;;  %1654 = vmatpush3.bf16.msra.mxu1 %v1651_v8  ;;  %v653_v43 = vld [vmem:[%s2510_s1 + $0x258] sm:$0xff]  ;;  %v1667_v45 = vpack.c.bf16 %v290_v39, %v289_v38  ;;  %v292_v48 = vld [vmem:[%s2510_s1 + $0xe8] sm:$0xff]  ;;  %v654_v49 = vld [vmem:[%s2510_s1 + $0x260] sm:$0xff] }
   0xf   : > { %s1917_s25 = smul.u32 72, %s2520_s18  ;;  %1782 = vmatpush3.bf16.msra.mxu0 %v1779_v12  ;;  %1656 = vmatprep.subr.bf16.mxu1 %v1655_v16  ;;  %v1795_v46 = vpack.c.bf16 %v653_v43, %v652_v42  ;;  %v655_v50 = vld [vmem:[%s2510_s1 + $0x268] sm:$0xff]  ;;  %v1671_v51 = vpack.c.bf16 %v292_v48, %v291_v47  ;;  %v293_v53 = vld [vmem:[%s2510_s1 + $0xf0] sm:$0xff]  ;;  %v294_v54 = vld [vmem:[%s2510_s1 + $0xf8] sm:$0xff]  ;;  %s1222_s16 = sshll.u32 %s2520_s18, 4 }
  0x10   : > { %1784 = vmatprep.subr.bf16.mxu0 %v1783_v17  ;;  %v1799_v52 = vpack.c.bf16 %v655_v50, %v654_v49  ;;  %v656_v55 = vld [vmem:[%s2510_s1 + $0x270] sm:$0xff]  ;;  %v657_v56 = vld [vmem:[%s2510_s1 + $0x278] sm:$0xff]  ;;  %v1675_v57 = vpack.c.bf16 %v294_v54, %v293_v53  ;;  %v263_v59 = vld [vmem:[%s2510_s1] sm:$0xff]  ;;  %s246_s22 = scalar_lea.vmem %s2514_s5, %s1222_s16 }
  0x11   : > { %s2074_s11 = scalar_lea.vmem %s2509_s0, %s1917_s25  ;;  %v1803_v58 = vpack.c.bf16 %v657_v56, %v656_v55  ;;  %v264_v60 = vld [vmem:[%s2510_s1 + $0x8] sm:$0xff]  ;;  %v745_v61 = vld [vmem:[%s2510_s1 + $0x280] sm:$0xff]  ;;  %v265_v4 = vld [vmem:[%s2510_s1 + $0x10] sm:$0xff] }
  0x12   : > { %v255_v26 = vld [vmem:[%s2074_s11 + $0x8] sm:$0xff]  ;;  %v2090_v31 = vld [vmem:[%s2074_s11 + $0x20] sm:$0xff]  ;;  %1658 = vmatpush3.bf16.msra.mxu1 %v1655_v16  ;;  %v2094_v33 = vld [vmem:[%s2074_s11 + $0x38] sm:$0xff]  ;;  %v1679_v63 = vpack.c.bf16 %v264_v60, %v263_v59 }
  0x13   : > { %1399 = vmatprep.mubr.f32.mxu1 %v255_v26  ;;  %v661_v29 = vrot.slane %v255_v26, 1  ;;  %v965_v30 = vrot.slane %v255_v26, 2  ;;  %v662_v32 = vrot.slane %v2090_v31, 1  ;;  %v966_v34 = vrot.slane %v2090_v31, 2  ;;  %1786 = vmatpush3.bf16.msra.mxu0 %v1783_v17  ;;  %v746_v62 = vld [vmem:[%s2510_s1 + $0x288] sm:$0xff]  ;;  %v2157_v1 = vld [vmem:[%s2074_s11 + $0x10] sm:$0xff] }
  0x14   : > { %1660 = vmatprep.subr.bf16.mxu1 %v1659_v22  ;;  %v968_v36 = vrot.slane %v2094_v33, 2  ;;  %1788 = vmatprep.subr.bf16.mxu0 %v1787_v23  ;;  %v664_v0 = vrot.slane %v2094_v33, 1  ;;  %v2160_v2 = vld [vmem:[%s2074_s11 + $0x28] sm:$0xff]  ;;  %v1807_v3 = vpack.c.bf16 %v746_v62, %v745_v61  ;;  %v266_v5 = vld [vmem:[%s2510_s1 + $0x18] sm:$0xff]  ;;  %v747_v6 = vld [vmem:[%s2510_s1 + $0x290] sm:$0xff]  ;;  %v764_v8 = vrot.slane %v2157_v1, 1 }
  0x15   : > { %v663_v40 = vsel %vm557_vm0, %v661_v29, %v662_v32  ;;  %v2108_v41 = vsel %vm864_vm1, %v965_v30, %v966_v34  ;;  %v748_v7 = vld [vmem:[%s2510_s1 + $0x298] sm:$0xff]  ;;  %v765_v9 = vrot.slane %v2160_v2, 1  ;;  %v1683_v11 = vpack.c.bf16 %v266_v5, %v265_v4  ;;  %v267_v13 = vld [vmem:[%s2510_s1 + $0x20] sm:$0xff]  ;;  %v268_v14 = vld [vmem:[%s2510_s1 + $0x28] sm:$0xff] }
  0x16   : > { %1539 = vmatprep.mubr.f32.mxu0 %v663_v40  ;;  %v2117_v44 = vsel %vm864_vm1, %v966_v34, %v968_v36  ;;  %1662 = vmatpush3.bf16.msra.mxu1 %v1659_v22  ;;  %v665_v10 = vsel %vm557_vm0, %v662_v32, %v664_v0  ;;  %v1811_v12 = vpack.c.bf16 %v748_v7, %v747_v6  ;;  %v2186_v15 = vld [vmem:[%s2074_s11 + $0x18] sm:$0xff]  ;;  %v749_v16 = vld [vmem:[%s2510_s1 + $0x2a0] sm:$0xff]  ;;  %v750_v17 = vld [vmem:[%s2510_s1 + $0x2a8] sm:$0xff] }
  0x17   : > { %1790 = vmatpush3.bf16.msra.mxu0 %v1787_v23  ;;  %1664 = vmatprep.subr.bf16.mxu1 %v1663_v35  ;;  %v2196_v18 = vld [vmem:[%s2074_s11] sm:$0xff]  ;;  %v559_v19 = vrot.slane %v2186_v15, 1  ;;  %v766_v20 = vsel %vm557_vm0, %v764_v8, %v765_v9  ;;  %v2203_v21 = vld [vmem:[%s2074_s11 + $0x30] sm:$0xff]  ;;  %v1687_v22 = vpack.c.bf16 %v268_v14, %v267_v13  ;;  %v1815_v24 = vpack.c.bf16 %v750_v17, %v749_v16  ;;  %v270_v26 = vld [vmem:[%s2510_s1 + $0x38] sm:$0xff] }
  0x18   : > { %1792 = vmatprep.subr.bf16.mxu0 %v1791_v37  ;;  %v561_v23 = vrot.slane %v2203_v21, 1  ;;  %v269_v25 = vld [vmem:[%s2510_s1 + $0x30] sm:$0xff]  ;;  %v752_v28 = vld [vmem:[%s2510_s1 + $0x2b8] sm:$0xff]  ;;  %v271_v32 = vld [vmem:[%s2510_s1 + $0x40] sm:$0xff]  ;;  %v865_v8 = vrot.slane %v2196_v18, 2 }
  0x19   : > { %v751_v27 = vld [vmem:[%s2510_s1 + $0x2b0] sm:$0xff]  ;;  %v1691_v30 = vpack.c.bf16 %v270_v26, %v269_v25  ;;  %v272_v33 = vld [vmem:[%s2510_s1 + $0x48] sm:$0xff]  ;;  %v753_v34 = vld [vmem:[%s2510_s1 + $0x2c0] sm:$0xff] }
  0x1a   : > { %1666 = vmatpush3.bf16.msra.mxu1 %v1663_v35  ;;  %v2222_v29 = vsel %vm557_vm0, %v559_v19, %v561_v23  ;;  %v754_v35 = vld [vmem:[%s2510_s1 + $0x2c8] sm:$0xff]  ;;  %v1695_v36 = vpack.c.bf16 %v272_v33, %v271_v32  ;;  %v273_v38 = vld [vmem:[%s2510_s1 + $0x50] sm:$0xff]  ;;  %v274_v39 = vld [vmem:[%s2510_s1 + $0x58] sm:$0xff] }
  0x1b   : > { %1794 = vmatpush3.bf16.msra.mxu0 %v1791_v37  ;;  %1668 = vmatprep.subr.bf16.mxu1 %v1667_v45  ;;  %v1823_v37 = vpack.c.bf16 %v754_v35, %v753_v34  ;;  %v755_v40 = vld [vmem:[%s2510_s1 + $0x2d0] sm:$0xff]  ;;  %v756_v42 = vld [vmem:[%s2510_s1 + $0x2d8] sm:$0xff]  ;;  %v1699_v43 = vpack.c.bf16 %v274_v39, %v273_v38  ;;  %v276_v47 = vld [vmem:[%s2510_s1 + $0x68] sm:$0xff] }
  0x1c   : > { %1796 = vmatprep.subr.bf16.mxu0 %v1795_v46  ;;  %v757_v48 = vld [vmem:[%s2510_s1 + $0x2e0] sm:$0xff]  ;;  %v758_v49 = vld [vmem:[%s2510_s1 + $0x2e8] sm:$0xff]  ;;  %v278_v53 = vld [vmem:[%s2510_s1 + $0x78] sm:$0xff] }
  0x1d   : > { %v759_v54 = vld [vmem:[%s2510_s1 + $0x2f0] sm:$0xff]  ;;  %v760_v55 = vld [vmem:[%s2510_s1 + $0x2f8] sm:$0xff]  ;;  %v446_v59 = vld [vmem:[%s2510_s1 + $0x108] sm:$0xff] }
  0x1e   : > { %1670 = vmatpush3.bf16.msra.mxu1 %v1667_v45  ;;  %v1827_v45 = vpack.c.bf16 %v756_v42, %v755_v40  ;;  %v262_v60 = vld [vmem:[%s2074_s11 + $0x40] sm:$0xff]  ;;  %v849_v62 = vld [vmem:[%s2510_s1 + $0x308] sm:$0xff]  ;;  %v447_v4 = vld [vmem:[%s2510_s1 + $0x110] sm:$0xff] }
  0x1f   : > { %1798 = vmatpush3.bf16.msra.mxu0 %v1795_v46  ;;  %1672 = vmatprep.subr.bf16.mxu1 %v1671_v51  ;;  %v275_v46 = vld [vmem:[%s2510_s1 + $0x60] sm:$0xff]  ;;  %v767_v0 = vrot.slane %v262_v60, 1  ;;  %v448_v5 = vld [vmem:[%s2510_s1 + $0x118] sm:$0xff]  ;;  %v850_v6 = vld [vmem:[%s2510_s1 + $0x310] sm:$0xff] }
  0x20   : > { %1800 = vmatprep.subr.bf16.mxu0 %v1799_v52  ;;  %v1703_v50 = vpack.c.bf16 %v276_v47, %v275_v46  ;;  %v848_v61 = vld [vmem:[%s2510_s1 + $0x300] sm:$0xff]  ;;  %v851_v7 = vld [vmem:[%s2510_s1 + $0x318] sm:$0xff]  ;;  %v450_v16 = vld [vmem:[%s2510_s1 + $0x128] sm:$0xff] }
  0x21   : > { %v1843_v13 = vpack.c.bf16 %v851_v7, %v850_v6  ;;  %v449_v14 = vld [vmem:[%s2510_s1 + $0x120] sm:$0xff]  ;;  %v452_v25 = vld [vmem:[%s2510_s1 + $0x138] sm:$0xff]  ;;  %v854_v26 = vld [vmem:[%s2510_s1 + $0x330] sm:$0xff] }
  0x22   : > { %1674 = vmatpush3.bf16.msra.mxu1 %v1671_v51  ;;  %v1831_v51 = vpack.c.bf16 %v758_v49, %v757_v48  ;;  %v852_v17 = vld [vmem:[%s2510_s1 + $0x320] sm:$0xff]  ;;  %v857_v33 = vld [vmem:[%s2510_s1 + $0x348] sm:$0xff]  ;;  %v858_v38 = vld [vmem:[%s2510_s1 + $0x350] sm:$0xff] }
  0x23   : > { %1802 = vmatpush3.bf16.msra.mxu0 %v1799_v52  ;;  %1676 = vmatprep.subr.bf16.mxu1 %v1675_v57  ;;  %v277_v52 = vld [vmem:[%s2510_s1 + $0x70] sm:$0xff]  ;;  %v856_v32 = vld [vmem:[%s2510_s1 + $0x340] sm:$0xff]  ;;  %v859_v39 = vld [vmem:[%s2510_s1 + $0x358] sm:$0xff] }
  0x24   : > { %1804 = vmatprep.subr.bf16.mxu0 %v1803_v58  ;;  %v1707_v56 = vpack.c.bf16 %v278_v53, %v277_v52  ;;  %v1855_v35 = vpack.c.bf16 %v857_v33, %v856_v32  ;;  %v1859_v42 = vpack.c.bf16 %v859_v39, %v858_v38  ;;  %v860_v46 = vld [vmem:[%s2510_s1 + $0x360] sm:$0xff]  ;;  %v861_v47 = vld [vmem:[%s2510_s1 + $0x368] sm:$0xff]  ;;  %v862_v52 = vld [vmem:[%s2510_s1 + $0x370] sm:$0xff] }
  0x25   : > { %v1863_v49 = vpack.c.bf16 %v861_v47, %v860_v46  ;;  %v863_v53 = vld [vmem:[%s2510_s1 + $0x378] sm:$0xff]  ;;  %v550_v32 = vld [vmem:[%s2510_s1 + $0x1e0] sm:$0xff]  ;;  %v551_v33 = vld [vmem:[%s2510_s1 + $0x1e8] sm:$0xff]  ;;  %v1058_v46 = vlaneseq }
  0x26   : > { %1678 = vmatpush3.bf16.msra.mxu1 %v1675_v57  ;;  %v1835_v57 = vpack.c.bf16 %v760_v55, %v759_v54  ;;  %v1867_v55 = vpack.c.bf16 %v863_v53, %v862_v52  ;;  %v552_v38 = vld [vmem:[%s2510_s1 + $0x1f0] sm:$0xff]  ;;  %v553_v39 = vld [vmem:[%s2510_s1 + $0x1f8] sm:$0xff] }
  0x27   : > { %1806 = vmatpush3.bf16.msra.mxu0 %v1803_v58  ;;  %1680 = vmatprep.subr.bf16.mxu1 %v1679_v63  ;;  %v445_v58 = vld [vmem:[%s2510_s1 + $0x100] sm:$0xff]  ;;  %v1059_v47 = vand.u32 127, %v1058_v46 }
  0x28   : > { %1808 = vmatprep.subr.bf16.mxu0 %v1807_v3 }
  0x29   : > { %1400 = vmatmul.mubr.f32.vlgmr.msra.gmra.mrb[0].mxu1 %v2090_v31  ;;  %v1819_v31 = vpack.c.bf16 %v752_v28, %v751_v27  ;;  %v855_v27 = vld [vmem:[%s2510_s1 + $0x338] sm:$0xff]  ;;  %vm1060_vm2 = vcmp.lt.s32.totalorder %v1059_v47, 8 }
  0x2a   : > { %1682 = vmatpush3.bf16.msra.mxu1 %v1679_v63  ;;  %1540 = vmatmul.mubr.f32.vlgmr.msra.gmra.mrb[0].mxu0 %v665_v10  ;;  %v1711_v63 = vpack.c.bf16 %v446_v59, %v445_v58  ;;  %v866_v10 = vrot.slane %v2186_v15, 2  ;;  %v949_v58 = vld [vmem:[%s2510_s1 + $0x380] sm:$0xff]  ;;  %v950_v59 = vld [vmem:[%s2510_s1 + $0x388] sm:$0xff] }
  0x2b   : > { %1810 = vmatpush3.bf16.msra.mxu0 %v1807_v3  ;;  %1684 = vmatprep.subr.bf16.mxu1 %v1683_v11  ;;  %v1839_v3 = vpack.c.bf16 %v849_v62, %v848_v61  ;;  %v868_v61 = vrot.slane %v2203_v21, 2  ;;  %v1871_v62 = vpack.c.bf16 %v950_v59, %v949_v58  ;;  %v952_v21 = vld [vmem:[%s2510_s1 + $0x398] sm:$0xff] }
  0x2c   : > { %1812 = vmatprep.subr.bf16.mxu0 %v1811_v12  ;;  %1434 = vmatprep.mubr.f32.mxu1 %v2196_v18 }
  0x2d   : > { %1574 = vmatprep.mubr.f32.mxu0 %v766_v20  ;;  %v867_v20 = vsel %vm864_vm1, %v865_v8, %v866_v10  ;;  %v543_v8 = vld [vmem:[%s2510_s1 + $0x1a8] sm:$0xff] }
  0x2e   : > { %1686 = vmatpush3.bf16.msra.mxu1 %v1683_v11  ;;  %v768_v11 = vsel %vm557_vm0, %v765_v9, %v767_v0  ;;  %v853_v9 = vld [vmem:[%s2510_s1 + $0x328] sm:$0xff]  ;;  %v541_v0 = vld [vmem:[%s2510_s1 + $0x198] sm:$0xff] }
  0x2f   : > { %1814 = vmatpush3.bf16.msra.mxu0 %v1811_v12  ;;  %1688 = vmatprep.subr.bf16.mxu1 %v1687_v22  ;;  %v1715_v12 = vpack.c.bf16 %v448_v5, %v447_v4  ;;  %v1847_v23 = vpack.c.bf16 %v853_v9, %v852_v17  ;;  %v951_v4 = vld [vmem:[%s2510_s1 + $0x390] sm:$0xff]  ;;  %v869_v5 = vsel %vm864_vm1, %v866_v10, %v868_v61  ;;  %v954_v10 = vld [vmem:[%s2510_s1 + $0x3a8] sm:$0xff] }
  0x30   : > { %1816 = vmatprep.subr.bf16.mxu0 %v1815_v24  ;;  %v1875_v7 = vpack.c.bf16 %v952_v21, %v951_v4 }
  0x32   : > { %1690 = vmatpush3.bf16.msra.mxu1 %v1687_v22  ;;  %v1719_v22 = vpack.c.bf16 %v450_v16, %v449_v14  ;;  %v545_v16 = vld [vmem:[%s2510_s1 + $0x1b8] sm:$0xff] }
  0x33   : > { %1818 = vmatpush3.bf16.msra.mxu0 %v1815_v24  ;;  %1692 = vmatprep.subr.bf16.mxu1 %v1691_v30  ;;  %v451_v24 = vld [vmem:[%s2510_s1 + $0x130] sm:$0xff] }
  0x34   : > { %1820 = vmatprep.subr.bf16.mxu0 %v1819_v31  ;;  %v1723_v28 = vpack.c.bf16 %v452_v25, %v451_v24 }
  0x36   : > { %1694 = vmatpush3.bf16.msra.mxu1 %v1691_v30  ;;  %v1851_v30 = vpack.c.bf16 %v855_v27, %v854_v26  ;;  %v548_v26 = vld [vmem:[%s2510_s1 + $0x1d0] sm:$0xff]  ;;  %v549_v27 = vld [vmem:[%s2510_s1 + $0x1d8] sm:$0xff] }
  0x37   : > { %1822 = vmatpush3.bf16.msra.mxu0 %v1819_v31  ;;  %1696 = vmatprep.subr.bf16.mxu1 %v1695_v36  ;;  %v453_v31 = vld [vmem:[%s2510_s1 + $0x140] sm:$0xff] }
  0x38   : > { %1824 = vmatprep.subr.bf16.mxu0 %v1823_v37 }
  0x3a   : > { %1698 = vmatpush3.bf16.msra.mxu1 %v1695_v36  ;;  %v455_v36 = vld [vmem:[%s2510_s1 + $0x150] sm:$0xff] }
  0x3b   : > { %1826 = vmatpush3.bf16.msra.mxu0 %v1823_v37  ;;  %1700 = vmatprep.subr.bf16.mxu1 %v1699_v43  ;;  %v456_v37 = vld [vmem:[%s2510_s1 + $0x158] sm:$0xff] }
  0x3c   : > { %1828 = vmatprep.subr.bf16.mxu0 %v1827_v45  ;;  %v1731_v40 = vpack.c.bf16 %v456_v37, %v455_v36  ;;  %v1767_v36 = vpack.c.bf16 %v551_v33, %v550_v32 }
  0x3e   : > { %1702 = vmatpush3.bf16.msra.mxu1 %v1699_v43  ;;  %v457_v43 = vld [vmem:[%s2510_s1 + $0x160] sm:$0xff] }
  0x3f   : > { %1830 = vmatpush3.bf16.msra.mxu0 %v1827_v45  ;;  %1704 = vmatprep.subr.bf16.mxu1 %v1703_v50  ;;  %v458_v45 = vld [vmem:[%s2510_s1 + $0x168] sm:$0xff] }
  0x40   : > { %1832 = vmatprep.subr.bf16.mxu0 %v1831_v51  ;;  %v1735_v48 = vpack.c.bf16 %v458_v45, %v457_v43  ;;  %v1771_v43 = vpack.c.bf16 %v553_v39, %v552_v38 }
  0x42   : > { %1706 = vmatpush3.bf16.msra.mxu1 %v1703_v50  ;;  %v459_v50 = vld [vmem:[%s2510_s1 + $0x170] sm:$0xff] }
  0x43   : > { %1834 = vmatpush3.bf16.msra.mxu0 %v1831_v51  ;;  %1708 = vmatprep.subr.bf16.mxu1 %v1707_v56  ;;  %v460_v51 = vld [vmem:[%s2510_s1 + $0x178] sm:$0xff] }
  0x44   : > { %1836 = vmatprep.subr.bf16.mxu0 %v1835_v57  ;;  %v1739_v54 = vpack.c.bf16 %v460_v51, %v459_v50  ;;  %v1216_v51 = vld [vmem:[%s2511_s2] ss:$0 sm:$0xff] }
  0x46   : > { %1710 = vmatpush3.bf16.msra.mxu1 %v1707_v56  ;;  %v538_v56 = vld [vmem:[%s2510_s1 + $0x180] sm:$0xff] }
  0x47   : > { %1838 = vmatpush3.bf16.msra.mxu0 %v1835_v57  ;;  %1712 = vmatprep.subr.bf16.mxu1 %v1711_v63  ;;  %v539_v57 = vld [vmem:[%s2510_s1 + $0x188] sm:$0xff] }
  0x48   : > { %1840 = vmatprep.subr.bf16.mxu0 %v1839_v3  ;;  %v1743_v60 = vpack.c.bf16 %v539_v57, %v538_v56 }
  0x49   : > { %1435 = vmatmul.mubr.f32.vlgmr.msra.gmra.mrb[0].mxu1 %v2186_v15  ;;  %v955_v15 = vld [vmem:[%s2510_s1 + $0x3b0] sm:$0xff] }
  0x4a   : > { %1714 = vmatpush3.bf16.msra.mxu1 %v1711_v63  ;;  %1575 = vmatmul.mubr.f32.vlgmr.msra.gmra.mrb[0].mxu0 %v768_v11  ;;  %v540_v63 = vld [vmem:[%s2510_s1 + $0x190] sm:$0xff]  ;;  %v953_v11 = vld [vmem:[%s2510_s1 + $0x3a0] sm:$0xff] }
  0x4b   : > { %1842 = vmatpush3.bf16.msra.mxu0 %v1839_v3  ;;  %1716 = vmatprep.subr.bf16.mxu1 %v1715_v12  ;;  %v558_v3 = vrot.slane %v2196_v18, 1  ;;  %v1747_v6 = vpack.c.bf16 %v541_v0, %v540_v63  ;;  %v542_v18 = vld [vmem:[%s2510_s1 + $0x1a0] sm:$0xff]  ;;  %v1879_v14 = vpack.c.bf16 %v954_v10, %v953_v11 }
  0x4c   : > { %1844 = vmatprep.subr.bf16.mxu0 %v1843_v13  ;;  %1469 = vmatprep.mubr.f32.mxu1 %v2157_v1  ;;  %v454_v1 = vld [vmem:[%s2510_s1 + $0x148] sm:$0xff] }
  0x4d   : > { %1609 = vmatprep.mubr.f32.mxu0 %v867_v20  ;;  %v1727_v34 = vpack.c.bf16 %v454_v1, %v453_v31  ;;  %v546_v20 = vld [vmem:[%s2510_s1 + $0x1c0] sm:$0xff]  ;;  %v1763_v31 = vpack.c.bf16 %v549_v27, %v548_v26 }
  0x4e   : > { %1718 = vmatpush3.bf16.msra.mxu1 %v1715_v12  ;;  %v560_v12 = vsel %vm557_vm0, %v558_v3, %v559_v19  ;;  %v956_v19 = vld [vmem:[%s2510_s1 + $0x3b8] sm:$0xff] }
  0x4f   : > { %1846 = vmatpush3.bf16.msra.mxu0 %v1843_v13  ;;  %1720 = vmatprep.subr.bf16.mxu1 %v1719_v22  ;;  %v1751_v13 = vpack.c.bf16 %v543_v8, %v542_v18  ;;  %v1883_v9 = vpack.c.bf16 %v956_v19, %v955_v15  ;;  %v1219_v15 = vld [vmem:[%s2513_s4] ss:$0 sm:$0xff] }
  0x50   : > { %1848 = vmatprep.subr.bf16.mxu0 %v1847_v23 }
  0x52   : > { %1722 = vmatpush3.bf16.msra.mxu1 %v1719_v22  ;;  %v547_v22 = vld [vmem:[%s2510_s1 + $0x1c8] sm:$0xff] }
  0x53   : > { %1850 = vmatpush3.bf16.msra.mxu0 %v1847_v23  ;;  %1724 = vmatprep.subr.bf16.mxu1 %v1723_v28  ;;  %v957_v23 = vld [vmem:[%s2510_s1 + $0x3c0] sm:$0xff]  ;;  %v1759_v24 = vpack.c.bf16 %v547_v22, %v546_v20 }
  0x54   : > { %1852 = vmatprep.subr.bf16.mxu0 %v1851_v30 }
  0x56   : > { %1726 = vmatpush3.bf16.msra.mxu1 %v1723_v28  ;;  %v959_v28 = vld [vmem:[%s2510_s1 + $0x3d0] sm:$0xff] }
  0x57   : > { %1854 = vmatpush3.bf16.msra.mxu0 %v1851_v30  ;;  %1728 = vmatprep.subr.bf16.mxu1 %v1727_v34  ;;  %v960_v30 = vld [vmem:[%s2510_s1 + $0x3d8] sm:$0xff] }
  0x58   : > { %1856 = vmatprep.subr.bf16.mxu0 %v1855_v35  ;;  %v1891_v1 = vpack.c.bf16 %v960_v30, %v959_v28 }
  0x5a   : > { %1730 = vmatpush3.bf16.msra.mxu1 %v1727_v34  ;;  %v961_v34 = vld [vmem:[%s2510_s1 + $0x3e0] sm:$0xff] }
  0x5b   : > { %1858 = vmatpush3.bf16.msra.mxu0 %v1855_v35  ;;  %1732 = vmatprep.subr.bf16.mxu1 %v1731_v40  ;;  %v962_v35 = vld [vmem:[%s2510_s1 + $0x3e8] sm:$0xff] }
  0x5c   : > { %1860 = vmatprep.subr.bf16.mxu0 %v1859_v42  ;;  %v1895_v37 = vpack.c.bf16 %v962_v35, %v961_v34 }
  0x5e   : > { %1734 = vmatpush3.bf16.msra.mxu1 %v1731_v40  ;;  %v963_v40 = vld [vmem:[%s2510_s1 + $0x3f0] sm:$0xff] }
  0x5f   : > { %1862 = vmatpush3.bf16.msra.mxu0 %v1859_v42  ;;  %1736 = vmatprep.subr.bf16.mxu1 %v1735_v48  ;;  %v964_v42 = vld [vmem:[%s2510_s1 + $0x3f8] sm:$0xff] }
  0x60   : > { %1864 = vmatprep.subr.bf16.mxu0 %v1863_v49  ;;  %v1899_v45 = vpack.c.bf16 %v964_v42, %v963_v40 }
  0x62   : > { %1738 = vmatpush3.bf16.msra.mxu1 %v1735_v48 }
  0x63   : > { %1866 = vmatpush3.bf16.msra.mxu0 %v1863_v49  ;;  %1740 = vmatprep.subr.bf16.mxu1 %v1739_v54 }
  0x64   : > { %1868 = vmatprep.subr.bf16.mxu0 %v1867_v55 }
  0x66   : > { %1742 = vmatpush3.bf16.msra.mxu1 %v1739_v54 }
  0x67   : > { %1870 = vmatpush3.bf16.msra.mxu0 %v1867_v55  ;;  %1744 = vmatprep.subr.bf16.mxu1 %v1743_v60  ;;  %v1971_v55 = vmov 0.0  }
  0x68   : > { %1872 = vmatprep.subr.bf16.mxu0 %v1871_v62  ;;  %v1217_v56 = vsel %vm1060_vm2, 1.0, %v1971_v55 }
  0x69   : > { %1470 = vmatmul.mubr.f32.vlgmr.msra.gmra.mrb[0].mxu1 %v2160_v2  ;;  %v544_v2 = vld [vmem:[%s2510_s1 + $0x1b0] sm:$0xff] }
  0x6a   : > { %1746 = vmatpush3.bf16.msra.mxu1 %v1743_v60  ;;  %1610 = vmatmul.mubr.f32.vlgmr.msra.gmra.mrb[0].mxu0 %v869_v5  ;;  %v1755_v17 = vpack.c.bf16 %v545_v16, %v544_v2 }
  0x6b   : > { %1874 = vmatpush3.bf16.msra.mxu0 %v1871_v62  ;;  %1748 = vmatprep.subr.bf16.mxu1 %v1747_v6 }
  0x6c   : > { %1876 = vmatprep.subr.bf16.mxu0 %v1875_v7  ;;  %1504 = vmatprep.mubr.f32.mxu1 %v560_v12  ;;  %v1110_v12 = vshrl.u32 %v1058_v46, 7 }
  0x6d   : > { %1644 = vmatprep.mubr.f32.mxu0 %v2108_v41  ;;  %v958_v41 = vld [vmem:[%s2510_s1 + $0x3c8] sm:$0xff] }
  0x6e   : > { %1750 = vmatpush3.bf16.msra.mxu1 %v1747_v6  ;;  %v1887_v25 = vpack.c.bf16 %v958_v41, %v957_v23  ;;  %v1111_v16 = vadd.s32 8, %v1110_v12 }
  0x6f   : > { %1878 = vmatpush3.bf16.msra.mxu0 %v1875_v7  ;;  %1752 = vmatprep.subr.bf16.mxu1 %v1751_v13 }
  0x70   : > { %1880 = vmatprep.subr.bf16.mxu0 %v1879_v14  ;;  %vm1116_vm3 = vcmp.lt.s32.totalorder %v1111_v16, 11 }
  0x72   : > { %1754 = vmatpush3.bf16.msra.mxu1 %v1751_v13 }
  0x73   : > { %1882 = vmatpush3.bf16.msra.mxu0 %v1879_v14  ;;  %1756 = vmatprep.subr.bf16.mxu1 %v1755_v17  ;;  %v1218_v14 = vld [vmem:[%s2512_s3] ss:$0 sm:$0xff] }
  0x74   : > { %1884 = vmatprep.subr.bf16.mxu0 %v1883_v9 }
  0x76   : > { %1758 = vmatpush3.bf16.msra.mxu1 %v1755_v17 }
  0x77   : > { %1886 = vmatpush3.bf16.msra.mxu0 %v1883_v9  ;;  %1760 = vmatprep.subr.bf16.mxu1 %v1759_v24 }
  0x78   : > { %1888 = vmatprep.subr.bf16.mxu0 %v1887_v25 }
  0x7a   : > { %1762 = vmatpush3.bf16.msra.mxu1 %v1759_v24 }
  0x7b   : > { %1890 = vmatpush3.bf16.msra.mxu0 %v1887_v25  ;;  %1764 = vmatprep.subr.bf16.mxu1 %v1763_v31 }
  0x7c   : > { %1892 = vmatprep.subr.bf16.mxu0 %v1891_v1 }
  0x7e   : > { %1766 = vmatpush3.bf16.msra.mxu1 %v1763_v31 }
  0x7f   : > { %1894 = vmatpush3.bf16.msra.mxu0 %v1891_v1  ;;  %1768 = vmatprep.subr.bf16.mxu1 %v1767_v36 }
  0x80   : > { %1896 = vmatprep.subr.bf16.mxu0 %v1895_v37 }
  0x82   : > { %1770 = vmatpush3.bf16.msra.mxu1 %v1767_v36 }
  0x83   : > { %1898 = vmatpush3.bf16.msra.mxu0 %v1895_v37  ;;  %1772 = vmatprep.subr.bf16.mxu1 %v1771_v43 }
  0x84   : > { %1900 = vmatprep.subr.bf16.mxu0 %v1899_v45 }
  0x86   : > { %1774 = vmatpush3.bf16.msra.mxu1 %v1771_v43 }
  0x87   : > { %1902 = vmatpush3.bf16.msra.mxu0 %v1899_v45 }
  0x89   : > { %1505 = vmatmul.mubr.f32.vlgmr.msra.gmra.mrb[0].mxu1 %v2222_v29 }
  0x8a   : > { %1645 = vmatmul.mubr.f32.vlgmr.msra.gmra.mrb[0].mxu0 %v2117_v44 }
 0x15c   : > { %v1506_v48 = vpop.f32.mrb[0].mxu1 }
 0x15d   : > { %v1646_v49 = vpop.f32.mrb[0].mxu0  ;;  %v631_v50 = vpop.f32.mrb[1].mxu1 }
 0x15e   : > { %v1903_v52 = vadd.f32 %v1646_v49, %v1506_v48  ;;  %v1038_v53 = vpop.f32.mrb[1].mxu0 }
 0x15f   : > { %v1904_v54 = vadd.f32 %v1038_v53, %v631_v50 }
 0x160   : > { %v1057_v57 = vadd.f32 %v1903_v52, %v1216_v51 }
 0x161   : > { %v1056_v58 = vadd.f32 %v1904_v54, %v1216_v51 }
 0x162   : > { %v1064_v29 = vmul.f32 %v1217_v56, %v1057_v57 }
 0x163   : > { %v1063_v44 = vmul.f32 %v1217_v56, %v1056_v58 }
 0x164   : > { %1067 = vadd.xlane.f32.xlu0 %v1064_v29 }
 0x168   : > { %1065 = vadd.xlane.f32.xlu0 %v1063_v44 }
 0x1f1   : > { %v1068_v59 = vpop.xlane.xlu0 %1067 }
 0x1f2   : > { %v1070_v60 = vmul.f32 0.125, %v1068_v59 }
 0x1f4   : > { %v1072_v61 = vsub.f32 %v1057_v57, %v1070_v60 }
 0x1f5   : > { %v1066_v62 = vpop.xlane.xlu0 %1065 }
 0x1f6   : > { %v1069_v63 = vmul.f32 0.125, %v1066_v62  ;;  %v1074_v0 = vmul.f32 %v1217_v56, %v1072_v61 }
 0x1f8   : > { %v1071_v3 = vsub.f32 %v1056_v58, %v1069_v63  ;;  %v1076_v4 = vmul.f32 %v1074_v0, %v1074_v0 }
 0x1fa   : > { %1079 = vadd.xlane.f32.xlu1 %v1076_v4  ;;  %v1073_v21 = vmul.f32 %v1217_v56, %v1071_v3 }
 0x1fc   : > { %v1075_v5 = vmul.f32 %v1073_v21, %v1073_v21 }
 0x1fe   : > { %1077 = vadd.xlane.f32.xlu1 %v1075_v5 }
 0x287   : > { %v1080_v6 = vpop.xlane.xlu1 %1079 }
 0x288   : > { %v1082_v7 = vmul.f32 0.125, %v1080_v6 }
 0x28a   : > { %v1084_v18 = vadd.f32 1e-05, %v1082_v7 }
 0x28b   : > { %v1078_v8 = vpop.xlane.xlu1 %1077 }
 0x28c   : > { %1943 = vrsqrt.f32 %v1084_v18  ;;  %v1081_v11 = vmul.f32 0.125, %v1078_v8 }
 0x28e   : > { %v1083_v10 = vadd.f32 1e-05, %v1081_v11 }
 0x290   : > { %1945 = vrsqrt.f32 %v1083_v10 }
 0x296   : > { %v1944_v13 = vpop.eup %1943 }
 0x297   : > { %v1088_v2 = vmul.f32 %v1944_v13, %v1074_v0 }
 0x299   : > { %v1097_v19 = vmul.f32 %v1218_v14, %v1088_v2 }
 0x29a   : > { %v1946_v17 = vpop.eup %1945 }
 0x29b   : > { %v1106_v9 = vadd.f32 %v1219_v15, %v1097_v19  ;;  %v1087_v20 = vmul.f32 %v1946_v17, %v1073_v21 }
 0x29d   : > { %v1108_v22 = vmax.f32 %v1106_v9, 0.0  ;;  %v1096_v23 = vmul.f32 %v1218_v14, %v1087_v20 }
 0x29f   : > { %v1122_v41 = vsel %vm1116_vm3, %v1108_v22, 0.0  ;;  %v1105_v24 = vadd.f32 %v1219_v15, %v1096_v23 }
 0x2a0   : > { %1124 = vst [vmem:[%s246_s22 + $0x8] sm:$0xff] %v1122_v41 }
 0x2a1   : > { %v1107_v25 = vmax.f32 %v1105_v24, 0.0 }
 0x2a3   : > { %1123 = vst [vmem:[%s246_s22] sm:$0xff] %v1107_v25 }
 0x2a4 PF: > { %s15_s20 = sadd.s32 1, %s1969_s20   ;;  %s2515_s18 = smov %s1965_s19 }
 0x2a5   : > { %p12_p5 = scmp.ge.s32.totalorder %s15_s20, 4   ;;  %s2516_s19 = smov %s2518_s21 }
 0x2a7   :  { %14 = sbr.rel (!%p12_p5) target bundleno = 2 (0x2), region = 71 }

// kernel: _lambda_.17
= control target key start
LH: loop header
LB: loop body
LE: loop exit
PB: predicated region body
PF: predicated region fallthrough
CT: control target
= control target key end

     0   :  { %s2051_s21 = smov 0   ;;  %s2053_s22 = smov 0   ;;  %s2559_s0 = inlined_call_operand.vmem [shape: f32[2,24,128], index: 0, kind: input, shape index: {}]   ;;  %s2560_s1 = inlined_call_operand.vmem [shape: f32[1024,128], index: 1, kind: input, shape index: {}]   ;;  %s2561_s2 = inlined_call_operand.vmem [shape: f32[1,128], index: 2, kind: input, shape index: {}]   ;;  %s2562_s3 = inlined_call_operand.vmem [shape: f32[1,128], index: 3, kind: input, shape index: {}, may-alias: {3,4}]   ;;  %s2563_s4 = inlined_call_operand.vmem [shape: f32[1,128], index: 4, kind: input, shape index: {}, may-alias: {3,4}]   ;;  %s2564_s5 = inlined_call_operand.vmem [shape: f32[2,16,384], index: 5, kind: input, shape index: {}]   ;;  %s2565_s6 = inlined_call_operand.vmem [shape: f32[2,16,128], index: 6, kind: output, shape index: {}]  }
   0x1   :  { %s2055_s23 = smov 0  }
   0x2 LB: > { %s28_s3 = sadd.s32 1, %s2010_s22  ;;  %p1263_p0 = scmp.ge.s32.totalorder %s2014_s23, 1  ;;  %s2014_s23 = sphi %s2055_s23, %s16_s23   ;;  %s2010_s22 = sphi %s2053_s22, %s2567_s22   ;;  %s2006_s21 = sphi %s2051_s21, %s2566_s21  }
   0x3   : > { %p30_p1 = scmp.ge.s32.totalorder %s28_s3, 2  ;;  %p244_p2 = scmp.lt.s32.totalorder %s2014_s23, 3 }
   0x5   : > { %s2569_s3 = smov (%p30_p1, %s28_s3), 0  ;;  %p245_p3 = pnand %p1263_p0, %p244_p2 }
   0x6   : > { %v335_v0 = vld [vmem:[%s2560_s1 + $0x80] sm:$0xff] (!%p245_p3)  ;;  %v336_v1 = vld [vmem:[%s2560_s1 + $0x88] sm:$0xff] (!%p245_p3)  ;;  %p288_p4 = scmp.lt.s32.totalorder (!%p245_p3), %s2006_s21, 1  ;;  %v337_v5 = vld [vmem:[%s2560_s1 + $0x90] sm:$0xff] (!%p245_p3)  ;;  %vm354_vm0 = vcmask (!%p245_p3), 1046528   ;;  %vm730_vm1 = vcmask (!%p245_p3), 1043456  }
   0x7   : > { %248 = sbr.rel (%p245_p3) target bundleno = 358 (0x166), region = 44  ;;  %v714_v2 = vld [vmem:[%s2560_s1 + $0x200] sm:$0xff] (!%p245_p3)  ;;  %v1696_v3 = vpack.c.bf16 (!%p245_p3), %v336_v1, %v335_v0  ;;  %v715_v4 = vld [vmem:[%s2560_s1 + $0x208] sm:$0xff] (!%p245_p3)  ;;  %v338_v6 = vld [vmem:[%s2560_s1 + $0x98] sm:$0xff] (!%p245_p3)  ;;  %vm629_vm2 = vcmask (!%p245_p3), 1044480   ;;  %vm1033_vm3 = vcmask (!%p245_p3), 1040384  }
   0x8   : > { %v1824_v7 = vpack.c.bf16 (!%p245_p3), %v715_v4, %v714_v2  ;;  %v1700_v8 = vpack.c.bf16 (!%p245_p3), %v338_v6, %v337_v5  ;;  %v716_v9 = vld [vmem:[%s2560_s1 + $0x210] sm:$0xff] (!%p245_p3)  ;;  %v717_v10 = vld [vmem:[%s2560_s1 + $0x218] sm:$0xff] (!%p245_p3)  ;;  %v339_v11 = vld [vmem:[%s2560_s1 + $0xa0] sm:$0xff] (!%p245_p3)  ;;  %vm831_vm4 = vcmask (!%p245_p3), 1042432   ;;  %vm528_vm5 = vcmask (!%p245_p3), 1045504  }
   0x9   : > { %1697 = vmatprep.subr.bf16.mxu1 (!%p245_p3), %v1696_v3  ;;  %v1828_v12 = vpack.c.bf16 (!%p245_p3), %v717_v10, %v716_v9  ;;  %v340_v13 = vld [vmem:[%s2560_s1 + $0xa8] sm:$0xff] (!%p245_p3)  ;;  %v718_v14 = vld [vmem:[%s2560_s1 + $0x220] sm:$0xff] (!%p245_p3)  ;;  %v341_v18 = vld [vmem:[%s2560_s1 + $0xb0] sm:$0xff] (!%p245_p3)  ;;  %vm932_vm6 = vcmask (!%p245_p3), 1041408  }
   0xa   : > { %v719_v15 = vld [vmem:[%s2560_s1 + $0x228] sm:$0xff] (!%p245_p3)  ;;  %1825 = vmatprep.subr.bf16.mxu0 (!%p245_p3), %v1824_v7  ;;  %1699 = vmatpush3.bf16.msra.mxu1 (!%p245_p3), %v1696_v3  ;;  %v1704_v16 = vpack.c.bf16 (!%p245_p3), %v340_v13, %v339_v11  ;;  %v342_v19 = vld [vmem:[%s2560_s1 + $0xb8] sm:$0xff] (!%p245_p3)  ;;  %v720_v20 = vld [vmem:[%s2560_s1 + $0x230] sm:$0xff] (!%p245_p3) }
   0xb   : > { %1827 = vmatpush3.bf16.msra.mxu0 (!%p245_p3), %v1824_v7  ;;  %1701 = vmatprep.subr.bf16.mxu1 (!%p245_p3), %v1700_v8  ;;  %v1832_v17 = vpack.c.bf16 (!%p245_p3), %v719_v15, %v718_v14  ;;  %v721_v21 = vld [vmem:[%s2560_s1 + $0x238] sm:$0xff] (!%p245_p3)  ;;  %v1708_v22 = vpack.c.bf16 (!%p245_p3), %v342_v19, %v341_v18  ;;  %v343_v24 = vld [vmem:[%s2560_s1 + $0xc0] sm:$0xff] (!%p245_p3)  ;;  %v344_v25 = vld [vmem:[%s2560_s1 + $0xc8] sm:$0xff] (!%p245_p3) }
   0xc   : > { %1829 = vmatprep.subr.bf16.mxu0 (!%p245_p3), %v1828_v12  ;;  %v1836_v23 = vpack.c.bf16 (!%p245_p3), %v721_v21, %v720_v20  ;;  %v722_v27 = vld [vmem:[%s2560_s1 + $0x240] sm:$0xff] (!%p245_p3)  ;;  %v723_v28 = vld [vmem:[%s2560_s1 + $0x248] sm:$0xff] (!%p245_p3)  ;;  %v1712_v34 = vpack.c.bf16 (!%p245_p3), %v344_v25, %v343_v24  ;;  %v345_v36 = vld [vmem:[%s2560_s1 + $0xd0] sm:$0xff] (!%p245_p3) }
   0xd   : > { %v1840_v35 = vpack.c.bf16 (!%p245_p3), %v723_v28, %v722_v27  ;;  %v346_v37 = vld [vmem:[%s2560_s1 + $0xd8] sm:$0xff] (!%p245_p3)  ;;  %v724_v40 = vld [vmem:[%s2560_s1 + $0x250] sm:$0xff] (!%p245_p3)  ;;  %v347_v44 = vld [vmem:[%s2560_s1 + $0xe0] sm:$0xff] (!%p245_p3) }
   0xe   : > { %s2571_s21 = smov (!%p288_p4, %s2006_s21), 1  ;;  %1703 = vmatpush3.bf16.msra.mxu1 %v1700_v8  ;;  %v725_v41 = vld [vmem:[%s2560_s1 + $0x258] sm:$0xff]  ;;  %v1716_v42 = vpack.c.bf16 %v346_v37, %v345_v36  ;;  %v348_v45 = vld [vmem:[%s2560_s1 + $0xe8] sm:$0xff]  ;;  %v726_v46 = vld [vmem:[%s2560_s1 + $0x260] sm:$0xff] }
   0xf   : > { %s1966_s25 = smul.u32 24, %s2571_s21  ;;  %1831 = vmatpush3.bf16.msra.mxu0 %v1828_v12  ;;  %1705 = vmatprep.subr.bf16.mxu1 %v1704_v16  ;;  %v1844_v43 = vpack.c.bf16 %v725_v41, %v724_v40  ;;  %v727_v47 = vld [vmem:[%s2560_s1 + $0x268] sm:$0xff]  ;;  %v1720_v50 = vpack.c.bf16 %v348_v45, %v347_v44  ;;  %v349_v55 = vld [vmem:[%s2560_s1 + $0xf0] sm:$0xff]  ;;  %v350_v56 = vld [vmem:[%s2560_s1 + $0xf8] sm:$0xff] }
  0x10   : > { %1833 = vmatprep.subr.bf16.mxu0 %v1832_v17  ;;  %v1848_v54 = vpack.c.bf16 %v727_v47, %v726_v46  ;;  %v728_v60 = vld [vmem:[%s2560_s1 + $0x270] sm:$0xff]  ;;  %v729_v61 = vld [vmem:[%s2560_s1 + $0x278] sm:$0xff]  ;;  %v1724_v1 = vpack.c.bf16 %v350_v56, %v349_v55  ;;  %v319_v3 = vld [vmem:[%s2560_s1] sm:$0xff]  ;;  %s1967_s18 = smul.u32 48, %s2571_s21 }
  0x11   : > { %s2123_s12 = scalar_lea.vmem %s2559_s0, %s1966_s25  ;;  %v1852_v2 = vpack.c.bf16 %v729_v61, %v728_v60  ;;  %v320_v4 = vld [vmem:[%s2560_s1 + $0x8] sm:$0xff]  ;;  %v815_v5 = vld [vmem:[%s2560_s1 + $0x280] sm:$0xff]  ;;  %v321_v11 = vld [vmem:[%s2560_s1 + $0x10] sm:$0xff]  ;;  %s1271_s25 = sshll.u32 %s2571_s21, 4 }
  0x12   : > { %v2132_v26 = vld [vmem:[%s2123_s12] sm:$0xff]  ;;  %v2141_v29 = vld [vmem:[%s2123_s12 + $0x8] sm:$0xff]  ;;  %1707 = vmatpush3.bf16.msra.mxu1 %v1704_v16  ;;  %v2180_v51 = vld [vmem:[%s2123_s12 + $0x10] sm:$0xff]  ;;  %v1728_v8 = vpack.c.bf16 %v320_v4, %v319_v3  ;;  %s302_s20 = scalar_lea.vmem %s2564_s5, %s1967_s18  ;;  %s312_s28 = scalar_lea.vmem %s2565_s6, %s1271_s25 }
  0x13   : > { %v355_v30 = vrot.slane %v2132_v26, 1  ;;  %v731_v31 = vrot.slane %v2132_v26, 4  ;;  %v356_v32 = vrot.slane %v2141_v29, 1  ;;  %v732_v33 = vrot.slane %v2141_v29, 4  ;;  %1835 = vmatpush3.bf16.msra.mxu0 %v1832_v17  ;;  %1709 = vmatprep.subr.bf16.mxu1 %v1708_v22  ;;  %v816_v6 = vld [vmem:[%s2560_s1 + $0x288] sm:$0xff]  ;;  %v322_v12 = vld [vmem:[%s2560_s1 + $0x18] sm:$0xff] }
  0x14   : > { %1837 = vmatprep.subr.bf16.mxu0 %v1836_v23  ;;  %v630_v48 = vrot.slane %v2132_v26, 3  ;;  %v631_v49 = vrot.slane %v2141_v29, 3  ;;  %v1034_v52 = vrot.slane %v2132_v26, 7  ;;  %v1035_v53 = vrot.slane %v2141_v29, 7  ;;  %v817_v13 = vld [vmem:[%s2560_s1 + $0x290] sm:$0xff]  ;;  %v818_v14 = vld [vmem:[%s2560_s1 + $0x298] sm:$0xff] }
  0x15   : > { %v357_v38 = vsel %vm354_vm0, %v355_v30, %v356_v32  ;;  %v733_v39 = vsel %vm730_vm1, %v731_v31, %v732_v33  ;;  %v633_v58 = vrot.slane %v2180_v51, 3  ;;  %v1037_v59 = vrot.slane %v2180_v51, 7  ;;  %v323_v21 = vld [vmem:[%s2560_s1 + $0x20] sm:$0xff]  ;;  %v820_v24 = vld [vmem:[%s2560_s1 + $0x2a8] sm:$0xff]  ;;  %v325_v30 = vld [vmem:[%s2560_s1 + $0x30] sm:$0xff] }
  0x16   : > { %1448 = vmatprep.mubr.f32.mxu1 %v357_v38  ;;  %1588 = vmatprep.mubr.f32.mxu0 %v733_v39  ;;  %v2191_v57 = vsel %vm629_vm2, %v630_v48, %v631_v49  ;;  %v2202_v62 = vsel %vm1033_vm3, %v1034_v52, %v1035_v53  ;;  %v358_v7 = vrot.slane %v2180_v51, 1  ;;  %v734_v9 = vrot.slane %v2180_v51, 4  ;;  %v326_v31 = vld [vmem:[%s2560_s1 + $0x38] sm:$0xff]  ;;  %v327_v36 = vld [vmem:[%s2560_s1 + $0x40] sm:$0xff]  ;;  %v328_v37 = vld [vmem:[%s2560_s1 + $0x48] sm:$0xff] }
  0x17   : > { %1711 = vmatpush3.bf16.msra.mxu1 %v1708_v22  ;;  %1839 = vmatpush3.bf16.msra.mxu0 %v1836_v23  ;;  %v2205_v63 = vsel %vm629_vm2, %v631_v49, %v633_v58  ;;  %v2208_v0 = vsel %vm1033_vm3, %v1035_v53, %v1037_v59  ;;  %v1856_v10 = vpack.c.bf16 %v816_v6, %v815_v5  ;;  %v832_v16 = vrot.slane %v2132_v26, 5  ;;  %v324_v22 = vld [vmem:[%s2560_s1 + $0x28] sm:$0xff]  ;;  %v819_v23 = vld [vmem:[%s2560_s1 + $0x2a0] sm:$0xff]  ;;  %v825_v44 = vld [vmem:[%s2560_s1 + $0x2d0] sm:$0xff] }
  0x18   : > { %1713 = vmatprep.subr.bf16.mxu1 %v1712_v34  ;;  %1841 = vmatprep.subr.bf16.mxu0 %v1840_v35  ;;  %v359_v15 = vsel %vm354_vm0, %v356_v32, %v358_v7  ;;  %v833_v17 = vrot.slane %v2141_v29, 5  ;;  %v735_v18 = vsel %vm730_vm1, %v732_v33, %v734_v9  ;;  %v1732_v19 = vpack.c.bf16 %v322_v12, %v321_v11  ;;  %v821_v32 = vld [vmem:[%s2560_s1 + $0x2b0] sm:$0xff]  ;;  %v822_v33 = vld [vmem:[%s2560_s1 + $0x2b8] sm:$0xff]  ;;  %v823_v38 = vld [vmem:[%s2560_s1 + $0x2c0] sm:$0xff] }
  0x19   : > { %v1860_v20 = vpack.c.bf16 %v818_v14, %v817_v13  ;;  %v1736_v27 = vpack.c.bf16 %v324_v22, %v323_v21  ;;  %v1864_v28 = vpack.c.bf16 %v820_v24, %v819_v23  ;;  %v824_v39 = vld [vmem:[%s2560_s1 + $0x2c8] sm:$0xff]  ;;  %v1744_v40 = vpack.c.bf16 %v328_v37, %v327_v36  ;;  %v826_v45 = vld [vmem:[%s2560_s1 + $0x2d8] sm:$0xff]  ;;  %v331_v48 = vld [vmem:[%s2560_s1 + $0x60] sm:$0xff] }
  0x1a   : > { %v834_v25 = vsel %vm831_vm4, %v832_v16, %v833_v17  ;;  %v1872_v41 = vpack.c.bf16 %v824_v39, %v823_v38  ;;  %v1876_v47 = vpack.c.bf16 %v826_v45, %v825_v44  ;;  %v332_v49 = vld [vmem:[%s2560_s1 + $0x68] sm:$0xff]  ;;  %v333_v55 = vld [vmem:[%s2560_s1 + $0x70] sm:$0xff]  ;;  %v334_v56 = vld [vmem:[%s2560_s1 + $0x78] sm:$0xff]  ;;  %v835_v6 = vrot.slane %v2180_v51, 5 }
  0x1b   : > { %1715 = vmatpush3.bf16.msra.mxu1 %v1712_v34  ;;  %1843 = vmatpush3.bf16.msra.mxu0 %v1840_v35  ;;  %v1740_v34 = vpack.c.bf16 %v326_v31, %v325_v30  ;;  %v1868_v35 = vpack.c.bf16 %v822_v33, %v821_v32  ;;  %v828_v52 = vld [vmem:[%s2560_s1 + $0x2e8] sm:$0xff]  ;;  %v1752_v53 = vpack.c.bf16 %v332_v49, %v331_v48  ;;  %v829_v58 = vld [vmem:[%s2560_s1 + $0x2f0] sm:$0xff]  ;;  %v830_v59 = vld [vmem:[%s2560_s1 + $0x2f8] sm:$0xff]  ;;  %v529_v12 = vrot.slane %v2132_v26, 2 }
  0x1c   : > { %1717 = vmatprep.subr.bf16.mxu1 %v1716_v42  ;;  %1845 = vmatprep.subr.bf16.mxu0 %v1844_v43  ;;  %v1756_v60 = vpack.c.bf16 %v334_v56, %v333_v55  ;;  %v1884_v61 = vpack.c.bf16 %v830_v59, %v829_v58  ;;  %v916_v3 = vld [vmem:[%s2560_s1 + $0x300] sm:$0xff]  ;;  %v917_v4 = vld [vmem:[%s2560_s1 + $0x308] sm:$0xff]  ;;  %v515_v9 = vld [vmem:[%s2560_s1 + $0x118] sm:$0xff]  ;;  %v530_v13 = vrot.slane %v2141_v29, 2  ;;  %v933_v14 = vrot.slane %v2132_v26, 6 }
  0x1d   : > { %v1888_v7 = vpack.c.bf16 %v917_v4, %v916_v3  ;;  %v919_v11 = vld [vmem:[%s2560_s1 + $0x318] sm:$0xff]  ;;  %v836_v16 = vsel %vm831_vm4, %v833_v17, %v835_v6  ;;  %v920_v21 = vld [vmem:[%s2560_s1 + $0x320] sm:$0xff]  ;;  %v921_v17 = vld [vmem:[%s2560_s1 + $0x328] sm:$0xff]  ;;  %v532_v3 = vrot.slane %v2180_v51, 2 }
  0x1e   : > { %v531_v22 = vsel %vm528_vm5, %v529_v12, %v530_v13  ;;  %v922_v30 = vld [vmem:[%s2560_s1 + $0x330] sm:$0xff]  ;;  %v923_v31 = vld [vmem:[%s2560_s1 + $0x338] sm:$0xff]  ;;  %v924_v36 = vld [vmem:[%s2560_s1 + $0x340] sm:$0xff] }
  0x1f   : > { %1719 = vmatpush3.bf16.msra.mxu1 %v1716_v42  ;;  %1847 = vmatpush3.bf16.msra.mxu0 %v1844_v43  ;;  %v329_v42 = vld [vmem:[%s2560_s1 + $0x50] sm:$0xff]  ;;  %v330_v43 = vld [vmem:[%s2560_s1 + $0x58] sm:$0xff]  ;;  %v1900_v33 = vpack.c.bf16 %v923_v31, %v922_v30  ;;  %v925_v37 = vld [vmem:[%s2560_s1 + $0x348] sm:$0xff] }
  0x20   : > { %1721 = vmatprep.subr.bf16.mxu1 %v1720_v50  ;;  %1849 = vmatprep.subr.bf16.mxu0 %v1848_v54  ;;  %v1748_v46 = vpack.c.bf16 %v330_v43, %v329_v42  ;;  %v1904_v39 = vpack.c.bf16 %v925_v37, %v924_v36  ;;  %v926_v42 = vld [vmem:[%s2560_s1 + $0x350] sm:$0xff]  ;;  %v927_v43 = vld [vmem:[%s2560_s1 + $0x358] sm:$0xff]  ;;  %v928_v48 = vld [vmem:[%s2560_s1 + $0x360] sm:$0xff] }
  0x21   : > { %v1908_v45 = vpack.c.bf16 %v927_v43, %v926_v42  ;;  %v929_v49 = vld [vmem:[%s2560_s1 + $0x368] sm:$0xff]  ;;  %v930_v55 = vld [vmem:[%s2560_s1 + $0x370] sm:$0xff]  ;;  %v931_v56 = vld [vmem:[%s2560_s1 + $0x378] sm:$0xff] }
  0x22   : > { %v1916_v59 = vpack.c.bf16 %v931_v56, %v930_v55  ;;  %v623_v30 = vld [vmem:[%s2560_s1 + $0x1d0] sm:$0xff]  ;;  %v624_v31 = vld [vmem:[%s2560_s1 + $0x1d8] sm:$0xff]  ;;  %v625_v36 = vld [vmem:[%s2560_s1 + $0x1e0] sm:$0xff] }
  0x23   : > { %1723 = vmatpush3.bf16.msra.mxu1 %v1720_v50  ;;  %1851 = vmatpush3.bf16.msra.mxu0 %v1848_v54  ;;  %v827_v50 = vld [vmem:[%s2560_s1 + $0x2e0] sm:$0xff]  ;;  %v626_v37 = vld [vmem:[%s2560_s1 + $0x1e8] sm:$0xff]  ;;  %v627_v42 = vld [vmem:[%s2560_s1 + $0x1f0] sm:$0xff] }
  0x24   : > { %1725 = vmatprep.subr.bf16.mxu1 %v1724_v1  ;;  %1853 = vmatprep.subr.bf16.mxu0 %v1852_v2  ;;  %v1880_v54 = vpack.c.bf16 %v828_v52, %v827_v50  ;;  %v1912_v52 = vpack.c.bf16 %v929_v49, %v928_v48  ;;  %v628_v43 = vld [vmem:[%s2560_s1 + $0x1f8] sm:$0xff]  ;;  %v1127_v48 = vlaneseq }
  0x26   : > { %v1128_v49 = vshrl.u32 %v1127_v48, 7 }
  0x27   : > { %1727 = vmatpush3.bf16.msra.mxu1 %v1724_v1  ;;  %1855 = vmatpush3.bf16.msra.mxu0 %v1852_v2  ;;  %v512_v1 = vld [vmem:[%s2560_s1 + $0x100] sm:$0xff]  ;;  %v513_v2 = vld [vmem:[%s2560_s1 + $0x108] sm:$0xff] }
  0x28   : > { %1729 = vmatprep.subr.bf16.mxu1 %v1728_v8  ;;  %1857 = vmatprep.subr.bf16.mxu0 %v1856_v10  ;;  %v1760_v5 = vpack.c.bf16 %v513_v2, %v512_v1  ;;  %v1017_v1 = vld [vmem:[%s2560_s1 + $0x380] sm:$0xff]  ;;  %v1018_v2 = vld [vmem:[%s2560_s1 + $0x388] sm:$0xff]  ;;  %v1129_v55 = vadd.s32 8, %v1128_v49 }
  0x29   : > { %v1920_v6 = vpack.c.bf16 %v1018_v2, %v1017_v1 }
  0x2a   : > { %1449 = vmatmul.mubr.f32.vlgmr.msra.gmra.mrb[0].mxu1 %v359_v15  ;;  %1589 = vmatmul.mubr.f32.vlgmr.msra.gmra.mrb[0].mxu0 %v735_v18  ;;  %v934_v15 = vrot.slane %v2141_v29, 6  ;;  %vm1134_vm7 = vcmp.lt.s32.totalorder %v1129_v55, 11 }
  0x2b   : > { %1731 = vmatpush3.bf16.msra.mxu1 %v1728_v8  ;;  %1859 = vmatpush3.bf16.msra.mxu0 %v1856_v10  ;;  %v514_v8 = vld [vmem:[%s2560_s1 + $0x110] sm:$0xff] }
  0x2c   : > { %1733 = vmatprep.subr.bf16.mxu1 %v1732_v19  ;;  %1861 = vmatprep.subr.bf16.mxu0 %v1860_v20  ;;  %v918_v10 = vld [vmem:[%s2560_s1 + $0x310] sm:$0xff]  ;;  %v1764_v18 = vpack.c.bf16 %v515_v9, %v514_v8  ;;  %v935_v23 = vsel %vm932_vm6, %v933_v14, %v934_v15  ;;  %v616_v8 = vld [vmem:[%s2560_s1 + $0x198] sm:$0xff] }
  0x2d   : > { %1483 = vmatprep.mubr.f32.mxu1 %v2132_v26  ;;  %1623 = vmatprep.mubr.f32.mxu0 %v834_v25  ;;  %v517_v26 = vld [vmem:[%s2560_s1 + $0x128] sm:$0xff]  ;;  %v1896_v25 = vpack.c.bf16 %v921_v17, %v920_v21  ;;  %v1019_v9 = vld [vmem:[%s2560_s1 + $0x390] sm:$0xff]  ;;  %v1024_v17 = vld [vmem:[%s2560_s1 + $0x3b8] sm:$0xff] }
  0x2e   : > { %v1023_v21 = vld [vmem:[%s2560_s1 + $0x3b0] sm:$0xff] }
  0x2f   : > { %1735 = vmatpush3.bf16.msra.mxu1 %v1732_v19  ;;  %1863 = vmatpush3.bf16.msra.mxu0 %v1860_v20  ;;  %v1892_v19 = vpack.c.bf16 %v919_v11, %v918_v10  ;;  %v516_v20 = vld [vmem:[%s2560_s1 + $0x120] sm:$0xff]  ;;  %v1020_v10 = vld [vmem:[%s2560_s1 + $0x398] sm:$0xff] }
  0x30   : > { %1737 = vmatprep.subr.bf16.mxu1 %v1736_v27  ;;  %1865 = vmatprep.subr.bf16.mxu0 %v1864_v28  ;;  %v1768_v24 = vpack.c.bf16 %v517_v26, %v516_v20  ;;  %v1924_v14 = vpack.c.bf16 %v1020_v10, %v1019_v9  ;;  %v619_v20 = vld [vmem:[%s2560_s1 + $0x1b0] sm:$0xff]  ;;  %v620_v26 = vld [vmem:[%s2560_s1 + $0x1b8] sm:$0xff] }
  0x33   : > { %1739 = vmatpush3.bf16.msra.mxu1 %v1736_v27  ;;  %1867 = vmatpush3.bf16.msra.mxu0 %v1864_v28  ;;  %v518_v27 = vld [vmem:[%s2560_s1 + $0x130] sm:$0xff]  ;;  %v519_v28 = vld [vmem:[%s2560_s1 + $0x138] sm:$0xff] }
  0x34   : > { %1741 = vmatprep.subr.bf16.mxu1 %v1740_v34  ;;  %1869 = vmatprep.subr.bf16.mxu0 %v1868_v35  ;;  %v1772_v32 = vpack.c.bf16 %v519_v28, %v518_v27 }
  0x37   : > { %1743 = vmatpush3.bf16.msra.mxu1 %v1740_v34  ;;  %1871 = vmatpush3.bf16.msra.mxu0 %v1868_v35  ;;  %v520_v34 = vld [vmem:[%s2560_s1 + $0x140] sm:$0xff]  ;;  %v521_v35 = vld [vmem:[%s2560_s1 + $0x148] sm:$0xff] }
  0x38   : > { %1745 = vmatprep.subr.bf16.mxu1 %v1744_v40  ;;  %1873 = vmatprep.subr.bf16.mxu0 %v1872_v41  ;;  %v1776_v38 = vpack.c.bf16 %v521_v35, %v520_v34  ;;  %v1812_v34 = vpack.c.bf16 %v624_v31, %v623_v30 }
  0x3b   : > { %1747 = vmatpush3.bf16.msra.mxu1 %v1744_v40  ;;  %1875 = vmatpush3.bf16.msra.mxu0 %v1872_v41  ;;  %v522_v40 = vld [vmem:[%s2560_s1 + $0x150] sm:$0xff]  ;;  %v523_v41 = vld [vmem:[%s2560_s1 + $0x158] sm:$0xff] }
  0x3c   : > { %1749 = vmatprep.subr.bf16.mxu1 %v1748_v46  ;;  %1877 = vmatprep.subr.bf16.mxu0 %v1876_v47  ;;  %v1780_v44 = vpack.c.bf16 %v523_v41, %v522_v40  ;;  %v1816_v40 = vpack.c.bf16 %v626_v37, %v625_v36 }
  0x3f   : > { %1751 = vmatpush3.bf16.msra.mxu1 %v1748_v46  ;;  %1879 = vmatpush3.bf16.msra.mxu0 %v1876_v47  ;;  %v524_v46 = vld [vmem:[%s2560_s1 + $0x160] sm:$0xff]  ;;  %v525_v47 = vld [vmem:[%s2560_s1 + $0x168] sm:$0xff] }
  0x40   : > { %1753 = vmatprep.subr.bf16.mxu1 %v1752_v53  ;;  %1881 = vmatprep.subr.bf16.mxu0 %v1880_v54  ;;  %v1784_v50 = vpack.c.bf16 %v525_v47, %v524_v46  ;;  %v1820_v46 = vpack.c.bf16 %v628_v43, %v627_v42 }
  0x43   : > { %1755 = vmatpush3.bf16.msra.mxu1 %v1752_v53  ;;  %1883 = vmatpush3.bf16.msra.mxu0 %v1880_v54  ;;  %v526_v53 = vld [vmem:[%s2560_s1 + $0x170] sm:$0xff]  ;;  %v527_v54 = vld [vmem:[%s2560_s1 + $0x178] sm:$0xff] }
  0x44   : > { %1757 = vmatprep.subr.bf16.mxu1 %v1756_v60  ;;  %1885 = vmatprep.subr.bf16.mxu0 %v1884_v61  ;;  %v1788_v58 = vpack.c.bf16 %v527_v54, %v526_v53  ;;  %v1141_v53 = vld [vmem:[%s302_s20] sm:$0xff]  ;;  %v1142_v54 = vld [vmem:[%s302_s20 + $0x8] sm:$0xff] }
  0x47   : > { %1759 = vmatpush3.bf16.msra.mxu1 %v1756_v60  ;;  %1887 = vmatpush3.bf16.msra.mxu0 %v1884_v61  ;;  %v613_v60 = vld [vmem:[%s2560_s1 + $0x180] sm:$0xff]  ;;  %v614_v61 = vld [vmem:[%s2560_s1 + $0x188] sm:$0xff] }
  0x48   : > { %1761 = vmatprep.subr.bf16.mxu1 %v1760_v5  ;;  %1889 = vmatprep.subr.bf16.mxu0 %v1888_v7  ;;  %v1792_v4 = vpack.c.bf16 %v614_v61, %v613_v60  ;;  %v1146_v60 = vld [vmem:[%s302_s20 + $0x28] sm:$0xff] }
  0x4a   : > { %1484 = vmatmul.mubr.f32.vlgmr.msra.gmra.mrb[0].mxu1 %v2141_v29  ;;  %1624 = vmatmul.mubr.f32.vlgmr.msra.gmra.mrb[0].mxu0 %v836_v16  ;;  %v617_v16 = vld [vmem:[%s2560_s1 + $0x1a0] sm:$0xff]  ;;  %v1022_v29 = vld [vmem:[%s2560_s1 + $0x3a8] sm:$0xff] }
  0x4b   : > { %1763 = vmatpush3.bf16.msra.mxu1 %v1760_v5  ;;  %1891 = vmatpush3.bf16.msra.mxu0 %v1888_v7  ;;  %v936_v5 = vrot.slane %v2180_v51, 6  ;;  %v615_v7 = vld [vmem:[%s2560_s1 + $0x190] sm:$0xff]  ;;  %v533_v51 = vsel %vm528_vm5, %v530_v13, %v532_v3  ;;  %v1021_v13 = vld [vmem:[%s2560_s1 + $0x3a0] sm:$0xff] }
  0x4c   : > { %1765 = vmatprep.subr.bf16.mxu1 %v1764_v18  ;;  %1893 = vmatprep.subr.bf16.mxu0 %v1892_v19  ;;  %v1796_v12 = vpack.c.bf16 %v616_v8, %v615_v7 }
  0x4d   : > { %1518 = vmatprep.mubr.f32.mxu1 %v531_v22  ;;  %1658 = vmatprep.mubr.f32.mxu0 %v935_v23  ;;  %v937_v11 = vsel %vm932_vm6, %v934_v15, %v936_v5  ;;  %v1804_v22 = vpack.c.bf16 %v620_v26, %v619_v20  ;;  %v1932_v23 = vpack.c.bf16 %v1024_v17, %v1023_v21 }
  0x4f   : > { %1767 = vmatpush3.bf16.msra.mxu1 %v1764_v18  ;;  %1895 = vmatpush3.bf16.msra.mxu0 %v1892_v19  ;;  %v618_v18 = vld [vmem:[%s2560_s1 + $0x1a8] sm:$0xff]  ;;  %v1928_v19 = vpack.c.bf16 %v1022_v29, %v1021_v13 }
  0x50   : > { %1769 = vmatprep.subr.bf16.mxu1 %v1768_v24  ;;  %1897 = vmatprep.subr.bf16.mxu0 %v1896_v25  ;;  %v1800_v15 = vpack.c.bf16 %v618_v18, %v617_v16 }
  0x53   : > { %1771 = vmatpush3.bf16.msra.mxu1 %v1768_v24  ;;  %1899 = vmatpush3.bf16.msra.mxu0 %v1896_v25  ;;  %v622_v24 = vld [vmem:[%s2560_s1 + $0x1c8] sm:$0xff]  ;;  %v1025_v25 = vld [vmem:[%s2560_s1 + $0x3c0] sm:$0xff] }
  0x54   : > { %1773 = vmatprep.subr.bf16.mxu1 %v1772_v32  ;;  %1901 = vmatprep.subr.bf16.mxu0 %v1900_v33 }
  0x57   : > { %1775 = vmatpush3.bf16.msra.mxu1 %v1772_v32  ;;  %1903 = vmatpush3.bf16.msra.mxu0 %v1900_v33  ;;  %v1027_v32 = vld [vmem:[%s2560_s1 + $0x3d0] sm:$0xff]  ;;  %v1028_v33 = vld [vmem:[%s2560_s1 + $0x3d8] sm:$0xff] }
  0x58   : > { %1777 = vmatprep.subr.bf16.mxu1 %v1776_v38  ;;  %1905 = vmatprep.subr.bf16.mxu0 %v1904_v39  ;;  %v1940_v35 = vpack.c.bf16 %v1028_v33, %v1027_v32 }
  0x5b   : > { %1779 = vmatpush3.bf16.msra.mxu1 %v1776_v38  ;;  %1907 = vmatpush3.bf16.msra.mxu0 %v1904_v39  ;;  %v1029_v38 = vld [vmem:[%s2560_s1 + $0x3e0] sm:$0xff]  ;;  %v1030_v39 = vld [vmem:[%s2560_s1 + $0x3e8] sm:$0xff] }
  0x5c   : > { %1781 = vmatprep.subr.bf16.mxu1 %v1780_v44  ;;  %1909 = vmatprep.subr.bf16.mxu0 %v1908_v45  ;;  %v1944_v41 = vpack.c.bf16 %v1030_v39, %v1029_v38 }
  0x5f   : > { %1783 = vmatpush3.bf16.msra.mxu1 %v1780_v44  ;;  %1911 = vmatpush3.bf16.msra.mxu0 %v1908_v45  ;;  %v1031_v44 = vld [vmem:[%s2560_s1 + $0x3f0] sm:$0xff]  ;;  %v1032_v45 = vld [vmem:[%s2560_s1 + $0x3f8] sm:$0xff] }
  0x60   : > { %1785 = vmatprep.subr.bf16.mxu1 %v1784_v50  ;;  %1913 = vmatprep.subr.bf16.mxu0 %v1912_v52  ;;  %v1948_v47 = vpack.c.bf16 %v1032_v45, %v1031_v44 }
  0x63   : > { %1787 = vmatpush3.bf16.msra.mxu1 %v1784_v50  ;;  %1915 = vmatpush3.bf16.msra.mxu0 %v1912_v52  ;;  %v1144_v50 = vld [vmem:[%s302_s20 + $0x18] sm:$0xff]  ;;  %v1145_v52 = vld [vmem:[%s302_s20 + $0x20] sm:$0xff] }
  0x64   : > { %1789 = vmatprep.subr.bf16.mxu1 %v1788_v58  ;;  %1917 = vmatprep.subr.bf16.mxu0 %v1916_v59  ;;  %v1148_v56 = vmax.f32 %v1144_v50, %v1145_v52 }
  0x67   : > { %1791 = vmatpush3.bf16.msra.mxu1 %v1788_v58  ;;  %1919 = vmatpush3.bf16.msra.mxu0 %v1916_v59  ;;  %v1147_v58 = vmax.f32 %v1141_v53, %v1142_v54 }
  0x68   : > { %1793 = vmatprep.subr.bf16.mxu1 %v1792_v4  ;;  %1921 = vmatprep.subr.bf16.mxu0 %v1920_v6 }
  0x6a   : > { %1519 = vmatmul.mubr.f32.vlgmr.msra.gmra.mrb[0].mxu1 %v533_v51  ;;  %1659 = vmatmul.mubr.f32.vlgmr.msra.gmra.mrb[0].mxu0 %v937_v11 }
  0x6b   : > { %1795 = vmatpush3.bf16.msra.mxu1 %v1792_v4  ;;  %1923 = vmatpush3.bf16.msra.mxu0 %v1920_v6  ;;  %v1150_v4 = vmax.f32 %v1148_v56, %v1146_v60 }
  0x6c   : > { %1797 = vmatprep.subr.bf16.mxu1 %v1796_v12  ;;  %1925 = vmatprep.subr.bf16.mxu0 %v1924_v14 }
  0x6d   : > { %1553 = vmatprep.mubr.f32.mxu1 %v2191_v57  ;;  %1693 = vmatprep.mubr.f32.mxu0 %v2202_v62  ;;  %v621_v57 = vld [vmem:[%s2560_s1 + $0x1c0] sm:$0xff]  ;;  %v1026_v62 = vld [vmem:[%s2560_s1 + $0x3c8] sm:$0xff] }
  0x6e   : > { %v1808_v27 = vpack.c.bf16 %v622_v24, %v621_v57  ;;  %v1936_v28 = vpack.c.bf16 %v1026_v62, %v1025_v25 }
  0x6f   : > { %1799 = vmatpush3.bf16.msra.mxu1 %v1796_v12  ;;  %1927 = vmatpush3.bf16.msra.mxu0 %v1924_v14 }
  0x70   : > { %1801 = vmatprep.subr.bf16.mxu1 %v1800_v15  ;;  %1929 = vmatprep.subr.bf16.mxu0 %v1928_v19 }
  0x73   : > { %1803 = vmatpush3.bf16.msra.mxu1 %v1800_v15  ;;  %1931 = vmatpush3.bf16.msra.mxu0 %v1928_v19 }
  0x74   : > { %1805 = vmatprep.subr.bf16.mxu1 %v1804_v22  ;;  %1933 = vmatprep.subr.bf16.mxu0 %v1932_v23 }
  0x77   : > { %1807 = vmatpush3.bf16.msra.mxu1 %v1804_v22  ;;  %1935 = vmatpush3.bf16.msra.mxu0 %v1932_v23 }
  0x78   : > { %1809 = vmatprep.subr.bf16.mxu1 %v1808_v27  ;;  %1937 = vmatprep.subr.bf16.mxu0 %v1936_v28 }
  0x7b   : > { %1811 = vmatpush3.bf16.msra.mxu1 %v1808_v27  ;;  %1939 = vmatpush3.bf16.msra.mxu0 %v1936_v28 }
  0x7c   : > { %1813 = vmatprep.subr.bf16.mxu1 %v1812_v34  ;;  %1941 = vmatprep.subr.bf16.mxu0 %v1940_v35 }
  0x7f   : > { %1815 = vmatpush3.bf16.msra.mxu1 %v1812_v34  ;;  %1943 = vmatpush3.bf16.msra.mxu0 %v1940_v35 }
  0x80   : > { %1817 = vmatprep.subr.bf16.mxu1 %v1816_v40  ;;  %1945 = vmatprep.subr.bf16.mxu0 %v1944_v41 }
  0x83   : > { %1819 = vmatpush3.bf16.msra.mxu1 %v1816_v40  ;;  %1947 = vmatpush3.bf16.msra.mxu0 %v1944_v41 }
  0x84   : > { %1821 = vmatprep.subr.bf16.mxu1 %v1820_v46  ;;  %1949 = vmatprep.subr.bf16.mxu0 %v1948_v47 }
  0x87   : > { %1823 = vmatpush3.bf16.msra.mxu1 %v1820_v46  ;;  %1951 = vmatpush3.bf16.msra.mxu0 %v1948_v47 }
  0x8a   : > { %1554 = vmatmul.mubr.f32.vlgmr.msra.gmra.mrb[0].mxu1 %v2205_v63  ;;  %1694 = vmatmul.mubr.f32.vlgmr.msra.gmra.mrb[0].mxu0 %v2208_v0  ;;  %v1143_v63 = vld [vmem:[%s302_s20 + $0x10] sm:$0xff]  ;;  %v1268_v0 = vld [vmem:[%s2561_s2] ss:$0 sm:$0xff] }
  0x8b   : > { %v1149_v6 = vmax.f32 %v1147_v58, %v1143_v63 }
 0x15d   : > { %v1555_v59 = vpop.f32.mrb[0].mxu1  ;;  %v1695_v61 = vpop.f32.mrb[0].mxu0 }
 0x15e   : > { %v703_v1 = vpop.f32.mrb[1].mxu1  ;;  %v1952_v2 = vadd.f32 %v1695_v61, %v1555_v59  ;;  %v1107_v3 = vpop.f32.mrb[1].mxu0 }
 0x15f   : > { %v1953_v5 = vadd.f32 %v1107_v3, %v703_v1 }
 0x160   : > { %v1126_v7 = vadd.f32 %v1952_v2, %v1268_v0 }
 0x161   : > { %v1125_v8 = vadd.f32 %v1953_v5, %v1268_v0 }
 0x162   : > { %v1140_v9 = vsel %vm1134_vm7, %v1126_v7, 0.0 }
 0x163   : > { %v1152_v10 = vadd.f32 %v1150_v4, %v1140_v9  ;;  %v1151_v51 = vadd.f32 %v1149_v6, %v1125_v8 }
 0x165   : > { %1154 = vst [vmem:[%s312_s28 + $0x8] sm:$0xff] %v1152_v10  ;;  %1153 = vst [vmem:[%s312_s28] sm:$0xff] %v1151_v51 }
 0x166 PF: > { %s16_s23 = sadd.s32 1, %s2014_s23   ;;  %s2566_s21 = smov %s2010_s22 }
 0x167   : > { %p13_p5 = scmp.ge.s32.totalorder %s16_s23, 4   ;;  %s2567_s22 = smov %s2569_s3 }
 0x169   :  { %15 = sbr.rel (!%p13_p5) target bundleno = 2 (0x2), region = 78 }

// kernel: _lambda_.19
= control target key start
LH: loop header
LB: loop body
LE: loop exit
PB: predicated region body
PF: predicated region fallthrough
CT: control target
= control target key end

     0   :  { %s1810_s18 = smov 0   ;;  %s1812_s19 = smov 0   ;;  %s2358_s0 = inlined_call_operand.vmem [shape: f32[2,16,384], index: 0, kind: input, shape index: {}]   ;;  %s2359_s1 = inlined_call_operand.vmem [shape: f32[1024,128], index: 1, kind: input, shape index: {}]   ;;  %s2360_s2 = inlined_call_operand.vmem [shape: f32[1,128], index: 2, kind: input, shape index: {}]   ;;  %s2361_s3 = inlined_call_operand.vmem [shape: f32[1,128], index: 3, kind: input, shape index: {}]   ;;  %s2362_s4 = inlined_call_operand.vmem [shape: f32[1,128], index: 4, kind: input, shape index: {}]   ;;  %s2363_s5 = inlined_call_operand.vmem [shape: f32[2,8,128], index: 5, kind: output, shape index: {}]  }
   0x1   :  { %s1814_s20 = smov 0  }
   0x2 LB: > { %s27_s21 = sadd.s32 1, %s1771_s19  ;;  %p1106_p0 = scmp.ge.s32.totalorder %s1775_s20, 1  ;;  %s1775_s20 = sphi %s1814_s20, %s15_s20   ;;  %s1771_s19 = sphi %s1812_s19, %s2365_s19   ;;  %s1767_s18 = sphi %s1810_s18, %s2364_s18  }
   0x3   : > { %p29_p1 = scmp.ge.s32.totalorder %s27_s21, 2  ;;  %p201_p2 = scmp.lt.s32.totalorder %s1775_s20, 3 }
   0x5   : > { %s2367_s21 = smov (%p29_p1, %s27_s21), 0  ;;  %p202_p3 = pnand %p1106_p0, %p201_p2 }
   0x6   : > { %v271_v0 = vld [vmem:[%s2359_s1 + $0x80] sm:$0xff] (!%p202_p3)  ;;  %v272_v1 = vld [vmem:[%s2359_s1 + $0x88] sm:$0xff] (!%p202_p3)  ;;  %v1777_v3 = vmov (!%p202_p3), 0.0|0.0   ;;  %v273_v6 = vld [vmem:[%s2359_s1 + $0x90] sm:$0xff] (!%p202_p3)  ;;  %vm1778_vm0 = vmmov (!%p202_p3), 0   ;;  %v1779_v11 = vmov (!%p202_p3), 0.0  }
   0x7   : > { %205 = sbr.rel (%p202_p3) target bundleno = 673 (0x2a1), region = 40  ;;  %v255_v2 = vld [vmem:[%s2359_s1] sm:$0xff] (!%p202_p3)  ;;  %1531 = vmatprep.subr.bf16.mxu0 (!%p202_p3), %v1777_v3  ;;  %v1532_v4 = vpack.c.bf16 (!%p202_p3), %v272_v1, %v271_v0  ;;  %1555 = vmatprep.subr.bf16.mxu1 (!%p202_p3), %v1777_v3  ;;  %v256_v5 = vld [vmem:[%s2359_s1 + $0x8] sm:$0xff] (!%p202_p3)  ;;  %v274_v7 = vld [vmem:[%s2359_s1 + $0x98] sm:$0xff] (!%p202_p3)  ;;  %p231_p4 = scmp.lt.s32.totalorder (!%p202_p3), %s1767_s18, 1  ;;  %vm532_vm1 = vcmask (!%p202_p3), 1046528  }
   0x8   : > { %v1556_v8 = vpack.c.bf16 (!%p202_p3), %v256_v5, %v255_v2  ;;  %v257_v9 = vld [vmem:[%s2359_s1 + $0x10] sm:$0xff] (!%p202_p3)  ;;  %v258_v10 = vld [vmem:[%s2359_s1 + $0x18] sm:$0xff] (!%p202_p3)  ;;  %1283 = vmatprep.mubr.msk.f32.mxu0 (!%p202_p3), %vm1778_vm0, %v1779_v11  ;;  %1318 = vmatprep.mubr.msk.f32.mxu1 (!%p202_p3), %vm1778_vm0, %v1779_v11  ;;  %v1535_v12 = vpack.c.bf16 (!%p202_p3), %v274_v7, %v273_v6  ;;  %v275_v14 = vld [vmem:[%s2359_s1 + $0xa0] sm:$0xff] (!%p202_p3)  ;;  %vm810_vm2 = vcmask (!%p202_p3), 1045504  }
   0x9   : > { %1533 = vmatpush3.bf16.msra.mxu0 (!%p202_p3), %v1532_v4  ;;  %v1559_v13 = vpack.c.bf16 (!%p202_p3), %v258_v10, %v257_v9  ;;  %v276_v15 = vld [vmem:[%s2359_s1 + $0xa8] sm:$0xff] (!%p202_p3)  ;;  %v259_v16 = vld [vmem:[%s2359_s1 + $0x20] sm:$0xff] (!%p202_p3)  ;;  %v277_v20 = vld [vmem:[%s2359_s1 + $0xb0] sm:$0xff] (!%p202_p3) }
   0xa   : > { %1557 = vmatpush3.bf16.msra.mxu1 (!%p202_p3), %v1556_v8  ;;  %1534 = vmatprep.subr.bf16.mxu0 (!%p202_p3), %v1777_v3  ;;  %v260_v17 = vld [vmem:[%s2359_s1 + $0x28] sm:$0xff] (!%p202_p3)  ;;  %v1538_v18 = vpack.c.bf16 (!%p202_p3), %v276_v15, %v275_v14  ;;  %v278_v21 = vld [vmem:[%s2359_s1 + $0xb8] sm:$0xff] (!%p202_p3)  ;;  %v261_v22 = vld [vmem:[%s2359_s1 + $0x30] sm:$0xff] (!%p202_p3) }
   0xb   : > { %1558 = vmatprep.subr.bf16.mxu1 (!%p202_p3), %v1777_v3  ;;  %v1562_v19 = vpack.c.bf16 (!%p202_p3), %v260_v17, %v259_v16  ;;  %v262_v23 = vld [vmem:[%s2359_s1 + $0x38] sm:$0xff] (!%p202_p3)  ;;  %v1541_v24 = vpack.c.bf16 (!%p202_p3), %v278_v21, %v277_v20  ;;  %v279_v26 = vld [vmem:[%s2359_s1 + $0xc0] sm:$0xff] (!%p202_p3)  ;;  %v280_v27 = vld [vmem:[%s2359_s1 + $0xc8] sm:$0xff] (!%p202_p3) }
   0xc   : > { %v1565_v25 = vpack.c.bf16 (!%p202_p3), %v262_v23, %v261_v22  ;;  %v263_v28 = vld [vmem:[%s2359_s1 + $0x40] sm:$0xff] (!%p202_p3)  ;;  %v264_v29 = vld [vmem:[%s2359_s1 + $0x48] sm:$0xff] (!%p202_p3)  ;;  %v1544_v30 = vpack.c.bf16 (!%p202_p3), %v280_v27, %v279_v26  ;;  %v281_v32 = vld [vmem:[%s2359_s1 + $0xd0] sm:$0xff] (!%p202_p3) }
   0xd   : > { %1536 = vmatpush3.bf16.msra.mxu0 (!%p202_p3), %v1535_v12  ;;  %v1568_v31 = vpack.c.bf16 (!%p202_p3), %v264_v29, %v263_v28  ;;  %v282_v33 = vld [vmem:[%s2359_s1 + $0xd8] sm:$0xff] (!%p202_p3)  ;;  %v265_v34 = vld [vmem:[%s2359_s1 + $0x50] sm:$0xff] (!%p202_p3)  ;;  %v283_v38 = vld [vmem:[%s2359_s1 + $0xe0] sm:$0xff] (!%p202_p3) }
   0xe   : > { %1560 = vmatpush3.bf16.msra.mxu1 %v1559_v13  ;;  %1537 = vmatprep.subr.bf16.mxu0 %v1777_v3  ;;  %v266_v35 = vld [vmem:[%s2359_s1 + $0x58] sm:$0xff]  ;;  %v1547_v36 = vpack.c.bf16 %v282_v33, %v281_v32  ;;  %v284_v39 = vld [vmem:[%s2359_s1 + $0xe8] sm:$0xff]  ;;  %s2369_s18 = smov (!%p231_p4, %s1767_s18), 1  ;;  %v267_v40 = vld [vmem:[%s2359_s1 + $0x60] sm:$0xff] }
   0xf   : > { %1561 = vmatprep.subr.bf16.mxu1 %v1777_v3  ;;  %v1571_v37 = vpack.c.bf16 %v266_v35, %v265_v34  ;;  %v268_v41 = vld [vmem:[%s2359_s1 + $0x68] sm:$0xff]  ;;  %v1550_v42 = vpack.c.bf16 %v284_v39, %v283_v38  ;;  %v285_v44 = vld [vmem:[%s2359_s1 + $0xf0] sm:$0xff]  ;;  %v286_v45 = vld [vmem:[%s2359_s1 + $0xf8] sm:$0xff]  ;;  %s1723_s15 = smul.u32 48, %s2369_s18  ;;  %s1108_s16 = sshll.u32 %s2369_s18, 3 }
  0x10   : > { %v1574_v43 = vpack.c.bf16 %v268_v41, %v267_v40  ;;  %v269_v46 = vld [vmem:[%s2359_s1 + $0x70] sm:$0xff]  ;;  %v270_v47 = vld [vmem:[%s2359_s1 + $0x78] sm:$0xff]  ;;  %v1553_v48 = vpack.c.bf16 %v286_v45, %v285_v44  ;;  %v427_v50 = vld [vmem:[%s2359_s1 + $0x100] sm:$0xff]  ;;  %s242_s23 = scalar_lea.vmem %s2363_s5, %s1108_s16 }
  0x11   : > { %1539 = vmatpush3.bf16.msra.mxu0 %v1538_v18  ;;  %v1577_v49 = vpack.c.bf16 %v270_v47, %v269_v46  ;;  %s1953_s26 = scalar_lea.vmem %s2358_s0, %s1723_s15  ;;  %v428_v51 = vld [vmem:[%s2359_s1 + $0x108] sm:$0xff]  ;;  %v514_v52 = vld [vmem:[%s2359_s1 + $0x180] sm:$0xff]  ;;  %v429_v58 = vld [vmem:[%s2359_s1 + $0x110] sm:$0xff] }
  0x12   : > { %1563 = vmatpush3.bf16.msra.mxu1 %v1562_v19  ;;  %1540 = vmatprep.subr.bf16.mxu0 %v1777_v3  ;;  %v515_v53 = vld [vmem:[%s2359_s1 + $0x188] sm:$0xff]  ;;  %v1580_v55 = vpack.c.bf16 %v428_v51, %v427_v50  ;;  %v1973_v56 = vld [vmem:[%s1953_s26] sm:$0xff]  ;;  %v430_v59 = vld [vmem:[%s2359_s1 + $0x118] sm:$0xff] }
  0x13   : > { %1564 = vmatprep.subr.bf16.mxu1 %v1777_v3  ;;  %v1969_v54 = vld [vmem:[%s1953_s26 + $0x8] sm:$0xff]  ;;  %v1604_v57 = vpack.c.bf16 %v515_v53, %v514_v52  ;;  %v516_v60 = vld [vmem:[%s2359_s1 + $0x190] sm:$0xff]  ;;  %v517_v61 = vld [vmem:[%s2359_s1 + $0x198] sm:$0xff]  ;;  %v1583_v62 = vpack.c.bf16 %v430_v59, %v429_v58  ;;  %v533_v38 = vrot.slane %v1973_v56, 1 }
  0x14   : > { %v1607_v63 = vpack.c.bf16 %v517_v61, %v516_v60  ;;  %v431_v0 = vld [vmem:[%s2359_s1 + $0x120] sm:$0xff]  ;;  %v432_v1 = vld [vmem:[%s2359_s1 + $0x128] sm:$0xff]  ;;  %v433_v7 = vld [vmem:[%s2359_s1 + $0x130] sm:$0xff] }
  0x15   : > { %1542 = vmatpush3.bf16.msra.mxu0 %v1541_v24  ;;  %v518_v2 = vld [vmem:[%s2359_s1 + $0x1a0] sm:$0xff]  ;;  %v519_v4 = vld [vmem:[%s2359_s1 + $0x1a8] sm:$0xff]  ;;  %v1586_v5 = vpack.c.bf16 %v432_v1, %v431_v0  ;;  %v434_v8 = vld [vmem:[%s2359_s1 + $0x138] sm:$0xff] }
  0x16   : > { %1566 = vmatpush3.bf16.msra.mxu1 %v1565_v25  ;;  %1543 = vmatprep.subr.bf16.mxu0 %v1777_v3  ;;  %v1610_v6 = vpack.c.bf16 %v519_v4, %v518_v2  ;;  %v520_v9 = vld [vmem:[%s2359_s1 + $0x1b0] sm:$0xff]  ;;  %v521_v10 = vld [vmem:[%s2359_s1 + $0x1b8] sm:$0xff]  ;;  %v1589_v12 = vpack.c.bf16 %v434_v8, %v433_v7  ;;  %v435_v14 = vld [vmem:[%s2359_s1 + $0x140] sm:$0xff] }
  0x17   : > { %1567 = vmatprep.subr.bf16.mxu1 %v1777_v3  ;;  %v1613_v13 = vpack.c.bf16 %v521_v10, %v520_v9  ;;  %v436_v15 = vld [vmem:[%s2359_s1 + $0x148] sm:$0xff]  ;;  %v522_v16 = vld [vmem:[%s2359_s1 + $0x1c0] sm:$0xff]  ;;  %v437_v20 = vld [vmem:[%s2359_s1 + $0x150] sm:$0xff] }
  0x18   : > { %v523_v17 = vld [vmem:[%s2359_s1 + $0x1c8] sm:$0xff]  ;;  %v1592_v18 = vpack.c.bf16 %v436_v15, %v435_v14  ;;  %v438_v21 = vld [vmem:[%s2359_s1 + $0x158] sm:$0xff]  ;;  %v524_v22 = vld [vmem:[%s2359_s1 + $0x1d0] sm:$0xff] }
  0x19   : > { %1545 = vmatpush3.bf16.msra.mxu0 %v1544_v30  ;;  %v1616_v19 = vpack.c.bf16 %v523_v17, %v522_v16  ;;  %v525_v23 = vld [vmem:[%s2359_s1 + $0x1d8] sm:$0xff]  ;;  %v1595_v24 = vpack.c.bf16 %v438_v21, %v437_v20  ;;  %v439_v26 = vld [vmem:[%s2359_s1 + $0x160] sm:$0xff]  ;;  %v440_v27 = vld [vmem:[%s2359_s1 + $0x168] sm:$0xff] }
  0x1a   : > { %1569 = vmatpush3.bf16.msra.mxu1 %v1568_v31  ;;  %1546 = vmatprep.subr.bf16.mxu0 %v1777_v3  ;;  %v1619_v25 = vpack.c.bf16 %v525_v23, %v524_v22  ;;  %v526_v28 = vld [vmem:[%s2359_s1 + $0x1e0] sm:$0xff]  ;;  %v527_v29 = vld [vmem:[%s2359_s1 + $0x1e8] sm:$0xff]  ;;  %v1598_v30 = vpack.c.bf16 %v440_v27, %v439_v26  ;;  %v441_v32 = vld [vmem:[%s2359_s1 + $0x170] sm:$0xff] }
  0x1b   : > { %1570 = vmatprep.subr.bf16.mxu1 %v1777_v3  ;;  %v1622_v31 = vpack.c.bf16 %v527_v29, %v526_v28  ;;  %v442_v33 = vld [vmem:[%s2359_s1 + $0x178] sm:$0xff]  ;;  %v528_v34 = vld [vmem:[%s2359_s1 + $0x1f0] sm:$0xff]  ;;  %v608_v40 = vld [vmem:[%s2359_s1 + $0x200] sm:$0xff] }
  0x1c   : > { %v529_v35 = vld [vmem:[%s2359_s1 + $0x1f8] sm:$0xff]  ;;  %v609_v41 = vld [vmem:[%s2359_s1 + $0x208] sm:$0xff]  ;;  %v2098_v45 = vld [vmem:[%s1953_s26 + $0x10] sm:$0xff] }
  0x1d   : > { %1548 = vmatpush3.bf16.msra.mxu0 %v1547_v36  ;;  %v2079_v36 = vld [vmem:[%s1953_s26 + $0x18] sm:$0xff]  ;;  %v1625_v39 = vpack.c.bf16 %v529_v35, %v528_v34  ;;  %v702_v44 = vld [vmem:[%s2359_s1 + $0x288] sm:$0xff]  ;;  %v1628_v46 = vpack.c.bf16 %v609_v41, %v608_v40  ;;  %v703_v51 = vld [vmem:[%s2359_s1 + $0x290] sm:$0xff]  ;;  %v719_v34 = vrot.slane %v2098_v45, 1 }
  0x1e   : > { %1572 = vmatpush3.bf16.msra.mxu1 %v1571_v37  ;;  %1549 = vmatprep.subr.bf16.mxu0 %v1777_v3  ;;  %v1601_v37 = vpack.c.bf16 %v442_v33, %v441_v32  ;;  %v611_v50 = vld [vmem:[%s2359_s1 + $0x218] sm:$0xff]  ;;  %v613_v58 = vld [vmem:[%s2359_s1 + $0x228] sm:$0xff]  ;;  %v705_v59 = vld [vmem:[%s2359_s1 + $0x2a0] sm:$0xff] }
  0x1f   : > { %1573 = vmatprep.subr.bf16.mxu1 %v1777_v3  ;;  %v704_v52 = vld [vmem:[%s2359_s1 + $0x298] sm:$0xff]  ;;  %v706_v60 = vld [vmem:[%s2359_s1 + $0x2a8] sm:$0xff]  ;;  %v707_v1 = vld [vmem:[%s2359_s1 + $0x2b0] sm:$0xff] }
  0x20   : > { %v615_v0 = vld [vmem:[%s2359_s1 + $0x238] sm:$0xff]  ;;  %v617_v7 = vld [vmem:[%s2359_s1 + $0x248] sm:$0xff]  ;;  %v709_v8 = vld [vmem:[%s2359_s1 + $0x2c0] sm:$0xff] }
  0x21   : > { %1551 = vmatpush3.bf16.msra.mxu0 %v1550_v42  ;;  %v534_v42 = vrot.slane %v2079_v36, 1  ;;  %v708_v2 = vld [vmem:[%s2359_s1 + $0x2b8] sm:$0xff]  ;;  %v710_v9 = vld [vmem:[%s2359_s1 + $0x2c8] sm:$0xff]  ;;  %v711_v15 = vld [vmem:[%s2359_s1 + $0x2d0] sm:$0xff] }
  0x22   : > { %1575 = vmatpush3.bf16.msra.mxu1 %v1574_v43  ;;  %1552 = vmatprep.subr.bf16.mxu0 %v1777_v3  ;;  %v701_v43 = vld [vmem:[%s2359_s1 + $0x280] sm:$0xff]  ;;  %v619_v14 = vld [vmem:[%s2359_s1 + $0x258] sm:$0xff]  ;;  %v621_v20 = vld [vmem:[%s2359_s1 + $0x268] sm:$0xff] }
  0x23   : > { %1576 = vmatprep.subr.bf16.mxu1 %v1777_v3  ;;  %v535_v47 = vsel %vm532_vm1, %v533_v38, %v534_v42  ;;  %v712_v16 = vld [vmem:[%s2359_s1 + $0x2d8] sm:$0xff]  ;;  %v713_v21 = vld [vmem:[%s2359_s1 + $0x2e0] sm:$0xff]  ;;  %v714_v22 = vld [vmem:[%s2359_s1 + $0x2e8] sm:$0xff] }
  0x24   : > { %v623_v26 = vld [vmem:[%s2359_s1 + $0x278] sm:$0xff]  ;;  %v2198_v27 = vld [vmem:[%s1953_s26 + $0x20] sm:$0xff]  ;;  %v715_v28 = vld [vmem:[%s2359_s1 + $0x2f0] sm:$0xff] }
  0x25   : > { %1554 = vmatpush3.bf16.msra.mxu0 %v1553_v48  ;;  %v1652_v48 = vpack.c.bf16 %v702_v44, %v701_v43  ;;  %v716_v29 = vld [vmem:[%s2359_s1 + $0x2f8] sm:$0xff]  ;;  %v627_v33 = vrot.slane %v2198_v27, 1  ;;  %v795_v38 = vld [vmem:[%s2359_s1 + $0x308] sm:$0xff]  ;;  %v886_v40 = vld [vmem:[%s2359_s1 + $0x380] sm:$0xff] }
  0x26   : > { %1578 = vmatpush3.bf16.msra.mxu1 %v1577_v49  ;;  %1579 = vmatprep.subr.bf16.mxu0 %v1777_v3  ;;  %v610_v49 = vld [vmem:[%s2359_s1 + $0x210] sm:$0xff]  ;;  %v1673_v35 = vpack.c.bf16 %v716_v29, %v715_v28  ;;  %v887_v41 = vld [vmem:[%s2359_s1 + $0x388] sm:$0xff]  ;;  %v812_v29 = vrot.slane %v2079_v36, 2 }
  0x27   : > { %1603 = vmatprep.subr.bf16.mxu1 %v1777_v3  ;;  %v1631_v53 = vpack.c.bf16 %v611_v50, %v610_v49  ;;  %v889_v49 = vld [vmem:[%s2359_s1 + $0x398] sm:$0xff] }
  0x28   : > { %1284 = vmatmul.mubr.f32.vlgmr.msra.gmra.mrb[0].mxu0 %v1969_v54 }
  0x29   : > { %1319 = vmatmul.mubr.f32.vlgmr.msra.gmra.mrb[0].mxu1 %v1973_v56  ;;  %1581 = vmatpush3.bf16.msra.mxu0 %v1580_v55  ;;  %v1655_v55 = vpack.c.bf16 %v704_v52, %v703_v51  ;;  %v798_v52 = vld [vmem:[%s2359_s1 + $0x320] sm:$0xff] }
  0x2a   : > { %1605 = vmatpush3.bf16.msra.mxu1 %v1604_v57  ;;  %1582 = vmatprep.subr.bf16.mxu0 %v1777_v3  ;;  %v612_v57 = vld [vmem:[%s2359_s1 + $0x220] sm:$0xff] }
  0x2b   : > { %1606 = vmatprep.subr.bf16.mxu1 %v1777_v3  ;;  %1353 = vmatprep.mubr.msk.f32.mxu0 %vm1778_vm0, %v1779_v11  ;;  %v1634_v61 = vpack.c.bf16 %v613_v58, %v612_v57  ;;  %v891_v57 = vld [vmem:[%s2359_s1 + $0x3a8] sm:$0xff] }
  0x2c   : > { %1388 = vmatprep.mubr.msk.f32.mxu1 %vm1778_vm0, %v1779_v11 }
  0x2d   : > { %1584 = vmatpush3.bf16.msra.mxu0 %v1583_v62  ;;  %v1658_v62 = vpack.c.bf16 %v706_v60, %v705_v59  ;;  %v800_v60 = vld [vmem:[%s2359_s1 + $0x330] sm:$0xff] }
  0x2e   : > { %1608 = vmatpush3.bf16.msra.mxu1 %v1607_v63  ;;  %1585 = vmatprep.subr.bf16.mxu0 %v1777_v3  ;;  %v614_v63 = vld [vmem:[%s2359_s1 + $0x230] sm:$0xff] }
  0x2f   : > { %1609 = vmatprep.subr.bf16.mxu1 %v1777_v3  ;;  %v1637_v4 = vpack.c.bf16 %v615_v0, %v614_v63  ;;  %v893_v63 = vld [vmem:[%s2359_s1 + $0x3b8] sm:$0xff] }
  0x31   : > { %1587 = vmatpush3.bf16.msra.mxu0 %v1586_v5  ;;  %v1661_v5 = vpack.c.bf16 %v708_v2, %v707_v1  ;;  %v802_v2 = vld [vmem:[%s2359_s1 + $0x340] sm:$0xff] }
  0x32   : > { %1611 = vmatpush3.bf16.msra.mxu1 %v1610_v6  ;;  %1588 = vmatprep.subr.bf16.mxu0 %v1777_v3  ;;  %v616_v6 = vld [vmem:[%s2359_s1 + $0x240] sm:$0xff] }
  0x33   : > { %1612 = vmatprep.subr.bf16.mxu1 %v1777_v3  ;;  %v1640_v10 = vpack.c.bf16 %v617_v7, %v616_v6  ;;  %v895_v6 = vld [vmem:[%s2359_s1 + $0x3c8] sm:$0xff] }
  0x35   : > { %1590 = vmatpush3.bf16.msra.mxu0 %v1589_v12  ;;  %v1664_v12 = vpack.c.bf16 %v710_v9, %v709_v8  ;;  %v804_v9 = vld [vmem:[%s2359_s1 + $0x350] sm:$0xff] }
  0x36   : > { %1614 = vmatpush3.bf16.msra.mxu1 %v1613_v13  ;;  %1591 = vmatprep.subr.bf16.mxu0 %v1777_v3  ;;  %v618_v13 = vld [vmem:[%s2359_s1 + $0x250] sm:$0xff] }
  0x37   : > { %1615 = vmatprep.subr.bf16.mxu1 %v1777_v3  ;;  %v1643_v17 = vpack.c.bf16 %v619_v14, %v618_v13  ;;  %v897_v13 = vld [vmem:[%s2359_s1 + $0x3d8] sm:$0xff] }
  0x39   : > { %1593 = vmatpush3.bf16.msra.mxu0 %v1592_v18  ;;  %v1667_v18 = vpack.c.bf16 %v712_v16, %v711_v15  ;;  %v806_v16 = vld [vmem:[%s2359_s1 + $0x360] sm:$0xff] }
  0x3a   : > { %1617 = vmatpush3.bf16.msra.mxu1 %v1616_v19  ;;  %1594 = vmatprep.subr.bf16.mxu0 %v1777_v3  ;;  %v620_v19 = vld [vmem:[%s2359_s1 + $0x260] sm:$0xff] }
  0x3b   : > { %1618 = vmatprep.subr.bf16.mxu1 %v1777_v3  ;;  %v1646_v23 = vpack.c.bf16 %v621_v20, %v620_v19  ;;  %v899_v19 = vld [vmem:[%s2359_s1 + $0x3e8] sm:$0xff] }
  0x3d   : > { %1596 = vmatpush3.bf16.msra.mxu0 %v1595_v24  ;;  %v1670_v24 = vpack.c.bf16 %v714_v22, %v713_v21  ;;  %v808_v22 = vld [vmem:[%s2359_s1 + $0x370] sm:$0xff] }
  0x3e   : > { %1620 = vmatpush3.bf16.msra.mxu1 %v1619_v25  ;;  %1597 = vmatprep.subr.bf16.mxu0 %v1777_v3  ;;  %v622_v25 = vld [vmem:[%s2359_s1 + $0x270] sm:$0xff] }
  0x3f   : > { %1621 = vmatprep.subr.bf16.mxu1 %v1777_v3  ;;  %v1649_v32 = vpack.c.bf16 %v623_v26, %v622_v25  ;;  %v901_v25 = vld [vmem:[%s2359_s1 + $0x3f8] sm:$0xff]  ;;  %v811_v26 = vrot.slane %v1973_v56, 2 }
  0x41   : > { %1599 = vmatpush3.bf16.msra.mxu0 %v1598_v30  ;;  %v254_v30 = vld [vmem:[%s1953_s26 + $0x28] sm:$0xff] }
  0x42   : > { %1623 = vmatpush3.bf16.msra.mxu1 %v1622_v31  ;;  %1600 = vmatprep.subr.bf16.mxu0 %v1777_v3  ;;  %v626_v31 = vrot.slane %v1969_v54, 1 }
  0x43   : > { %1624 = vmatprep.subr.bf16.mxu1 %v1777_v3 }
  0x44   : > { %v628_v42 = vsel %vm532_vm1, %v626_v31, %v627_v33  ;;  %v813_v33 = vsel %vm810_vm2, %v811_v26, %v812_v29 }
  0x45   : > { %1602 = vmatpush3.bf16.msra.mxu0 %v1601_v37  ;;  %v794_v37 = vld [vmem:[%s2359_s1 + $0x300] sm:$0xff] }
  0x46   : > { %1626 = vmatpush3.bf16.msra.mxu1 %v1625_v39  ;;  %1627 = vmatprep.subr.bf16.mxu0 %v1777_v3  ;;  %v720_v39 = vrot.slane %v254_v30, 1  ;;  %v1676_v43 = vpack.c.bf16 %v795_v38, %v794_v37  ;;  %v902_v30 = vrot.slane %v1969_v54, 2 }
  0x47   : > { %1651 = vmatprep.subr.bf16.mxu1 %v1777_v3 }
  0x48   : > { %1354 = vmatmul.mubr.f32.vlgmr.msra.gmra.mrb[2].mxu0 %v2098_v45  ;;  %v721_v44 = vsel %vm532_vm1, %v719_v34, %v720_v39  ;;  %v1700_v45 = vpack.c.bf16 %v887_v41, %v886_v40 }
  0x49   : > { %1629 = vmatpush3.bf16.msra.mxu0 %v1628_v46  ;;  %1389 = vmatmul.mubr.f32.vlgmr.msra.gmra.mrb[2].mxu1 %v535_v47  ;;  %v796_v46 = vld [vmem:[%s2359_s1 + $0x310] sm:$0xff]  ;;  %v797_v47 = vld [vmem:[%s2359_s1 + $0x318] sm:$0xff] }
  0x4a   : > { %1653 = vmatpush3.bf16.msra.mxu1 %v1652_v48  ;;  %1630 = vmatprep.subr.bf16.mxu0 %v1777_v3  ;;  %v888_v48 = vld [vmem:[%s2359_s1 + $0x390] sm:$0xff]  ;;  %v1679_v50 = vpack.c.bf16 %v797_v47, %v796_v46 }
  0x4b   : > { %1654 = vmatprep.subr.bf16.mxu1 %v1777_v3  ;;  %1423 = vmatprep.mubr.msk.f32.mxu0 %vm1778_vm0, %v1779_v11  ;;  %v1703_v51 = vpack.c.bf16 %v889_v49, %v888_v48  ;;  %v985_v48 = vlaneseq }
  0x4c   : > { %1458 = vmatprep.mubr.msk.f32.mxu1 %vm1778_vm0, %v1779_v11 }
  0x4d   : > { %1632 = vmatpush3.bf16.msra.mxu0 %v1631_v53  ;;  %v799_v53 = vld [vmem:[%s2359_s1 + $0x328] sm:$0xff]  ;;  %v986_v49 = vand.u32 127, %v985_v48 }
  0x4e   : > { %1656 = vmatpush3.bf16.msra.mxu1 %v1655_v55  ;;  %1633 = vmatprep.subr.bf16.mxu0 %v1777_v3  ;;  %v890_v55 = vld [vmem:[%s2359_s1 + $0x3a0] sm:$0xff]  ;;  %v1682_v58 = vpack.c.bf16 %v799_v53, %v798_v52 }
  0x4f   : > { %1657 = vmatprep.subr.bf16.mxu1 %v1777_v3  ;;  %v1706_v59 = vpack.c.bf16 %v891_v57, %v890_v55  ;;  %vm987_vm3 = vcmp.lt.s32.totalorder %v986_v49, 16  ;;  %v1109_v57 = vld [vmem:[%s2360_s2] ss:$0 sm:$0xff] }
  0x51   : > { %1635 = vmatpush3.bf16.msra.mxu0 %v1634_v61  ;;  %v801_v61 = vld [vmem:[%s2359_s1 + $0x338] sm:$0xff] }
  0x52   : > { %1659 = vmatpush3.bf16.msra.mxu1 %v1658_v62  ;;  %1636 = vmatprep.subr.bf16.mxu0 %v1777_v3  ;;  %v892_v62 = vld [vmem:[%s2359_s1 + $0x3b0] sm:$0xff]  ;;  %v1685_v0 = vpack.c.bf16 %v801_v61, %v800_v60 }
  0x53   : > { %1660 = vmatprep.subr.bf16.mxu1 %v1777_v3  ;;  %v1709_v1 = vpack.c.bf16 %v893_v63, %v892_v62 }
  0x55   : > { %1638 = vmatpush3.bf16.msra.mxu0 %v1637_v4  ;;  %v803_v4 = vld [vmem:[%s2359_s1 + $0x348] sm:$0xff] }
  0x56   : > { %1662 = vmatpush3.bf16.msra.mxu1 %v1661_v5  ;;  %1639 = vmatprep.subr.bf16.mxu0 %v1777_v3  ;;  %v894_v5 = vld [vmem:[%s2359_s1 + $0x3c0] sm:$0xff]  ;;  %v1688_v7 = vpack.c.bf16 %v803_v4, %v802_v2 }
  0x57   : > { %1663 = vmatprep.subr.bf16.mxu1 %v1777_v3  ;;  %v1712_v8 = vpack.c.bf16 %v895_v6, %v894_v5 }
  0x59   : > { %1641 = vmatpush3.bf16.msra.mxu0 %v1640_v10  ;;  %v805_v10 = vld [vmem:[%s2359_s1 + $0x358] sm:$0xff] }
  0x5a   : > { %1665 = vmatpush3.bf16.msra.mxu1 %v1664_v12  ;;  %1642 = vmatprep.subr.bf16.mxu0 %v1777_v3  ;;  %v896_v12 = vld [vmem:[%s2359_s1 + $0x3d0] sm:$0xff]  ;;  %v1691_v14 = vpack.c.bf16 %v805_v10, %v804_v9  ;;  %v1021_v9 = vshrl.u32 %v985_v48, 7  ;;  %v1112_v10 = vld [vmem:[%s2362_s4] ss:$0 sm:$0xff] }
  0x5b   : > { %1666 = vmatprep.subr.bf16.mxu1 %v1777_v3  ;;  %v1715_v15 = vpack.c.bf16 %v897_v13, %v896_v12 }
  0x5c   : > { %vm1024_vm4 = vcmp.lt.s32.totalorder %v1021_v9, 4 }
  0x5d   : > { %1644 = vmatpush3.bf16.msra.mxu0 %v1643_v17  ;;  %v807_v17 = vld [vmem:[%s2359_s1 + $0x368] sm:$0xff] }
  0x5e   : > { %1668 = vmatpush3.bf16.msra.mxu1 %v1667_v18  ;;  %1645 = vmatprep.subr.bf16.mxu0 %v1777_v3  ;;  %v898_v18 = vld [vmem:[%s2359_s1 + $0x3e0] sm:$0xff]  ;;  %v1694_v20 = vpack.c.bf16 %v807_v17, %v806_v16 }
  0x5f   : > { %1669 = vmatprep.subr.bf16.mxu1 %v1777_v3  ;;  %v1718_v21 = vpack.c.bf16 %v899_v19, %v898_v18 }
  0x61   : > { %1647 = vmatpush3.bf16.msra.mxu0 %v1646_v23  ;;  %v809_v23 = vld [vmem:[%s2359_s1 + $0x378] sm:$0xff] }
  0x62   : > { %1671 = vmatpush3.bf16.msra.mxu1 %v1670_v24  ;;  %1648 = vmatprep.subr.bf16.mxu0 %v1777_v3  ;;  %v900_v24 = vld [vmem:[%s2359_s1 + $0x3f0] sm:$0xff]  ;;  %v1697_v28 = vpack.c.bf16 %v809_v23, %v808_v22 }
  0x63   : > { %1672 = vmatprep.subr.bf16.mxu1 %v1777_v3  ;;  %v1721_v31 = vpack.c.bf16 %v901_v25, %v900_v24 }
  0x65   : > { %1650 = vmatpush3.bf16.msra.mxu0 %v1649_v32  ;;  %v903_v32 = vrot.slane %v2198_v27, 2 }
  0x66   : > { %1674 = vmatpush3.bf16.msra.mxu1 %v1673_v35  ;;  %1675 = vmatprep.subr.bf16.mxu0 %v1777_v3 }
  0x67   : > { %1699 = vmatprep.subr.bf16.mxu1 %v1777_v3  ;;  %v904_v34 = vsel %vm810_vm2, %v902_v30, %v903_v32 }
  0x68   : > { %1424 = vmatmul.mubr.f32.vlgmr.msra.gmra.mrb[4].mxu0 %v628_v42 }
  0x69   : > { %1677 = vmatpush3.bf16.msra.mxu0 %v1676_v43  ;;  %1459 = vmatmul.mubr.f32.vlgmr.msra.gmra.mrb[4].mxu1 %v721_v44 }
  0x6a   : > { %1701 = vmatpush3.bf16.msra.mxu1 %v1700_v45  ;;  %1678 = vmatprep.subr.bf16.mxu0 %v1777_v3 }
  0x6b   : > { %1702 = vmatprep.subr.bf16.mxu1 %v1777_v3  ;;  %1493 = vmatprep.mubr.msk.f32.mxu0 %vm1778_vm0, %v1779_v11 }
  0x6c   : > { %1528 = vmatprep.mubr.msk.f32.mxu1 %vm1778_vm0, %v1779_v11 }
  0x6d   : > { %1680 = vmatpush3.bf16.msra.mxu0 %v1679_v50 }
  0x6e   : > { %1704 = vmatpush3.bf16.msra.mxu1 %v1703_v51  ;;  %1681 = vmatprep.subr.bf16.mxu0 %v1777_v3 }
  0x6f   : > { %1705 = vmatprep.subr.bf16.mxu1 %v1777_v3 }
  0x71   : > { %1683 = vmatpush3.bf16.msra.mxu0 %v1682_v58 }
  0x72   : > { %1707 = vmatpush3.bf16.msra.mxu1 %v1706_v59  ;;  %1684 = vmatprep.subr.bf16.mxu0 %v1777_v3  ;;  %v1110_v59 = vsel %vm987_vm3, 1.0, %v1779_v11 }
  0x73   : > { %1708 = vmatprep.subr.bf16.mxu1 %v1777_v3 }
  0x75   : > { %1686 = vmatpush3.bf16.msra.mxu0 %v1685_v0 }
  0x76   : > { %1710 = vmatpush3.bf16.msra.mxu1 %v1709_v1  ;;  %1687 = vmatprep.subr.bf16.mxu0 %v1777_v3 }
  0x77   : > { %1711 = vmatprep.subr.bf16.mxu1 %v1777_v3 }
  0x79   : > { %1689 = vmatpush3.bf16.msra.mxu0 %v1688_v7 }
  0x7a   : > { %1713 = vmatpush3.bf16.msra.mxu1 %v1712_v8  ;;  %1690 = vmatprep.subr.bf16.mxu0 %v1777_v3  ;;  %v1111_v8 = vld [vmem:[%s2361_s3] ss:$0 sm:$0xff] }
  0x7b   : > { %1714 = vmatprep.subr.bf16.mxu1 %v1777_v3 }
  0x7d   : > { %1692 = vmatpush3.bf16.msra.mxu0 %v1691_v14 }
  0x7e   : > { %1716 = vmatpush3.bf16.msra.mxu1 %v1715_v15  ;;  %1693 = vmatprep.subr.bf16.mxu0 %v1777_v3 }
  0x7f   : > { %1717 = vmatprep.subr.bf16.mxu1 %v1777_v3 }
  0x81   : > { %1695 = vmatpush3.bf16.msra.mxu0 %v1694_v20 }
  0x82   : > { %1719 = vmatpush3.bf16.msra.mxu1 %v1718_v21  ;;  %1696 = vmatprep.subr.bf16.mxu0 %v1777_v3 }
  0x83   : > { %1720 = vmatprep.subr.bf16.mxu1 %v1777_v3 }
  0x85   : > { %1698 = vmatpush3.bf16.msra.mxu0 %v1697_v28 }
  0x86   : > { %1722 = vmatpush3.bf16.msra.mxu1 %v1721_v31 }
  0x88   : > { %1494 = vmatmul.mubr.f32.vlgmr.msra.gmra.mrb[6].mxu0 %v813_v33 }
  0x89   : > { %1529 = vmatmul.mubr.f32.vlgmr.msra.gmra.mrb[6].mxu1 %v904_v34 }
  0xfb   : > { %v353_v56 = vpop.f32.mrb[0].mxu0 }
  0xfc   : > { %v1285_v35 = vpop.f32.mrb[1].mxu0  ;;  %v423_v36 = vpop.f32.mrb[0].mxu1 }
  0xfd   : > { %v424_v37 = vadd.f32 %v423_v36, %v353_v56  ;;  %v1320_v54 = vpop.f32.mrb[1].mxu1 }
 0x11b   : > { %v509_v38 = vpop.f32.mrb[2].mxu0 }
 0x11c   : > { %v513_v39 = vadd.f32 %v509_v38, %v424_v37  ;;  %v1355_v40 = vpop.f32.mrb[3].mxu0  ;;  %v603_v41 = vpop.f32.mrb[2].mxu1 }
 0x11d   : > { %v1390_v42 = vpop.f32.mrb[3].mxu1 }
 0x11e   : > { %v607_v43 = vadd.f32 %v603_v41, %v513_v39 }
 0x13b   : > { %v696_v27 = vpop.f32.mrb[4].mxu0 }
 0x13c   : > { %v700_v44 = vadd.f32 %v696_v27, %v607_v43  ;;  %v1425_v3 = vpop.f32.mrb[5].mxu0  ;;  %v789_v45 = vpop.f32.mrb[4].mxu1 }
 0x13d   : > { %v1460_v46 = vpop.f32.mrb[5].mxu1 }
 0x13e   : > { %v793_v47 = vadd.f32 %v789_v45, %v700_v44 }
 0x15b   : > { %v881_v50 = vpop.f32.mrb[6].mxu0 }
 0x15c   : > { %v885_v51 = vadd.f32 %v881_v50, %v793_v47  ;;  %v1495_v52 = vpop.f32.mrb[7].mxu0  ;;  %v972_v53 = vpop.f32.mrb[6].mxu1 }
 0x15d   : > { %v1530_v55 = vpop.f32.mrb[7].mxu1 }
 0x15e   : > { %v976_v58 = vadd.f32 %v972_v53, %v885_v51 }
 0x160   : > { %v984_v60 = vadd.f32 %v1109_v57, %v976_v58 }
 0x162   : > { %v990_v61 = vmul.f32 %v1110_v59, %v984_v60 }
 0x164   : > { %991 = vadd.xlane.f32.xlu0 %v990_v61 }
 0x1f1   : > { %v992_v62 = vpop.xlane.xlu0 %991 }
 0x1f2   : > { %v993_v63 = vmul.f32 0.0625, %v992_v62 }
 0x1f4   : > { %v994_v0 = vsub.f32 %v984_v60, %v993_v63 }
 0x1f6   : > { %v995_v1 = vmul.f32 %v1110_v59, %v994_v0 }
 0x1f8   : > { %v996_v2 = vmul.f32 %v995_v1, %v995_v1 }
 0x1fa   : > { %997 = vadd.xlane.f32.xlu0 %v996_v2 }
 0x287   : > { %v998_v4 = vpop.xlane.xlu0 %997 }
 0x288   : > { %v999_v5 = vmul.f32 0.0625, %v998_v4 }
 0x28a   : > { %v1000_v6 = vadd.f32 1e-05, %v999_v5 }
 0x28c   : > { %1751 = vrsqrt.f32 %v1000_v6 }
 0x296   : > { %v1752_v7 = vpop.eup %1751 }
 0x297   : > { %v1002_v11 = vmul.f32 %v1752_v7, %v995_v1 }
 0x299   : > { %v1010_v12 = vmul.f32 %v1111_v8, %v1002_v11 }
 0x29b   : > { %v1018_v13 = vadd.f32 %v1112_v10, %v1010_v12 }
 0x29d   : > { %v1019_v14 = vmax.f32 %v1018_v13, 0.0 }
 0x29f   : > { %v1027_v15 = vsel %vm1024_vm4, %v1019_v14, 0.0 }
 0x2a0   : > { %1028 = vst [vmem:[%s242_s23] sm:$0xff] %v1027_v15 }
 0x2a1 PF: > { %s15_s20 = sadd.s32 1, %s1775_s20   ;;  %s2364_s18 = smov %s1771_s19 }
 0x2a2   : > { %p12_p5 = scmp.ge.s32.totalorder %s15_s20, 4   ;;  %s2365_s19 = smov %s2367_s21 }
 0x2a4   :  { %14 = sbr.rel (!%p12_p5) target bundleno = 2 (0x2), region = 71 }

// kernel: _lambda_.21
= control target key start
LH: loop header
LB: loop body
LE: loop exit
PB: predicated region body
PF: predicated region fallthrough
CT: control target
= control target key end

     0   :  { %v16_v0 = vlaneseq  ;;  %v81_v3 = vmov 0.0   ;;  %s120_s0 = inlined_call_operand.vmem [shape: f32[16,128], index: 0, kind: input, shape index: {}]   ;;  %s121_s1 = inlined_call_operand.vmem [shape: f32[1,128], index: 1, kind: input, shape index: {}]   ;;  %s122_s2 = inlined_call_operand.vmem [shape: f32[1,128], index: 2, kind: input, shape index: {}]   ;;  %s123_s3 = inlined_call_operand.vmem [shape: f32[16,128], index: 3, kind: output, shape index: {}]  }
   0x1   :  { %v14_v2 = vld [vmem:[%s120_s0] sm:$0xff]  ;;  %v15_v5 = vld [vmem:[%s120_s0 + $0x8] sm:$0xff] }
   0x2   :  { %v17_v1 = vand.u32 127, %v16_v0  ;;  %v74_v25 = vld [vmem:[%s121_s1] ss:$0 sm:$0xff] }
   0x3   :  { %v75_v27 = vld [vmem:[%s122_s2] ss:$0 sm:$0xff] }
   0x4   :  { %vm18_vm0 = vcmp.lt.s32.totalorder %v17_v1, 16 }
   0x5   :  { %v73_v4 = vsel %vm18_vm0, 1.0, %v81_v3 }
   0x6   :  { %v21_v6 = vmul.f32 %v73_v4, %v14_v2  ;;  %v22_v7 = vmul.f32 %v73_v4, %v15_v5 }
   0x8   :  { %23 = vadd.xlane.f32.xlu0 %v21_v6 }
   0xc   :  { %25 = vadd.xlane.f32.xlu0 %v22_v7 }
  0x95   :  { %v24_v8 = vpop.xlane.xlu0 %23 }
  0x96   :  { %v27_v9 = vmul.f32 0.0625, %v24_v8 }
  0x98   :  { %v29_v10 = vsub.f32 %v14_v2, %v27_v9 }
  0x99   :  { %v26_v11 = vpop.xlane.xlu0 %25 }
  0x9a   :  { %v28_v12 = vmul.f32 0.0625, %v26_v11  ;;  %v31_v13 = vmul.f32 %v73_v4, %v29_v10 }
  0x9c   :  { %v30_v14 = vsub.f32 %v15_v5, %v28_v12  ;;  %v33_v15 = vmul.f32 %v31_v13, %v31_v13 }
  0x9e   :  { %35 = vadd.xlane.f32.xlu1 %v33_v15  ;;  %v32_v16 = vmul.f32 %v73_v4, %v30_v14 }
  0xa0   :  { %v34_v17 = vmul.f32 %v32_v16, %v32_v16 }
  0xa2   :  { %37 = vadd.xlane.f32.xlu1 %v34_v17 }
 0x12b   :  { %v36_v18 = vpop.xlane.xlu1 %35 }
 0x12c   :  { %v39_v19 = vmul.f32 0.0625, %v36_v18 }
 0x12e   :  { %v41_v20 = vadd.f32 1e-05, %v39_v19 }
 0x12f   :  { %v38_v21 = vpop.xlane.xlu1 %37 }
 0x130   :  { %77 = vrsqrt.f32 %v41_v20  ;;  %v40_v22 = vmul.f32 0.0625, %v38_v21 }
 0x132   :  { %v42_v23 = vadd.f32 1e-05, %v40_v22 }
 0x134   :  { %79 = vrsqrt.f32 %v42_v23 }
 0x13a   :  { %v78_v24 = vpop.eup %77 }
 0x13b   :  { %v45_v26 = vmul.f32 %v78_v24, %v31_v13 }
 0x13d   :  { %v54_v28 = vmul.f32 %v74_v25, %v45_v26 }
 0x13e   :  { %v80_v29 = vpop.eup %79 }
 0x13f   :  { %v63_v30 = vadd.f32 %v75_v27, %v54_v28  ;;  %v46_v31 = vmul.f32 %v80_v29, %v32_v16 }
 0x141   :  { %v65_v32 = vmax.f32 %v63_v30, 0.0  ;;  %v55_v33 = vmul.f32 %v74_v25, %v46_v31 }
 0x143   :  { %67 = vst [vmem:[%s123_s3] sm:$0xff] %v65_v32  ;;  %v64_v34 = vadd.f32 %v75_v27, %v55_v33 }
 0x145   :  { %v66_v35 = vmax.f32 %v64_v34, 0.0 }
 0x147   :  { %68 = vst [vmem:[%s123_s3 + $0x8] sm:$0xff] %v66_v35 }

// kernel: _lambda_.20
= control target key start
LH: loop header
LB: loop body
LE: loop exit
PB: predicated region body
PF: predicated region fallthrough
CT: control target
= control target key end

     0   :  { %s1867_s21 = smov 0   ;;  %s1869_s22 = smov 0   ;;  %s2411_s0 = inlined_call_operand.vmem [shape: f32[2,16,128], index: 0, kind: input, shape index: {}]   ;;  %s2412_s1 = inlined_call_operand.vmem [shape: f32[1024,128], index: 1, kind: input, shape index: {}]   ;;  %s2413_s2 = inlined_call_operand.vmem [shape: f32[1,128], index: 2, kind: input, shape index: {}]   ;;  %s2414_s3 = inlined_call_operand.vmem [shape: f32[1,128], index: 3, kind: input, shape index: {}, may-alias: {3,4}]   ;;  %s2415_s4 = inlined_call_operand.vmem [shape: f32[1,128], index: 4, kind: input, shape index: {}, may-alias: {3,4}]   ;;  %s2416_s5 = inlined_call_operand.vmem [shape: f32[2,8,384], index: 5, kind: input, shape index: {}]   ;;  %s2417_s6 = inlined_call_operand.vmem [shape: f32[2,8,128], index: 6, kind: output, shape index: {}]  }
   0x1   :  { %s1871_s23 = smov 0  }
   0x2 LB: > { %s28_s3 = sadd.s32 1, %s1823_s22  ;;  %p1160_p0 = scmp.ge.s32.totalorder %s1827_s23, 1  ;;  %s1827_s23 = sphi %s1871_s23, %s16_s23   ;;  %s1823_s22 = sphi %s1869_s22, %s2419_s22   ;;  %s1819_s21 = sphi %s1867_s21, %s2418_s21  }
   0x3   : > { %p30_p1 = scmp.ge.s32.totalorder %s28_s3, 2  ;;  %p242_p2 = scmp.lt.s32.totalorder %s1827_s23, 3 }
   0x5   : > { %s2421_s3 = smov (%p30_p1, %s28_s3), 0  ;;  %p243_p3 = pnand %p1160_p0, %p242_p2 }
   0x6   : > { %v324_v0 = vld [vmem:[%s2412_s1 + $0x80] sm:$0xff] (!%p243_p3)  ;;  %v325_v1 = vld [vmem:[%s2412_s1 + $0x88] sm:$0xff] (!%p243_p3)  ;;  %v1829_v3 = vmov (!%p243_p3), 0.0|0.0   ;;  %v326_v6 = vld [vmem:[%s2412_s1 + $0x90] sm:$0xff] (!%p243_p3)  ;;  %p283_p4 = scmp.lt.s32.totalorder (!%p243_p3), %s1819_s21, 1  ;;  %vm1830_vm0 = vmmov (!%p243_p3), 0  }
   0x7   : > { %246 = sbr.rel (%p243_p3) target bundleno = 358 (0x166), region = 44  ;;  %v308_v2 = vld [vmem:[%s2412_s1] sm:$0xff] (!%p243_p3)  ;;  %1585 = vmatprep.subr.bf16.mxu0 (!%p243_p3), %v1829_v3  ;;  %v1586_v4 = vpack.c.bf16 (!%p243_p3), %v325_v1, %v324_v0  ;;  %1609 = vmatprep.subr.bf16.mxu1 (!%p243_p3), %v1829_v3  ;;  %v309_v5 = vld [vmem:[%s2412_s1 + $0x8] sm:$0xff] (!%p243_p3)  ;;  %v327_v7 = vld [vmem:[%s2412_s1 + $0x98] sm:$0xff] (!%p243_p3)  ;;  %v1831_v11 = vmov (!%p243_p3), 0.0   ;;  %vm687_vm1 = vcmask (!%p243_p3), 1043456  }
   0x8   : > { %v1610_v8 = vpack.c.bf16 (!%p243_p3), %v309_v5, %v308_v2  ;;  %v310_v9 = vld [vmem:[%s2412_s1 + $0x10] sm:$0xff] (!%p243_p3)  ;;  %v311_v10 = vld [vmem:[%s2412_s1 + $0x18] sm:$0xff] (!%p243_p3)  ;;  %1337 = vmatprep.mubr.msk.f32.mxu0 (!%p243_p3), %vm1830_vm0, %v1831_v11  ;;  %1372 = vmatprep.mubr.msk.f32.mxu1 (!%p243_p3), %vm1830_vm0, %v1831_v11  ;;  %v1589_v12 = vpack.c.bf16 (!%p243_p3), %v327_v7, %v326_v6  ;;  %v328_v14 = vld [vmem:[%s2412_s1 + $0xa0] sm:$0xff] (!%p243_p3)  ;;  %vm779_vm2 = vcmask (!%p243_p3), 1042432   ;;  %vm871_vm3 = vcmask (!%p243_p3), 1041408  }
   0x9   : > { %1587 = vmatpush3.bf16.msra.mxu0 (!%p243_p3), %v1586_v4  ;;  %v1613_v13 = vpack.c.bf16 (!%p243_p3), %v311_v10, %v310_v9  ;;  %v329_v15 = vld [vmem:[%s2412_s1 + $0xa8] sm:$0xff] (!%p243_p3)  ;;  %v312_v16 = vld [vmem:[%s2412_s1 + $0x20] sm:$0xff] (!%p243_p3)  ;;  %v330_v20 = vld [vmem:[%s2412_s1 + $0xb0] sm:$0xff] (!%p243_p3)  ;;  %vm963_vm4 = vcmask (!%p243_p3), 1040384   ;;  %vm342_vm5 = vcmask (!%p243_p3), 1046528   ;;  %vm503_vm6 = vcmask (!%p243_p3), 1045504  }
   0xa   : > { %1611 = vmatpush3.bf16.msra.mxu1 (!%p243_p3), %v1610_v8  ;;  %1588 = vmatprep.subr.bf16.mxu0 (!%p243_p3), %v1829_v3  ;;  %v313_v17 = vld [vmem:[%s2412_s1 + $0x28] sm:$0xff] (!%p243_p3)  ;;  %v1592_v18 = vpack.c.bf16 (!%p243_p3), %v329_v15, %v328_v14  ;;  %v331_v21 = vld [vmem:[%s2412_s1 + $0xb8] sm:$0xff] (!%p243_p3)  ;;  %v314_v22 = vld [vmem:[%s2412_s1 + $0x30] sm:$0xff] (!%p243_p3)  ;;  %vm595_vm7 = vcmask (!%p243_p3), 1044480  }
   0xb   : > { %1612 = vmatprep.subr.bf16.mxu1 (!%p243_p3), %v1829_v3  ;;  %v1616_v19 = vpack.c.bf16 (!%p243_p3), %v313_v17, %v312_v16  ;;  %v315_v23 = vld [vmem:[%s2412_s1 + $0x38] sm:$0xff] (!%p243_p3)  ;;  %v1595_v24 = vpack.c.bf16 (!%p243_p3), %v331_v21, %v330_v20  ;;  %v332_v25 = vld [vmem:[%s2412_s1 + $0xc0] sm:$0xff] (!%p243_p3)  ;;  %v333_v27 = vld [vmem:[%s2412_s1 + $0xc8] sm:$0xff] (!%p243_p3) }
   0xc   : > { %v1619_v26 = vpack.c.bf16 (!%p243_p3), %v315_v23, %v314_v22  ;;  %v316_v30 = vld [vmem:[%s2412_s1 + $0x40] sm:$0xff] (!%p243_p3)  ;;  %v317_v31 = vld [vmem:[%s2412_s1 + $0x48] sm:$0xff] (!%p243_p3)  ;;  %v1598_v35 = vpack.c.bf16 (!%p243_p3), %v333_v27, %v332_v25  ;;  %v334_v39 = vld [vmem:[%s2412_s1 + $0xd0] sm:$0xff] (!%p243_p3) }
   0xd   : > { %1590 = vmatpush3.bf16.msra.mxu0 (!%p243_p3), %v1589_v12  ;;  %v1622_v38 = vpack.c.bf16 (!%p243_p3), %v317_v31, %v316_v30  ;;  %v335_v40 = vld [vmem:[%s2412_s1 + $0xd8] sm:$0xff] (!%p243_p3)  ;;  %v318_v43 = vld [vmem:[%s2412_s1 + $0x50] sm:$0xff] (!%p243_p3)  ;;  %v336_v52 = vld [vmem:[%s2412_s1 + $0xe0] sm:$0xff] (!%p243_p3) }
   0xe   : > { %s2423_s21 = smov (!%p283_p4, %s1819_s21), 1  ;;  %1614 = vmatpush3.bf16.msra.mxu1 %v1613_v13  ;;  %1591 = vmatprep.subr.bf16.mxu0 %v1829_v3  ;;  %v319_v44 = vld [vmem:[%s2412_s1 + $0x58] sm:$0xff]  ;;  %v1601_v49 = vpack.c.bf16 %v335_v40, %v334_v39  ;;  %v337_v53 = vld [vmem:[%s2412_s1 + $0xe8] sm:$0xff]  ;;  %v320_v54 = vld [vmem:[%s2412_s1 + $0x60] sm:$0xff] }
   0xf   : > { %s1168_s25 = sshll.u32 %s2423_s21, 4  ;;  %1615 = vmatprep.subr.bf16.mxu1 %v1829_v3  ;;  %v1625_v51 = vpack.c.bf16 %v319_v44, %v318_v43  ;;  %v321_v55 = vld [vmem:[%s2412_s1 + $0x68] sm:$0xff]  ;;  %v1604_v56 = vpack.c.bf16 %v337_v53, %v336_v52  ;;  %v338_v58 = vld [vmem:[%s2412_s1 + $0xf0] sm:$0xff]  ;;  %v339_v59 = vld [vmem:[%s2412_s1 + $0xf8] sm:$0xff]  ;;  %s1777_s17 = smul.u32 24, %s2423_s21 }
  0x10   : > { %s287_s12 = scalar_lea.vmem %s2411_s0, %s1168_s25  ;;  %v1628_v57 = vpack.c.bf16 %v321_v55, %v320_v54  ;;  %v322_v60 = vld [vmem:[%s2412_s1 + $0x70] sm:$0xff]  ;;  %v323_v61 = vld [vmem:[%s2412_s1 + $0x78] sm:$0xff]  ;;  %v1607_v62 = vpack.c.bf16 %v339_v59, %v338_v58  ;;  %v487_v2 = vld [vmem:[%s2412_s1 + $0x100] sm:$0xff]  ;;  %s1164_s25 = sshll.u32 %s2423_s21, 3 }
  0x11   : > { %1593 = vmatpush3.bf16.msra.mxu0 %v1592_v18  ;;  %v1960_v28 = vld [vmem:[%s287_s12] sm:$0xff]  ;;  %v1962_v29 = vld [vmem:[%s287_s12 + $0x8] sm:$0xff]  ;;  %v1631_v1 = vpack.c.bf16 %v323_v61, %v322_v60  ;;  %v489_v10 = vld [vmem:[%s2412_s1 + $0x110] sm:$0xff]  ;;  %s296_s20 = scalar_lea.vmem %s2416_s5, %s1777_s17  ;;  %s303_s28 = scalar_lea.vmem %s2417_s6, %s1164_s25 }
  0x12   : > { %1617 = vmatpush3.bf16.msra.mxu1 %v1616_v19  ;;  %1594 = vmatprep.subr.bf16.mxu0 %v1829_v3  ;;  %v688_v32 = vrot.slane %v1960_v28, 4  ;;  %v689_v33 = vrot.slane %v1962_v29, 4  ;;  %v780_v34 = vrot.slane %v1960_v28, 5  ;;  %v781_v37 = vrot.slane %v1962_v29, 5  ;;  %v488_v4 = vld [vmem:[%s2412_s1 + $0x108] sm:$0xff]  ;;  %v579_v5 = vld [vmem:[%s2412_s1 + $0x180] sm:$0xff] }
  0x13   : > { %1618 = vmatprep.subr.bf16.mxu1 %v1829_v3  ;;  %v872_v41 = vrot.slane %v1960_v28, 6  ;;  %v873_v42 = vrot.slane %v1962_v29, 6  ;;  %v964_v46 = vrot.slane %v1960_v28, 7  ;;  %v965_v47 = vrot.slane %v1962_v29, 7  ;;  %v580_v6 = vld [vmem:[%s2412_s1 + $0x188] sm:$0xff]  ;;  %v490_v12 = vld [vmem:[%s2412_s1 + $0x118] sm:$0xff] }
  0x14   : > { %v1974_v36 = vsel %vm687_vm1, %v688_v32, %v689_v33  ;;  %v1994_v45 = vsel %vm779_vm2, %v780_v34, %v781_v37  ;;  %v343_v63 = vrot.slane %v1960_v28, 1  ;;  %v344_v0 = vrot.slane %v1962_v29, 1  ;;  %v581_v13 = vld [vmem:[%s2412_s1 + $0x190] sm:$0xff]  ;;  %v582_v14 = vld [vmem:[%s2412_s1 + $0x198] sm:$0xff]  ;;  %v491_v17 = vld [vmem:[%s2412_s1 + $0x120] sm:$0xff] }
  0x15   : > { %1596 = vmatpush3.bf16.msra.mxu0 %v1595_v24  ;;  %v1998_v48 = vsel %vm871_vm3, %v872_v41, %v873_v42  ;;  %v2000_v50 = vsel %vm963_vm4, %v964_v46, %v965_v47  ;;  %v1634_v8 = vpack.c.bf16 %v488_v4, %v487_v2  ;;  %v1658_v9 = vpack.c.bf16 %v580_v6, %v579_v5  ;;  %v492_v18 = vld [vmem:[%s2412_s1 + $0x128] sm:$0xff]  ;;  %v583_v19 = vld [vmem:[%s2412_s1 + $0x1a0] sm:$0xff]  ;;  %v493_v23 = vld [vmem:[%s2412_s1 + $0x130] sm:$0xff] }
  0x16   : > { %1620 = vmatpush3.bf16.msra.mxu1 %v1619_v26  ;;  %1597 = vmatprep.subr.bf16.mxu0 %v1829_v3  ;;  %v345_v7 = vsel %vm342_vm5, %v343_v63, %v344_v0  ;;  %v1637_v15 = vpack.c.bf16 %v490_v12, %v489_v10  ;;  %v1661_v16 = vpack.c.bf16 %v582_v14, %v581_v13  ;;  %v584_v20 = vld [vmem:[%s2412_s1 + $0x1a8] sm:$0xff]  ;;  %v494_v24 = vld [vmem:[%s2412_s1 + $0x138] sm:$0xff]  ;;  %v585_v25 = vld [vmem:[%s2412_s1 + $0x1b0] sm:$0xff]  ;;  %v504_v58 = vrot.slane %v1960_v28, 2 }
  0x17   : > { %1621 = vmatprep.subr.bf16.mxu1 %v1829_v3  ;;  %v1640_v21 = vpack.c.bf16 %v492_v18, %v491_v17  ;;  %v1664_v22 = vpack.c.bf16 %v584_v20, %v583_v19  ;;  %v586_v26 = vld [vmem:[%s2412_s1 + $0x1b8] sm:$0xff]  ;;  %v1643_v27 = vpack.c.bf16 %v494_v24, %v493_v23  ;;  %v495_v31 = vld [vmem:[%s2412_s1 + $0x140] sm:$0xff]  ;;  %v496_v32 = vld [vmem:[%s2412_s1 + $0x148] sm:$0xff]  ;;  %v505_v59 = vrot.slane %v1962_v29, 2 }
  0x18   : > { %v1667_v30 = vpack.c.bf16 %v586_v26, %v585_v25  ;;  %v587_v33 = vld [vmem:[%s2412_s1 + $0x1c0] sm:$0xff]  ;;  %v588_v34 = vld [vmem:[%s2412_s1 + $0x1c8] sm:$0xff]  ;;  %v498_v39 = vld [vmem:[%s2412_s1 + $0x158] sm:$0xff]  ;;  %v596_v63 = vrot.slane %v1960_v28, 3  ;;  %v597_v0 = vrot.slane %v1962_v29, 3 }
  0x19   : > { %1599 = vmatpush3.bf16.msra.mxu0 %v1598_v35  ;;  %v1646_v35 = vpack.c.bf16 %v496_v32, %v495_v31  ;;  %v1670_v37 = vpack.c.bf16 %v588_v34, %v587_v33  ;;  %v589_v40 = vld [vmem:[%s2412_s1 + $0x1d0] sm:$0xff]  ;;  %v590_v41 = vld [vmem:[%s2412_s1 + $0x1d8] sm:$0xff]  ;;  %v499_v44 = vld [vmem:[%s2412_s1 + $0x160] sm:$0xff]  ;;  %v506_v4 = vsel %vm503_vm6, %v504_v58, %v505_v59 }
  0x1a   : > { %1623 = vmatpush3.bf16.msra.mxu1 %v1622_v38  ;;  %1600 = vmatprep.subr.bf16.mxu0 %v1829_v3  ;;  %v497_v38 = vld [vmem:[%s2412_s1 + $0x150] sm:$0xff]  ;;  %v1673_v43 = vpack.c.bf16 %v590_v41, %v589_v40  ;;  %v500_v46 = vld [vmem:[%s2412_s1 + $0x168] sm:$0xff]  ;;  %v591_v47 = vld [vmem:[%s2412_s1 + $0x1e0] sm:$0xff] }
  0x1b   : > { %1624 = vmatprep.subr.bf16.mxu1 %v1829_v3  ;;  %v1649_v42 = vpack.c.bf16 %v498_v39, %v497_v38  ;;  %v501_v53 = vld [vmem:[%s2412_s1 + $0x170] sm:$0xff]  ;;  %v502_v54 = vld [vmem:[%s2412_s1 + $0x178] sm:$0xff]  ;;  %v671_v61 = vld [vmem:[%s2412_s1 + $0x200] sm:$0xff] }
  0x1c   : > { %v593_v55 = vld [vmem:[%s2412_s1 + $0x1f0] sm:$0xff]  ;;  %v764_v2 = vld [vmem:[%s2412_s1 + $0x288] sm:$0xff]  ;;  %v675_v13 = vld [vmem:[%s2412_s1 + $0x220] sm:$0xff] }
  0x1d   : > { %1602 = vmatpush3.bf16.msra.mxu0 %v1601_v49  ;;  %v592_v49 = vld [vmem:[%s2412_s1 + $0x1e8] sm:$0xff]  ;;  %v673_v29 = vld [vmem:[%s2412_s1 + $0x210] sm:$0xff]  ;;  %v678_v20 = vld [vmem:[%s2412_s1 + $0x238] sm:$0xff] }
  0x1e   : > { %1626 = vmatpush3.bf16.msra.mxu1 %v1625_v51  ;;  %1603 = vmatprep.subr.bf16.mxu0 %v1829_v3  ;;  %v1652_v51 = vpack.c.bf16 %v500_v46, %v499_v44  ;;  %v1676_v52 = vpack.c.bf16 %v592_v49, %v591_v47  ;;  %v676_v14 = vld [vmem:[%s2412_s1 + $0x228] sm:$0xff]  ;;  %v677_v19 = vld [vmem:[%s2412_s1 + $0x230] sm:$0xff]  ;;  %v679_v25 = vld [vmem:[%s2412_s1 + $0x240] sm:$0xff] }
  0x1f   : > { %1627 = vmatprep.subr.bf16.mxu1 %v1829_v3  ;;  %v1688_v17 = vpack.c.bf16 %v676_v14, %v675_v13  ;;  %v1691_v23 = vpack.c.bf16 %v678_v20, %v677_v19  ;;  %v680_v26 = vld [vmem:[%s2412_s1 + $0x248] sm:$0xff]  ;;  %v681_v33 = vld [vmem:[%s2412_s1 + $0x250] sm:$0xff]  ;;  %v682_v34 = vld [vmem:[%s2412_s1 + $0x258] sm:$0xff] }
  0x20   : > { %v1694_v31 = vpack.c.bf16 %v680_v26, %v679_v25  ;;  %v1697_v38 = vpack.c.bf16 %v682_v34, %v681_v33  ;;  %v683_v40 = vld [vmem:[%s2412_s1 + $0x260] sm:$0xff]  ;;  %v684_v41 = vld [vmem:[%s2412_s1 + $0x268] sm:$0xff]  ;;  %v685_v47 = vld [vmem:[%s2412_s1 + $0x270] sm:$0xff] }
  0x21   : > { %1605 = vmatpush3.bf16.msra.mxu0 %v1604_v56  ;;  %v594_v56 = vld [vmem:[%s2412_s1 + $0x1f8] sm:$0xff]  ;;  %v1700_v44 = vpack.c.bf16 %v684_v41, %v683_v40  ;;  %v948_v58 = vld [vmem:[%s2412_s1 + $0x388] sm:$0xff]  ;;  %v955_v14 = vld [vmem:[%s2412_s1 + $0x3c0] sm:$0xff] }
  0x22   : > { %1629 = vmatpush3.bf16.msra.mxu1 %v1628_v57  ;;  %1606 = vmatprep.subr.bf16.mxu0 %v1829_v3  ;;  %v1655_v57 = vpack.c.bf16 %v502_v54, %v501_v53  ;;  %v1679_v60 = vpack.c.bf16 %v594_v56, %v593_v55  ;;  %v686_v49 = vld [vmem:[%s2412_s1 + $0x278] sm:$0xff]  ;;  %v855_v55 = vld [vmem:[%s2412_s1 + $0x300] sm:$0xff]  ;;  %v856_v56 = vld [vmem:[%s2412_s1 + $0x308] sm:$0xff] }
  0x23   : > { %1630 = vmatprep.subr.bf16.mxu1 %v1829_v3  ;;  %v1703_v53 = vpack.c.bf16 %v686_v49, %v685_v47  ;;  %v1730_v59 = vpack.c.bf16 %v856_v56, %v855_v55  ;;  %v864_v13 = vld [vmem:[%s2412_s1 + $0x348] sm:$0xff]  ;;  %v866_v19 = vld [vmem:[%s2412_s1 + $0x358] sm:$0xff]  ;;  %v957_v20 = vld [vmem:[%s2412_s1 + $0x3d0] sm:$0xff] }
  0x24   : > { %v868_v25 = vld [vmem:[%s2412_s1 + $0x368] sm:$0xff]  ;;  %v959_v26 = vld [vmem:[%s2412_s1 + $0x3e0] sm:$0xff]  ;;  %v870_v33 = vld [vmem:[%s2412_s1 + $0x378] sm:$0xff] }
  0x25   : > { %1608 = vmatpush3.bf16.msra.mxu0 %v1607_v62  ;;  %v672_v62 = vld [vmem:[%s2412_s1 + $0x208] sm:$0xff]  ;;  %v961_v34 = vld [vmem:[%s2412_s1 + $0x3f0] sm:$0xff] }
  0x26   : > { %1632 = vmatpush3.bf16.msra.mxu1 %v1631_v1  ;;  %1633 = vmatprep.subr.bf16.mxu0 %v1829_v3  ;;  %v763_v1 = vld [vmem:[%s2412_s1 + $0x280] sm:$0xff]  ;;  %v1682_v5 = vpack.c.bf16 %v672_v62, %v671_v61  ;;  %v857_v61 = vld [vmem:[%s2412_s1 + $0x310] sm:$0xff]  ;;  %v858_v62 = vld [vmem:[%s2412_s1 + $0x318] sm:$0xff] }
  0x27   : > { %1657 = vmatprep.subr.bf16.mxu1 %v1829_v3  ;;  %v1706_v6 = vpack.c.bf16 %v764_v2, %v763_v1  ;;  %v1733_v1 = vpack.c.bf16 %v858_v62, %v857_v61 }
  0x28   : > { %1338 = vmatmul.mubr.f32.vlgmr.msra.gmra.mrb[0].mxu0 %v345_v7  ;;  %v674_v7 = vld [vmem:[%s2412_s1 + $0x218] sm:$0xff] }
  0x29   : > { %1373 = vmatmul.mubr.f32.vlgmr.msra.gmra.mrb[0].mxu1 %v1960_v28  ;;  %1635 = vmatpush3.bf16.msra.mxu0 %v1634_v8  ;;  %v598_v28 = vsel %vm595_vm7, %v596_v63, %v597_v0  ;;  %v765_v8 = vld [vmem:[%s2412_s1 + $0x290] sm:$0xff]  ;;  %v1685_v10 = vpack.c.bf16 %v674_v7, %v673_v29  ;;  %v950_v0 = vld [vmem:[%s2412_s1 + $0x398] sm:$0xff] }
  0x2a   : > { %1659 = vmatpush3.bf16.msra.mxu1 %v1658_v9  ;;  %1636 = vmatprep.subr.bf16.mxu0 %v1829_v3  ;;  %v766_v9 = vld [vmem:[%s2412_s1 + $0x298] sm:$0xff]  ;;  %v949_v63 = vld [vmem:[%s2412_s1 + $0x390] sm:$0xff] }
  0x2b   : > { %1660 = vmatprep.subr.bf16.mxu1 %v1829_v3  ;;  %1407 = vmatprep.mubr.msk.f32.mxu0 %vm1830_vm0, %v1831_v11  ;;  %v1709_v12 = vpack.c.bf16 %v766_v9, %v765_v8  ;;  %v1757_v2 = vpack.c.bf16 %v950_v0, %v949_v63  ;;  %v861_v29 = vld [vmem:[%s2412_s1 + $0x330] sm:$0xff]  ;;  %v862_v7 = vld [vmem:[%s2412_s1 + $0x338] sm:$0xff] }
  0x2c   : > { %1442 = vmatprep.mubr.msk.f32.mxu1 %vm1830_vm0, %v1831_v11  ;;  %v954_v8 = vld [vmem:[%s2412_s1 + $0x3b8] sm:$0xff]  ;;  %v1739_v9 = vpack.c.bf16 %v862_v7, %v861_v29 }
  0x2d   : > { %1638 = vmatpush3.bf16.msra.mxu0 %v1637_v15  ;;  %v767_v15 = vld [vmem:[%s2412_s1 + $0x2a0] sm:$0xff] }
  0x2e   : > { %1662 = vmatpush3.bf16.msra.mxu1 %v1661_v16  ;;  %1639 = vmatprep.subr.bf16.mxu0 %v1829_v3  ;;  %v768_v16 = vld [vmem:[%s2412_s1 + $0x2a8] sm:$0xff] }
  0x2f   : > { %1663 = vmatprep.subr.bf16.mxu1 %v1829_v3  ;;  %v1712_v18 = vpack.c.bf16 %v768_v16, %v767_v15  ;;  %v956_v15 = vld [vmem:[%s2412_s1 + $0x3c8] sm:$0xff] }
  0x31   : > { %1641 = vmatpush3.bf16.msra.mxu0 %v1640_v21  ;;  %v769_v21 = vld [vmem:[%s2412_s1 + $0x2b0] sm:$0xff] }
  0x32   : > { %1665 = vmatpush3.bf16.msra.mxu1 %v1664_v22  ;;  %1642 = vmatprep.subr.bf16.mxu0 %v1829_v3  ;;  %v770_v22 = vld [vmem:[%s2412_s1 + $0x2b8] sm:$0xff] }
  0x33   : > { %1666 = vmatprep.subr.bf16.mxu1 %v1829_v3  ;;  %v1715_v24 = vpack.c.bf16 %v770_v22, %v769_v21  ;;  %v958_v21 = vld [vmem:[%s2412_s1 + $0x3d8] sm:$0xff] }
  0x35   : > { %1644 = vmatpush3.bf16.msra.mxu0 %v1643_v27  ;;  %v771_v27 = vld [vmem:[%s2412_s1 + $0x2c0] sm:$0xff] }
  0x36   : > { %1668 = vmatpush3.bf16.msra.mxu1 %v1667_v30  ;;  %1645 = vmatprep.subr.bf16.mxu0 %v1829_v3  ;;  %v772_v30 = vld [vmem:[%s2412_s1 + $0x2c8] sm:$0xff] }
  0x37   : > { %1669 = vmatprep.subr.bf16.mxu1 %v1829_v3  ;;  %v1718_v32 = vpack.c.bf16 %v772_v30, %v771_v27  ;;  %v960_v27 = vld [vmem:[%s2412_s1 + $0x3e8] sm:$0xff] }
  0x39   : > { %1647 = vmatpush3.bf16.msra.mxu0 %v1646_v35  ;;  %v773_v35 = vld [vmem:[%s2412_s1 + $0x2d0] sm:$0xff] }
  0x3a   : > { %1671 = vmatpush3.bf16.msra.mxu1 %v1670_v37  ;;  %1648 = vmatprep.subr.bf16.mxu0 %v1829_v3  ;;  %v774_v37 = vld [vmem:[%s2412_s1 + $0x2d8] sm:$0xff] }
  0x3b   : > { %1672 = vmatprep.subr.bf16.mxu1 %v1829_v3  ;;  %v1721_v39 = vpack.c.bf16 %v774_v37, %v773_v35  ;;  %v962_v35 = vld [vmem:[%s2412_s1 + $0x3f8] sm:$0xff] }
  0x3d   : > { %1650 = vmatpush3.bf16.msra.mxu0 %v1649_v42  ;;  %v775_v42 = vld [vmem:[%s2412_s1 + $0x2e0] sm:$0xff] }
  0x3e   : > { %1674 = vmatpush3.bf16.msra.mxu1 %v1673_v43  ;;  %1651 = vmatprep.subr.bf16.mxu0 %v1829_v3  ;;  %v776_v43 = vld [vmem:[%s2412_s1 + $0x2e8] sm:$0xff] }
  0x3f   : > { %1675 = vmatprep.subr.bf16.mxu1 %v1829_v3  ;;  %v1724_v46 = vpack.c.bf16 %v776_v43, %v775_v42 }
  0x41   : > { %1653 = vmatpush3.bf16.msra.mxu0 %v1652_v51  ;;  %v777_v51 = vld [vmem:[%s2412_s1 + $0x2f0] sm:$0xff] }
  0x42   : > { %1677 = vmatpush3.bf16.msra.mxu1 %v1676_v52  ;;  %1654 = vmatprep.subr.bf16.mxu0 %v1829_v3  ;;  %v778_v52 = vld [vmem:[%s2412_s1 + $0x2f8] sm:$0xff] }
  0x43   : > { %1678 = vmatprep.subr.bf16.mxu1 %v1829_v3  ;;  %v1727_v54 = vpack.c.bf16 %v778_v52, %v777_v51 }
  0x45   : > { %1656 = vmatpush3.bf16.msra.mxu0 %v1655_v57  ;;  %v947_v57 = vld [vmem:[%s2412_s1 + $0x380] sm:$0xff] }
  0x46   : > { %1680 = vmatpush3.bf16.msra.mxu1 %v1679_v60  ;;  %1681 = vmatprep.subr.bf16.mxu0 %v1829_v3  ;;  %v1754_v60 = vpack.c.bf16 %v948_v58, %v947_v57  ;;  %v1055_v57 = vld [vmem:[%s296_s20] sm:$0xff]  ;;  %v1056_v58 = vld [vmem:[%s296_s20 + $0x8] sm:$0xff] }
  0x47   : > { %1705 = vmatprep.subr.bf16.mxu1 %v1829_v3  ;;  %v1058_v61 = vmax.f32 %v1055_v57, %v1056_v58 }
  0x48   : > { %1408 = vmatmul.mubr.f32.vlgmr.msra.gmra.mrb[2].mxu0 %v506_v4  ;;  %v859_v4 = vld [vmem:[%s2412_s1 + $0x320] sm:$0xff] }
  0x49   : > { %1683 = vmatpush3.bf16.msra.mxu0 %v1682_v5  ;;  %1443 = vmatmul.mubr.f32.vlgmr.msra.gmra.mrb[2].mxu1 %v598_v28  ;;  %v860_v5 = vld [vmem:[%s2412_s1 + $0x328] sm:$0xff] }
  0x4a   : > { %1707 = vmatpush3.bf16.msra.mxu1 %v1706_v6  ;;  %1684 = vmatprep.subr.bf16.mxu0 %v1829_v3  ;;  %v1736_v28 = vpack.c.bf16 %v860_v5, %v859_v4 }
  0x4b   : > { %1708 = vmatprep.subr.bf16.mxu1 %v1829_v3  ;;  %1477 = vmatprep.mubr.msk.f32.mxu0 %vm1830_vm0, %v1831_v11 }
  0x4c   : > { %1512 = vmatprep.mubr.msk.f32.mxu1 %vm1830_vm0, %v1831_v11 }
  0x4d   : > { %1686 = vmatpush3.bf16.msra.mxu0 %v1685_v10 }
  0x4e   : > { %1710 = vmatpush3.bf16.msra.mxu1 %v1709_v12  ;;  %1687 = vmatprep.subr.bf16.mxu0 %v1829_v3  ;;  %v863_v12 = vld [vmem:[%s2412_s1 + $0x340] sm:$0xff] }
  0x4f   : > { %1711 = vmatprep.subr.bf16.mxu1 %v1829_v3  ;;  %v1742_v16 = vpack.c.bf16 %v864_v13, %v863_v12 }
  0x51   : > { %1689 = vmatpush3.bf16.msra.mxu0 %v1688_v17  ;;  %v1766_v17 = vpack.c.bf16 %v956_v15, %v955_v14 }
  0x52   : > { %1713 = vmatpush3.bf16.msra.mxu1 %v1712_v18  ;;  %1690 = vmatprep.subr.bf16.mxu0 %v1829_v3  ;;  %v865_v18 = vld [vmem:[%s2412_s1 + $0x350] sm:$0xff] }
  0x53   : > { %1714 = vmatprep.subr.bf16.mxu1 %v1829_v3  ;;  %v1745_v22 = vpack.c.bf16 %v866_v19, %v865_v18 }
  0x55   : > { %1692 = vmatpush3.bf16.msra.mxu0 %v1691_v23  ;;  %v1769_v23 = vpack.c.bf16 %v958_v21, %v957_v20 }
  0x56   : > { %1716 = vmatpush3.bf16.msra.mxu1 %v1715_v24  ;;  %1693 = vmatprep.subr.bf16.mxu0 %v1829_v3  ;;  %v867_v24 = vld [vmem:[%s2412_s1 + $0x360] sm:$0xff] }
  0x57   : > { %1717 = vmatprep.subr.bf16.mxu1 %v1829_v3  ;;  %v1748_v30 = vpack.c.bf16 %v868_v25, %v867_v24 }
  0x59   : > { %1695 = vmatpush3.bf16.msra.mxu0 %v1694_v31  ;;  %v1772_v31 = vpack.c.bf16 %v960_v27, %v959_v26 }
  0x5a   : > { %1719 = vmatpush3.bf16.msra.mxu1 %v1718_v32  ;;  %1696 = vmatprep.subr.bf16.mxu0 %v1829_v3  ;;  %v869_v32 = vld [vmem:[%s2412_s1 + $0x370] sm:$0xff] }
  0x5b   : > { %1720 = vmatprep.subr.bf16.mxu1 %v1829_v3  ;;  %v1751_v37 = vpack.c.bf16 %v870_v33, %v869_v32 }
  0x5d   : > { %1698 = vmatpush3.bf16.msra.mxu0 %v1697_v38  ;;  %v1775_v38 = vpack.c.bf16 %v962_v35, %v961_v34 }
  0x5e   : > { %1722 = vmatpush3.bf16.msra.mxu1 %v1721_v39  ;;  %1699 = vmatprep.subr.bf16.mxu0 %v1829_v3 }
  0x5f   : > { %1723 = vmatprep.subr.bf16.mxu1 %v1829_v3 }
  0x61   : > { %1701 = vmatpush3.bf16.msra.mxu0 %v1700_v44 }
  0x62   : > { %1725 = vmatpush3.bf16.msra.mxu1 %v1724_v46  ;;  %1702 = vmatprep.subr.bf16.mxu0 %v1829_v3 }
  0x63   : > { %1726 = vmatprep.subr.bf16.mxu1 %v1829_v3 }
  0x65   : > { %1704 = vmatpush3.bf16.msra.mxu0 %v1703_v53 }
  0x66   : > { %1728 = vmatpush3.bf16.msra.mxu1 %v1727_v54  ;;  %1729 = vmatprep.subr.bf16.mxu0 %v1829_v3 }
  0x67   : > { %1753 = vmatprep.subr.bf16.mxu1 %v1829_v3 }
  0x68   : > { %1478 = vmatmul.mubr.f32.vlgmr.msra.gmra.mrb[4].mxu0 %v1974_v36  ;;  %v951_v36 = vld [vmem:[%s2412_s1 + $0x3a0] sm:$0xff] }
  0x69   : > { %1731 = vmatpush3.bf16.msra.mxu0 %v1730_v59  ;;  %1513 = vmatmul.mubr.f32.vlgmr.msra.gmra.mrb[4].mxu1 %v1994_v45  ;;  %v952_v45 = vld [vmem:[%s2412_s1 + $0x3a8] sm:$0xff] }
  0x6a   : > { %1755 = vmatpush3.bf16.msra.mxu1 %v1754_v60  ;;  %1732 = vmatprep.subr.bf16.mxu0 %v1829_v3  ;;  %v1760_v6 = vpack.c.bf16 %v952_v45, %v951_v36 }
  0x6b   : > { %1756 = vmatprep.subr.bf16.mxu1 %v1829_v3  ;;  %1547 = vmatprep.mubr.msk.f32.mxu0 %vm1830_vm0, %v1831_v11 }
  0x6c   : > { %1582 = vmatprep.mubr.msk.f32.mxu1 %vm1830_vm0, %v1831_v11  ;;  %v953_v11 = vld [vmem:[%s2412_s1 + $0x3b0] sm:$0xff] }
  0x6d   : > { %1734 = vmatpush3.bf16.msra.mxu0 %v1733_v1  ;;  %v1763_v10 = vpack.c.bf16 %v954_v8, %v953_v11  ;;  %v1057_v1 = vld [vmem:[%s296_s20 + $0x10] sm:$0xff] }
  0x6e   : > { %1758 = vmatpush3.bf16.msra.mxu1 %v1757_v2  ;;  %1735 = vmatprep.subr.bf16.mxu0 %v1829_v3  ;;  %v1165_v2 = vld [vmem:[%s2413_s2] ss:$0 sm:$0xff]  ;;  %v1059_v36 = vmax.f32 %v1058_v61, %v1057_v1 }
  0x6f   : > { %1759 = vmatprep.subr.bf16.mxu1 %v1829_v3 }
  0x71   : > { %1737 = vmatpush3.bf16.msra.mxu0 %v1736_v28 }
  0x72   : > { %1761 = vmatpush3.bf16.msra.mxu1 %v1760_v6  ;;  %1738 = vmatprep.subr.bf16.mxu0 %v1829_v3 }
  0x73   : > { %1762 = vmatprep.subr.bf16.mxu1 %v1829_v3 }
  0x75   : > { %1740 = vmatpush3.bf16.msra.mxu0 %v1739_v9 }
  0x76   : > { %1764 = vmatpush3.bf16.msra.mxu1 %v1763_v10  ;;  %1741 = vmatprep.subr.bf16.mxu0 %v1829_v3 }
  0x77   : > { %1765 = vmatprep.subr.bf16.mxu1 %v1829_v3 }
  0x79   : > { %1743 = vmatpush3.bf16.msra.mxu0 %v1742_v16 }
  0x7a   : > { %1767 = vmatpush3.bf16.msra.mxu1 %v1766_v17  ;;  %1744 = vmatprep.subr.bf16.mxu0 %v1829_v3 }
  0x7b   : > { %1768 = vmatprep.subr.bf16.mxu1 %v1829_v3 }
  0x7d   : > { %1746 = vmatpush3.bf16.msra.mxu0 %v1745_v22 }
  0x7e   : > { %1770 = vmatpush3.bf16.msra.mxu1 %v1769_v23  ;;  %1747 = vmatprep.subr.bf16.mxu0 %v1829_v3 }
  0x7f   : > { %1771 = vmatprep.subr.bf16.mxu1 %v1829_v3 }
  0x81   : > { %1749 = vmatpush3.bf16.msra.mxu0 %v1748_v30 }
  0x82   : > { %1773 = vmatpush3.bf16.msra.mxu1 %v1772_v31  ;;  %1750 = vmatprep.subr.bf16.mxu0 %v1829_v3 }
  0x83   : > { %1774 = vmatprep.subr.bf16.mxu1 %v1829_v3 }
  0x85   : > { %1752 = vmatpush3.bf16.msra.mxu0 %v1751_v37 }
  0x86   : > { %1776 = vmatpush3.bf16.msra.mxu1 %v1775_v38 }
  0x88   : > { %1548 = vmatmul.mubr.f32.vlgmr.msra.gmra.mrb[6].mxu0 %v1998_v48 }
  0x89   : > { %1583 = vmatmul.mubr.f32.vlgmr.msra.gmra.mrb[6].mxu1 %v2000_v50  ;;  %v1047_v50 = vlaneseq }
  0x8b   : > { %v1048_v60 = vshrl.u32 %v1047_v50, 7 }
  0x8d   : > { %vm1051_vm8 = vcmp.lt.s32.totalorder %v1048_v60, 4 }
  0xfb   : > { %v413_v39 = vpop.f32.mrb[0].mxu0 }
  0xfc   : > { %v1339_v40 = vpop.f32.mrb[1].mxu0  ;;  %v483_v41 = vpop.f32.mrb[0].mxu1 }
  0xfd   : > { %v484_v42 = vadd.f32 %v483_v41, %v413_v39  ;;  %v1374_v43 = vpop.f32.mrb[1].mxu1 }
 0x11b   : > { %v574_v44 = vpop.f32.mrb[2].mxu0 }
 0x11c   : > { %v578_v46 = vadd.f32 %v574_v44, %v484_v42  ;;  %v1409_v47 = vpop.f32.mrb[3].mxu0  ;;  %v666_v49 = vpop.f32.mrb[2].mxu1 }
 0x11d   : > { %v1444_v51 = vpop.f32.mrb[3].mxu1 }
 0x11e   : > { %v670_v52 = vadd.f32 %v666_v49, %v578_v46 }
 0x13b   : > { %v758_v53 = vpop.f32.mrb[4].mxu0 }
 0x13c   : > { %v762_v3 = vadd.f32 %v758_v53, %v670_v52  ;;  %v1479_v54 = vpop.f32.mrb[5].mxu0  ;;  %v850_v55 = vpop.f32.mrb[4].mxu1 }
 0x13d   : > { %v1514_v56 = vpop.f32.mrb[5].mxu1 }
 0x13e   : > { %v854_v48 = vadd.f32 %v850_v55, %v762_v3 }
 0x15b   : > { %v942_v59 = vpop.f32.mrb[6].mxu0 }
 0x15c   : > { %v946_v62 = vadd.f32 %v942_v59, %v854_v48  ;;  %v1549_v63 = vpop.f32.mrb[7].mxu0  ;;  %v1034_v0 = vpop.f32.mrb[6].mxu1 }
 0x15d   : > { %v1584_v4 = vpop.f32.mrb[7].mxu1 }
 0x15e   : > { %v1038_v5 = vadd.f32 %v1034_v0, %v946_v62 }
 0x160   : > { %v1046_v45 = vadd.f32 %v1165_v2, %v1038_v5 }
 0x162   : > { %v1054_v28 = vsel %vm1051_vm8, %v1046_v45, 0.0 }
 0x163   : > { %v1060_v6 = vadd.f32 %v1059_v36, %v1054_v28 }
 0x165   : > { %1061 = vst [vmem:[%s303_s28] sm:$0xff] %v1060_v6 }
 0x166 PF: > { %s16_s23 = sadd.s32 1, %s1827_s23   ;;  %s2418_s21 = smov %s1823_s22 }
 0x167   : > { %p13_p5 = scmp.ge.s32.totalorder %s16_s23, 4   ;;  %s2419_s22 = smov %s2421_s3 }
 0x169   :  { %15 = sbr.rel (!%p13_p5) target bundleno = 2 (0x2), region = 78 }

// kernel: _lambda_.22
= control target key start
LH: loop header
LB: loop body
LE: loop exit
PB: predicated region body
PF: predicated region fallthrough
CT: control target
= control target key end

     0   :  { %s1810_s18 = smov 0   ;;  %s1812_s19 = smov 0   ;;  %s2358_s0 = inlined_call_operand.vmem [shape: f32[2,16,384], index: 0, kind: input, shape index: {}]   ;;  %s2359_s1 = inlined_call_operand.vmem [shape: f32[1024,128], index: 1, kind: input, shape index: {}]   ;;  %s2360_s2 = inlined_call_operand.vmem [shape: f32[1,128], index: 2, kind: input, shape index: {}]   ;;  %s2361_s3 = inlined_call_operand.vmem [shape: f32[1,128], index: 3, kind: input, shape index: {}]   ;;  %s2362_s4 = inlined_call_operand.vmem [shape: f32[1,128], index: 4, kind: input, shape index: {}]   ;;  %s2363_s5 = inlined_call_operand.vmem [shape: f32[2,8,128], index: 5, kind: output, shape index: {}]  }
   0x1   :  { %s1814_s20 = smov 0  }
   0x2 LB: > { %s27_s21 = sadd.s32 1, %s1771_s19  ;;  %p1106_p0 = scmp.ge.s32.totalorder %s1775_s20, 1  ;;  %s1775_s20 = sphi %s1814_s20, %s15_s20   ;;  %s1771_s19 = sphi %s1812_s19, %s2365_s19   ;;  %s1767_s18 = sphi %s1810_s18, %s2364_s18  }
   0x3   : > { %p29_p1 = scmp.ge.s32.totalorder %s27_s21, 2  ;;  %p201_p2 = scmp.lt.s32.totalorder %s1775_s20, 3 }
   0x5   : > { %s2367_s21 = smov (%p29_p1, %s27_s21), 0  ;;  %p202_p3 = pnand %p1106_p0, %p201_p2 }
   0x6   : > { %v271_v0 = vld [vmem:[%s2359_s1 + $0x80] sm:$0xff] (!%p202_p3)  ;;  %v272_v1 = vld [vmem:[%s2359_s1 + $0x88] sm:$0xff] (!%p202_p3)  ;;  %v1777_v3 = vmov (!%p202_p3), 0.0|0.0   ;;  %v273_v6 = vld [vmem:[%s2359_s1 + $0x90] sm:$0xff] (!%p202_p3)  ;;  %vm1778_vm0 = vmmov (!%p202_p3), 0   ;;  %v1779_v11 = vmov (!%p202_p3), 0.0  }
   0x7   : > { %205 = sbr.rel (%p202_p3) target bundleno = 673 (0x2a1), region = 40  ;;  %v255_v2 = vld [vmem:[%s2359_s1] sm:$0xff] (!%p202_p3)  ;;  %1531 = vmatprep.subr.bf16.mxu0 (!%p202_p3), %v1777_v3  ;;  %v1532_v4 = vpack.c.bf16 (!%p202_p3), %v272_v1, %v271_v0  ;;  %1555 = vmatprep.subr.bf16.mxu1 (!%p202_p3), %v1777_v3  ;;  %v256_v5 = vld [vmem:[%s2359_s1 + $0x8] sm:$0xff] (!%p202_p3)  ;;  %v274_v7 = vld [vmem:[%s2359_s1 + $0x98] sm:$0xff] (!%p202_p3)  ;;  %p231_p4 = scmp.lt.s32.totalorder (!%p202_p3), %s1767_s18, 1  ;;  %vm532_vm1 = vcmask (!%p202_p3), 1046528  }
   0x8   : > { %v1556_v8 = vpack.c.bf16 (!%p202_p3), %v256_v5, %v255_v2  ;;  %v257_v9 = vld [vmem:[%s2359_s1 + $0x10] sm:$0xff] (!%p202_p3)  ;;  %v258_v10 = vld [vmem:[%s2359_s1 + $0x18] sm:$0xff] (!%p202_p3)  ;;  %1283 = vmatprep.mubr.msk.f32.mxu0 (!%p202_p3), %vm1778_vm0, %v1779_v11  ;;  %1318 = vmatprep.mubr.msk.f32.mxu1 (!%p202_p3), %vm1778_vm0, %v1779_v11  ;;  %v1535_v12 = vpack.c.bf16 (!%p202_p3), %v274_v7, %v273_v6  ;;  %v275_v14 = vld [vmem:[%s2359_s1 + $0xa0] sm:$0xff] (!%p202_p3)  ;;  %vm810_vm2 = vcmask (!%p202_p3), 1045504  }
   0x9   : > { %1533 = vmatpush3.bf16.msra.mxu0 (!%p202_p3), %v1532_v4  ;;  %v1559_v13 = vpack.c.bf16 (!%p202_p3), %v258_v10, %v257_v9  ;;  %v276_v15 = vld [vmem:[%s2359_s1 + $0xa8] sm:$0xff] (!%p202_p3)  ;;  %v259_v16 = vld [vmem:[%s2359_s1 + $0x20] sm:$0xff] (!%p202_p3)  ;;  %v277_v20 = vld [vmem:[%s2359_s1 + $0xb0] sm:$0xff] (!%p202_p3) }
   0xa   : > { %1557 = vmatpush3.bf16.msra.mxu1 (!%p202_p3), %v1556_v8  ;;  %1534 = vmatprep.subr.bf16.mxu0 (!%p202_p3), %v1777_v3  ;;  %v260_v17 = vld [vmem:[%s2359_s1 + $0x28] sm:$0xff] (!%p202_p3)  ;;  %v1538_v18 = vpack.c.bf16 (!%p202_p3), %v276_v15, %v275_v14  ;;  %v278_v21 = vld [vmem:[%s2359_s1 + $0xb8] sm:$0xff] (!%p202_p3)  ;;  %v261_v22 = vld [vmem:[%s2359_s1 + $0x30] sm:$0xff] (!%p202_p3) }
   0xb   : > { %1558 = vmatprep.subr.bf16.mxu1 (!%p202_p3), %v1777_v3  ;;  %v1562_v19 = vpack.c.bf16 (!%p202_p3), %v260_v17, %v259_v16  ;;  %v262_v23 = vld [vmem:[%s2359_s1 + $0x38] sm:$0xff] (!%p202_p3)  ;;  %v1541_v24 = vpack.c.bf16 (!%p202_p3), %v278_v21, %v277_v20  ;;  %v279_v26 = vld [vmem:[%s2359_s1 + $0xc0] sm:$0xff] (!%p202_p3)  ;;  %v280_v27 = vld [vmem:[%s2359_s1 + $0xc8] sm:$0xff] (!%p202_p3) }
   0xc   : > { %v1565_v25 = vpack.c.bf16 (!%p202_p3), %v262_v23, %v261_v22  ;;  %v263_v28 = vld [vmem:[%s2359_s1 + $0x40] sm:$0xff] (!%p202_p3)  ;;  %v264_v29 = vld [vmem:[%s2359_s1 + $0x48] sm:$0xff] (!%p202_p3)  ;;  %v1544_v30 = vpack.c.bf16 (!%p202_p3), %v280_v27, %v279_v26  ;;  %v281_v32 = vld [vmem:[%s2359_s1 + $0xd0] sm:$0xff] (!%p202_p3) }
   0xd   : > { %1536 = vmatpush3.bf16.msra.mxu0 (!%p202_p3), %v1535_v12  ;;  %v1568_v31 = vpack.c.bf16 (!%p202_p3), %v264_v29, %v263_v28  ;;  %v282_v33 = vld [vmem:[%s2359_s1 + $0xd8] sm:$0xff] (!%p202_p3)  ;;  %v265_v34 = vld [vmem:[%s2359_s1 + $0x50] sm:$0xff] (!%p202_p3)  ;;  %v283_v38 = vld [vmem:[%s2359_s1 + $0xe0] sm:$0xff] (!%p202_p3) }
   0xe   : > { %1560 = vmatpush3.bf16.msra.mxu1 %v1559_v13  ;;  %1537 = vmatprep.subr.bf16.mxu0 %v1777_v3  ;;  %v266_v35 = vld [vmem:[%s2359_s1 + $0x58] sm:$0xff]  ;;  %v1547_v36 = vpack.c.bf16 %v282_v33, %v281_v32  ;;  %v284_v39 = vld [vmem:[%s2359_s1 + $0xe8] sm:$0xff]  ;;  %s2369_s18 = smov (!%p231_p4, %s1767_s18), 1  ;;  %v267_v40 = vld [vmem:[%s2359_s1 + $0x60] sm:$0xff] }
   0xf   : > { %1561 = vmatprep.subr.bf16.mxu1 %v1777_v3  ;;  %v1571_v37 = vpack.c.bf16 %v266_v35, %v265_v34  ;;  %v268_v41 = vld [vmem:[%s2359_s1 + $0x68] sm:$0xff]  ;;  %v1550_v42 = vpack.c.bf16 %v284_v39, %v283_v38  ;;  %v285_v44 = vld [vmem:[%s2359_s1 + $0xf0] sm:$0xff]  ;;  %v286_v45 = vld [vmem:[%s2359_s1 + $0xf8] sm:$0xff]  ;;  %s1723_s15 = smul.u32 48, %s2369_s18  ;;  %s1108_s16 = sshll.u32 %s2369_s18, 3 }
  0x10   : > { %v1574_v43 = vpack.c.bf16 %v268_v41, %v267_v40  ;;  %v269_v46 = vld [vmem:[%s2359_s1 + $0x70] sm:$0xff]  ;;  %v270_v47 = vld [vmem:[%s2359_s1 + $0x78] sm:$0xff]  ;;  %v1553_v48 = vpack.c.bf16 %v286_v45, %v285_v44  ;;  %v427_v50 = vld [vmem:[%s2359_s1 + $0x100] sm:$0xff]  ;;  %s242_s23 = scalar_lea.vmem %s2363_s5, %s1108_s16 }
  0x11   : > { %1539 = vmatpush3.bf16.msra.mxu0 %v1538_v18  ;;  %v1577_v49 = vpack.c.bf16 %v270_v47, %v269_v46  ;;  %s1953_s26 = scalar_lea.vmem %s2358_s0, %s1723_s15  ;;  %v428_v51 = vld [vmem:[%s2359_s1 + $0x108] sm:$0xff]  ;;  %v514_v52 = vld [vmem:[%s2359_s1 + $0x180] sm:$0xff]  ;;  %v429_v58 = vld [vmem:[%s2359_s1 + $0x110] sm:$0xff] }
  0x12   : > { %1563 = vmatpush3.bf16.msra.mxu1 %v1562_v19  ;;  %1540 = vmatprep.subr.bf16.mxu0 %v1777_v3  ;;  %v515_v53 = vld [vmem:[%s2359_s1 + $0x188] sm:$0xff]  ;;  %v1580_v55 = vpack.c.bf16 %v428_v51, %v427_v50  ;;  %v1973_v56 = vld [vmem:[%s1953_s26] sm:$0xff]  ;;  %v430_v59 = vld [vmem:[%s2359_s1 + $0x118] sm:$0xff] }
  0x13   : > { %1564 = vmatprep.subr.bf16.mxu1 %v1777_v3  ;;  %v1969_v54 = vld [vmem:[%s1953_s26 + $0x8] sm:$0xff]  ;;  %v1604_v57 = vpack.c.bf16 %v515_v53, %v514_v52  ;;  %v516_v60 = vld [vmem:[%s2359_s1 + $0x190] sm:$0xff]  ;;  %v517_v61 = vld [vmem:[%s2359_s1 + $0x198] sm:$0xff]  ;;  %v1583_v62 = vpack.c.bf16 %v430_v59, %v429_v58  ;;  %v533_v38 = vrot.slane %v1973_v56, 1 }
  0x14   : > { %v1607_v63 = vpack.c.bf16 %v517_v61, %v516_v60  ;;  %v431_v0 = vld [vmem:[%s2359_s1 + $0x120] sm:$0xff]  ;;  %v432_v1 = vld [vmem:[%s2359_s1 + $0x128] sm:$0xff]  ;;  %v433_v7 = vld [vmem:[%s2359_s1 + $0x130] sm:$0xff] }
  0x15   : > { %1542 = vmatpush3.bf16.msra.mxu0 %v1541_v24  ;;  %v518_v2 = vld [vmem:[%s2359_s1 + $0x1a0] sm:$0xff]  ;;  %v519_v4 = vld [vmem:[%s2359_s1 + $0x1a8] sm:$0xff]  ;;  %v1586_v5 = vpack.c.bf16 %v432_v1, %v431_v0  ;;  %v434_v8 = vld [vmem:[%s2359_s1 + $0x138] sm:$0xff] }
  0x16   : > { %1566 = vmatpush3.bf16.msra.mxu1 %v1565_v25  ;;  %1543 = vmatprep.subr.bf16.mxu0 %v1777_v3  ;;  %v1610_v6 = vpack.c.bf16 %v519_v4, %v518_v2  ;;  %v520_v9 = vld [vmem:[%s2359_s1 + $0x1b0] sm:$0xff]  ;;  %v521_v10 = vld [vmem:[%s2359_s1 + $0x1b8] sm:$0xff]  ;;  %v1589_v12 = vpack.c.bf16 %v434_v8, %v433_v7  ;;  %v435_v14 = vld [vmem:[%s2359_s1 + $0x140] sm:$0xff] }
  0x17   : > { %1567 = vmatprep.subr.bf16.mxu1 %v1777_v3  ;;  %v1613_v13 = vpack.c.bf16 %v521_v10, %v520_v9  ;;  %v436_v15 = vld [vmem:[%s2359_s1 + $0x148] sm:$0xff]  ;;  %v522_v16 = vld [vmem:[%s2359_s1 + $0x1c0] sm:$0xff]  ;;  %v437_v20 = vld [vmem:[%s2359_s1 + $0x150] sm:$0xff] }
  0x18   : > { %v523_v17 = vld [vmem:[%s2359_s1 + $0x1c8] sm:$0xff]  ;;  %v1592_v18 = vpack.c.bf16 %v436_v15, %v435_v14  ;;  %v438_v21 = vld [vmem:[%s2359_s1 + $0x158] sm:$0xff]  ;;  %v524_v22 = vld [vmem:[%s2359_s1 + $0x1d0] sm:$0xff] }
  0x19   : > { %1545 = vmatpush3.bf16.msra.mxu0 %v1544_v30  ;;  %v1616_v19 = vpack.c.bf16 %v523_v17, %v522_v16  ;;  %v525_v23 = vld [vmem:[%s2359_s1 + $0x1d8] sm:$0xff]  ;;  %v1595_v24 = vpack.c.bf16 %v438_v21, %v437_v20  ;;  %v439_v26 = vld [vmem:[%s2359_s1 + $0x160] sm:$0xff]  ;;  %v440_v27 = vld [vmem:[%s2359_s1 + $0x168] sm:$0xff] }
  0x1a   : > { %1569 = vmatpush3.bf16.msra.mxu1 %v1568_v31  ;;  %1546 = vmatprep.subr.bf16.mxu0 %v1777_v3  ;;  %v1619_v25 = vpack.c.bf16 %v525_v23, %v524_v22  ;;  %v526_v28 = vld [vmem:[%s2359_s1 + $0x1e0] sm:$0xff]  ;;  %v527_v29 = vld [vmem:[%s2359_s1 + $0x1e8] sm:$0xff]  ;;  %v1598_v30 = vpack.c.bf16 %v440_v27, %v439_v26  ;;  %v441_v32 = vld [vmem:[%s2359_s1 + $0x170] sm:$0xff] }
  0x1b   : > { %1570 = vmatprep.subr.bf16.mxu1 %v1777_v3  ;;  %v1622_v31 = vpack.c.bf16 %v527_v29, %v526_v28  ;;  %v442_v33 = vld [vmem:[%s2359_s1 + $0x178] sm:$0xff]  ;;  %v528_v34 = vld [vmem:[%s2359_s1 + $0x1f0] sm:$0xff]  ;;  %v608_v40 = vld [vmem:[%s2359_s1 + $0x200] sm:$0xff] }
  0x1c   : > { %v529_v35 = vld [vmem:[%s2359_s1 + $0x1f8] sm:$0xff]  ;;  %v609_v41 = vld [vmem:[%s2359_s1 + $0x208] sm:$0xff]  ;;  %v2098_v45 = vld [vmem:[%s1953_s26 + $0x10] sm:$0xff] }
  0x1d   : > { %1548 = vmatpush3.bf16.msra.mxu0 %v1547_v36  ;;  %v2079_v36 = vld [vmem:[%s1953_s26 + $0x18] sm:$0xff]  ;;  %v1625_v39 = vpack.c.bf16 %v529_v35, %v528_v34  ;;  %v702_v44 = vld [vmem:[%s2359_s1 + $0x288] sm:$0xff]  ;;  %v1628_v46 = vpack.c.bf16 %v609_v41, %v608_v40  ;;  %v703_v51 = vld [vmem:[%s2359_s1 + $0x290] sm:$0xff]  ;;  %v719_v34 = vrot.slane %v2098_v45, 1 }
  0x1e   : > { %1572 = vmatpush3.bf16.msra.mxu1 %v1571_v37  ;;  %1549 = vmatprep.subr.bf16.mxu0 %v1777_v3  ;;  %v1601_v37 = vpack.c.bf16 %v442_v33, %v441_v32  ;;  %v611_v50 = vld [vmem:[%s2359_s1 + $0x218] sm:$0xff]  ;;  %v613_v58 = vld [vmem:[%s2359_s1 + $0x228] sm:$0xff]  ;;  %v705_v59 = vld [vmem:[%s2359_s1 + $0x2a0] sm:$0xff] }
  0x1f   : > { %1573 = vmatprep.subr.bf16.mxu1 %v1777_v3  ;;  %v704_v52 = vld [vmem:[%s2359_s1 + $0x298] sm:$0xff]  ;;  %v706_v60 = vld [vmem:[%s2359_s1 + $0x2a8] sm:$0xff]  ;;  %v707_v1 = vld [vmem:[%s2359_s1 + $0x2b0] sm:$0xff] }
  0x20   : > { %v615_v0 = vld [vmem:[%s2359_s1 + $0x238] sm:$0xff]  ;;  %v617_v7 = vld [vmem:[%s2359_s1 + $0x248] sm:$0xff]  ;;  %v709_v8 = vld [vmem:[%s2359_s1 + $0x2c0] sm:$0xff] }
  0x21   : > { %1551 = vmatpush3.bf16.msra.mxu0 %v1550_v42  ;;  %v534_v42 = vrot.slane %v2079_v36, 1  ;;  %v708_v2 = vld [vmem:[%s2359_s1 + $0x2b8] sm:$0xff]  ;;  %v710_v9 = vld [vmem:[%s2359_s1 + $0x2c8] sm:$0xff]  ;;  %v711_v15 = vld [vmem:[%s2359_s1 + $0x2d0] sm:$0xff] }
  0x22   : > { %1575 = vmatpush3.bf16.msra.mxu1 %v1574_v43  ;;  %1552 = vmatprep.subr.bf16.mxu0 %v1777_v3  ;;  %v701_v43 = vld [vmem:[%s2359_s1 + $0x280] sm:$0xff]  ;;  %v619_v14 = vld [vmem:[%s2359_s1 + $0x258] sm:$0xff]  ;;  %v621_v20 = vld [vmem:[%s2359_s1 + $0x268] sm:$0xff] }
  0x23   : > { %1576 = vmatprep.subr.bf16.mxu1 %v1777_v3  ;;  %v535_v47 = vsel %vm532_vm1, %v533_v38, %v534_v42  ;;  %v712_v16 = vld [vmem:[%s2359_s1 + $0x2d8] sm:$0xff]  ;;  %v713_v21 = vld [vmem:[%s2359_s1 + $0x2e0] sm:$0xff]  ;;  %v714_v22 = vld [vmem:[%s2359_s1 + $0x2e8] sm:$0xff] }
  0x24   : > { %v623_v26 = vld [vmem:[%s2359_s1 + $0x278] sm:$0xff]  ;;  %v2198_v27 = vld [vmem:[%s1953_s26 + $0x20] sm:$0xff]  ;;  %v715_v28 = vld [vmem:[%s2359_s1 + $0x2f0] sm:$0xff] }
  0x25   : > { %1554 = vmatpush3.bf16.msra.mxu0 %v1553_v48  ;;  %v1652_v48 = vpack.c.bf16 %v702_v44, %v701_v43  ;;  %v716_v29 = vld [vmem:[%s2359_s1 + $0x2f8] sm:$0xff]  ;;  %v627_v33 = vrot.slane %v2198_v27, 1  ;;  %v795_v38 = vld [vmem:[%s2359_s1 + $0x308] sm:$0xff]  ;;  %v886_v40 = vld [vmem:[%s2359_s1 + $0x380] sm:$0xff] }
  0x26   : > { %1578 = vmatpush3.bf16.msra.mxu1 %v1577_v49  ;;  %1579 = vmatprep.subr.bf16.mxu0 %v1777_v3  ;;  %v610_v49 = vld [vmem:[%s2359_s1 + $0x210] sm:$0xff]  ;;  %v1673_v35 = vpack.c.bf16 %v716_v29, %v715_v28  ;;  %v887_v41 = vld [vmem:[%s2359_s1 + $0x388] sm:$0xff]  ;;  %v812_v29 = vrot.slane %v2079_v36, 2 }
  0x27   : > { %1603 = vmatprep.subr.bf16.mxu1 %v1777_v3  ;;  %v1631_v53 = vpack.c.bf16 %v611_v50, %v610_v49  ;;  %v889_v49 = vld [vmem:[%s2359_s1 + $0x398] sm:$0xff] }
  0x28   : > { %1284 = vmatmul.mubr.f32.vlgmr.msra.gmra.mrb[0].mxu0 %v1969_v54 }
  0x29   : > { %1319 = vmatmul.mubr.f32.vlgmr.msra.gmra.mrb[0].mxu1 %v1973_v56  ;;  %1581 = vmatpush3.bf16.msra.mxu0 %v1580_v55  ;;  %v1655_v55 = vpack.c.bf16 %v704_v52, %v703_v51  ;;  %v798_v52 = vld [vmem:[%s2359_s1 + $0x320] sm:$0xff] }
  0x2a   : > { %1605 = vmatpush3.bf16.msra.mxu1 %v1604_v57  ;;  %1582 = vmatprep.subr.bf16.mxu0 %v1777_v3  ;;  %v612_v57 = vld [vmem:[%s2359_s1 + $0x220] sm:$0xff] }
  0x2b   : > { %1606 = vmatprep.subr.bf16.mxu1 %v1777_v3  ;;  %1353 = vmatprep.mubr.msk.f32.mxu0 %vm1778_vm0, %v1779_v11  ;;  %v1634_v61 = vpack.c.bf16 %v613_v58, %v612_v57  ;;  %v891_v57 = vld [vmem:[%s2359_s1 + $0x3a8] sm:$0xff] }
  0x2c   : > { %1388 = vmatprep.mubr.msk.f32.mxu1 %vm1778_vm0, %v1779_v11 }
  0x2d   : > { %1584 = vmatpush3.bf16.msra.mxu0 %v1583_v62  ;;  %v1658_v62 = vpack.c.bf16 %v706_v60, %v705_v59  ;;  %v800_v60 = vld [vmem:[%s2359_s1 + $0x330] sm:$0xff] }
  0x2e   : > { %1608 = vmatpush3.bf16.msra.mxu1 %v1607_v63  ;;  %1585 = vmatprep.subr.bf16.mxu0 %v1777_v3  ;;  %v614_v63 = vld [vmem:[%s2359_s1 + $0x230] sm:$0xff] }
  0x2f   : > { %1609 = vmatprep.subr.bf16.mxu1 %v1777_v3  ;;  %v1637_v4 = vpack.c.bf16 %v615_v0, %v614_v63  ;;  %v893_v63 = vld [vmem:[%s2359_s1 + $0x3b8] sm:$0xff] }
  0x31   : > { %1587 = vmatpush3.bf16.msra.mxu0 %v1586_v5  ;;  %v1661_v5 = vpack.c.bf16 %v708_v2, %v707_v1  ;;  %v802_v2 = vld [vmem:[%s2359_s1 + $0x340] sm:$0xff] }
  0x32   : > { %1611 = vmatpush3.bf16.msra.mxu1 %v1610_v6  ;;  %1588 = vmatprep.subr.bf16.mxu0 %v1777_v3  ;;  %v616_v6 = vld [vmem:[%s2359_s1 + $0x240] sm:$0xff] }
  0x33   : > { %1612 = vmatprep.subr.bf16.mxu1 %v1777_v3  ;;  %v1640_v10 = vpack.c.bf16 %v617_v7, %v616_v6  ;;  %v895_v6 = vld [vmem:[%s2359_s1 + $0x3c8] sm:$0xff] }
  0x35   : > { %1590 = vmatpush3.bf16.msra.mxu0 %v1589_v12  ;;  %v1664_v12 = vpack.c.bf16 %v710_v9, %v709_v8  ;;  %v804_v9 = vld [vmem:[%s2359_s1 + $0x350] sm:$0xff] }
  0x36   : > { %1614 = vmatpush3.bf16.msra.mxu1 %v1613_v13  ;;  %1591 = vmatprep.subr.bf16.mxu0 %v1777_v3  ;;  %v618_v13 = vld [vmem:[%s2359_s1 + $0x250] sm:$0xff] }
  0x37   : > { %1615 = vmatprep.subr.bf16.mxu1 %v1777_v3  ;;  %v1643_v17 = vpack.c.bf16 %v619_v14, %v618_v13  ;;  %v897_v13 = vld [vmem:[%s2359_s1 + $0x3d8] sm:$0xff] }
  0x39   : > { %1593 = vmatpush3.bf16.msra.mxu0 %v1592_v18  ;;  %v1667_v18 = vpack.c.bf16 %v712_v16, %v711_v15  ;;  %v806_v16 = vld [vmem:[%s2359_s1 + $0x360] sm:$0xff] }
  0x3a   : > { %1617 = vmatpush3.bf16.msra.mxu1 %v1616_v19  ;;  %1594 = vmatprep.subr.bf16.mxu0 %v1777_v3  ;;  %v620_v19 = vld [vmem:[%s2359_s1 + $0x260] sm:$0xff] }
  0x3b   : > { %1618 = vmatprep.subr.bf16.mxu1 %v1777_v3  ;;  %v1646_v23 = vpack.c.bf16 %v621_v20, %v620_v19  ;;  %v899_v19 = vld [vmem:[%s2359_s1 + $0x3e8] sm:$0xff] }
  0x3d   : > { %1596 = vmatpush3.bf16.msra.mxu0 %v1595_v24  ;;  %v1670_v24 = vpack.c.bf16 %v714_v22, %v713_v21  ;;  %v808_v22 = vld [vmem:[%s2359_s1 + $0x370] sm:$0xff] }
  0x3e   : > { %1620 = vmatpush3.bf16.msra.mxu1 %v1619_v25  ;;  %1597 = vmatprep.subr.bf16.mxu0 %v1777_v3  ;;  %v622_v25 = vld [vmem:[%s2359_s1 + $0x270] sm:$0xff] }
  0x3f   : > { %1621 = vmatprep.subr.bf16.mxu1 %v1777_v3  ;;  %v1649_v32 = vpack.c.bf16 %v623_v26, %v622_v25  ;;  %v901_v25 = vld [vmem:[%s2359_s1 + $0x3f8] sm:$0xff]  ;;  %v811_v26 = vrot.slane %v1973_v56, 2 }
  0x41   : > { %1599 = vmatpush3.bf16.msra.mxu0 %v1598_v30  ;;  %v254_v30 = vld [vmem:[%s1953_s26 + $0x28] sm:$0xff] }
  0x42   : > { %1623 = vmatpush3.bf16.msra.mxu1 %v1622_v31  ;;  %1600 = vmatprep.subr.bf16.mxu0 %v1777_v3  ;;  %v626_v31 = vrot.slane %v1969_v54, 1 }
  0x43   : > { %1624 = vmatprep.subr.bf16.mxu1 %v1777_v3 }
  0x44   : > { %v628_v42 = vsel %vm532_vm1, %v626_v31, %v627_v33  ;;  %v813_v33 = vsel %vm810_vm2, %v811_v26, %v812_v29 }
  0x45   : > { %1602 = vmatpush3.bf16.msra.mxu0 %v1601_v37  ;;  %v794_v37 = vld [vmem:[%s2359_s1 + $0x300] sm:$0xff] }
  0x46   : > { %1626 = vmatpush3.bf16.msra.mxu1 %v1625_v39  ;;  %1627 = vmatprep.subr.bf16.mxu0 %v1777_v3  ;;  %v720_v39 = vrot.slane %v254_v30, 1  ;;  %v1676_v43 = vpack.c.bf16 %v795_v38, %v794_v37  ;;  %v902_v30 = vrot.slane %v1969_v54, 2 }
  0x47   : > { %1651 = vmatprep.subr.bf16.mxu1 %v1777_v3 }
  0x48   : > { %1354 = vmatmul.mubr.f32.vlgmr.msra.gmra.mrb[2].mxu0 %v2098_v45  ;;  %v721_v44 = vsel %vm532_vm1, %v719_v34, %v720_v39  ;;  %v1700_v45 = vpack.c.bf16 %v887_v41, %v886_v40 }
  0x49   : > { %1629 = vmatpush3.bf16.msra.mxu0 %v1628_v46  ;;  %1389 = vmatmul.mubr.f32.vlgmr.msra.gmra.mrb[2].mxu1 %v535_v47  ;;  %v796_v46 = vld [vmem:[%s2359_s1 + $0x310] sm:$0xff]  ;;  %v797_v47 = vld [vmem:[%s2359_s1 + $0x318] sm:$0xff] }
  0x4a   : > { %1653 = vmatpush3.bf16.msra.mxu1 %v1652_v48  ;;  %1630 = vmatprep.subr.bf16.mxu0 %v1777_v3  ;;  %v888_v48 = vld [vmem:[%s2359_s1 + $0x390] sm:$0xff]  ;;  %v1679_v50 = vpack.c.bf16 %v797_v47, %v796_v46 }
  0x4b   : > { %1654 = vmatprep.subr.bf16.mxu1 %v1777_v3  ;;  %1423 = vmatprep.mubr.msk.f32.mxu0 %vm1778_vm0, %v1779_v11  ;;  %v1703_v51 = vpack.c.bf16 %v889_v49, %v888_v48  ;;  %v985_v48 = vlaneseq }
  0x4c   : > { %1458 = vmatprep.mubr.msk.f32.mxu1 %vm1778_vm0, %v1779_v11 }
  0x4d   : > { %1632 = vmatpush3.bf16.msra.mxu0 %v1631_v53  ;;  %v799_v53 = vld [vmem:[%s2359_s1 + $0x328] sm:$0xff]  ;;  %v986_v49 = vand.u32 127, %v985_v48 }
  0x4e   : > { %1656 = vmatpush3.bf16.msra.mxu1 %v1655_v55  ;;  %1633 = vmatprep.subr.bf16.mxu0 %v1777_v3  ;;  %v890_v55 = vld [vmem:[%s2359_s1 + $0x3a0] sm:$0xff]  ;;  %v1682_v58 = vpack.c.bf16 %v799_v53, %v798_v52 }
  0x4f   : > { %1657 = vmatprep.subr.bf16.mxu1 %v1777_v3  ;;  %v1706_v59 = vpack.c.bf16 %v891_v57, %v890_v55  ;;  %vm987_vm3 = vcmp.lt.s32.totalorder %v986_v49, 16  ;;  %v1109_v57 = vld [vmem:[%s2360_s2] ss:$0 sm:$0xff] }
  0x51   : > { %1635 = vmatpush3.bf16.msra.mxu0 %v1634_v61  ;;  %v801_v61 = vld [vmem:[%s2359_s1 + $0x338] sm:$0xff] }
  0x52   : > { %1659 = vmatpush3.bf16.msra.mxu1 %v1658_v62  ;;  %1636 = vmatprep.subr.bf16.mxu0 %v1777_v3  ;;  %v892_v62 = vld [vmem:[%s2359_s1 + $0x3b0] sm:$0xff]  ;;  %v1685_v0 = vpack.c.bf16 %v801_v61, %v800_v60 }
  0x53   : > { %1660 = vmatprep.subr.bf16.mxu1 %v1777_v3  ;;  %v1709_v1 = vpack.c.bf16 %v893_v63, %v892_v62 }
  0x55   : > { %1638 = vmatpush3.bf16.msra.mxu0 %v1637_v4  ;;  %v803_v4 = vld [vmem:[%s2359_s1 + $0x348] sm:$0xff] }
  0x56   : > { %1662 = vmatpush3.bf16.msra.mxu1 %v1661_v5  ;;  %1639 = vmatprep.subr.bf16.mxu0 %v1777_v3  ;;  %v894_v5 = vld [vmem:[%s2359_s1 + $0x3c0] sm:$0xff]  ;;  %v1688_v7 = vpack.c.bf16 %v803_v4, %v802_v2 }
  0x57   : > { %1663 = vmatprep.subr.bf16.mxu1 %v1777_v3  ;;  %v1712_v8 = vpack.c.bf16 %v895_v6, %v894_v5 }
  0x59   : > { %1641 = vmatpush3.bf16.msra.mxu0 %v1640_v10  ;;  %v805_v10 = vld [vmem:[%s2359_s1 + $0x358] sm:$0xff] }
  0x5a   : > { %1665 = vmatpush3.bf16.msra.mxu1 %v1664_v12  ;;  %1642 = vmatprep.subr.bf16.mxu0 %v1777_v3  ;;  %v896_v12 = vld [vmem:[%s2359_s1 + $0x3d0] sm:$0xff]  ;;  %v1691_v14 = vpack.c.bf16 %v805_v10, %v804_v9  ;;  %v1021_v9 = vshrl.u32 %v985_v48, 7  ;;  %v1112_v10 = vld [vmem:[%s2362_s4] ss:$0 sm:$0xff] }
  0x5b   : > { %1666 = vmatprep.subr.bf16.mxu1 %v1777_v3  ;;  %v1715_v15 = vpack.c.bf16 %v897_v13, %v896_v12 }
  0x5c   : > { %vm1024_vm4 = vcmp.lt.s32.totalorder %v1021_v9, 2 }
  0x5d   : > { %1644 = vmatpush3.bf16.msra.mxu0 %v1643_v17  ;;  %v807_v17 = vld [vmem:[%s2359_s1 + $0x368] sm:$0xff] }
  0x5e   : > { %1668 = vmatpush3.bf16.msra.mxu1 %v1667_v18  ;;  %1645 = vmatprep.subr.bf16.mxu0 %v1777_v3  ;;  %v898_v18 = vld [vmem:[%s2359_s1 + $0x3e0] sm:$0xff]  ;;  %v1694_v20 = vpack.c.bf16 %v807_v17, %v806_v16 }
  0x5f   : > { %1669 = vmatprep.subr.bf16.mxu1 %v1777_v3  ;;  %v1718_v21 = vpack.c.bf16 %v899_v19, %v898_v18 }
  0x61   : > { %1647 = vmatpush3.bf16.msra.mxu0 %v1646_v23  ;;  %v809_v23 = vld [vmem:[%s2359_s1 + $0x378] sm:$0xff] }
  0x62   : > { %1671 = vmatpush3.bf16.msra.mxu1 %v1670_v24  ;;  %1648 = vmatprep.subr.bf16.mxu0 %v1777_v3  ;;  %v900_v24 = vld [vmem:[%s2359_s1 + $0x3f0] sm:$0xff]  ;;  %v1697_v28 = vpack.c.bf16 %v809_v23, %v808_v22 }
  0x63   : > { %1672 = vmatprep.subr.bf16.mxu1 %v1777_v3  ;;  %v1721_v31 = vpack.c.bf16 %v901_v25, %v900_v24 }
  0x65   : > { %1650 = vmatpush3.bf16.msra.mxu0 %v1649_v32  ;;  %v903_v32 = vrot.slane %v2198_v27, 2 }
  0x66   : > { %1674 = vmatpush3.bf16.msra.mxu1 %v1673_v35  ;;  %1675 = vmatprep.subr.bf16.mxu0 %v1777_v3 }
  0x67   : > { %1699 = vmatprep.subr.bf16.mxu1 %v1777_v3  ;;  %v904_v34 = vsel %vm810_vm2, %v902_v30, %v903_v32 }
  0x68   : > { %1424 = vmatmul.mubr.f32.vlgmr.msra.gmra.mrb[4].mxu0 %v628_v42 }
  0x69   : > { %1677 = vmatpush3.bf16.msra.mxu0 %v1676_v43  ;;  %1459 = vmatmul.mubr.f32.vlgmr.msra.gmra.mrb[4].mxu1 %v721_v44 }
  0x6a   : > { %1701 = vmatpush3.bf16.msra.mxu1 %v1700_v45  ;;  %1678 = vmatprep.subr.bf16.mxu0 %v1777_v3 }
  0x6b   : > { %1702 = vmatprep.subr.bf16.mxu1 %v1777_v3  ;;  %1493 = vmatprep.mubr.msk.f32.mxu0 %vm1778_vm0, %v1779_v11 }
  0x6c   : > { %1528 = vmatprep.mubr.msk.f32.mxu1 %vm1778_vm0, %v1779_v11 }
  0x6d   : > { %1680 = vmatpush3.bf16.msra.mxu0 %v1679_v50 }
  0x6e   : > { %1704 = vmatpush3.bf16.msra.mxu1 %v1703_v51  ;;  %1681 = vmatprep.subr.bf16.mxu0 %v1777_v3 }
  0x6f   : > { %1705 = vmatprep.subr.bf16.mxu1 %v1777_v3 }
  0x71   : > { %1683 = vmatpush3.bf16.msra.mxu0 %v1682_v58 }
  0x72   : > { %1707 = vmatpush3.bf16.msra.mxu1 %v1706_v59  ;;  %1684 = vmatprep.subr.bf16.mxu0 %v1777_v3  ;;  %v1110_v59 = vsel %vm987_vm3, 1.0, %v1779_v11 }
  0x73   : > { %1708 = vmatprep.subr.bf16.mxu1 %v1777_v3 }
  0x75   : > { %1686 = vmatpush3.bf16.msra.mxu0 %v1685_v0 }
  0x76   : > { %1710 = vmatpush3.bf16.msra.mxu1 %v1709_v1  ;;  %1687 = vmatprep.subr.bf16.mxu0 %v1777_v3 }
  0x77   : > { %1711 = vmatprep.subr.bf16.mxu1 %v1777_v3 }
  0x79   : > { %1689 = vmatpush3.bf16.msra.mxu0 %v1688_v7 }
  0x7a   : > { %1713 = vmatpush3.bf16.msra.mxu1 %v1712_v8  ;;  %1690 = vmatprep.subr.bf16.mxu0 %v1777_v3  ;;  %v1111_v8 = vld [vmem:[%s2361_s3] ss:$0 sm:$0xff] }
  0x7b   : > { %1714 = vmatprep.subr.bf16.mxu1 %v1777_v3 }
  0x7d   : > { %1692 = vmatpush3.bf16.msra.mxu0 %v1691_v14 }
  0x7e   : > { %1716 = vmatpush3.bf16.msra.mxu1 %v1715_v15  ;;  %1693 = vmatprep.subr.bf16.mxu0 %v1777_v3 }
  0x7f   : > { %1717 = vmatprep.subr.bf16.mxu1 %v1777_v3 }
  0x81   : > { %1695 = vmatpush3.bf16.msra.mxu0 %v1694_v20 }
  0x82   : > { %1719 = vmatpush3.bf16.msra.mxu1 %v1718_v21  ;;  %1696 = vmatprep.subr.bf16.mxu0 %v1777_v3 }
  0x83   : > { %1720 = vmatprep.subr.bf16.mxu1 %v1777_v3 }
  0x85   : > { %1698 = vmatpush3.bf16.msra.mxu0 %v1697_v28 }
  0x86   : > { %1722 = vmatpush3.bf16.msra.mxu1 %v1721_v31 }
  0x88   : > { %1494 = vmatmul.mubr.f32.vlgmr.msra.gmra.mrb[6].mxu0 %v813_v33 }
  0x89   : > { %1529 = vmatmul.mubr.f32.vlgmr.msra.gmra.mrb[6].mxu1 %v904_v34 }
  0xfb   : > { %v353_v56 = vpop.f32.mrb[0].mxu0 }
  0xfc   : > { %v1285_v35 = vpop.f32.mrb[1].mxu0  ;;  %v423_v36 = vpop.f32.mrb[0].mxu1 }
  0xfd   : > { %v424_v37 = vadd.f32 %v423_v36, %v353_v56  ;;  %v1320_v54 = vpop.f32.mrb[1].mxu1 }
 0x11b   : > { %v509_v38 = vpop.f32.mrb[2].mxu0 }
 0x11c   : > { %v513_v39 = vadd.f32 %v509_v38, %v424_v37  ;;  %v1355_v40 = vpop.f32.mrb[3].mxu0  ;;  %v603_v41 = vpop.f32.mrb[2].mxu1 }
 0x11d   : > { %v1390_v42 = vpop.f32.mrb[3].mxu1 }
 0x11e   : > { %v607_v43 = vadd.f32 %v603_v41, %v513_v39 }
 0x13b   : > { %v696_v27 = vpop.f32.mrb[4].mxu0 }
 0x13c   : > { %v700_v44 = vadd.f32 %v696_v27, %v607_v43  ;;  %v1425_v3 = vpop.f32.mrb[5].mxu0  ;;  %v789_v45 = vpop.f32.mrb[4].mxu1 }
 0x13d   : > { %v1460_v46 = vpop.f32.mrb[5].mxu1 }
 0x13e   : > { %v793_v47 = vadd.f32 %v789_v45, %v700_v44 }
 0x15b   : > { %v881_v50 = vpop.f32.mrb[6].mxu0 }
 0x15c   : > { %v885_v51 = vadd.f32 %v881_v50, %v793_v47  ;;  %v1495_v52 = vpop.f32.mrb[7].mxu0  ;;  %v972_v53 = vpop.f32.mrb[6].mxu1 }
 0x15d   : > { %v1530_v55 = vpop.f32.mrb[7].mxu1 }
 0x15e   : > { %v976_v58 = vadd.f32 %v972_v53, %v885_v51 }
 0x160   : > { %v984_v60 = vadd.f32 %v1109_v57, %v976_v58 }
 0x162   : > { %v990_v61 = vmul.f32 %v1110_v59, %v984_v60 }
 0x164   : > { %991 = vadd.xlane.f32.xlu0 %v990_v61 }
 0x1f1   : > { %v992_v62 = vpop.xlane.xlu0 %991 }
 0x1f2   : > { %v993_v63 = vmul.f32 0.0625, %v992_v62 }
 0x1f4   : > { %v994_v0 = vsub.f32 %v984_v60, %v993_v63 }
 0x1f6   : > { %v995_v1 = vmul.f32 %v1110_v59, %v994_v0 }
 0x1f8   : > { %v996_v2 = vmul.f32 %v995_v1, %v995_v1 }
 0x1fa   : > { %997 = vadd.xlane.f32.xlu0 %v996_v2 }
 0x287   : > { %v998_v4 = vpop.xlane.xlu0 %997 }
 0x288   : > { %v999_v5 = vmul.f32 0.0625, %v998_v4 }
 0x28a   : > { %v1000_v6 = vadd.f32 1e-05, %v999_v5 }
 0x28c   : > { %1751 = vrsqrt.f32 %v1000_v6 }
 0x296   : > { %v1752_v7 = vpop.eup %1751 }
 0x297   : > { %v1002_v11 = vmul.f32 %v1752_v7, %v995_v1 }
 0x299   : > { %v1010_v12 = vmul.f32 %v1111_v8, %v1002_v11 }
 0x29b   : > { %v1018_v13 = vadd.f32 %v1112_v10, %v1010_v12 }
 0x29d   : > { %v1019_v14 = vmax.f32 %v1018_v13, 0.0 }
 0x29f   : > { %v1027_v15 = vsel %vm1024_vm4, %v1019_v14, 0.0 }
 0x2a0   : > { %1028 = vst [vmem:[%s242_s23] sm:$0xff] %v1027_v15 }
 0x2a1 PF: > { %s15_s20 = sadd.s32 1, %s1775_s20   ;;  %s2364_s18 = smov %s1771_s19 }
 0x2a2   : > { %p12_p5 = scmp.ge.s32.totalorder %s15_s20, 4   ;;  %s2365_s19 = smov %s2367_s21 }
 0x2a4   :  { %14 = sbr.rel (!%p12_p5) target bundleno = 2 (0x2), region = 71 }

// kernel: _lambda_.23
= control target key start
LH: loop header
LB: loop body
LE: loop exit
PB: predicated region body
PF: predicated region fallthrough
CT: control target
= control target key end

     0   :  { %s1867_s21 = smov 0   ;;  %s1869_s22 = smov 0   ;;  %s2411_s0 = inlined_call_operand.vmem [shape: f32[2,16,128], index: 0, kind: input, shape index: {}]   ;;  %s2412_s1 = inlined_call_operand.vmem [shape: f32[1024,128], index: 1, kind: input, shape index: {}]   ;;  %s2413_s2 = inlined_call_operand.vmem [shape: f32[1,128], index: 2, kind: input, shape index: {}]   ;;  %s2414_s3 = inlined_call_operand.vmem [shape: f32[1,128], index: 3, kind: input, shape index: {}, may-alias: {3,4}]   ;;  %s2415_s4 = inlined_call_operand.vmem [shape: f32[1,128], index: 4, kind: input, shape index: {}, may-alias: {3,4}]   ;;  %s2416_s5 = inlined_call_operand.vmem [shape: f32[2,8,384], index: 5, kind: input, shape index: {}]   ;;  %s2417_s6 = inlined_call_operand.vmem [shape: f32[2,8,128], index: 6, kind: output, shape index: {}]  }
   0x1   :  { %s1871_s23 = smov 0  }
   0x2 LB: > { %s28_s3 = sadd.s32 1, %s1823_s22  ;;  %p1160_p0 = scmp.ge.s32.totalorder %s1827_s23, 1  ;;  %s1827_s23 = sphi %s1871_s23, %s16_s23   ;;  %s1823_s22 = sphi %s1869_s22, %s2419_s22   ;;  %s1819_s21 = sphi %s1867_s21, %s2418_s21  }
   0x3   : > { %p30_p1 = scmp.ge.s32.totalorder %s28_s3, 2  ;;  %p242_p2 = scmp.lt.s32.totalorder %s1827_s23, 3 }
   0x5   : > { %s2421_s3 = smov (%p30_p1, %s28_s3), 0  ;;  %p243_p3 = pnand %p1160_p0, %p242_p2 }
   0x6   : > { %v324_v0 = vld [vmem:[%s2412_s1 + $0x80] sm:$0xff] (!%p243_p3)  ;;  %v325_v1 = vld [vmem:[%s2412_s1 + $0x88] sm:$0xff] (!%p243_p3)  ;;  %v1829_v3 = vmov (!%p243_p3), 0.0|0.0   ;;  %v326_v6 = vld [vmem:[%s2412_s1 + $0x90] sm:$0xff] (!%p243_p3)  ;;  %p283_p4 = scmp.lt.s32.totalorder (!%p243_p3), %s1819_s21, 1  ;;  %vm1830_vm0 = vmmov (!%p243_p3), 0  }
   0x7   : > { %246 = sbr.rel (%p243_p3) target bundleno = 358 (0x166), region = 44  ;;  %v308_v2 = vld [vmem:[%s2412_s1] sm:$0xff] (!%p243_p3)  ;;  %1585 = vmatprep.subr.bf16.mxu0 (!%p243_p3), %v1829_v3  ;;  %v1586_v4 = vpack.c.bf16 (!%p243_p3), %v325_v1, %v324_v0  ;;  %1609 = vmatprep.subr.bf16.mxu1 (!%p243_p3), %v1829_v3  ;;  %v309_v5 = vld [vmem:[%s2412_s1 + $0x8] sm:$0xff] (!%p243_p3)  ;;  %v327_v7 = vld [vmem:[%s2412_s1 + $0x98] sm:$0xff] (!%p243_p3)  ;;  %v1831_v11 = vmov (!%p243_p3), 0.0   ;;  %vm687_vm1 = vcmask (!%p243_p3), 1043456  }
   0x8   : > { %v1610_v8 = vpack.c.bf16 (!%p243_p3), %v309_v5, %v308_v2  ;;  %v310_v9 = vld [vmem:[%s2412_s1 + $0x10] sm:$0xff] (!%p243_p3)  ;;  %v311_v10 = vld [vmem:[%s2412_s1 + $0x18] sm:$0xff] (!%p243_p3)  ;;  %1337 = vmatprep.mubr.msk.f32.mxu0 (!%p243_p3), %vm1830_vm0, %v1831_v11  ;;  %1372 = vmatprep.mubr.msk.f32.mxu1 (!%p243_p3), %vm1830_vm0, %v1831_v11  ;;  %v1589_v12 = vpack.c.bf16 (!%p243_p3), %v327_v7, %v326_v6  ;;  %v328_v14 = vld [vmem:[%s2412_s1 + $0xa0] sm:$0xff] (!%p243_p3)  ;;  %vm779_vm2 = vcmask (!%p243_p3), 1042432   ;;  %vm871_vm3 = vcmask (!%p243_p3), 1041408  }
   0x9   : > { %1587 = vmatpush3.bf16.msra.mxu0 (!%p243_p3), %v1586_v4  ;;  %v1613_v13 = vpack.c.bf16 (!%p243_p3), %v311_v10, %v310_v9  ;;  %v329_v15 = vld [vmem:[%s2412_s1 + $0xa8] sm:$0xff] (!%p243_p3)  ;;  %v312_v16 = vld [vmem:[%s2412_s1 + $0x20] sm:$0xff] (!%p243_p3)  ;;  %v330_v20 = vld [vmem:[%s2412_s1 + $0xb0] sm:$0xff] (!%p243_p3)  ;;  %vm963_vm4 = vcmask (!%p243_p3), 1040384   ;;  %vm342_vm5 = vcmask (!%p243_p3), 1046528   ;;  %vm503_vm6 = vcmask (!%p243_p3), 1045504  }
   0xa   : > { %1611 = vmatpush3.bf16.msra.mxu1 (!%p243_p3), %v1610_v8  ;;  %1588 = vmatprep.subr.bf16.mxu0 (!%p243_p3), %v1829_v3  ;;  %v313_v17 = vld [vmem:[%s2412_s1 + $0x28] sm:$0xff] (!%p243_p3)  ;;  %v1592_v18 = vpack.c.bf16 (!%p243_p3), %v329_v15, %v328_v14  ;;  %v331_v21 = vld [vmem:[%s2412_s1 + $0xb8] sm:$0xff] (!%p243_p3)  ;;  %v314_v22 = vld [vmem:[%s2412_s1 + $0x30] sm:$0xff] (!%p243_p3)  ;;  %vm595_vm7 = vcmask (!%p243_p3), 1044480  }
   0xb   : > { %1612 = vmatprep.subr.bf16.mxu1 (!%p243_p3), %v1829_v3  ;;  %v1616_v19 = vpack.c.bf16 (!%p243_p3), %v313_v17, %v312_v16  ;;  %v315_v23 = vld [vmem:[%s2412_s1 + $0x38] sm:$0xff] (!%p243_p3)  ;;  %v1595_v24 = vpack.c.bf16 (!%p243_p3), %v331_v21, %v330_v20  ;;  %v332_v25 = vld [vmem:[%s2412_s1 + $0xc0] sm:$0xff] (!%p243_p3)  ;;  %v333_v27 = vld [vmem:[%s2412_s1 + $0xc8] sm:$0xff] (!%p243_p3) }
   0xc   : > { %v1619_v26 = vpack.c.bf16 (!%p243_p3), %v315_v23, %v314_v22  ;;  %v316_v30 = vld [vmem:[%s2412_s1 + $0x40] sm:$0xff] (!%p243_p3)  ;;  %v317_v31 = vld [vmem:[%s2412_s1 + $0x48] sm:$0xff] (!%p243_p3)  ;;  %v1598_v35 = vpack.c.bf16 (!%p243_p3), %v333_v27, %v332_v25  ;;  %v334_v39 = vld [vmem:[%s2412_s1 + $0xd0] sm:$0xff] (!%p243_p3) }
   0xd   : > { %1590 = vmatpush3.bf16.msra.mxu0 (!%p243_p3), %v1589_v12  ;;  %v1622_v38 = vpack.c.bf16 (!%p243_p3), %v317_v31, %v316_v30  ;;  %v335_v40 = vld [vmem:[%s2412_s1 + $0xd8] sm:$0xff] (!%p243_p3)  ;;  %v318_v43 = vld [vmem:[%s2412_s1 + $0x50] sm:$0xff] (!%p243_p3)  ;;  %v336_v52 = vld [vmem:[%s2412_s1 + $0xe0] sm:$0xff] (!%p243_p3) }
   0xe   : > { %s2423_s21 = smov (!%p283_p4, %s1819_s21), 1  ;;  %1614 = vmatpush3.bf16.msra.mxu1 %v1613_v13  ;;  %1591 = vmatprep.subr.bf16.mxu0 %v1829_v3  ;;  %v319_v44 = vld [vmem:[%s2412_s1 + $0x58] sm:$0xff]  ;;  %v1601_v49 = vpack.c.bf16 %v335_v40, %v334_v39  ;;  %v337_v53 = vld [vmem:[%s2412_s1 + $0xe8] sm:$0xff]  ;;  %v320_v54 = vld [vmem:[%s2412_s1 + $0x60] sm:$0xff] }
   0xf   : > { %s1168_s25 = sshll.u32 %s2423_s21, 4  ;;  %1615 = vmatprep.subr.bf16.mxu1 %v1829_v3  ;;  %v1625_v51 = vpack.c.bf16 %v319_v44, %v318_v43  ;;  %v321_v55 = vld [vmem:[%s2412_s1 + $0x68] sm:$0xff]  ;;  %v1604_v56 = vpack.c.bf16 %v337_v53, %v336_v52  ;;  %v338_v58 = vld [vmem:[%s2412_s1 + $0xf0] sm:$0xff]  ;;  %v339_v59 = vld [vmem:[%s2412_s1 + $0xf8] sm:$0xff]  ;;  %s1777_s17 = smul.u32 24, %s2423_s21 }
  0x10   : > { %s287_s12 = scalar_lea.vmem %s2411_s0, %s1168_s25  ;;  %v1628_v57 = vpack.c.bf16 %v321_v55, %v320_v54  ;;  %v322_v60 = vld [vmem:[%s2412_s1 + $0x70] sm:$0xff]  ;;  %v323_v61 = vld [vmem:[%s2412_s1 + $0x78] sm:$0xff]  ;;  %v1607_v62 = vpack.c.bf16 %v339_v59, %v338_v58  ;;  %v487_v2 = vld [vmem:[%s2412_s1 + $0x100] sm:$0xff]  ;;  %s1164_s25 = sshll.u32 %s2423_s21, 3 }
  0x11   : > { %1593 = vmatpush3.bf16.msra.mxu0 %v1592_v18  ;;  %v1960_v28 = vld [vmem:[%s287_s12] sm:$0xff]  ;;  %v1962_v29 = vld [vmem:[%s287_s12 + $0x8] sm:$0xff]  ;;  %v1631_v1 = vpack.c.bf16 %v323_v61, %v322_v60  ;;  %v489_v10 = vld [vmem:[%s2412_s1 + $0x110] sm:$0xff]  ;;  %s296_s20 = scalar_lea.vmem %s2416_s5, %s1777_s17  ;;  %s303_s28 = scalar_lea.vmem %s2417_s6, %s1164_s25 }
  0x12   : > { %1617 = vmatpush3.bf16.msra.mxu1 %v1616_v19  ;;  %1594 = vmatprep.subr.bf16.mxu0 %v1829_v3  ;;  %v688_v32 = vrot.slane %v1960_v28, 4  ;;  %v689_v33 = vrot.slane %v1962_v29, 4  ;;  %v780_v34 = vrot.slane %v1960_v28, 5  ;;  %v781_v37 = vrot.slane %v1962_v29, 5  ;;  %v488_v4 = vld [vmem:[%s2412_s1 + $0x108] sm:$0xff]  ;;  %v579_v5 = vld [vmem:[%s2412_s1 + $0x180] sm:$0xff] }
  0x13   : > { %1618 = vmatprep.subr.bf16.mxu1 %v1829_v3  ;;  %v872_v41 = vrot.slane %v1960_v28, 6  ;;  %v873_v42 = vrot.slane %v1962_v29, 6  ;;  %v964_v46 = vrot.slane %v1960_v28, 7  ;;  %v965_v47 = vrot.slane %v1962_v29, 7  ;;  %v580_v6 = vld [vmem:[%s2412_s1 + $0x188] sm:$0xff]  ;;  %v490_v12 = vld [vmem:[%s2412_s1 + $0x118] sm:$0xff] }
  0x14   : > { %v1974_v36 = vsel %vm687_vm1, %v688_v32, %v689_v33  ;;  %v1994_v45 = vsel %vm779_vm2, %v780_v34, %v781_v37  ;;  %v343_v63 = vrot.slane %v1960_v28, 1  ;;  %v344_v0 = vrot.slane %v1962_v29, 1  ;;  %v581_v13 = vld [vmem:[%s2412_s1 + $0x190] sm:$0xff]  ;;  %v582_v14 = vld [vmem:[%s2412_s1 + $0x198] sm:$0xff]  ;;  %v491_v17 = vld [vmem:[%s2412_s1 + $0x120] sm:$0xff] }
  0x15   : > { %1596 = vmatpush3.bf16.msra.mxu0 %v1595_v24  ;;  %v1998_v48 = vsel %vm871_vm3, %v872_v41, %v873_v42  ;;  %v2000_v50 = vsel %vm963_vm4, %v964_v46, %v965_v47  ;;  %v1634_v8 = vpack.c.bf16 %v488_v4, %v487_v2  ;;  %v1658_v9 = vpack.c.bf16 %v580_v6, %v579_v5  ;;  %v492_v18 = vld [vmem:[%s2412_s1 + $0x128] sm:$0xff]  ;;  %v583_v19 = vld [vmem:[%s2412_s1 + $0x1a0] sm:$0xff]  ;;  %v493_v23 = vld [vmem:[%s2412_s1 + $0x130] sm:$0xff] }
  0x16   : > { %1620 = vmatpush3.bf16.msra.mxu1 %v1619_v26  ;;  %1597 = vmatprep.subr.bf16.mxu0 %v1829_v3  ;;  %v345_v7 = vsel %vm342_vm5, %v343_v63, %v344_v0  ;;  %v1637_v15 = vpack.c.bf16 %v490_v12, %v489_v10  ;;  %v1661_v16 = vpack.c.bf16 %v582_v14, %v581_v13  ;;  %v584_v20 = vld [vmem:[%s2412_s1 + $0x1a8] sm:$0xff]  ;;  %v494_v24 = vld [vmem:[%s2412_s1 + $0x138] sm:$0xff]  ;;  %v585_v25 = vld [vmem:[%s2412_s1 + $0x1b0] sm:$0xff]  ;;  %v504_v58 = vrot.slane %v1960_v28, 2 }
  0x17   : > { %1621 = vmatprep.subr.bf16.mxu1 %v1829_v3  ;;  %v1640_v21 = vpack.c.bf16 %v492_v18, %v491_v17  ;;  %v1664_v22 = vpack.c.bf16 %v584_v20, %v583_v19  ;;  %v586_v26 = vld [vmem:[%s2412_s1 + $0x1b8] sm:$0xff]  ;;  %v1643_v27 = vpack.c.bf16 %v494_v24, %v493_v23  ;;  %v495_v31 = vld [vmem:[%s2412_s1 + $0x140] sm:$0xff]  ;;  %v496_v32 = vld [vmem:[%s2412_s1 + $0x148] sm:$0xff]  ;;  %v505_v59 = vrot.slane %v1962_v29, 2 }
  0x18   : > { %v1667_v30 = vpack.c.bf16 %v586_v26, %v585_v25  ;;  %v587_v33 = vld [vmem:[%s2412_s1 + $0x1c0] sm:$0xff]  ;;  %v588_v34 = vld [vmem:[%s2412_s1 + $0x1c8] sm:$0xff]  ;;  %v498_v39 = vld [vmem:[%s2412_s1 + $0x158] sm:$0xff]  ;;  %v596_v63 = vrot.slane %v1960_v28, 3  ;;  %v597_v0 = vrot.slane %v1962_v29, 3 }
  0x19   : > { %1599 = vmatpush3.bf16.msra.mxu0 %v1598_v35  ;;  %v1646_v35 = vpack.c.bf16 %v496_v32, %v495_v31  ;;  %v1670_v37 = vpack.c.bf16 %v588_v34, %v587_v33  ;;  %v589_v40 = vld [vmem:[%s2412_s1 + $0x1d0] sm:$0xff]  ;;  %v590_v41 = vld [vmem:[%s2412_s1 + $0x1d8] sm:$0xff]  ;;  %v499_v44 = vld [vmem:[%s2412_s1 + $0x160] sm:$0xff]  ;;  %v506_v4 = vsel %vm503_vm6, %v504_v58, %v505_v59 }
  0x1a   : > { %1623 = vmatpush3.bf16.msra.mxu1 %v1622_v38  ;;  %1600 = vmatprep.subr.bf16.mxu0 %v1829_v3  ;;  %v497_v38 = vld [vmem:[%s2412_s1 + $0x150] sm:$0xff]  ;;  %v1673_v43 = vpack.c.bf16 %v590_v41, %v589_v40  ;;  %v500_v46 = vld [vmem:[%s2412_s1 + $0x168] sm:$0xff]  ;;  %v591_v47 = vld [vmem:[%s2412_s1 + $0x1e0] sm:$0xff] }
  0x1b   : > { %1624 = vmatprep.subr.bf16.mxu1 %v1829_v3  ;;  %v1649_v42 = vpack.c.bf16 %v498_v39, %v497_v38  ;;  %v501_v53 = vld [vmem:[%s2412_s1 + $0x170] sm:$0xff]  ;;  %v502_v54 = vld [vmem:[%s2412_s1 + $0x178] sm:$0xff]  ;;  %v671_v61 = vld [vmem:[%s2412_s1 + $0x200] sm:$0xff] }
  0x1c   : > { %v593_v55 = vld [vmem:[%s2412_s1 + $0x1f0] sm:$0xff]  ;;  %v764_v2 = vld [vmem:[%s2412_s1 + $0x288] sm:$0xff]  ;;  %v675_v13 = vld [vmem:[%s2412_s1 + $0x220] sm:$0xff] }
  0x1d   : > { %1602 = vmatpush3.bf16.msra.mxu0 %v1601_v49  ;;  %v592_v49 = vld [vmem:[%s2412_s1 + $0x1e8] sm:$0xff]  ;;  %v673_v29 = vld [vmem:[%s2412_s1 + $0x210] sm:$0xff]  ;;  %v678_v20 = vld [vmem:[%s2412_s1 + $0x238] sm:$0xff] }
  0x1e   : > { %1626 = vmatpush3.bf16.msra.mxu1 %v1625_v51  ;;  %1603 = vmatprep.subr.bf16.mxu0 %v1829_v3  ;;  %v1652_v51 = vpack.c.bf16 %v500_v46, %v499_v44  ;;  %v1676_v52 = vpack.c.bf16 %v592_v49, %v591_v47  ;;  %v676_v14 = vld [vmem:[%s2412_s1 + $0x228] sm:$0xff]  ;;  %v677_v19 = vld [vmem:[%s2412_s1 + $0x230] sm:$0xff]  ;;  %v679_v25 = vld [vmem:[%s2412_s1 + $0x240] sm:$0xff] }
  0x1f   : > { %1627 = vmatprep.subr.bf16.mxu1 %v1829_v3  ;;  %v1688_v17 = vpack.c.bf16 %v676_v14, %v675_v13  ;;  %v1691_v23 = vpack.c.bf16 %v678_v20, %v677_v19  ;;  %v680_v26 = vld [vmem:[%s2412_s1 + $0x248] sm:$0xff]  ;;  %v681_v33 = vld [vmem:[%s2412_s1 + $0x250] sm:$0xff]  ;;  %v682_v34 = vld [vmem:[%s2412_s1 + $0x258] sm:$0xff] }
  0x20   : > { %v1694_v31 = vpack.c.bf16 %v680_v26, %v679_v25  ;;  %v1697_v38 = vpack.c.bf16 %v682_v34, %v681_v33  ;;  %v683_v40 = vld [vmem:[%s2412_s1 + $0x260] sm:$0xff]  ;;  %v684_v41 = vld [vmem:[%s2412_s1 + $0x268] sm:$0xff]  ;;  %v685_v47 = vld [vmem:[%s2412_s1 + $0x270] sm:$0xff] }
  0x21   : > { %1605 = vmatpush3.bf16.msra.mxu0 %v1604_v56  ;;  %v594_v56 = vld [vmem:[%s2412_s1 + $0x1f8] sm:$0xff]  ;;  %v1700_v44 = vpack.c.bf16 %v684_v41, %v683_v40  ;;  %v948_v58 = vld [vmem:[%s2412_s1 + $0x388] sm:$0xff]  ;;  %v955_v14 = vld [vmem:[%s2412_s1 + $0x3c0] sm:$0xff] }
  0x22   : > { %1629 = vmatpush3.bf16.msra.mxu1 %v1628_v57  ;;  %1606 = vmatprep.subr.bf16.mxu0 %v1829_v3  ;;  %v1655_v57 = vpack.c.bf16 %v502_v54, %v501_v53  ;;  %v1679_v60 = vpack.c.bf16 %v594_v56, %v593_v55  ;;  %v686_v49 = vld [vmem:[%s2412_s1 + $0x278] sm:$0xff]  ;;  %v855_v55 = vld [vmem:[%s2412_s1 + $0x300] sm:$0xff]  ;;  %v856_v56 = vld [vmem:[%s2412_s1 + $0x308] sm:$0xff] }
  0x23   : > { %1630 = vmatprep.subr.bf16.mxu1 %v1829_v3  ;;  %v1703_v53 = vpack.c.bf16 %v686_v49, %v685_v47  ;;  %v1730_v59 = vpack.c.bf16 %v856_v56, %v855_v55  ;;  %v864_v13 = vld [vmem:[%s2412_s1 + $0x348] sm:$0xff]  ;;  %v866_v19 = vld [vmem:[%s2412_s1 + $0x358] sm:$0xff]  ;;  %v957_v20 = vld [vmem:[%s2412_s1 + $0x3d0] sm:$0xff] }
  0x24   : > { %v868_v25 = vld [vmem:[%s2412_s1 + $0x368] sm:$0xff]  ;;  %v959_v26 = vld [vmem:[%s2412_s1 + $0x3e0] sm:$0xff]  ;;  %v870_v33 = vld [vmem:[%s2412_s1 + $0x378] sm:$0xff] }
  0x25   : > { %1608 = vmatpush3.bf16.msra.mxu0 %v1607_v62  ;;  %v672_v62 = vld [vmem:[%s2412_s1 + $0x208] sm:$0xff]  ;;  %v961_v34 = vld [vmem:[%s2412_s1 + $0x3f0] sm:$0xff] }
  0x26   : > { %1632 = vmatpush3.bf16.msra.mxu1 %v1631_v1  ;;  %1633 = vmatprep.subr.bf16.mxu0 %v1829_v3  ;;  %v763_v1 = vld [vmem:[%s2412_s1 + $0x280] sm:$0xff]  ;;  %v1682_v5 = vpack.c.bf16 %v672_v62, %v671_v61  ;;  %v857_v61 = vld [vmem:[%s2412_s1 + $0x310] sm:$0xff]  ;;  %v858_v62 = vld [vmem:[%s2412_s1 + $0x318] sm:$0xff] }
  0x27   : > { %1657 = vmatprep.subr.bf16.mxu1 %v1829_v3  ;;  %v1706_v6 = vpack.c.bf16 %v764_v2, %v763_v1  ;;  %v1733_v1 = vpack.c.bf16 %v858_v62, %v857_v61 }
  0x28   : > { %1338 = vmatmul.mubr.f32.vlgmr.msra.gmra.mrb[0].mxu0 %v345_v7  ;;  %v674_v7 = vld [vmem:[%s2412_s1 + $0x218] sm:$0xff] }
  0x29   : > { %1373 = vmatmul.mubr.f32.vlgmr.msra.gmra.mrb[0].mxu1 %v1960_v28  ;;  %1635 = vmatpush3.bf16.msra.mxu0 %v1634_v8  ;;  %v598_v28 = vsel %vm595_vm7, %v596_v63, %v597_v0  ;;  %v765_v8 = vld [vmem:[%s2412_s1 + $0x290] sm:$0xff]  ;;  %v1685_v10 = vpack.c.bf16 %v674_v7, %v673_v29  ;;  %v950_v0 = vld [vmem:[%s2412_s1 + $0x398] sm:$0xff] }
  0x2a   : > { %1659 = vmatpush3.bf16.msra.mxu1 %v1658_v9  ;;  %1636 = vmatprep.subr.bf16.mxu0 %v1829_v3  ;;  %v766_v9 = vld [vmem:[%s2412_s1 + $0x298] sm:$0xff]  ;;  %v949_v63 = vld [vmem:[%s2412_s1 + $0x390] sm:$0xff] }
  0x2b   : > { %1660 = vmatprep.subr.bf16.mxu1 %v1829_v3  ;;  %1407 = vmatprep.mubr.msk.f32.mxu0 %vm1830_vm0, %v1831_v11  ;;  %v1709_v12 = vpack.c.bf16 %v766_v9, %v765_v8  ;;  %v1757_v2 = vpack.c.bf16 %v950_v0, %v949_v63  ;;  %v861_v29 = vld [vmem:[%s2412_s1 + $0x330] sm:$0xff]  ;;  %v862_v7 = vld [vmem:[%s2412_s1 + $0x338] sm:$0xff] }
  0x2c   : > { %1442 = vmatprep.mubr.msk.f32.mxu1 %vm1830_vm0, %v1831_v11  ;;  %v954_v8 = vld [vmem:[%s2412_s1 + $0x3b8] sm:$0xff]  ;;  %v1739_v9 = vpack.c.bf16 %v862_v7, %v861_v29 }
  0x2d   : > { %1638 = vmatpush3.bf16.msra.mxu0 %v1637_v15  ;;  %v767_v15 = vld [vmem:[%s2412_s1 + $0x2a0] sm:$0xff] }
  0x2e   : > { %1662 = vmatpush3.bf16.msra.mxu1 %v1661_v16  ;;  %1639 = vmatprep.subr.bf16.mxu0 %v1829_v3  ;;  %v768_v16 = vld [vmem:[%s2412_s1 + $0x2a8] sm:$0xff] }
  0x2f   : > { %1663 = vmatprep.subr.bf16.mxu1 %v1829_v3  ;;  %v1712_v18 = vpack.c.bf16 %v768_v16, %v767_v15  ;;  %v956_v15 = vld [vmem:[%s2412_s1 + $0x3c8] sm:$0xff] }
  0x31   : > { %1641 = vmatpush3.bf16.msra.mxu0 %v1640_v21  ;;  %v769_v21 = vld [vmem:[%s2412_s1 + $0x2b0] sm:$0xff] }
  0x32   : > { %1665 = vmatpush3.bf16.msra.mxu1 %v1664_v22  ;;  %1642 = vmatprep.subr.bf16.mxu0 %v1829_v3  ;;  %v770_v22 = vld [vmem:[%s2412_s1 + $0x2b8] sm:$0xff] }
  0x33   : > { %1666 = vmatprep.subr.bf16.mxu1 %v1829_v3  ;;  %v1715_v24 = vpack.c.bf16 %v770_v22, %v769_v21  ;;  %v958_v21 = vld [vmem:[%s2412_s1 + $0x3d8] sm:$0xff] }
  0x35   : > { %1644 = vmatpush3.bf16.msra.mxu0 %v1643_v27  ;;  %v771_v27 = vld [vmem:[%s2412_s1 + $0x2c0] sm:$0xff] }
  0x36   : > { %1668 = vmatpush3.bf16.msra.mxu1 %v1667_v30  ;;  %1645 = vmatprep.subr.bf16.mxu0 %v1829_v3  ;;  %v772_v30 = vld [vmem:[%s2412_s1 + $0x2c8] sm:$0xff] }
  0x37   : > { %1669 = vmatprep.subr.bf16.mxu1 %v1829_v3  ;;  %v1718_v32 = vpack.c.bf16 %v772_v30, %v771_v27  ;;  %v960_v27 = vld [vmem:[%s2412_s1 + $0x3e8] sm:$0xff] }
  0x39   : > { %1647 = vmatpush3.bf16.msra.mxu0 %v1646_v35  ;;  %v773_v35 = vld [vmem:[%s2412_s1 + $0x2d0] sm:$0xff] }
  0x3a   : > { %1671 = vmatpush3.bf16.msra.mxu1 %v1670_v37  ;;  %1648 = vmatprep.subr.bf16.mxu0 %v1829_v3  ;;  %v774_v37 = vld [vmem:[%s2412_s1 + $0x2d8] sm:$0xff] }
  0x3b   : > { %1672 = vmatprep.subr.bf16.mxu1 %v1829_v3  ;;  %v1721_v39 = vpack.c.bf16 %v774_v37, %v773_v35  ;;  %v962_v35 = vld [vmem:[%s2412_s1 + $0x3f8] sm:$0xff] }
  0x3d   : > { %1650 = vmatpush3.bf16.msra.mxu0 %v1649_v42  ;;  %v775_v42 = vld [vmem:[%s2412_s1 + $0x2e0] sm:$0xff] }
  0x3e   : > { %1674 = vmatpush3.bf16.msra.mxu1 %v1673_v43  ;;  %1651 = vmatprep.subr.bf16.mxu0 %v1829_v3  ;;  %v776_v43 = vld [vmem:[%s2412_s1 + $0x2e8] sm:$0xff] }
  0x3f   : > { %1675 = vmatprep.subr.bf16.mxu1 %v1829_v3  ;;  %v1724_v46 = vpack.c.bf16 %v776_v43, %v775_v42 }
  0x41   : > { %1653 = vmatpush3.bf16.msra.mxu0 %v1652_v51  ;;  %v777_v51 = vld [vmem:[%s2412_s1 + $0x2f0] sm:$0xff] }
  0x42   : > { %1677 = vmatpush3.bf16.msra.mxu1 %v1676_v52  ;;  %1654 = vmatprep.subr.bf16.mxu0 %v1829_v3  ;;  %v778_v52 = vld [vmem:[%s2412_s1 + $0x2f8] sm:$0xff] }
  0x43   : > { %1678 = vmatprep.subr.bf16.mxu1 %v1829_v3  ;;  %v1727_v54 = vpack.c.bf16 %v778_v52, %v777_v51 }
  0x45   : > { %1656 = vmatpush3.bf16.msra.mxu0 %v1655_v57  ;;  %v947_v57 = vld [vmem:[%s2412_s1 + $0x380] sm:$0xff] }
  0x46   : > { %1680 = vmatpush3.bf16.msra.mxu1 %v1679_v60  ;;  %1681 = vmatprep.subr.bf16.mxu0 %v1829_v3  ;;  %v1754_v60 = vpack.c.bf16 %v948_v58, %v947_v57  ;;  %v1055_v57 = vld [vmem:[%s296_s20] sm:$0xff]  ;;  %v1056_v58 = vld [vmem:[%s296_s20 + $0x8] sm:$0xff] }
  0x47   : > { %1705 = vmatprep.subr.bf16.mxu1 %v1829_v3  ;;  %v1058_v61 = vmax.f32 %v1055_v57, %v1056_v58 }
  0x48   : > { %1408 = vmatmul.mubr.f32.vlgmr.msra.gmra.mrb[2].mxu0 %v506_v4  ;;  %v859_v4 = vld [vmem:[%s2412_s1 + $0x320] sm:$0xff] }
  0x49   : > { %1683 = vmatpush3.bf16.msra.mxu0 %v1682_v5  ;;  %1443 = vmatmul.mubr.f32.vlgmr.msra.gmra.mrb[2].mxu1 %v598_v28  ;;  %v860_v5 = vld [vmem:[%s2412_s1 + $0x328] sm:$0xff] }
  0x4a   : > { %1707 = vmatpush3.bf16.msra.mxu1 %v1706_v6  ;;  %1684 = vmatprep.subr.bf16.mxu0 %v1829_v3  ;;  %v1736_v28 = vpack.c.bf16 %v860_v5, %v859_v4 }
  0x4b   : > { %1708 = vmatprep.subr.bf16.mxu1 %v1829_v3  ;;  %1477 = vmatprep.mubr.msk.f32.mxu0 %vm1830_vm0, %v1831_v11 }
  0x4c   : > { %1512 = vmatprep.mubr.msk.f32.mxu1 %vm1830_vm0, %v1831_v11 }
  0x4d   : > { %1686 = vmatpush3.bf16.msra.mxu0 %v1685_v10 }
  0x4e   : > { %1710 = vmatpush3.bf16.msra.mxu1 %v1709_v12  ;;  %1687 = vmatprep.subr.bf16.mxu0 %v1829_v3  ;;  %v863_v12 = vld [vmem:[%s2412_s1 + $0x340] sm:$0xff] }
  0x4f   : > { %1711 = vmatprep.subr.bf16.mxu1 %v1829_v3  ;;  %v1742_v16 = vpack.c.bf16 %v864_v13, %v863_v12 }
  0x51   : > { %1689 = vmatpush3.bf16.msra.mxu0 %v1688_v17  ;;  %v1766_v17 = vpack.c.bf16 %v956_v15, %v955_v14 }
  0x52   : > { %1713 = vmatpush3.bf16.msra.mxu1 %v1712_v18  ;;  %1690 = vmatprep.subr.bf16.mxu0 %v1829_v3  ;;  %v865_v18 = vld [vmem:[%s2412_s1 + $0x350] sm:$0xff] }
  0x53   : > { %1714 = vmatprep.subr.bf16.mxu1 %v1829_v3  ;;  %v1745_v22 = vpack.c.bf16 %v866_v19, %v865_v18 }
  0x55   : > { %1692 = vmatpush3.bf16.msra.mxu0 %v1691_v23  ;;  %v1769_v23 = vpack.c.bf16 %v958_v21, %v957_v20 }
  0x56   : > { %1716 = vmatpush3.bf16.msra.mxu1 %v1715_v24  ;;  %1693 = vmatprep.subr.bf16.mxu0 %v1829_v3  ;;  %v867_v24 = vld [vmem:[%s2412_s1 + $0x360] sm:$0xff] }
  0x57   : > { %1717 = vmatprep.subr.bf16.mxu1 %v1829_v3  ;;  %v1748_v30 = vpack.c.bf16 %v868_v25, %v867_v24 }
  0x59   : > { %1695 = vmatpush3.bf16.msra.mxu0 %v1694_v31  ;;  %v1772_v31 = vpack.c.bf16 %v960_v27, %v959_v26 }
  0x5a   : > { %1719 = vmatpush3.bf16.msra.mxu1 %v1718_v32  ;;  %1696 = vmatprep.subr.bf16.mxu0 %v1829_v3  ;;  %v869_v32 = vld [vmem:[%s2412_s1 + $0x370] sm:$0xff] }
  0x5b   : > { %1720 = vmatprep.subr.bf16.mxu1 %v1829_v3  ;;  %v1751_v37 = vpack.c.bf16 %v870_v33, %v869_v32 }
  0x5d   : > { %1698 = vmatpush3.bf16.msra.mxu0 %v1697_v38  ;;  %v1775_v38 = vpack.c.bf16 %v962_v35, %v961_v34 }
  0x5e   : > { %1722 = vmatpush3.bf16.msra.mxu1 %v1721_v39  ;;  %1699 = vmatprep.subr.bf16.mxu0 %v1829_v3 }
  0x5f   : > { %1723 = vmatprep.subr.bf16.mxu1 %v1829_v3 }
  0x61   : > { %1701 = vmatpush3.bf16.msra.mxu0 %v1700_v44 }
  0x62   : > { %1725 = vmatpush3.bf16.msra.mxu1 %v1724_v46  ;;  %1702 = vmatprep.subr.bf16.mxu0 %v1829_v3 }
  0x63   : > { %1726 = vmatprep.subr.bf16.mxu1 %v1829_v3 }
  0x65   : > { %1704 = vmatpush3.bf16.msra.mxu0 %v1703_v53 }
  0x66   : > { %1728 = vmatpush3.bf16.msra.mxu1 %v1727_v54  ;;  %1729 = vmatprep.subr.bf16.mxu0 %v1829_v3 }
  0x67   : > { %1753 = vmatprep.subr.bf16.mxu1 %v1829_v3 }
  0x68   : > { %1478 = vmatmul.mubr.f32.vlgmr.msra.gmra.mrb[4].mxu0 %v1974_v36  ;;  %v951_v36 = vld [vmem:[%s2412_s1 + $0x3a0] sm:$0xff] }
  0x69   : > { %1731 = vmatpush3.bf16.msra.mxu0 %v1730_v59  ;;  %1513 = vmatmul.mubr.f32.vlgmr.msra.gmra.mrb[4].mxu1 %v1994_v45  ;;  %v952_v45 = vld [vmem:[%s2412_s1 + $0x3a8] sm:$0xff] }
  0x6a   : > { %1755 = vmatpush3.bf16.msra.mxu1 %v1754_v60  ;;  %1732 = vmatprep.subr.bf16.mxu0 %v1829_v3  ;;  %v1760_v6 = vpack.c.bf16 %v952_v45, %v951_v36 }
  0x6b   : > { %1756 = vmatprep.subr.bf16.mxu1 %v1829_v3  ;;  %1547 = vmatprep.mubr.msk.f32.mxu0 %vm1830_vm0, %v1831_v11 }
  0x6c   : > { %1582 = vmatprep.mubr.msk.f32.mxu1 %vm1830_vm0, %v1831_v11  ;;  %v953_v11 = vld [vmem:[%s2412_s1 + $0x3b0] sm:$0xff] }
  0x6d   : > { %1734 = vmatpush3.bf16.msra.mxu0 %v1733_v1  ;;  %v1763_v10 = vpack.c.bf16 %v954_v8, %v953_v11  ;;  %v1057_v1 = vld [vmem:[%s296_s20 + $0x10] sm:$0xff] }
  0x6e   : > { %1758 = vmatpush3.bf16.msra.mxu1 %v1757_v2  ;;  %1735 = vmatprep.subr.bf16.mxu0 %v1829_v3  ;;  %v1165_v2 = vld [vmem:[%s2413_s2] ss:$0 sm:$0xff]  ;;  %v1059_v36 = vmax.f32 %v1058_v61, %v1057_v1 }
  0x6f   : > { %1759 = vmatprep.subr.bf16.mxu1 %v1829_v3 }
  0x71   : > { %1737 = vmatpush3.bf16.msra.mxu0 %v1736_v28 }
  0x72   : > { %1761 = vmatpush3.bf16.msra.mxu1 %v1760_v6  ;;  %1738 = vmatprep.subr.bf16.mxu0 %v1829_v3 }
  0x73   : > { %1762 = vmatprep.subr.bf16.mxu1 %v1829_v3 }
  0x75   : > { %1740 = vmatpush3.bf16.msra.mxu0 %v1739_v9 }
  0x76   : > { %1764 = vmatpush3.bf16.msra.mxu1 %v1763_v10  ;;  %1741 = vmatprep.subr.bf16.mxu0 %v1829_v3 }
  0x77   : > { %1765 = vmatprep.subr.bf16.mxu1 %v1829_v3 }
  0x79   : > { %1743 = vmatpush3.bf16.msra.mxu0 %v1742_v16 }
  0x7a   : > { %1767 = vmatpush3.bf16.msra.mxu1 %v1766_v17  ;;  %1744 = vmatprep.subr.bf16.mxu0 %v1829_v3 }
  0x7b   : > { %1768 = vmatprep.subr.bf16.mxu1 %v1829_v3 }
  0x7d   : > { %1746 = vmatpush3.bf16.msra.mxu0 %v1745_v22 }
  0x7e   : > { %1770 = vmatpush3.bf16.msra.mxu1 %v1769_v23  ;;  %1747 = vmatprep.subr.bf16.mxu0 %v1829_v3 }
  0x7f   : > { %1771 = vmatprep.subr.bf16.mxu1 %v1829_v3 }
  0x81   : > { %1749 = vmatpush3.bf16.msra.mxu0 %v1748_v30 }
  0x82   : > { %1773 = vmatpush3.bf16.msra.mxu1 %v1772_v31  ;;  %1750 = vmatprep.subr.bf16.mxu0 %v1829_v3 }
  0x83   : > { %1774 = vmatprep.subr.bf16.mxu1 %v1829_v3 }
  0x85   : > { %1752 = vmatpush3.bf16.msra.mxu0 %v1751_v37 }
  0x86   : > { %1776 = vmatpush3.bf16.msra.mxu1 %v1775_v38 }
  0x88   : > { %1548 = vmatmul.mubr.f32.vlgmr.msra.gmra.mrb[6].mxu0 %v1998_v48 }
  0x89   : > { %1583 = vmatmul.mubr.f32.vlgmr.msra.gmra.mrb[6].mxu1 %v2000_v50  ;;  %v1047_v50 = vlaneseq }
  0x8b   : > { %v1048_v60 = vshrl.u32 %v1047_v50, 7 }
  0x8d   : > { %vm1051_vm8 = vcmp.lt.s32.totalorder %v1048_v60, 2 }
  0xfb   : > { %v413_v39 = vpop.f32.mrb[0].mxu0 }
  0xfc   : > { %v1339_v40 = vpop.f32.mrb[1].mxu0  ;;  %v483_v41 = vpop.f32.mrb[0].mxu1 }
  0xfd   : > { %v484_v42 = vadd.f32 %v483_v41, %v413_v39  ;;  %v1374_v43 = vpop.f32.mrb[1].mxu1 }
 0x11b   : > { %v574_v44 = vpop.f32.mrb[2].mxu0 }
 0x11c   : > { %v578_v46 = vadd.f32 %v574_v44, %v484_v42  ;;  %v1409_v47 = vpop.f32.mrb[3].mxu0  ;;  %v666_v49 = vpop.f32.mrb[2].mxu1 }
 0x11d   : > { %v1444_v51 = vpop.f32.mrb[3].mxu1 }
 0x11e   : > { %v670_v52 = vadd.f32 %v666_v49, %v578_v46 }
 0x13b   : > { %v758_v53 = vpop.f32.mrb[4].mxu0 }
 0x13c   : > { %v762_v3 = vadd.f32 %v758_v53, %v670_v52  ;;  %v1479_v54 = vpop.f32.mrb[5].mxu0  ;;  %v850_v55 = vpop.f32.mrb[4].mxu1 }
 0x13d   : > { %v1514_v56 = vpop.f32.mrb[5].mxu1 }
 0x13e   : > { %v854_v48 = vadd.f32 %v850_v55, %v762_v3 }
 0x15b   : > { %v942_v59 = vpop.f32.mrb[6].mxu0 }
 0x15c   : > { %v946_v62 = vadd.f32 %v942_v59, %v854_v48  ;;  %v1549_v63 = vpop.f32.mrb[7].mxu0  ;;  %v1034_v0 = vpop.f32.mrb[6].mxu1 }
 0x15d   : > { %v1584_v4 = vpop.f32.mrb[7].mxu1 }
 0x15e   : > { %v1038_v5 = vadd.f32 %v1034_v0, %v946_v62 }
 0x160   : > { %v1046_v45 = vadd.f32 %v1165_v2, %v1038_v5 }
 0x162   : > { %v1054_v28 = vsel %vm1051_vm8, %v1046_v45, 0.0 }
 0x163   : > { %v1060_v6 = vadd.f32 %v1059_v36, %v1054_v28 }
 0x165   : > { %1061 = vst [vmem:[%s303_s28] sm:$0xff] %v1060_v6 }
 0x166 PF: > { %s16_s23 = sadd.s32 1, %s1827_s23   ;;  %s2418_s21 = smov %s1823_s22 }
 0x167   : > { %p13_p5 = scmp.ge.s32.totalorder %s16_s23, 4   ;;  %s2419_s22 = smov %s2421_s3 }
 0x169   :  { %15 = sbr.rel (!%p13_p5) target bundleno = 2 (0x2), region = 78 }

</bundles_post_ra>
